<compile_context>
chip_gen: v7x
topology: tpu7x:2x2x1
jax: 0.10.0
libtpu: 0.0.40
codegen_flags: <defaults>
</compile_context>

<pallas_src>
import functools

import numpy as np

import jax
import jax.numpy as jnp
from jax.experimental import pallas as pl
from jax.experimental.pallas import tpu as pltpu

CODE_SIZE = 100                       # cfg.code_size (hardcoded to 100 in the reference)
LATENT_PAD = 104                      # code width zero-padded to a multiple of 8 (MXU K alignment)
FC1_OUT = int(CODE_SIZE * 2 / 3)      # 66
FC1_PAD = 72                          # 66 padded to a multiple of 8
BN_EPS = 1e-5


# --------------------------------------------------------------------------
# tile pickers
# --------------------------------------------------------------------------

def _pick_row_tile(n, cap=512):
    """Largest divisor of n that is <= cap and a multiple of 8 (or n itself)."""
    for t in range(min(cap, n), 0, -1):
        if n % t == 0 and (t % 8 == 0 or t == n):
            return t
    return n


def _pick_col_tile(total, cap=1024):
    """Largest divisor of total <= cap that is a multiple of 128 (or the full width)."""
    for t in range(min(cap, total), 0, -1):
        if total % t == 0 and (t % 128 == 0 or t == total):
            return t
    return total


# --------------------------------------------------------------------------
# Kernel 1: fused per-point MLP (3 -> 64 -> 128 -> 1024) + global max-pool
# --------------------------------------------------------------------------

def _pointmlp_max_kernel(x_ref, w1_ref, b1_ref, w2_ref, b2_ref, w3_ref, b3_ref,
                         o_ref, *, relu3):
    n = pl.program_id(1)

    x = x_ref[0]                                   # (tn, 3) points-major
    w1 = w1_ref[0]                                 # (3, 64) (possibly per-batch, STN-folded)
    # conv1 with K=3: three broadcast FMAs instead of a badly underfilled MXU matmul.
    h = (x[:, 0:1] * w1[0:1, :]
         + x[:, 1:2] * w1[1:2, :]
         + x[:, 2:3] * w1[2:3, :]) + b1_ref[...]
    h = jnp.maximum(h, 0.0)
    h = jnp.maximum(
        jnp.dot(h, w2_ref[...], preferred_element_type=jnp.float32) + b2_ref[...], 0.0)
    h = jnp.dot(h, w3_ref[...], preferred_element_type=jnp.float32) + b3_ref[...]
    if relu3:
        h = jnp.maximum(h, 0.0)

    tile_max = jnp.max(h, axis=0, keepdims=True)[None]      # (1, 1, 1024)

    @pl.when(n == 0)
    def _():
        o_ref[...] = jnp.full_like(o_ref, -jnp.inf)

    o_ref[...] = jnp.maximum(o_ref[...], tile_max)


def pointmlp_max(x, w1, b1, w2, b2, w3, b3, *, relu3):
    """x:(B,N,3)  ->  global feature (B, 1024).  w1 is (3,64) shared or (B,3,64) per-batch."""
    B, N, _ = x.shape
    tn = _pick_row_tile(N, cap=512)
    if w1.ndim == 2:
        w1 = w1[None]
    per_batch = w1.shape[0] > 1
    w1_map = (lambda b, n: (b, 0, 0)) if per_batch else (lambda b, n: (0, 0, 0))

    kernel = functools.partial(_pointmlp_max_kernel, relu3=relu3)
    out = pl.pallas_call(
        kernel,
        out_shape=jax.ShapeDtypeStruct((B, 1, 1024), jnp.float32),
        grid=(B, N // tn),
        in_specs=[
            pl.BlockSpec((1, tn, 3), lambda b, n: (b, n, 0)),
            pl.BlockSpec((1, 3, 64), w1_map),
            pl.BlockSpec((1, 64), lambda b, n: (0, 0)),
            pl.BlockSpec((64, 128), lambda b, n: (0, 0)),
            pl.BlockSpec((1, 128), lambda b, n: (0, 0)),
            pl.BlockSpec((128, 1024), lambda b, n: (0, 0)),
            pl.BlockSpec((1, 1024), lambda b, n: (0, 0)),
        ],
        out_specs=pl.BlockSpec((1, 1, 1024), lambda b, n: (b, 0, 0)),
        compiler_params=pltpu.CompilerParams(
            dimension_semantics=("parallel", "arbitrary")),
    )(x, w1, b1, w2, b2, w3, b3)
    return out[:, 0, :]


# --------------------------------------------------------------------------
# Kernel 2: STN FC head  (1024 -> 512 -> 256 -> 9, identity folded into fc3 bias)
# --------------------------------------------------------------------------

def _stn_head_kernel(g_ref, w1_ref, b1_ref, w2_ref, b2_ref, w3_ref, b3_ref, o_ref):
    h = jnp.maximum(
        jnp.dot(g_ref[...], w1_ref[...], preferred_element_type=jnp.float32) + b1_ref[...], 0.0)
    h = jnp.maximum(
        jnp.dot(h, w2_ref[...], preferred_element_type=jnp.float32) + b2_ref[...], 0.0)
    o_ref[...] = jnp.dot(h, w3_ref[...], preferred_element_type=jnp.float32) + b3_ref[...]


def stn_head(p, g):
    B = g.shape[0]
    return pl.pallas_call(
        _stn_head_kernel,
        out_shape=jax.ShapeDtypeStruct((B, 9), jnp.float32),
        grid=(1,),
        in_specs=[
            pl.BlockSpec((B, 1024), lambda i: (0, 0)),
            pl.BlockSpec((1024, 512), lambda i: (0, 0)),
            pl.BlockSpec((1, 512), lambda i: (0, 0)),
            pl.BlockSpec((512, 256), lambda i: (0, 0)),
            pl.BlockSpec((1, 256), lambda i: (0, 0)),
            pl.BlockSpec((256, 9), lambda i: (0, 0)),
            pl.BlockSpec((1, 9), lambda i: (0, 0)),
        ],
        out_specs=pl.BlockSpec((B, 9), lambda i: (0, 0)),
    )(g, p["fc1"]["w"], p["fc1"]["b"], p["fc2"]["w"], p["fc2"]["b"],
      p["fc3"]["w"], p["fc3"]["b"])


# --------------------------------------------------------------------------
# Kernel 3: VAE head  (fc1 -> fc2 -> code, fc_mu / fc_var, reparameterize, per-sample KL)
# --------------------------------------------------------------------------

def _encoder_head_kernel(feat_ref, eps_ref, w1_ref, b1_ref, w2_ref, b2_ref,
                         wmu_ref, bmu_ref, wvar_ref, bvar_ref,
                         code_ref, z_ref, kl_ref):
    h = jnp.maximum(
        jnp.dot(feat_ref[...], w1_ref[...], preferred_element_type=jnp.float32) + b1_ref[...], 0.0)
    code = jnp.dot(h, w2_ref[...], preferred_element_type=jnp.float32) + b2_ref[...]
    mu = jnp.dot(code, wmu_ref[...], preferred_element_type=jnp.float32) + bmu_ref[...]
    log_var = jnp.dot(code, wvar_ref[...], preferred_element_type=jnp.float32) + bvar_ref[...]

    std = jnp.exp(0.5 * log_var)
    eps = eps_ref[...]
    z = mu + std * eps                              # Normal(mu, std).rsample()

    # kl = sum_c [ log q(z|x) - log p(z) ];  (z - mu)/std == eps exactly, log(std) = log_var/2.
    # Zero-padded latent lanes contribute exactly 0.
    kl = jnp.sum(-0.5 * log_var - 0.5 * eps * eps + 0.5 * z * z, axis=1, keepdims=True)

    code_ref[...] = code
    z_ref[...] = z
    kl_ref[...] = kl


def encoder_head(params, feat, eps_p):
    B = feat.shape[0]
    L = LATENT_PAD
    return pl.pallas_call(
        _encoder_head_kernel,
        out_shape=(jax.ShapeDtypeStruct((B, L), jnp.float32),
                   jax.ShapeDtypeStruct((B, L), jnp.float32),
                   jax.ShapeDtypeStruct((B, 1), jnp.float32)),
        grid=(1,),
        in_specs=[
            pl.BlockSpec((B, 1024), lambda i: (0, 0)),
            pl.BlockSpec((B, L), lambda i: (0, 0)),
            pl.BlockSpec((1024, FC1_PAD), lambda i: (0, 0)),
            pl.BlockSpec((1, FC1_PAD), lambda i: (0, 0)),
            pl.BlockSpec((FC1_PAD, L), lambda i: (0, 0)),
            pl.BlockSpec((1, L), lambda i: (0, 0)),
            pl.BlockSpec((L, L), lambda i: (0, 0)),
            pl.BlockSpec((1, L), lambda i: (0, 0)),
            pl.BlockSpec((L, L), lambda i: (0, 0)),
            pl.BlockSpec((1, L), lambda i: (0, 0)),
        ],
        out_specs=(
            pl.BlockSpec((B, L), lambda i: (0, 0)),
            pl.BlockSpec((B, L), lambda i: (0, 0)),
            pl.BlockSpec((B, 1), lambda i: (0, 0)),
        ),
    )(feat, eps_p,
      params["fc1"]["w"], params["fc1"]["b"], params["fc2"]["w"], params["fc2"]["b"],
      params["fc_mu"]["w"], params["fc_mu"]["b"], params["fc_var"]["w"], params["fc_var"]["b"])


# --------------------------------------------------------------------------
# Kernel 4: decoder on [z ; code] (2B rows), fc3 column-tiled, recon log-prob fused in epilogue
# --------------------------------------------------------------------------

def _decoder_recon_kernel(codes_ref, xflat_ref, logscale_ref,
                          w1_ref, b1_ref, w2_ref, b2_ref, w3_ref, b3_ref,
                          dec_ref, recon_ref, h_ref, *, batch):
    j = pl.program_id(0)

    @pl.when(j == 0)
    def _():
        h1 = jnp.maximum(
            jnp.dot(codes_ref[...], w1_ref[...], preferred_element_type=jnp.float32)
            + b1_ref[...], 0.0)
        h_ref[...] = jnp.maximum(
            jnp.dot(h1, w2_ref[...], preferred_element_type=jnp.float32) + b2_ref[...], 0.0)
        recon_ref[...] = jnp.zeros_like(recon_ref)

    y = jnp.tanh(
        jnp.dot(h_ref[...], w3_ref[...], preferred_element_type=jnp.float32) + b3_ref[...])

    dec_ref[...] = y[batch:, :]                     # rows [B:2B] = decoder(code)

    # reconstruction log-likelihood of x under Normal(decoder(z), exp(log_scale))
    # TODO(synk): reference sums log_pxz over dim=(1,2,3) on a 3D tensor; we sum all non-batch dims.
    log_scale = logscale_ref[0, 0]
    diff = (xflat_ref[...] - y[:batch, :]) * jnp.exp(-log_scale)
    log_2pi = jnp.float32(np.log(2.0 * np.pi))
    lp = -log_scale - 0.5 * log_2pi - 0.5 * diff * diff
    recon_ref[...] += jnp.sum(lp, axis=1, keepdims=True)


def decoder_and_recon(p_dec, codes_cat, x_flat, log_scale):
    twoB, L = codes_cat.shape
    B = twoB // 2
    threeN = p_dec["fc3"]["w"].shape[1]
    tn = _pick_col_tile(threeN, cap=1024)

    kernel = functools.partial(_decoder_recon_kernel, batch=B)
    dec, recon = pl.pallas_call(
        kernel,
        out_shape=(jax.ShapeDtypeStruct((B, threeN), jnp.float32),
                   jax.ShapeDtypeStruct((B, 1), jnp.float32)),
        grid=(threeN // tn,),
        in_specs=[
            pl.BlockSpec((twoB, L), lambda j: (0, 0)),
            pl.BlockSpec((B, tn), lambda j: (0, j)),
            pl.BlockSpec((1, 1), lambda j: (0, 0), memory_space=pltpu.MemorySpace.SMEM),
            pl.BlockSpec((L, 512), lambda j: (0, 0)),
            pl.BlockSpec((1, 512), lambda j: (0, 0)),
            pl.BlockSpec((512, 1024), lambda j: (0, 0)),
            pl.BlockSpec((1, 1024), lambda j: (0, 0)),
            pl.BlockSpec((1024, tn), lambda j: (0, j)),
            pl.BlockSpec((1, tn), lambda j: (0, j)),
        ],
        out_specs=(
            pl.BlockSpec((B, tn), lambda j: (0, j)),
            pl.BlockSpec((B, 1), lambda j: (0, 0)),
        ),
        scratch_shapes=[pltpu.VMEM((twoB, 1024), jnp.float32)],
        compiler_params=pltpu.CompilerParams(dimension_semantics=("arbitrary",)),
    )(codes_cat, x_flat, log_scale,
      p_dec["fc1"]["w"], p_dec["fc1"]["b"],
      p_dec["fc2"]["w"], p_dec["fc2"]["b"],
      p_dec["fc3"]["w"], p_dec["fc3"]["b"])
    return dec, recon


# --------------------------------------------------------------------------
# Parameter initialization (deterministic, PyTorch-like fan-in uniform; BN folded)
# --------------------------------------------------------------------------

def _init_linear(key, fan_in, fan_out):
    kw, kb = jax.random.split(key)
    bound = 1.0 / np.sqrt(fan_in)
    w = jax.random.uniform(kw, (fan_in, fan_out), jnp.float32, -bound, bound)
    b = jax.random.uniform(kb, (fan_out,), jnp.float32, -bound, bound)
    return {"w": w, "b": b.reshape(1, fan_out)}


def _init_layer_with_bn(key, cin, cout):
    # eval-mode BatchNorm1d with default stats (mean=0, var=1, gamma=1, beta=0) folded in.
    layer = _init_linear(key, cin, cout)
    s = 1.0 / np.sqrt(1.0 + BN_EPS)
    return {"w": layer["w"] * s, "b": layer["b"] * s}


def _pad_out(layer, pad):      # zero-pad output channels (exact: padded outputs are 0)
    return {"w": jnp.pad(layer["w"], ((0, 0), (0, pad))),
            "b": jnp.pad(layer["b"], ((0, 0), (0, pad)))}


def _pad_in(layer, pad):       # zero-pad input channels (exact: padded inputs multiply 0)
    return {"w": jnp.pad(layer["w"], ((0, pad), (0, 0))), "b": layer["b"]}


def init_params(key, num_points):
    ks = jax.random.split(key, 16)
    stn_fc3 = _init_linear(ks[5], 256, 9)
    # fold the identity added after STN fc3 into its bias.
    stn_fc3 = {"w": stn_fc3["w"],
               "b": stn_fc3["b"] + jnp.array([[1., 0., 0., 0., 1., 0., 0., 0., 1.]], jnp.float32)}

    lat_pad = LATENT_PAD - CODE_SIZE   # 4
    fc1_pad = FC1_PAD - FC1_OUT        # 6

    return {
        "stn": {
            "conv1": _init_layer_with_bn(ks[0], 3, 64),
            "conv2": _init_layer_with_bn(ks[1], 64, 128),
            "conv3": _init_layer_with_bn(ks[2], 128, 1024),
            "fc1": _init_layer_with_bn(ks[3], 1024, 512),
            "fc2": _init_layer_with_bn(ks[4], 512, 256),
            "fc3": stn_fc3,
        },
        "feat": {
            "conv1": _init_layer_with_bn(ks[6], 3, 64),
            "conv2": _init_layer_with_bn(ks[7], 64, 128),
            "conv3": _init_layer_with_bn(ks[8], 128, 1024),
        },
        # encoder head, zero-padded to MXU-friendly widths (numerically identical)
        "fc1": _pad_out(_init_linear(ks[9], 1024, FC1_OUT), fc1_pad),                     # (1024,72)
        "fc2": _pad_out(_pad_in(_init_linear(ks[10], FC1_OUT, CODE_SIZE), fc1_pad), lat_pad),  # (72,104)
        # TODO(synk): reference declares fc_mu/fc_var as nn.Linear(512, code_size) but applies them
        # to the size-100 code (shape mismatch); implemented as Linear(code_size, code_size).
        "fc_mu": _pad_out(_pad_in(_init_linear(ks[11], CODE_SIZE, CODE_SIZE), lat_pad), lat_pad),
        "fc_var": _pad_out(_pad_in(_init_linear(ks[12], CODE_SIZE, CODE_SIZE), lat_pad), lat_pad),
        "dec": {
            "fc1": _pad_in(_init_linear(ks[13], CODE_SIZE, 512), lat_pad),                # (104,512)
            "fc2": _init_linear(ks[14], 512, 1024),
            "fc3": _init_linear(ks[15], 1024, 3 * num_points),
        },
        "log_scale": jnp.zeros((1, 1), jnp.float32),   # nn.Parameter([0.0])
    }


# --------------------------------------------------------------------------
# Forward pass
# --------------------------------------------------------------------------

def pointnet_autoencoder_forward(params, x, eps):
    """x: (B, N, 3) point cloud; eps: (B, code_size) standard-normal noise."""
    B, N, dim = x.shape
    assert dim == 3, "Fail: expecting 3 (x-y-z) as last tensor dimension!"

    # ---- STN branch: fused conv1-3 + global max-pool, then fused FC head ----
    p_stn = params["stn"]
    g_stn = pointmlp_max(x, p_stn["conv1"]["w"], p_stn["conv1"]["b"],
                         p_stn["conv2"]["w"], p_stn["conv2"]["b"],
                         p_stn["conv3"]["w"], p_stn["conv3"]["b"], relu3=True)
    trans = stn_head(p_stn, g_stn).reshape(B, 3, 3)

    # ---- feat branch: fold the 3x3 transform into conv1 weight (per batch) ----
    p_feat = params["feat"]
    w1_eff = jnp.einsum("bde,ec->bdc", trans, p_feat["conv1"]["w"])   # (B, 3, 64)
    feat = pointmlp_max(x, w1_eff, p_feat["conv1"]["b"],
                        p_feat["conv2"]["w"], p_feat["conv2"]["b"],
                        p_feat["conv3"]["w"], p_feat["conv3"]["b"], relu3=False)

    # ---- VAE head: code, reparameterized z, per-sample KL (fused) ----
    eps_p = jnp.pad(eps, ((0, 0), (0, LATENT_PAD - CODE_SIZE)))
    code_p, z_p, kl = encoder_head(params, feat, eps_p)               # (B,104),(B,104),(B,1)

    # ---- decoder run once on [z ; code]; recon log-prob fused into the fc3 epilogue ----
    x_flat = jnp.transpose(x, (0, 2, 1)).reshape(B, 3 * N)            # matches x_hat (B,3,N) layout
    codes_cat = jnp.concatenate([z_p, code_p], axis=0)                # (2B, 104)
    decoded_flat, recon = decoder_and_recon(params["dec"], codes_cat, x_flat,
                                            params["log_scale"])

    elbo = jnp.mean(kl - recon)                                       # (kl - recon_loss).mean()
    decoded = jnp.transpose(decoded_flat.reshape(B, 3, N), (0, 2, 1))  # (B, N, 3)
    return decoded, trans, elbo


# --------------------------------------------------------------------------

if __name__ == "__main__":
    B, N = 2, 64                                   # small shapes: batch=2, 64 points
    key = jax.random.PRNGKey(0)
    k_params, k_x, k_eps = jax.random.split(key, 3)

    params = init_params(k_params, num_points=N)
    x = jax.random.normal(k_x, (B, N, 3), jnp.float32)
    eps = jax.random.normal(k_eps, (B, CODE_SIZE), jnp.float32)

    fwd = jax.jit(pointnet_autoencoder_forward)
    decoded, trans, elbo = fwd(params, x, eps)
    jax.block_until_ready((decoded, trans, elbo))

    assert decoded.shape == (B, N, 3)
    assert trans.shape == (B, 3, 3)
    assert elbo.shape == ()
    assert bool(jnp.all(jnp.isfinite(decoded)))
    assert bool(jnp.all(jnp.isfinite(trans)))
    assert bool(jnp.isfinite(elbo))
    print("KERNEL_OK")
</pallas_src>

<mosaic_0001>
module attributes {stable_mosaic.version = 11 : i64} {
  func.func @_stn_head_kernel(%arg0: i32, %arg1: memref<2x1024xf32, #tpu.memory_space<vmem>>, %arg2: memref<1024x512xf32, #tpu.memory_space<vmem>>, %arg3: memref<1x512xf32, #tpu.memory_space<vmem>>, %arg4: memref<512x256xf32, #tpu.memory_space<vmem>>, %arg5: memref<1x256xf32, #tpu.memory_space<vmem>>, %arg6: memref<256x9xf32, #tpu.memory_space<vmem>>, %arg7: memref<1x9xf32, #tpu.memory_space<vmem>>, %arg8: memref<2x9xf32, #tpu.memory_space<vmem>>) attributes {dimension_semantics = [#tpu.dimension_semantics<arbitrary>], iteration_bounds = array<i64: 1>, scalar_prefetch = 0 : i64, scratch_operands = 0 : i64, tpu.core_type = #tpu.core_type<tc>, window_params = [{pipeline_mode = #tpu.pipeline_mode<synchronous>, transform_indices = @transform_0, window_bounds = array<i64: 2, 1024>}, {pipeline_mode = #tpu.pipeline_mode<synchronous>, transform_indices = @transform_1, window_bounds = array<i64: 1024, 512>}, {pipeline_mode = #tpu.pipeline_mode<synchronous>, transform_indices = @transform_2, window_bounds = array<i64: 1, 512>}, {pipeline_mode = #tpu.pipeline_mode<synchronous>, transform_indices = @transform_3, window_bounds = array<i64: 512, 256>}, {pipeline_mode = #tpu.pipeline_mode<synchronous>, transform_indices = @transform_4, window_bounds = array<i64: 1, 256>}, {pipeline_mode = #tpu.pipeline_mode<synchronous>, transform_indices = @transform_5, window_bounds = array<i64: 256, 9>}, {pipeline_mode = #tpu.pipeline_mode<synchronous>, transform_indices = @transform_6, window_bounds = array<i64: 1, 9>}, {pipeline_mode = #tpu.pipeline_mode<synchronous>, transform_indices = @transform_7, window_bounds = array<i64: 2, 9>}]} {
    %c0 = arith.constant 0 : index
    %c0_0 = arith.constant 0 : index
    %0 = vector.load %arg1[%c0, %c0_0] : memref<2x1024xf32, #tpu.memory_space<vmem>>, vector<2x1024xf32>
    %c0_1 = arith.constant 0 : index
    %c0_2 = arith.constant 0 : index
    %1 = vector.load %arg2[%c0_1, %c0_2] : memref<1024x512xf32, #tpu.memory_space<vmem>>, vector<1024x512xf32>
    %cst = arith.constant dense<0.000000e+00> : vector<2x512xf32>
    %2 = tpu.matmul %0, %1, %cst {dimension_numbers = #tpu.dot_dimension_numbers<[1], [0], [0], [1], [0, 0, 1, 1], [], []>} : vector<2x1024xf32>, vector<1024x512xf32>, vector<2x512xf32> -> vector<2x512xf32>
    %c0_3 = arith.constant 0 : index
    %c0_4 = arith.constant 0 : index
    %3 = vector.load %arg3[%c0_3, %c0_4] : memref<1x512xf32, #tpu.memory_space<vmem>>, vector<1x512xf32>
    %4 = vector.broadcast %3 : vector<1x512xf32> to vector<2x512xf32>
    %5 = arith.addf %2, %4 : vector<2x512xf32>
    %cst_5 = arith.constant 0.000000e+00 : f32
    %6 = vector.broadcast %cst_5 : f32 to vector<2x512xf32>
    %7 = arith.maximumf %5, %6 : vector<2x512xf32>
    %c0_6 = arith.constant 0 : index
    %c0_7 = arith.constant 0 : index
    %8 = vector.load %arg4[%c0_6, %c0_7] : memref<512x256xf32, #tpu.memory_space<vmem>>, vector<512x256xf32>
    %cst_8 = arith.constant dense<0.000000e+00> : vector<2x256xf32>
    %9 = tpu.matmul %7, %8, %cst_8 {dimension_numbers = #tpu.dot_dimension_numbers<[1], [0], [0], [1], [0, 0, 1, 1], [], []>} : vector<2x512xf32>, vector<512x256xf32>, vector<2x256xf32> -> vector<2x256xf32>
    %c0_9 = arith.constant 0 : index
    %c0_10 = arith.constant 0 : index
    %10 = vector.load %arg5[%c0_9, %c0_10] : memref<1x256xf32, #tpu.memory_space<vmem>>, vector<1x256xf32>
    %11 = vector.broadcast %10 : vector<1x256xf32> to vector<2x256xf32>
    %12 = arith.addf %9, %11 : vector<2x256xf32>
    %cst_11 = arith.constant 0.000000e+00 : f32
    %13 = vector.broadcast %cst_11 : f32 to vector<2x256xf32>
    %14 = arith.maximumf %12, %13 : vector<2x256xf32>
    %c0_12 = arith.constant 0 : index
    %c0_13 = arith.constant 0 : index
    %15 = vector.load %arg6[%c0_12, %c0_13] : memref<256x9xf32, #tpu.memory_space<vmem>>, vector<256x9xf32>
    %cst_14 = arith.constant dense<0.000000e+00> : vector<2x9xf32>
    %16 = tpu.matmul %14, %15, %cst_14 {dimension_numbers = #tpu.dot_dimension_numbers<[1], [0], [0], [1], [0, 0, 1, 1], [], []>} : vector<2x256xf32>, vector<256x9xf32>, vector<2x9xf32> -> vector<2x9xf32>
    %c0_15 = arith.constant 0 : index
    %c0_16 = arith.constant 0 : index
    %17 = vector.load %arg7[%c0_15, %c0_16] : memref<1x9xf32, #tpu.memory_space<vmem>>, vector<1x9xf32>
    %18 = vector.broadcast %17 : vector<1x9xf32> to vector<2x9xf32>
    %19 = arith.addf %16, %18 : vector<2x9xf32>
    %c0_17 = arith.constant 0 : index
    %c0_18 = arith.constant 0 : index
    %20 = vector.load %arg8[%c0_17, %c0_18] : memref<2x9xf32, #tpu.memory_space<vmem>>, vector<2x9xf32>
    tpu.vector_store %arg8[%c0_17, %c0_18], %19 {strides = array<i32>} : memref<2x9xf32, #tpu.memory_space<vmem>>, vector<2x9xf32>,
    return
  }
  func.func @transform_0(%arg0: i32) -> (i32, i32) {
    %c0_i32 = arith.constant 0 : i32
    %c0_i32_0 = arith.constant 0 : i32
    %c0_i32_1 = arith.constant 0 : i32
    return %c0_i32, %c0_i32_0 : i32, i32
  }
  func.func @transform_1(%arg0: i32) -> (i32, i32) {
    %c0_i32 = arith.constant 0 : i32
    %c0_i32_0 = arith.constant 0 : i32
    %c0_i32_1 = arith.constant 0 : i32
    return %c0_i32, %c0_i32_0 : i32, i32
  }
  func.func @transform_2(%arg0: i32) -> (i32, i32) {
    %c0_i32 = arith.constant 0 : i32
    %c0_i32_0 = arith.constant 0 : i32
    %c0_i32_1 = arith.constant 0 : i32
    return %c0_i32, %c0_i32_0 : i32, i32
  }
  func.func @transform_3(%arg0: i32) -> (i32, i32) {
    %c0_i32 = arith.constant 0 : i32
    %c0_i32_0 = arith.constant 0 : i32
    %c0_i32_1 = arith.constant 0 : i32
    return %c0_i32, %c0_i32_0 : i32, i32
  }
  func.func @transform_4(%arg0: i32) -> (i32, i32) {
    %c0_i32 = arith.constant 0 : i32
    %c0_i32_0 = arith.constant 0 : i32
    %c0_i32_1 = arith.constant 0 : i32
    return %c0_i32, %c0_i32_0 : i32, i32
  }
  func.func @transform_5(%arg0: i32) -> (i32, i32) {
    %c0_i32 = arith.constant 0 : i32
    %c0_i32_0 = arith.constant 0 : i32
    %c0_i32_1 = arith.constant 0 : i32
    return %c0_i32, %c0_i32_0 : i32, i32
  }
  func.func @transform_6(%arg0: i32) -> (i32, i32) {
    %c0_i32 = arith.constant 0 : i32
    %c0_i32_0 = arith.constant 0 : i32
    %c0_i32_1 = arith.constant 0 : i32
    return %c0_i32, %c0_i32_0 : i32, i32
  }
  func.func @transform_7(%arg0: i32) -> (i32, i32) {
    %c0_i32 = arith.constant 0 : i32
    %c0_i32_0 = arith.constant 0 : i32
    %c0_i32_1 = arith.constant 0 : i32
    return %c0_i32, %c0_i32_0 : i32, i32
  }
}

module attributes {stable_mosaic.version = 11 : i64} {
  func.func @_pointmlp_max_kernel(%arg0: i32, %arg1: i32, %arg2: memref<1x64x3xf32, #tpu.memory_space<vmem>>, %arg3: memref<1x3x64xf32, #tpu.memory_space<vmem>>, %arg4: memref<1x64xf32, #tpu.memory_space<vmem>>, %arg5: memref<64x128xf32, #tpu.memory_space<vmem>>, %arg6: memref<1x128xf32, #tpu.memory_space<vmem>>, %arg7: memref<128x1024xf32, #tpu.memory_space<vmem>>, %arg8: memref<1x1024xf32, #tpu.memory_space<vmem>>, %arg9: memref<1x1x1024xf32, #tpu.memory_space<vmem>>) attributes {dimension_semantics = [#tpu.dimension_semantics<parallel>, #tpu.dimension_semantics<arbitrary>], iteration_bounds = array<i64: 2, 1>, scalar_prefetch = 0 : i64, scratch_operands = 0 : i64, tpu.core_type = #tpu.core_type<tc>, window_params = [{transform_indices = @transform_0, window_bounds = array<i64: 1, 64, 3>}, {pipeline_mode = #tpu.pipeline_mode<synchronous>, transform_indices = @transform_1, window_bounds = array<i64: 1, 3, 64>}, {pipeline_mode = #tpu.pipeline_mode<synchronous>, transform_indices = @transform_2, window_bounds = array<i64: 1, 64>}, {pipeline_mode = #tpu.pipeline_mode<synchronous>, transform_indices = @transform_3, window_bounds = array<i64: 64, 128>}, {pipeline_mode = #tpu.pipeline_mode<synchronous>, transform_indices = @transform_4, window_bounds = array<i64: 1, 128>}, {pipeline_mode = #tpu.pipeline_mode<synchronous>, transform_indices = @transform_5, window_bounds = array<i64: 128, 1024>}, {pipeline_mode = #tpu.pipeline_mode<synchronous>, transform_indices = @transform_6, window_bounds = array<i64: 1, 1024>}, {transform_indices = @transform_7, window_bounds = array<i64: 1, 1, 1024>}]} {
    %c0 = arith.constant 0 : index
    %c0_0 = arith.constant 0 : index
    %c0_1 = arith.constant 0 : index
    %0 = vector.load %arg2[%c0, %c0_0, %c0_1] : memref<1x64x3xf32, #tpu.memory_space<vmem>>, vector<1x64x3xf32>
    %1 = vector.shape_cast %0 : vector<1x64x3xf32> to vector<64x3xf32>
    %c0_2 = arith.constant 0 : index
    %c0_3 = arith.constant 0 : index
    %c0_4 = arith.constant 0 : index
    %2 = vector.load %arg3[%c0_2, %c0_3, %c0_4] : memref<1x3x64xf32, #tpu.memory_space<vmem>>, vector<1x3x64xf32>
    %3 = vector.shape_cast %2 : vector<1x3x64xf32> to vector<3x64xf32>
    %4 = vector.extract_strided_slice %1 {offsets = [0, 0], sizes = [64, 1], strides = [1, 1]} : vector<64x3xf32> to vector<64x1xf32>
    %5 = vector.extract_strided_slice %3 {offsets = [0, 0], sizes = [1, 64], strides = [1, 1]} : vector<3x64xf32> to vector<1x64xf32>
    %6 = vector.broadcast %4 : vector<64x1xf32> to vector<64x64xf32>
    %7 = vector.broadcast %5 : vector<1x64xf32> to vector<64x64xf32>
    %8 = arith.mulf %6, %7 : vector<64x64xf32>
    %9 = vector.extract_strided_slice %1 {offsets = [0, 1], sizes = [64, 1], strides = [1, 1]} : vector<64x3xf32> to vector<64x1xf32>
    %10 = vector.extract_strided_slice %3 {offsets = [1, 0], sizes = [1, 64], strides = [1, 1]} : vector<3x64xf32> to vector<1x64xf32>
    %11 = vector.broadcast %9 : vector<64x1xf32> to vector<64x64xf32>
    %12 = vector.broadcast %10 : vector<1x64xf32> to vector<64x64xf32>
    %13 = arith.mulf %11, %12 : vector<64x64xf32>
    %14 = arith.addf %8, %13 : vector<64x64xf32>
    %15 = vector.extract_strided_slice %1 {offsets = [0, 2], sizes = [64, 1], strides = [1, 1]} : vector<64x3xf32> to vector<64x1xf32>
    %16 = vector.extract_strided_slice %3 {offsets = [2, 0], sizes = [1, 64], strides = [1, 1]} : vector<3x64xf32> to vector<1x64xf32>
    %17 = vector.broadcast %15 : vector<64x1xf32> to vector<64x64xf32>
    %18 = vector.broadcast %16 : vector<1x64xf32> to vector<64x64xf32>
    %19 = arith.mulf %17, %18 : vector<64x64xf32>
    %20 = arith.addf %14, %19 : vector<64x64xf32>
    %c0_5 = arith.constant 0 : index
    %c0_6 = arith.constant 0 : index
    %21 = vector.load %arg4[%c0_5, %c0_6] : memref<1x64xf32, #tpu.memory_space<vmem>>, vector<1x64xf32>
    %22 = vector.broadcast %21 : vector<1x64xf32> to vector<64x64xf32>
    %23 = arith.addf %20, %22 : vector<64x64xf32>
    %cst = arith.constant 0.000000e+00 : f32
    %24 = vector.broadcast %cst : f32 to vector<64x64xf32>
    %25 = arith.maximumf %23, %24 : vector<64x64xf32>
    %c0_7 = arith.constant 0 : index
    %c0_8 = arith.constant 0 : index
    %26 = vector.load %arg5[%c0_7, %c0_8] : memref<64x128xf32, #tpu.memory_space<vmem>>, vector<64x128xf32>
    %cst_9 = arith.constant dense<0.000000e+00> : vector<64x128xf32>
    %27 = tpu.matmul %25, %26, %cst_9 {dimension_numbers = #tpu.dot_dimension_numbers<[1], [0], [0], [1], [0, 0, 1, 1], [], []>} : vector<64x64xf32>, vector<64x128xf32>, vector<64x128xf32> -> vector<64x128xf32>
    %c0_10 = arith.constant 0 : index
    %c0_11 = arith.constant 0 : index
    %28 = vector.load %arg6[%c0_10, %c0_11] : memref<1x128xf32, #tpu.memory_space<vmem>>, vector<1x128xf32>
    %29 = vector.broadcast %28 : vector<1x128xf32> to vector<64x128xf32>
    %30 = arith.addf %27, %29 : vector<64x128xf32>
    %cst_12 = arith.constant 0.000000e+00 : f32
    %31 = vector.broadcast %cst_12 : f32 to vector<64x128xf32>
    %32 = arith.maximumf %30, %31 : vector<64x128xf32>
    %c0_13 = arith.constant 0 : index
    %c0_14 = arith.constant 0 : index
    %33 = vector.load %arg7[%c0_13, %c0_14] : memref<128x1024xf32, #tpu.memory_space<vmem>>, vector<128x1024xf32>
    %cst_15 = arith.constant dense<0.000000e+00> : vector<64x1024xf32>
    %34 = tpu.matmul %32, %33, %cst_15 {dimension_numbers = #tpu.dot_dimension_numbers<[1], [0], [0], [1], [0, 0, 1, 1], [], []>} : vector<64x128xf32>, vector<128x1024xf32>, vector<64x1024xf32> -> vector<64x1024xf32>
    %c0_16 = arith.constant 0 : index
    %c0_17 = arith.constant 0 : index
    %35 = vector.load %arg8[%c0_16, %c0_17] : memref<1x1024xf32, #tpu.memory_space<vmem>>, vector<1x1024xf32>
    %36 = vector.broadcast %35 : vector<1x1024xf32> to vector<64x1024xf32>
    %37 = arith.addf %34, %36 : vector<64x1024xf32>
    %cst_18 = arith.constant 0.000000e+00 : f32
    %38 = vector.broadcast %cst_18 : f32 to vector<64x1024xf32>
    %39 = arith.maximumf %37, %38 : vector<64x1024xf32>
    %cst_19 = arith.constant dense<0xFF800000> : vector<1024xf32>
    %40 = vector.multi_reduction <maximumf>, %39, %cst_19 [0] : vector<64x1024xf32> to vector<1024xf32>
    %41 = vector.shape_cast %40 : vector<1024xf32> to vector<1x1024xf32>
    %42 = vector.shape_cast %41 : vector<1x1024xf32> to vector<1x1x1024xf32>
    %c0_i32 = arith.constant 0 : i32
    %43 = arith.cmpi eq, %arg1, %c0_i32 : i32
    %44 = arith.extui %43 : i1 to i32
    %c0_i32_20 = arith.constant 0 : i32
    %45 = arith.cmpi ne, %44, %c0_i32_20 : i32
    scf.if %45 {
      %cst_27 = arith.constant 0xFF800000 : f32
      %49 = vector.broadcast %cst_27 : f32 to vector<1x1x1024xf32>
      %c0_28 = arith.constant 0 : index
      %c0_29 = arith.constant 0 : index
      %c0_30 = arith.constant 0 : index
      %50 = vector.load %arg9[%c0_28, %c0_29, %c0_30] : memref<1x1x1024xf32, #tpu.memory_space<vmem>>, vector<1x1x1024xf32>
      tpu.vector_store %arg9[%c0_28, %c0_29, %c0_30], %49 {strides = array<i32>} : memref<1x1x1024xf32, #tpu.memory_space<vmem>>, vector<1x1x1024xf32>,
    } else {
    }
    %c0_21 = arith.constant 0 : index
    %c0_22 = arith.constant 0 : index
    %c0_23 = arith.constant 0 : index
    %46 = vector.load %arg9[%c0_21, %c0_22, %c0_23] : memref<1x1x1024xf32, #tpu.memory_space<vmem>>, vector<1x1x1024xf32>
    %47 = arith.maximumf %46, %42 : vector<1x1x1024xf32>
    %c0_24 = arith.constant 0 : index
    %c0_25 = arith.constant 0 : index
    %c0_26 = arith.constant 0 : index
    %48 = vector.load %arg9[%c0_24, %c0_25, %c0_26] : memref<1x1x1024xf32, #tpu.memory_space<vmem>>, vector<1x1x1024xf32>
    tpu.vector_store %arg9[%c0_24, %c0_25, %c0_26], %47 {strides = array<i32>} : memref<1x1x1024xf32, #tpu.memory_space<vmem>>, vector<1x1x1024xf32>,
    return
  }
  func.func @transform_0(%arg0: i32, %arg1: i32) -> (i32, i32, i32) {
    %c0_i32 = arith.constant 0 : i32
    %c0_i32_0 = arith.constant 0 : i32
    return %arg0, %arg1, %c0_i32 : i32, i32, i32
  }
  func.func @transform_1(%arg0: i32, %arg1: i32) -> (i32, i32, i32) {
    %c0_i32 = arith.constant 0 : i32
    %c0_i32_0 = arith.constant 0 : i32
    %c0_i32_1 = arith.constant 0 : i32
    %c0_i32_2 = arith.constant 0 : i32
    return %c0_i32, %c0_i32_0, %c0_i32_1 : i32, i32, i32
  }
  func.func @transform_2(%arg0: i32, %arg1: i32) -> (i32, i32) {
    %c0_i32 = arith.constant 0 : i32
    %c0_i32_0 = arith.constant 0 : i32
    %c0_i32_1 = arith.constant 0 : i32
    return %c0_i32, %c0_i32_0 : i32, i32
  }
  func.func @transform_3(%arg0: i32, %arg1: i32) -> (i32, i32) {
    %c0_i32 = arith.constant 0 : i32
    %c0_i32_0 = arith.constant 0 : i32
    %c0_i32_1 = arith.constant 0 : i32
    return %c0_i32, %c0_i32_0 : i32, i32
  }
  func.func @transform_4(%arg0: i32, %arg1: i32) -> (i32, i32) {
    %c0_i32 = arith.constant 0 : i32
    %c0_i32_0 = arith.constant 0 : i32
    %c0_i32_1 = arith.constant 0 : i32
    return %c0_i32, %c0_i32_0 : i32, i32
  }
  func.func @transform_5(%arg0: i32, %arg1: i32) -> (i32, i32) {
    %c0_i32 = arith.constant 0 : i32
    %c0_i32_0 = arith.constant 0 : i32
    %c0_i32_1 = arith.constant 0 : i32
    return %c0_i32, %c0_i32_0 : i32, i32
  }
  func.func @transform_6(%arg0: i32, %arg1: i32) -> (i32, i32) {
    %c0_i32 = arith.constant 0 : i32
    %c0_i32_0 = arith.constant 0 : i32
    %c0_i32_1 = arith.constant 0 : i32
    return %c0_i32, %c0_i32_0 : i32, i32
  }
  func.func @transform_7(%arg0: i32, %arg1: i32) -> (i32, i32, i32) {
    %c0_i32 = arith.constant 0 : i32
    %c0_i32_0 = arith.constant 0 : i32
    %c0_i32_1 = arith.constant 0 : i32
    return %arg0, %c0_i32, %c0_i32_0 : i32, i32, i32
  }
}

module attributes {stable_mosaic.version = 11 : i64} {
  func.func @_pointmlp_max_kernel(%arg0: i32, %arg1: i32, %arg2: memref<1x64x3xf32, #tpu.memory_space<vmem>>, %arg3: memref<1x3x64xf32, #tpu.memory_space<vmem>>, %arg4: memref<1x64xf32, #tpu.memory_space<vmem>>, %arg5: memref<64x128xf32, #tpu.memory_space<vmem>>, %arg6: memref<1x128xf32, #tpu.memory_space<vmem>>, %arg7: memref<128x1024xf32, #tpu.memory_space<vmem>>, %arg8: memref<1x1024xf32, #tpu.memory_space<vmem>>, %arg9: memref<1x1x1024xf32, #tpu.memory_space<vmem>>) attributes {dimension_semantics = [#tpu.dimension_semantics<parallel>, #tpu.dimension_semantics<arbitrary>], iteration_bounds = array<i64: 2, 1>, scalar_prefetch = 0 : i64, scratch_operands = 0 : i64, tpu.core_type = #tpu.core_type<tc>, window_params = [{transform_indices = @transform_0, window_bounds = array<i64: 1, 64, 3>}, {transform_indices = @transform_1, window_bounds = array<i64: 1, 3, 64>}, {pipeline_mode = #tpu.pipeline_mode<synchronous>, transform_indices = @transform_2, window_bounds = array<i64: 1, 64>}, {pipeline_mode = #tpu.pipeline_mode<synchronous>, transform_indices = @transform_3, window_bounds = array<i64: 64, 128>}, {pipeline_mode = #tpu.pipeline_mode<synchronous>, transform_indices = @transform_4, window_bounds = array<i64: 1, 128>}, {pipeline_mode = #tpu.pipeline_mode<synchronous>, transform_indices = @transform_5, window_bounds = array<i64: 128, 1024>}, {pipeline_mode = #tpu.pipeline_mode<synchronous>, transform_indices = @transform_6, window_bounds = array<i64: 1, 1024>}, {transform_indices = @transform_7, window_bounds = array<i64: 1, 1, 1024>}]} {
    %c0 = arith.constant 0 : index
    %c0_0 = arith.constant 0 : index
    %c0_1 = arith.constant 0 : index
    %0 = vector.load %arg2[%c0, %c0_0, %c0_1] : memref<1x64x3xf32, #tpu.memory_space<vmem>>, vector<1x64x3xf32>
    %1 = vector.shape_cast %0 : vector<1x64x3xf32> to vector<64x3xf32>
    %c0_2 = arith.constant 0 : index
    %c0_3 = arith.constant 0 : index
    %c0_4 = arith.constant 0 : index
    %2 = vector.load %arg3[%c0_2, %c0_3, %c0_4] : memref<1x3x64xf32, #tpu.memory_space<vmem>>, vector<1x3x64xf32>
    %3 = vector.shape_cast %2 : vector<1x3x64xf32> to vector<3x64xf32>
    %4 = vector.extract_strided_slice %1 {offsets = [0, 0], sizes = [64, 1], strides = [1, 1]} : vector<64x3xf32> to vector<64x1xf32>
    %5 = vector.extract_strided_slice %3 {offsets = [0, 0], sizes = [1, 64], strides = [1, 1]} : vector<3x64xf32> to vector<1x64xf32>
    %6 = vector.broadcast %4 : vector<64x1xf32> to vector<64x64xf32>
    %7 = vector.broadcast %5 : vector<1x64xf32> to vector<64x64xf32>
    %8 = arith.mulf %6, %7 : vector<64x64xf32>
    %9 = vector.extract_strided_slice %1 {offsets = [0, 1], sizes = [64, 1], strides = [1, 1]} : vector<64x3xf32> to vector<64x1xf32>
    %10 = vector.extract_strided_slice %3 {offsets = [1, 0], sizes = [1, 64], strides = [1, 1]} : vector<3x64xf32> to vector<1x64xf32>
    %11 = vector.broadcast %9 : vector<64x1xf32> to vector<64x64xf32>
    %12 = vector.broadcast %10 : vector<1x64xf32> to vector<64x64xf32>
    %13 = arith.mulf %11, %12 : vector<64x64xf32>
    %14 = arith.addf %8, %13 : vector<64x64xf32>
    %15 = vector.extract_strided_slice %1 {offsets = [0, 2], sizes = [64, 1], strides = [1, 1]} : vector<64x3xf32> to vector<64x1xf32>
    %16 = vector.extract_strided_slice %3 {offsets = [2, 0], sizes = [1, 64], strides = [1, 1]} : vector<3x64xf32> to vector<1x64xf32>
    %17 = vector.broadcast %15 : vector<64x1xf32> to vector<64x64xf32>
    %18 = vector.broadcast %16 : vector<1x64xf32> to vector<64x64xf32>
    %19 = arith.mulf %17, %18 : vector<64x64xf32>
    %20 = arith.addf %14, %19 : vector<64x64xf32>
    %c0_5 = arith.constant 0 : index
    %c0_6 = arith.constant 0 : index
    %21 = vector.load %arg4[%c0_5, %c0_6] : memref<1x64xf32, #tpu.memory_space<vmem>>, vector<1x64xf32>
    %22 = vector.broadcast %21 : vector<1x64xf32> to vector<64x64xf32>
    %23 = arith.addf %20, %22 : vector<64x64xf32>
    %cst = arith.constant 0.000000e+00 : f32
    %24 = vector.broadcast %cst : f32 to vector<64x64xf32>
    %25 = arith.maximumf %23, %24 : vector<64x64xf32>
    %c0_7 = arith.constant 0 : index
    %c0_8 = arith.constant 0 : index
    %26 = vector.load %arg5[%c0_7, %c0_8] : memref<64x128xf32, #tpu.memory_space<vmem>>, vector<64x128xf32>
    %cst_9 = arith.constant dense<0.000000e+00> : vector<64x128xf32>
    %27 = tpu.matmul %25, %26, %cst_9 {dimension_numbers = #tpu.dot_dimension_numbers<[1], [0], [0], [1], [0, 0, 1, 1], [], []>} : vector<64x64xf32>, vector<64x128xf32>, vector<64x128xf32> -> vector<64x128xf32>
    %c0_10 = arith.constant 0 : index
    %c0_11 = arith.constant 0 : index
    %28 = vector.load %arg6[%c0_10, %c0_11] : memref<1x128xf32, #tpu.memory_space<vmem>>, vector<1x128xf32>
    %29 = vector.broadcast %28 : vector<1x128xf32> to vector<64x128xf32>
    %30 = arith.addf %27, %29 : vector<64x128xf32>
    %cst_12 = arith.constant 0.000000e+00 : f32
    %31 = vector.broadcast %cst_12 : f32 to vector<64x128xf32>
    %32 = arith.maximumf %30, %31 : vector<64x128xf32>
    %c0_13 = arith.constant 0 : index
    %c0_14 = arith.constant 0 : index
    %33 = vector.load %arg7[%c0_13, %c0_14] : memref<128x1024xf32, #tpu.memory_space<vmem>>, vector<128x1024xf32>
    %cst_15 = arith.constant dense<0.000000e+00> : vector<64x1024xf32>
    %34 = tpu.matmul %32, %33, %cst_15 {dimension_numbers = #tpu.dot_dimension_numbers<[1], [0], [0], [1], [0, 0, 1, 1], [], []>} : vector<64x128xf32>, vector<128x1024xf32>, vector<64x1024xf32> -> vector<64x1024xf32>
    %c0_16 = arith.constant 0 : index
    %c0_17 = arith.constant 0 : index
    %35 = vector.load %arg8[%c0_16, %c0_17] : memref<1x1024xf32, #tpu.memory_space<vmem>>, vector<1x1024xf32>
    %36 = vector.broadcast %35 : vector<1x1024xf32> to vector<64x1024xf32>
    %37 = arith.addf %34, %36 : vector<64x1024xf32>
    %cst_18 = arith.constant dense<0xFF800000> : vector<1024xf32>
    %38 = vector.multi_reduction <maximumf>, %37, %cst_18 [0] : vector<64x1024xf32> to vector<1024xf32>
    %39 = vector.shape_cast %38 : vector<1024xf32> to vector<1x1024xf32>
    %40 = vector.shape_cast %39 : vector<1x1024xf32> to vector<1x1x1024xf32>
    %c0_i32 = arith.constant 0 : i32
    %41 = arith.cmpi eq, %arg1, %c0_i32 : i32
    %42 = arith.extui %41 : i1 to i32
    %c0_i32_19 = arith.constant 0 : i32
    %43 = arith.cmpi ne, %42, %c0_i32_19 : i32
    scf.if %43 {
      %cst_26 = arith.constant 0xFF800000 : f32
      %47 = vector.broadcast %cst_26 : f32 to vector<1x1x1024xf32>
      %c0_27 = arith.constant 0 : index
      %c0_28 = arith.constant 0 : index
      %c0_29 = arith.constant 0 : index
      %48 = vector.load %arg9[%c0_27, %c0_28, %c0_29] : memref<1x1x1024xf32, #tpu.memory_space<vmem>>, vector<1x1x1024xf32>
      tpu.vector_store %arg9[%c0_27, %c0_28, %c0_29], %47 {strides = array<i32>} : memref<1x1x1024xf32, #tpu.memory_space<vmem>>, vector<1x1x1024xf32>,
    } else {
    }
    %c0_20 = arith.constant 0 : index
    %c0_21 = arith.constant 0 : index
    %c0_22 = arith.constant 0 : index
    %44 = vector.load %arg9[%c0_20, %c0_21, %c0_22] : memref<1x1x1024xf32, #tpu.memory_space<vmem>>, vector<1x1x1024xf32>
    %45 = arith.maximumf %44, %40 : vector<1x1x1024xf32>
    %c0_23 = arith.constant 0 : index
    %c0_24 = arith.constant 0 : index
    %c0_25 = arith.constant 0 : index
    %46 = vector.load %arg9[%c0_23, %c0_24, %c0_25] : memref<1x1x1024xf32, #tpu.memory_space<vmem>>, vector<1x1x1024xf32>
    tpu.vector_store %arg9[%c0_23, %c0_24, %c0_25], %45 {strides = array<i32>} : memref<1x1x1024xf32, #tpu.memory_space<vmem>>, vector<1x1x1024xf32>,
    return
  }
  func.func @transform_0(%arg0: i32, %arg1: i32) -> (i32, i32, i32) {
    %c0_i32 = arith.constant 0 : i32
    %c0_i32_0 = arith.constant 0 : i32
    return %arg0, %arg1, %c0_i32 : i32, i32, i32
  }
  func.func @transform_1(%arg0: i32, %arg1: i32) -> (i32, i32, i32) {
    %c0_i32 = arith.constant 0 : i32
    %c0_i32_0 = arith.constant 0 : i32
    %c0_i32_1 = arith.constant 0 : i32
    return %arg0, %c0_i32, %c0_i32_0 : i32, i32, i32
  }
  func.func @transform_2(%arg0: i32, %arg1: i32) -> (i32, i32) {
    %c0_i32 = arith.constant 0 : i32
    %c0_i32_0 = arith.constant 0 : i32
    %c0_i32_1 = arith.constant 0 : i32
    return %c0_i32, %c0_i32_0 : i32, i32
  }
  func.func @transform_3(%arg0: i32, %arg1: i32) -> (i32, i32) {
    %c0_i32 = arith.constant 0 : i32
    %c0_i32_0 = arith.constant 0 : i32
    %c0_i32_1 = arith.constant 0 : i32
    return %c0_i32, %c0_i32_0 : i32, i32
  }
  func.func @transform_4(%arg0: i32, %arg1: i32) -> (i32, i32) {
    %c0_i32 = arith.constant 0 : i32
    %c0_i32_0 = arith.constant 0 : i32
    %c0_i32_1 = arith.constant 0 : i32
    return %c0_i32, %c0_i32_0 : i32, i32
  }
  func.func @transform_5(%arg0: i32, %arg1: i32) -> (i32, i32) {
    %c0_i32 = arith.constant 0 : i32
    %c0_i32_0 = arith.constant 0 : i32
    %c0_i32_1 = arith.constant 0 : i32
    return %c0_i32, %c0_i32_0 : i32, i32
  }
  func.func @transform_6(%arg0: i32, %arg1: i32) -> (i32, i32) {
    %c0_i32 = arith.constant 0 : i32
    %c0_i32_0 = arith.constant 0 : i32
    %c0_i32_1 = arith.constant 0 : i32
    return %c0_i32, %c0_i32_0 : i32, i32
  }
  func.func @transform_7(%arg0: i32, %arg1: i32) -> (i32, i32, i32) {
    %c0_i32 = arith.constant 0 : i32
    %c0_i32_0 = arith.constant 0 : i32
    %c0_i32_1 = arith.constant 0 : i32
    return %arg0, %c0_i32, %c0_i32_0 : i32, i32, i32
  }
}

module attributes {stable_mosaic.version = 11 : i64} {
  func.func @_encoder_head_kernel(%arg0: i32, %arg1: memref<2x1024xf32, #tpu.memory_space<vmem>>, %arg2: memref<2x104xf32, #tpu.memory_space<vmem>>, %arg3: memref<1024x72xf32, #tpu.memory_space<vmem>>, %arg4: memref<1x72xf32, #tpu.memory_space<vmem>>, %arg5: memref<72x104xf32, #tpu.memory_space<vmem>>, %arg6: memref<1x104xf32, #tpu.memory_space<vmem>>, %arg7: memref<104x104xf32, #tpu.memory_space<vmem>>, %arg8: memref<1x104xf32, #tpu.memory_space<vmem>>, %arg9: memref<104x104xf32, #tpu.memory_space<vmem>>, %arg10: memref<1x104xf32, #tpu.memory_space<vmem>>, %arg11: memref<2x104xf32, #tpu.memory_space<vmem>>, %arg12: memref<2x104xf32, #tpu.memory_space<vmem>>, %arg13: memref<2x1xf32, #tpu.memory_space<vmem>>) attributes {dimension_semantics = [#tpu.dimension_semantics<arbitrary>], iteration_bounds = array<i64: 1>, scalar_prefetch = 0 : i64, scratch_operands = 0 : i64, tpu.core_type = #tpu.core_type<tc>, window_params = [{pipeline_mode = #tpu.pipeline_mode<synchronous>, transform_indices = @transform_0, window_bounds = array<i64: 2, 1024>}, {pipeline_mode = #tpu.pipeline_mode<synchronous>, transform_indices = @transform_1, window_bounds = array<i64: 2, 104>}, {pipeline_mode = #tpu.pipeline_mode<synchronous>, transform_indices = @transform_2, window_bounds = array<i64: 1024, 72>}, {pipeline_mode = #tpu.pipeline_mode<synchronous>, transform_indices = @transform_3, window_bounds = array<i64: 1, 72>}, {pipeline_mode = #tpu.pipeline_mode<synchronous>, transform_indices = @transform_4, window_bounds = array<i64: 72, 104>}, {pipeline_mode = #tpu.pipeline_mode<synchronous>, transform_indices = @transform_5, window_bounds = array<i64: 1, 104>}, {pipeline_mode = #tpu.pipeline_mode<synchronous>, transform_indices = @transform_6, window_bounds = array<i64: 104, 104>}, {pipeline_mode = #tpu.pipeline_mode<synchronous>, transform_indices = @transform_7, window_bounds = array<i64: 1, 104>}, {pipeline_mode = #tpu.pipeline_mode<synchronous>, transform_indices = @transform_8, window_bounds = array<i64: 104, 104>}, {pipeline_mode = #tpu.pipeline_mode<synchronous>, transform_indices = @transform_9, window_bounds = array<i64: 1, 104>}, {pipeline_mode = #tpu.pipeline_mode<synchronous>, transform_indices = @transform_10, window_bounds = array<i64: 2, 104>}, {pipeline_mode = #tpu.pipeline_mode<synchronous>, transform_indices = @transform_11, window_bounds = array<i64: 2, 104>}, {pipeline_mode = #tpu.pipeline_mode<synchronous>, transform_indices = @transform_12, window_bounds = array<i64: 2, 1>}]} {
    %c0 = arith.constant 0 : index
    %c0_0 = arith.constant 0 : index
    %0 = vector.load %arg1[%c0, %c0_0] : memref<2x1024xf32, #tpu.memory_space<vmem>>, vector<2x1024xf32>
    %c0_1 = arith.constant 0 : index
    %c0_2 = arith.constant 0 : index
    %1 = vector.load %arg3[%c0_1, %c0_2] : memref<1024x72xf32, #tpu.memory_space<vmem>>, vector<1024x72xf32>
    %cst = arith.constant dense<0.000000e+00> : vector<2x72xf32>
    %2 = tpu.matmul %0, %1, %cst {dimension_numbers = #tpu.dot_dimension_numbers<[1], [0], [0], [1], [0, 0, 1, 1], [], []>} : vector<2x1024xf32>, vector<1024x72xf32>, vector<2x72xf32> -> vector<2x72xf32>
    %c0_3 = arith.constant 0 : index
    %c0_4 = arith.constant 0 : index
    %3 = vector.load %arg4[%c0_3, %c0_4] : memref<1x72xf32, #tpu.memory_space<vmem>>, vector<1x72xf32>
    %4 = vector.broadcast %3 : vector<1x72xf32> to vector<2x72xf32>
    %5 = arith.addf %2, %4 : vector<2x72xf32>
    %cst_5 = arith.constant 0.000000e+00 : f32
    %6 = vector.broadcast %cst_5 : f32 to vector<2x72xf32>
    %7 = arith.maximumf %5, %6 : vector<2x72xf32>
    %c0_6 = arith.constant 0 : index
    %c0_7 = arith.constant 0 : index
    %8 = vector.load %arg5[%c0_6, %c0_7] : memref<72x104xf32, #tpu.memory_space<vmem>>, vector<72x104xf32>
    %cst_8 = arith.constant dense<0.000000e+00> : vector<2x104xf32>
    %9 = tpu.matmul %7, %8, %cst_8 {dimension_numbers = #tpu.dot_dimension_numbers<[1], [0], [0], [1], [0, 0, 1, 1], [], []>} : vector<2x72xf32>, vector<72x104xf32>, vector<2x104xf32> -> vector<2x104xf32>
    %c0_9 = arith.constant 0 : index
    %c0_10 = arith.constant 0 : index
    %10 = vector.load %arg6[%c0_9, %c0_10] : memref<1x104xf32, #tpu.memory_space<vmem>>, vector<1x104xf32>
    %11 = vector.broadcast %10 : vector<1x104xf32> to vector<2x104xf32>
    %12 = arith.addf %9, %11 : vector<2x104xf32>
    %c0_11 = arith.constant 0 : index
    %c0_12 = arith.constant 0 : index
    %13 = vector.load %arg7[%c0_11, %c0_12] : memref<104x104xf32, #tpu.memory_space<vmem>>, vector<104x104xf32>
    %cst_13 = arith.constant dense<0.000000e+00> : vector<2x104xf32>
    %14 = tpu.matmul %12, %13, %cst_13 {dimension_numbers = #tpu.dot_dimension_numbers<[1], [0], [0], [1], [0, 0, 1, 1], [], []>} : vector<2x104xf32>, vector<104x104xf32>, vector<2x104xf32> -> vector<2x104xf32>
    %c0_14 = arith.constant 0 : index
    %c0_15 = arith.constant 0 : index
    %15 = vector.load %arg8[%c0_14, %c0_15] : memref<1x104xf32, #tpu.memory_space<vmem>>, vector<1x104xf32>
    %16 = vector.broadcast %15 : vector<1x104xf32> to vector<2x104xf32>
    %17 = arith.addf %14, %16 : vector<2x104xf32>
    %c0_16 = arith.constant 0 : index
    %c0_17 = arith.constant 0 : index
    %18 = vector.load %arg9[%c0_16, %c0_17] : memref<104x104xf32, #tpu.memory_space<vmem>>, vector<104x104xf32>
    %cst_18 = arith.constant dense<0.000000e+00> : vector<2x104xf32>
    %19 = tpu.matmul %12, %18, %cst_18 {dimension_numbers = #tpu.dot_dimension_numbers<[1], [0], [0], [1], [0, 0, 1, 1], [], []>} : vector<2x104xf32>, vector<104x104xf32>, vector<2x104xf32> -> vector<2x104xf32>
    %c0_19 = arith.constant 0 : index
    %c0_20 = arith.constant 0 : index
    %20 = vector.load %arg10[%c0_19, %c0_20] : memref<1x104xf32, #tpu.memory_space<vmem>>, vector<1x104xf32>
    %21 = vector.broadcast %20 : vector<1x104xf32> to vector<2x104xf32>
    %22 = arith.addf %19, %21 : vector<2x104xf32>
    %cst_21 = arith.constant 5.000000e-01 : f32
    %23 = vector.broadcast %cst_21 : f32 to vector<2x104xf32>
    %24 = arith.mulf %23, %22 : vector<2x104xf32>
    %25 = math.exp %24 : vector<2x104xf32>
    %c0_22 = arith.constant 0 : index
    %c0_23 = arith.constant 0 : index
    %26 = vector.load %arg2[%c0_22, %c0_23] : memref<2x104xf32, #tpu.memory_space<vmem>>, vector<2x104xf32>
    %27 = arith.mulf %25, %26 : vector<2x104xf32>
    %28 = arith.addf %17, %27 : vector<2x104xf32>
    %cst_24 = arith.constant -5.000000e-01 : f32
    %29 = vector.broadcast %cst_24 : f32 to vector<2x104xf32>
    %30 = arith.mulf %29, %22 : vector<2x104xf32>
    %cst_25 = arith.constant 5.000000e-01 : f32
    %31 = vector.broadcast %cst_25 : f32 to vector<2x104xf32>
    %32 = arith.mulf %31, %26 : vector<2x104xf32>
    %33 = arith.mulf %32, %26 : vector<2x104xf32>
    %34 = arith.subf %30, %33 : vector<2x104xf32>
    %cst_26 = arith.constant 5.000000e-01 : f32
    %35 = vector.broadcast %cst_26 : f32 to vector<2x104xf32>
    %36 = arith.mulf %35, %28 : vector<2x104xf32>
    %37 = arith.mulf %36, %28 : vector<2x104xf32>
    %38 = arith.addf %34, %37 : vector<2x104xf32>
    %cst_27 = arith.constant dense<0.000000e+00> : vector<2xf32>
    %39 = vector.multi_reduction <add>, %38, %cst_27 [1] : vector<2x104xf32> to vector<2xf32>
    %40 = vector.shape_cast %39 : vector<2xf32> to vector<2x1xf32>
    %c0_28 = arith.constant 0 : index
    %c0_29 = arith.constant 0 : index
    %41 = vector.load %arg11[%c0_28, %c0_29] : memref<2x104xf32, #tpu.memory_space<vmem>>, vector<2x104xf32>
    tpu.vector_store %arg11[%c0_28, %c0_29], %12 {strides = array<i32>} : memref<2x104xf32, #tpu.memory_space<vmem>>, vector<2x104xf32>,
    %c0_30 = arith.constant 0 : index
    %c0_31 = arith.constant 0 : index
    %42 = vector.load %arg12[%c0_30, %c0_31] : memref<2x104xf32, #tpu.memory_space<vmem>>, vector<2x104xf32>
    tpu.vector_store %arg12[%c0_30, %c0_31], %28 {strides = array<i32>} : memref<2x104xf32, #tpu.memory_space<vmem>>, vector<2x104xf32>,
    %c0_32 = arith.constant 0 : index
    %c0_33 = arith.constant 0 : index
    %43 = vector.load %arg13[%c0_32, %c0_33] : memref<2x1xf32, #tpu.memory_space<vmem>>, vector<2x1xf32>
    tpu.vector_store %arg13[%c0_32, %c0_33], %40 {strides = array<i32>} : memref<2x1xf32, #tpu.memory_space<vmem>>, vector<2x1xf32>,
    return
  }
  func.func @transform_0(%arg0: i32) -> (i32, i32) {
    %c0_i32 = arith.constant 0 : i32
    %c0_i32_0 = arith.constant 0 : i32
    %c0_i32_1 = arith.constant 0 : i32
    return %c0_i32, %c0_i32_0 : i32, i32
  }
  func.func @transform_1(%arg0: i32) -> (i32, i32) {
    %c0_i32 = arith.constant 0 : i32
    %c0_i32_0 = arith.constant 0 : i32
    %c0_i32_1 = arith.constant 0 : i32
    return %c0_i32, %c0_i32_0 : i32, i32
  }
  func.func @transform_2(%arg0: i32) -> (i32, i32) {
    %c0_i32 = arith.constant 0 : i32
    %c0_i32_0 = arith.constant 0 : i32
    %c0_i32_1 = arith.constant 0 : i32
    return %c0_i32, %c0_i32_0 : i32, i32
  }
  func.func @transform_3(%arg0: i32) -> (i32, i32) {
    %c0_i32 = arith.constant 0 : i32
    %c0_i32_0 = arith.constant 0 : i32
    %c0_i32_1 = arith.constant 0 : i32
    return %c0_i32, %c0_i32_0 : i32, i32
  }
  func.func @transform_4(%arg0: i32) -> (i32, i32) {
    %c0_i32 = arith.constant 0 : i32
    %c0_i32_0 = arith.constant 0 : i32
    %c0_i32_1 = arith.constant 0 : i32
    return %c0_i32, %c0_i32_0 : i32, i32
  }
  func.func @transform_5(%arg0: i32) -> (i32, i32) {
    %c0_i32 = arith.constant 0 : i32
    %c0_i32_0 = arith.constant 0 : i32
    %c0_i32_1 = arith.constant 0 : i32
    return %c0_i32, %c0_i32_0 : i32, i32
  }
  func.func @transform_6(%arg0: i32) -> (i32, i32) {
    %c0_i32 = arith.constant 0 : i32
    %c0_i32_0 = arith.constant 0 : i32
    %c0_i32_1 = arith.constant 0 : i32
    return %c0_i32, %c0_i32_0 : i32, i32
  }
  func.func @transform_7(%arg0: i32) -> (i32, i32) {
    %c0_i32 = arith.constant 0 : i32
    %c0_i32_0 = arith.constant 0 : i32
    %c0_i32_1 = arith.constant 0 : i32
    return %c0_i32, %c0_i32_0 : i32, i32
  }
  func.func @transform_8(%arg0: i32) -> (i32, i32) {
    %c0_i32 = arith.constant 0 : i32
    %c0_i32_0 = arith.constant 0 : i32
    %c0_i32_1 = arith.constant 0 : i32
    return %c0_i32, %c0_i32_0 : i32, i32
  }
  func.func @transform_9(%arg0: i32) -> (i32, i32) {
    %c0_i32 = arith.constant 0 : i32
    %c0_i32_0 = arith.constant 0 : i32
    %c0_i32_1 = arith.constant 0 : i32
    return %c0_i32, %c0_i32_0 : i32, i32
  }
  func.func @transform_10(%arg0: i32) -> (i32, i32) {
    %c0_i32 = arith.constant 0 : i32
    %c0_i32_0 = arith.constant 0 : i32
    %c0_i32_1 = arith.constant 0 : i32
    return %c0_i32, %c0_i32_0 : i32, i32
  }
  func.func @transform_11(%arg0: i32) -> (i32, i32) {
    %c0_i32 = arith.constant 0 : i32
    %c0_i32_0 = arith.constant 0 : i32
    %c0_i32_1 = arith.constant 0 : i32
    return %c0_i32, %c0_i32_0 : i32, i32
  }
  func.func @transform_12(%arg0: i32) -> (i32, i32) {
    %c0_i32 = arith.constant 0 : i32
    %c0_i32_0 = arith.constant 0 : i32
    %c0_i32_1 = arith.constant 0 : i32
    return %c0_i32, %c0_i32_0 : i32, i32
  }
}

module attributes {stable_mosaic.version = 11 : i64} {
  func.func @_decoder_recon_kernel(%arg0: i32, %arg1: memref<4x104xf32, #tpu.memory_space<vmem>>, %arg2: memref<2x192xf32, #tpu.memory_space<vmem>>, %arg3: memref<1x1xf32, #tpu.memory_space<smem>>, %arg4: memref<104x512xf32, #tpu.memory_space<vmem>>, %arg5: memref<1x512xf32, #tpu.memory_space<vmem>>, %arg6: memref<512x1024xf32, #tpu.memory_space<vmem>>, %arg7: memref<1x1024xf32, #tpu.memory_space<vmem>>, %arg8: memref<1024x192xf32, #tpu.memory_space<vmem>>, %arg9: memref<1x192xf32, #tpu.memory_space<vmem>>, %arg10: memref<2x192xf32, #tpu.memory_space<vmem>>, %arg11: memref<2x1xf32, #tpu.memory_space<vmem>>, %arg12: memref<4x1024xf32, #tpu.memory_space<vmem>>) attributes {dimension_semantics = [#tpu.dimension_semantics<arbitrary>], iteration_bounds = array<i64: 1>, scalar_prefetch = 0 : i64, scratch_operands = 1 : i64, tpu.core_type = #tpu.core_type<tc>, window_params = [{pipeline_mode = #tpu.pipeline_mode<synchronous>, transform_indices = @transform_0, window_bounds = array<i64: 4, 104>}, {transform_indices = @transform_1, window_bounds = array<i64: 2, 192>}, {transform_indices = @transform_2, window_bounds = array<i64: 1, 1>}, {pipeline_mode = #tpu.pipeline_mode<synchronous>, transform_indices = @transform_3, window_bounds = array<i64: 104, 512>}, {pipeline_mode = #tpu.pipeline_mode<synchronous>, transform_indices = @transform_4, window_bounds = array<i64: 1, 512>}, {pipeline_mode = #tpu.pipeline_mode<synchronous>, transform_indices = @transform_5, window_bounds = array<i64: 512, 1024>}, {pipeline_mode = #tpu.pipeline_mode<synchronous>, transform_indices = @transform_6, window_bounds = array<i64: 1, 1024>}, {transform_indices = @transform_7, window_bounds = array<i64: 1024, 192>}, {transform_indices = @transform_8, window_bounds = array<i64: 1, 192>}, {transform_indices = @transform_9, window_bounds = array<i64: 2, 192>}, {pipeline_mode = #tpu.pipeline_mode<synchronous>, transform_indices = @transform_10, window_bounds = array<i64: 2, 1>}]} {
    %c0_i32 = arith.constant 0 : i32
    %0 = arith.cmpi eq, %arg0, %c0_i32 : i32
    %1 = arith.extui %0 : i1 to i32
    %c0_i32_0 = arith.constant 0 : i32
    %2 = arith.cmpi ne, %1, %c0_i32_0 : i32
    scf.if %2 {
      %c0_22 = arith.constant 0 : index
      %c0_23 = arith.constant 0 : index
      %33 = vector.load %arg1[%c0_22, %c0_23] : memref<4x104xf32, #tpu.memory_space<vmem>>, vector<4x104xf32>
      %c0_24 = arith.constant 0 : index
      %c0_25 = arith.constant 0 : index
      %34 = vector.load %arg4[%c0_24, %c0_25] : memref<104x512xf32, #tpu.memory_space<vmem>>, vector<104x512xf32>
      %cst_26 = arith.constant dense<0.000000e+00> : vector<4x512xf32>
      %35 = tpu.matmul %33, %34, %cst_26 {dimension_numbers = #tpu.dot_dimension_numbers<[1], [0], [0], [1], [0, 0, 1, 1], [], []>} : vector<4x104xf32>, vector<104x512xf32>, vector<4x512xf32> -> vector<4x512xf32>
      %c0_27 = arith.constant 0 : index
      %c0_28 = arith.constant 0 : index
      %36 = vector.load %arg5[%c0_27, %c0_28] : memref<1x512xf32, #tpu.memory_space<vmem>>, vector<1x512xf32>
      %37 = vector.broadcast %36 : vector<1x512xf32> to vector<4x512xf32>
      %38 = arith.addf %35, %37 : vector<4x512xf32>
      %cst_29 = arith.constant 0.000000e+00 : f32
      %39 = vector.broadcast %cst_29 : f32 to vector<4x512xf32>
      %40 = arith.maximumf %38, %39 : vector<4x512xf32>
      %c0_30 = arith.constant 0 : index
      %c0_31 = arith.constant 0 : index
      %41 = vector.load %arg6[%c0_30, %c0_31] : memref<512x1024xf32, #tpu.memory_space<vmem>>, vector<512x1024xf32>
      %cst_32 = arith.constant dense<0.000000e+00> : vector<4x1024xf32>
      %42 = tpu.matmul %40, %41, %cst_32 {dimension_numbers = #tpu.dot_dimension_numbers<[1], [0], [0], [1], [0, 0, 1, 1], [], []>} : vector<4x512xf32>, vector<512x1024xf32>, vector<4x1024xf32> -> vector<4x1024xf32>
      %c0_33 = arith.constant 0 : index
      %c0_34 = arith.constant 0 : index
      %43 = vector.load %arg7[%c0_33, %c0_34] : memref<1x1024xf32, #tpu.memory_space<vmem>>, vector<1x1024xf32>
      %44 = vector.broadcast %43 : vector<1x1024xf32> to vector<4x1024xf32>
      %45 = arith.addf %42, %44 : vector<4x1024xf32>
      %cst_35 = arith.constant 0.000000e+00 : f32
      %46 = vector.broadcast %cst_35 : f32 to vector<4x1024xf32>
      %47 = arith.maximumf %45, %46 : vector<4x1024xf32>
      %c0_36 = arith.constant 0 : index
      %c0_37 = arith.constant 0 : index
      %48 = vector.load %arg12[%c0_36, %c0_37] : memref<4x1024xf32, #tpu.memory_space<vmem>>, vector<4x1024xf32>
      tpu.vector_store %arg12[%c0_36, %c0_37], %47 {strides = array<i32>} : memref<4x1024xf32, #tpu.memory_space<vmem>>, vector<4x1024xf32>,
      %cst_38 = arith.constant 0.000000e+00 : f32
      %49 = vector.broadcast %cst_38 : f32 to vector<2x1xf32>
      %c0_39 = arith.constant 0 : index
      %c0_40 = arith.constant 0 : index
      %50 = vector.load %arg11[%c0_39, %c0_40] : memref<2x1xf32, #tpu.memory_space<vmem>>, vector<2x1xf32>
      tpu.vector_store %arg11[%c0_39, %c0_40], %49 {strides = array<i32>} : memref<2x1xf32, #tpu.memory_space<vmem>>, vector<2x1xf32>,
    } else {
    }
    %c0 = arith.constant 0 : index
    %c0_1 = arith.constant 0 : index
    %3 = vector.load %arg12[%c0, %c0_1] : memref<4x1024xf32, #tpu.memory_space<vmem>>, vector<4x1024xf32>
    %c0_2 = arith.constant 0 : index
    %c0_3 = arith.constant 0 : index
    %4 = vector.load %arg8[%c0_2, %c0_3] : memref<1024x192xf32, #tpu.memory_space<vmem>>, vector<1024x192xf32>
    %cst = arith.constant dense<0.000000e+00> : vector<4x192xf32>
    %5 = tpu.matmul %3, %4, %cst {dimension_numbers = #tpu.dot_dimension_numbers<[1], [0], [0], [1], [0, 0, 1, 1], [], []>} : vector<4x1024xf32>, vector<1024x192xf32>, vector<4x192xf32> -> vector<4x192xf32>
    %c0_4 = arith.constant 0 : index
    %c0_5 = arith.constant 0 : index
    %6 = vector.load %arg9[%c0_4, %c0_5] : memref<1x192xf32, #tpu.memory_space<vmem>>, vector<1x192xf32>
    %7 = vector.broadcast %6 : vector<1x192xf32> to vector<4x192xf32>
    %8 = arith.addf %5, %7 : vector<4x192xf32>
    %9 = math.tanh %8 : vector<4x192xf32>
    %10 = vector.extract_strided_slice %9 {offsets = [2, 0], sizes = [2, 192], strides = [1, 1]} : vector<4x192xf32> to vector<2x192xf32>
    %c0_6 = arith.constant 0 : index
    %c0_7 = arith.constant 0 : index
    %11 = vector.load %arg10[%c0_6, %c0_7] : memref<2x192xf32, #tpu.memory_space<vmem>>, vector<2x192xf32>
    tpu.vector_store %arg10[%c0_6, %c0_7], %10 {strides = array<i32>} : memref<2x192xf32, #tpu.memory_space<vmem>>, vector<2x192xf32>,
    %c0_8 = arith.constant 0 : index
    %c0_9 = arith.constant 0 : index
    %12 = memref.load %arg3[%c0_8, %c0_9] : memref<1x1xf32, #tpu.memory_space<smem>>
    %c0_10 = arith.constant 0 : index
    %c0_11 = arith.constant 0 : index
    %13 = vector.load %arg2[%c0_10, %c0_11] : memref<2x192xf32, #tpu.memory_space<vmem>>, vector<2x192xf32>
    %14 = vector.extract_strided_slice %9 {offsets = [0, 0], sizes = [2, 192], strides = [1, 1]} : vector<4x192xf32> to vector<2x192xf32>
    %15 = arith.subf %13, %14 : vector<2x192xf32>
    %cst_12 = arith.constant 0.000000e+00 : f32
    %16 = arith.subf %cst_12, %12 : f32
    %17 = math.exp %16 : f32
    %18 = vector.broadcast %17 : f32 to vector<2x192xf32>
    %19 = arith.mulf %15, %18 : vector<2x192xf32>
    %cst_13 = arith.constant 0.000000e+00 : f32
    %20 = arith.subf %cst_13, %12 : f32
    %cst_14 = arith.constant 5.000000e-01 : f32
    %cst_15 = arith.constant 1.83787704 : f32
    %21 = arith.mulf %cst_14, %cst_15 : f32
    %22 = arith.subf %20, %21 : f32
    %cst_16 = arith.constant 5.000000e-01 : f32
    %23 = vector.broadcast %cst_16 : f32 to vector<2x192xf32>
    %24 = arith.mulf %23, %19 : vector<2x192xf32>
    %25 = arith.mulf %24, %19 : vector<2x192xf32>
    %26 = vector.broadcast %22 : f32 to vector<2x192xf32>
    %27 = arith.subf %26, %25 : vector<2x192xf32>
    %c0_17 = arith.constant 0 : index
    %c0_18 = arith.constant 0 : index
    %28 = vector.load %arg11[%c0_17, %c0_18] : memref<2x1xf32, #tpu.memory_space<vmem>>, vector<2x1xf32>
    %cst_19 = arith.constant dense<0.000000e+00> : vector<2xf32>
    %29 = vector.multi_reduction <add>, %27, %cst_19 [1] : vector<2x192xf32> to vector<2xf32>
    %30 = vector.shape_cast %29 : vector<2xf32> to vector<2x1xf32>
    %31 = arith.addf %28, %30 : vector<2x1xf32>
    %c0_20 = arith.constant 0 : index
    %c0_21 = arith.constant 0 : index
    %32 = vector.load %arg11[%c0_20, %c0_21] : memref<2x1xf32, #tpu.memory_space<vmem>>, vector<2x1xf32>
    tpu.vector_store %arg11[%c0_20, %c0_21], %31 {strides = array<i32>} : memref<2x1xf32, #tpu.memory_space<vmem>>, vector<2x1xf32>,
    return
  }
  func.func @transform_0(%arg0: i32) -> (i32, i32) {
    %c0_i32 = arith.constant 0 : i32
    %c0_i32_0 = arith.constant 0 : i32
    %c0_i32_1 = arith.constant 0 : i32
    return %c0_i32, %c0_i32_0 : i32, i32
  }
  func.func @transform_1(%arg0: i32) -> (i32, i32) {
    %c0_i32 = arith.constant 0 : i32
    %c0_i32_0 = arith.constant 0 : i32
    return %c0_i32, %arg0 : i32, i32
  }
  func.func @transform_2(%arg0: i32) -> (i32, i32) {
    %c0_i32 = arith.constant 0 : i32
    %c0_i32_0 = arith.constant 0 : i32
    %c0_i32_1 = arith.constant 0 : i32
    return %c0_i32, %c0_i32_0 : i32, i32
  }
  func.func @transform_3(%arg0: i32) -> (i32, i32) {
    %c0_i32 = arith.constant 0 : i32
    %c0_i32_0 = arith.constant 0 : i32
    %c0_i32_1 = arith.constant 0 : i32
    return %c0_i32, %c0_i32_0 : i32, i32
  }
  func.func @transform_4(%arg0: i32) -> (i32, i32) {
    %c0_i32 = arith.constant 0 : i32
    %c0_i32_0 = arith.constant 0 : i32
    %c0_i32_1 = arith.constant 0 : i32
    return %c0_i32, %c0_i32_0 : i32, i32
  }
  func.func @transform_5(%arg0: i32) -> (i32, i32) {
    %c0_i32 = arith.constant 0 : i32
    %c0_i32_0 = arith.constant 0 : i32
    %c0_i32_1 = arith.constant 0 : i32
    return %c0_i32, %c0_i32_0 : i32, i32
  }
  func.func @transform_6(%arg0: i32) -> (i32, i32) {
    %c0_i32 = arith.constant 0 : i32
    %c0_i32_0 = arith.constant 0 : i32
    %c0_i32_1 = arith.constant 0 : i32
    return %c0_i32, %c0_i32_0 : i32, i32
  }
  func.func @transform_7(%arg0: i32) -> (i32, i32) {
    %c0_i32 = arith.constant 0 : i32
    %c0_i32_0 = arith.constant 0 : i32
    return %c0_i32, %arg0 : i32, i32
  }
  func.func @transform_8(%arg0: i32) -> (i32, i32) {
    %c0_i32 = arith.constant 0 : i32
    %c0_i32_0 = arith.constant 0 : i32
    return %c0_i32, %arg0 : i32, i32
  }
  func.func @transform_9(%arg0: i32) -> (i32, i32) {
    %c0_i32 = arith.constant 0 : i32
    %c0_i32_0 = arith.constant 0 : i32
    return %c0_i32, %arg0 : i32, i32
  }
  func.func @transform_10(%arg0: i32) -> (i32, i32) {
    %c0_i32 = arith.constant 0 : i32
    %c0_i32_0 = arith.constant 0 : i32
    %c0_i32_1 = arith.constant 0 : i32
    return %c0_i32, %c0_i32_0 : i32, i32
  }
}

</mosaic_0001>

<bundles_post_ra>
// kernel: pointnet_autoencoder_forward.7
= control target key start
LH: loop header
LB: loop body
LE: loop exit
PB: predicated region body
PF: predicated region fallthrough
CT: control target
= control target key end

     0   :  { %s1876_s24 = smov 0   ;;  %s1878_s25 = smov 0   ;;  %s2663_s0 = inlined_call_operand.vmem [shape: f32[2,64,3], index: 0, kind: input, shape index: {}]   ;;  %s2664_s1 = inlined_call_operand.vmem [shape: f32[2,3,64], index: 1, kind: input, shape index: {}]   ;;  %s2665_s2 = inlined_call_operand.vmem [shape: f32[1,64], index: 2, kind: input, shape index: {}]   ;;  %s2666_s3 = inlined_call_operand.vmem [shape: f32[64,128], index: 3, kind: input, shape index: {}]   ;;  %s2667_s4 = inlined_call_operand.vmem [shape: f32[1,128], index: 4, kind: input, shape index: {}]   ;;  %s2668_s5 = inlined_call_operand.vmem [shape: f32[128,1024], index: 5, kind: input, shape index: {}]   ;;  %s2669_s6 = inlined_call_operand.vmem [shape: f32[1,1024], index: 6, kind: input, shape index: {}]   ;;  %s2670_s7 = inlined_call_operand.vmem [shape: f32[2,1,1024], index: 7, kind: output, shape index: {}]  }
   0x1   :  { %s1880_s26 = smov 0  }
   0x2 LB: > { %s29_s27 = sadd.s32 1, %s1825_s25  ;;  %p1538_p0 = scmp.ge.s32.totalorder %s1829_s26, 1  ;;  %s1829_s26 = sphi %s1880_s26, %s17_s26   ;;  %s1825_s25 = sphi %s1878_s25, %s2672_s25   ;;  %s1821_s24 = sphi %s1876_s24, %s2671_s24  }
   0x3   : > { %p31_p1 = scmp.ge.s32.totalorder %s29_s27, 2  ;;  %p265_p2 = scmp.lt.s32.totalorder %s1829_s26, 3 }
   0x5   : > { %s2674_s27 = smov (%p31_p1, %s29_s27), 0  ;;  %p266_p3 = pnand %p1538_p0, %p265_p2 }
   0x6   : > { %p305_p4 = scmp.lt.s32.totalorder (!%p266_p3), %s1821_s24, 1  ;;  %v1831_v0 = vmov (!%p266_p3), 1   ;;  %v1832_v1 = vmov (!%p266_p3), 0   ;;  %v510_v4 = vld [vmem:[%s2666_s3] sm:$0xff] (!%p266_p3)  ;;  %v511_v5 = vld [vmem:[%s2666_s3 + $0x8] sm:$0xff] (!%p266_p3)  ;;  %v512_v8 = vld [vmem:[%s2666_s3 + $0x10] sm:$0xff] (!%p266_p3) }
   0x7   : > { %269 = sbr.rel (%p266_p3) target bundleno = 723 (0x2d3), region = 48  ;;  %1790 = vset.pattern.permute.xlu0 (!%p266_p3), %v1831_v0  ;;  %1792 = vset.pattern.permute.xlu1 (!%p266_p3), %v1832_v1  ;;  %v1600_v6 = vpack.c.bf16 (!%p266_p3), %v511_v5, %v510_v4  ;;  %v513_v9 = vld [vmem:[%s2666_s3 + $0x18] sm:$0xff] (!%p266_p3)  ;;  %v1833_v11 = vmov (!%p266_p3), 2   ;;  %v514_v12 = vld [vmem:[%s2666_s3 + $0x20] sm:$0xff] (!%p266_p3)  ;;  %v515_v13 = vld [vmem:[%s2666_s3 + $0x28] sm:$0xff] (!%p266_p3)  ;;  %v371_v4 = vlaneseq (!%p266_p3)  ;;  %vm525_vm0 = vcmask (!%p266_p3), 523264  }
   0x8   : > { %v1604_v10 = vpack.c.bf16 (!%p266_p3), %v513_v9, %v512_v8  ;;  %v1608_v15 = vpack.c.bf16 (!%p266_p3), %v515_v13, %v514_v12  ;;  %v516_v16 = vld [vmem:[%s2666_s3 + $0x30] sm:$0xff] (!%p266_p3)  ;;  %v517_v17 = vld [vmem:[%s2666_s3 + $0x38] sm:$0xff] (!%p266_p3)  ;;  %v664_v23 = vld [vmem:[%s2668_s5 + $0x8] sm:$0xff] (!%p266_p3) }
   0x9   : > { %1601 = vmatprep.subr.bf16.mxu0 (!%p266_p3), %v1600_v6  ;;  %v1612_v18 = vpack.c.bf16 (!%p266_p3), %v517_v17, %v516_v16  ;;  %v672_v24 = vld [vmem:[%s2668_s5 + $0x48] sm:$0xff] (!%p266_p3)  ;;  %v666_v25 = vld [vmem:[%s2668_s5 + $0x18] sm:$0xff] (!%p266_p3)  ;;  %v663_v28 = vld [vmem:[%s2668_s5] sm:$0xff] (!%p266_p3)  ;;  %v2036_v5 = vshrl.u32 (!%p266_p3), %v371_v4, 7 }
   0xa   : > { %1603 = vmatpush3.bf16.msra.mxu0 (!%p266_p3), %v1600_v6  ;;  %v1616_v26 = vpack.c.bf16 (!%p266_p3), %v672_v24, %v664_v23  ;;  %v674_v27 = vld [vmem:[%s2668_s5 + $0x58] sm:$0xff] (!%p266_p3)  ;;  %v671_v29 = vld [vmem:[%s2668_s5 + $0x40] sm:$0xff] (!%p266_p3)  ;;  %v680_v32 = vld [vmem:[%s2668_s5 + $0x88] sm:$0xff] (!%p266_p3) }
   0xb   : > { %1605 = vmatprep.subr.bf16.mxu0 (!%p266_p3), %v1604_v10  ;;  %v1648_v30 = vpack.c.bf16 (!%p266_p3), %v674_v27, %v666_v25  ;;  %v1618_v31 = vpack.c.bf16 (!%p266_p3), %v671_v29, %v663_v28  ;;  %v688_v33 = vld [vmem:[%s2668_s5 + $0xc8] sm:$0xff] (!%p266_p3)  ;;  %v679_v35 = vld [vmem:[%s2668_s5 + $0x80] sm:$0xff] (!%p266_p3)  ;;  %v417_v6 = vsub.s32 (!%p266_p3), 1, %v2036_v5  ;;  %v469_v12 = vsub.s32 (!%p266_p3), 2, %v2036_v5 }
   0xc   : > { %1617 = vmatprep.subr.bf16.mxu1 (!%p266_p3), %v1616_v26  ;;  %v1620_v34 = vpack.c.bf16 (!%p266_p3), %v688_v33, %v680_v32  ;;  %v687_v36 = vld [vmem:[%s2668_s5 + $0xc0] sm:$0xff] (!%p266_p3)  ;;  %v696_v38 = vld [vmem:[%s2668_s5 + $0x108] sm:$0xff] (!%p266_p3) }
   0xd   : > { %1619 = vmatpush1.bf16.msra.mxu1 (!%p266_p3), %v1618_v31  ;;  %v1622_v37 = vpack.c.bf16 (!%p266_p3), %v687_v36, %v679_v35  ;;  %v704_v39 = vld [vmem:[%s2668_s5 + $0x148] sm:$0xff] (!%p266_p3)  ;;  %v695_v41 = vld [vmem:[%s2668_s5 + $0x100] sm:$0xff] (!%p266_p3)  ;;  %v673_v35 = vld [vmem:[%s2668_s5 + $0x50] sm:$0xff] (!%p266_p3) }
   0xe   : > { %s2676_s24 = smov (!%p305_p4, %s1821_s24), 1  ;;  %1607 = vmatpush3.bf16.msra.mxu0 %v1604_v10  ;;  %1621 = vmatprep.subr.bf16.mxu1 %v1620_v34  ;;  %v1624_v40 = vpack.c.bf16 %v704_v39, %v696_v38  ;;  %v703_v42 = vld [vmem:[%s2668_s5 + $0x140] sm:$0xff]  ;;  %v712_v44 = vld [vmem:[%s2668_s5 + $0x188] sm:$0xff]  ;;  %v665_v34 = vld [vmem:[%s2668_s5 + $0x10] sm:$0xff] }
   0xf   : > { %s1555_s28 = sshll.u32 %s2676_s24, 6  ;;  %1609 = vmatprep.subr.bf16.mxu0 %v1608_v15  ;;  %v1626_v43 = vpack.c.bf16 %v703_v42, %v695_v41  ;;  %v720_v45 = vld [vmem:[%s2668_s5 + $0x1c8] sm:$0xff]  ;;  %v711_v47 = vld [vmem:[%s2668_s5 + $0x180] sm:$0xff]  ;;  %s1541_s10 = sshll.u32 %s2676_s24, 2  ;;  %v682_v36 = vld [vmem:[%s2668_s5 + $0x98] sm:$0xff] }
  0x10   : > { %s1902_s8 = scalar_lea.vmem %s2663_s0, %s1555_s28  ;;  %v1628_v46 = vpack.c.bf16 %v720_v45, %v712_v44  ;;  %v719_v48 = vld [vmem:[%s2668_s5 + $0x1c0] sm:$0xff]  ;;  %v728_v49 = vld [vmem:[%s2668_s5 + $0x208] sm:$0xff]  ;;  %v689_v44 = vld [vmem:[%s2668_s5 + $0xd0] sm:$0xff]  ;;  %s1542_s29 = sshll.u32 %s2676_s24, 3 }
  0x11   : > { %v323_v2 = vld [vmem:[%s1902_s8 + $0x8] sm:$0xff]  ;;  %v322_v3 = vld [vmem:[%s1902_s8] sm:$0xff]  ;;  %v325_v7 = vld [vmem:[%s1902_s8 + $0x18] sm:$0xff]  ;;  %1623 = vmatpush1.bf16.msra.mxu1 %v1622_v37  ;;  %v1630_v51 = vpack.c.bf16 %v719_v48, %v711_v47 }
  0x12   : > { %338 = vperm.xlu1 %1792, %v323_v2   ;;  %384 = vperm.xlu0 %1790, %v322_v3   ;;  %v324_v14 = vld [vmem:[%s1902_s8 + $0x10] sm:$0xff]  ;;  %v327_v19 = vld [vmem:[%s1902_s8 + $0x28] sm:$0xff]  ;;  %v329_v20 = vld [vmem:[%s1902_s8 + $0x38] sm:$0xff] }
  0x13   : > { %1611 = vmatpush3.bf16.msra.mxu0 %v1608_v15  ;;  %v326_v21 = vld [vmem:[%s1902_s8 + $0x20] sm:$0xff]  ;;  %v328_v22 = vld [vmem:[%s1902_s8 + $0x30] sm:$0xff]  ;;  %1625 = vmatprep.subr.bf16.mxu1 %v1624_v40  ;;  %v736_v50 = vld [vmem:[%s2668_s5 + $0x248] sm:$0xff]  ;;  %s317_s8 = scalar_lea.vmem %s2664_s1, %s1541_s10  ;;  %v1650_v40 = vpack.c.bf16 %v673_v35, %v665_v34  ;;  %s321_s10 = scalar_lea.vmem %s2670_s7, %s1542_s29 }
  0x14   : > { %1613 = vmatprep.subr.bf16.mxu0 %v1612_v18  ;;  %v1632_v52 = vpack.c.bf16 %v736_v50, %v728_v49  ;;  %v727_v53 = vld [vmem:[%s2668_s5 + $0x200] sm:$0xff]  ;;  %v744_v55 = vld [vmem:[%s2668_s5 + $0x288] sm:$0xff]  ;;  %v690_v37 = vld [vmem:[%s2668_s5 + $0xd8] sm:$0xff] }
  0x15   : > { %1627 = vmatpush1.bf16.msra.mxu1 %v1626_v43  ;;  %v735_v54 = vld [vmem:[%s2668_s5 + $0x240] sm:$0xff]  ;;  %v752_v56 = vld [vmem:[%s2668_s5 + $0x2c8] sm:$0xff]  ;;  %v1652_v42 = vpack.c.bf16 %v690_v37, %v682_v36  ;;  %v681_v43 = vld [vmem:[%s2668_s5 + $0x90] sm:$0xff] }
  0x16   : > { %1793 = vset.pattern.permute.xlu1 %v1831_v0  ;;  %1791 = vset.pattern.permute.xlu0 %v1832_v1  ;;  %v1634_v57 = vpack.c.bf16 %v735_v54, %v727_v53  ;;  %v1636_v58 = vpack.c.bf16 %v752_v56, %v744_v55  ;;  %v743_v59 = vld [vmem:[%s2668_s5 + $0x280] sm:$0xff]  ;;  %v760_v61 = vld [vmem:[%s2668_s5 + $0x308] sm:$0xff]  ;;  %v706_v47 = vld [vmem:[%s2668_s5 + $0x158] sm:$0xff]  ;;  %v1654_v50 = vpack.c.bf16 %v689_v44, %v681_v43 }
  0x17   : > { %388 = vperm.xlu1 %1793, %v323_v2   ;;  %333 = vperm.xlu0 %1791, %v322_v3   ;;  %v751_v60 = vld [vmem:[%s2668_s5 + $0x2c0] sm:$0xff]  ;;  %v768_v62 = vld [vmem:[%s2668_s5 + $0x348] sm:$0xff]  ;;  %v697_v54 = vld [vmem:[%s2668_s5 + $0x110] sm:$0xff] }
  0x18   : > { %1615 = vmatpush3.bf16.msra.mxu0 %v1612_v18  ;;  %1629 = vmatprep.subr.bf16.mxu1 %v1628_v46  ;;  %v1638_v63 = vpack.c.bf16 %v751_v60, %v743_v59  ;;  %v330_v10 = vld [vmem:[%s317_s8] sm:$0x7]  ;;  %v698_v46 = vld [vmem:[%s2668_s5 + $0x118] sm:$0xff]  ;;  %v705_v55 = vld [vmem:[%s2668_s5 + $0x150] sm:$0xff] }
  0x19   : > { %1649 = vmatprep.subr.bf16.mxu0 %v1648_v30  ;;  %1631 = vmatpush1.bf16.msra.mxu1 %v1630_v51  ;;  %v2056_v18 = vrot.slane %v330_v10, %v469_v12  ;;  %v2063_v24 = vld [vmem:[%s2665_s2] ss:$0 sm:$0xff]  ;;  %v1656_v53 = vpack.c.bf16 %v706_v47, %v698_v46 }
  0x1a   : > { %1633 = vmatprep.subr.bf16.mxu1 %v1632_v52 }
  0x1b   : > { %1794 = vset.pattern.permute.xlu1 %v1833_v11  ;;  %348 = vperm.xlu0 %1791, %v325_v7  }
  0x1c   : > { %436 = vperm.xlu1 %1794, %v322_v3  }
  0x1d   : > { %1635 = vmatpush1.bf16.msra.mxu1 %v1634_v57  ;;  %v714_v57 = vld [vmem:[%s2668_s5 + $0x198] sm:$0xff] }
  0x1e   : > { %1637 = vmatprep.subr.bf16.mxu1 %v1636_v58  ;;  %v722_v58 = vld [vmem:[%s2668_s5 + $0x1d8] sm:$0xff] }
  0x1f   : > { %1797 = vset.pattern.permute.xlu0 %v1833_v11 }
  0x20   : > { %1795 = vset.pattern.permute.xlu1 %v1832_v1  ;;  %440 = vperm.xlu0 %1797, %v323_v2   ;;  %v767_v2 = vld [vmem:[%s2668_s5 + $0x340] sm:$0xff] }
  0x21   : > { %343 = vperm.xlu1 %1795, %v324_v14   ;;  %1639 = vmatpush1.bf16.msra.mxu1 %v1638_v63 }
  0x24   : > { %448 = vperm.xlu0 %1797, %v325_v7  }
  0x25   : > { %1796 = vset.pattern.permute.xlu1 %v1831_v0 }
  0x26   : > { %392 = vperm.xlu1 %1796, %v324_v14  }
  0x28   : > { %456 = vperm.xlu0 %1797, %v327_v19  }
  0x2a   : > { %396 = vperm.xlu1 %1796, %v325_v7   ;;  %v373_v7 = vsub.s32 0, %v2036_v5 }
  0x2c   : > { %1802 = vset.pattern.permute.xlu0 %v1832_v1  ;;  %v2050_v13 = vrot.slane %v330_v10, %v373_v7 }
  0x2d   : > { %358 = vperm.xlu0 %1802, %v327_v19  }
  0x2e   : > { %1798 = vset.pattern.permute.xlu1 %v1833_v11 }
  0x2f   : > { %444 = vperm.xlu1 %1798, %v324_v14  }
  0x31   : > { %368 = vperm.xlu0 %1802, %v329_v20  }
  0x33   : > { %1799 = vset.pattern.permute.xlu1 %v1832_v1 }
  0x34   : > { %353 = vperm.xlu1 %1799, %v326_v21  }
  0x35   : > { %1806 = vset.pattern.permute.xlu0 %v1833_v11 }
  0x36   : > { %464 = vperm.xlu0 %1806, %v329_v20  }
  0x38   : > { %1800 = vset.pattern.permute.xlu1 %v1831_v0 }
  0x39   : > { %400 = vperm.xlu1 %1800, %v326_v21  }
  0x3d   : > { %404 = vperm.xlu1 %1800, %v327_v19  }
  0x41   : > { %1801 = vset.pattern.permute.xlu1 %v1833_v11 }
  0x42   : > { %452 = vperm.xlu1 %1801, %v326_v21  }
  0x46   : > { %1803 = vset.pattern.permute.xlu1 %v1832_v1  ;;  %v759_v1 = vld [vmem:[%s2668_s5 + $0x300] sm:$0xff] }
  0x47   : > { %363 = vperm.xlu1 %1803, %v328_v22   ;;  %v1642_v3 = vpack.c.bf16 %v767_v2, %v759_v1  ;;  %v713_v1 = vld [vmem:[%s2668_s5 + $0x190] sm:$0xff] }
  0x48   : > { %v721_v2 = vld [vmem:[%s2668_s5 + $0x1d0] sm:$0xff] }
  0x4b   : > { %1804 = vset.pattern.permute.xlu1 %v1831_v0  ;;  %v1640_v0 = vpack.c.bf16 %v768_v62, %v760_v61  ;;  %v1658_v61 = vpack.c.bf16 %v705_v55, %v697_v54 }
  0x4c   : > { %408 = vperm.xlu1 %1804, %v328_v22  }
  0x4d   : > { %1641 = vmatprep.subr.bf16.mxu1 %v1640_v0  ;;  %v1660_v0 = vpack.c.bf16 %v722_v58, %v714_v57 }
  0x4e   : > { %1643 = vmatpush1.bf16.msra.mxu1 %v1642_v3 }
  0x50   : > { %412 = vperm.xlu1 %1804, %v329_v20  }
  0x54   : > { %1805 = vset.pattern.permute.xlu1 %v1833_v11  ;;  %v2045_v11 = vrot.slane %v330_v10, %v417_v6 }
  0x55   : > { %460 = vperm.xlu1 %1805, %v328_v22  }
  0x91   : > { %v339_v8 = vpop.permute.xlu1 %338  ;;  %v385_v9 = vpop.permute.xlu0 %384 }
  0x92   : > { %v419_v14 = vmul.f32 %v2045_v11, %v385_v9  ;;  %v376_v25 = vmul.f32 %v2050_v13, %v339_v8  ;;  %v730_v8 = vld [vmem:[%s2668_s5 + $0x218] sm:$0xff] }
  0x93   : > { %v738_v9 = vld [vmem:[%s2668_s5 + $0x258] sm:$0xff] }
  0x96   : > { %v389_v15 = vpop.permute.xlu1 %388  ;;  %v334_v16 = vpop.permute.xlu0 %333 }
  0x97   : > { %v375_v17 = vmul.f32 %v2050_v13, %v334_v16  ;;  %v420_v22 = vmul.f32 %v2045_v11, %v389_v15 }
  0x99   : > { %v427_v19 = vadd.f32 %v419_v14, %v375_v17  ;;  %v428_v28 = vadd.f32 %v420_v22, %v376_v25  ;;  %v1662_v14 = vpack.c.bf16 %v721_v2, %v713_v1  ;;  %v1664_v17 = vpack.c.bf16 %v738_v9, %v730_v8  ;;  %v754_v25 = vld [vmem:[%s2668_s5 + $0x2d8] sm:$0xff] }
  0x9a   : > { %v349_v20 = vpop.permute.xlu0 %348 }
  0x9b   : > { %v437_v21 = vpop.permute.xlu1 %436  ;;  %v378_v48 = vmul.f32 %v2050_v13, %v349_v20  ;;  %v737_v20 = vld [vmem:[%s2668_s5 + $0x250] sm:$0xff] }
  0x9c   : > { %v471_v23 = vmul.f32 %v2056_v18, %v437_v21 }
  0x9e   : > { %v479_v26 = vadd.f32 %v471_v23, %v427_v19  ;;  %v729_v19 = vld [vmem:[%s2668_s5 + $0x210] sm:$0xff]  ;;  %v746_v23 = vld [vmem:[%s2668_s5 + $0x298] sm:$0xff] }
  0x9f   : > { %v441_v27 = vpop.permute.xlu0 %440 }
  0xa0   : > { %v472_v29 = vmul.f32 %v2056_v18, %v441_v27  ;;  %v344_v30 = vpop.permute.xlu1 %343  ;;  %v494_v31 = vadd.f32 %v2063_v24, %v479_v26  ;;  %v1666_v27 = vpack.c.bf16 %v737_v20, %v729_v19 }
  0xa1   : > { %v377_v60 = vmul.f32 %v2050_v13, %v344_v30  ;;  %v745_v30 = vld [vmem:[%s2668_s5 + $0x290] sm:$0xff] }
  0xa2   : > { %v480_v32 = vadd.f32 %v472_v29, %v428_v28  ;;  %v502_v33 = vmax.f32 %v494_v31, 0.0  ;;  %v1668_v29 = vpack.c.bf16 %v754_v25, %v746_v23  ;;  %v753_v31 = vld [vmem:[%s2668_s5 + $0x2d0] sm:$0xff]  ;;  %v783_v23 = vld [vmem:[%s2668_s5 + $0x3c0] sm:$0xff] }
  0xa3   : > { %v449_v45 = vpop.permute.xlu0 %448  ;;  %v1670_v36 = vpack.c.bf16 %v753_v31, %v745_v30  ;;  %v777_v25 = vld [vmem:[%s2668_s5 + $0x390] sm:$0xff]  ;;  %v668_v30 = vld [vmem:[%s2668_s5 + $0x28] sm:$0xff] }
  0xa4   : > { %v495_v38 = vadd.f32 %v2063_v24, %v480_v32  ;;  %1588 = vmatprep.mubr.msk.f32.mxu0 %vm525_vm0, %v502_v33  ;;  %v474_v52 = vmul.f32 %v2056_v18, %v449_v45  ;;  %v762_v32 = vld [vmem:[%s2668_s5 + $0x318] sm:$0xff]  ;;  %v676_v31 = vld [vmem:[%s2668_s5 + $0x68] sm:$0xff] }
  0xa5   : > { %v393_v39 = vpop.permute.xlu1 %392  ;;  %v770_v33 = vld [vmem:[%s2668_s5 + $0x358] sm:$0xff] }
  0xa6   : > { %v503_v41 = vmax.f32 %v495_v38, 0.0  ;;  %v421_v56 = vmul.f32 %v2045_v11, %v393_v39  ;;  %v1672_v37 = vpack.c.bf16 %v770_v33, %v762_v32  ;;  %v761_v38 = vld [vmem:[%s2668_s5 + $0x310] sm:$0xff]  ;;  %v670_v32 = vld [vmem:[%s2668_s5 + $0x38] sm:$0xff]  ;;  %v1680_v33 = vpack.c.bf16 %v676_v31, %v668_v30  ;;  %v731_v31 = vld [vmem:[%s2668_s5 + $0x220] sm:$0xff] }
  0xa7   : > { %v457_v16 = vpop.permute.xlu0 %456  ;;  %v769_v39 = vld [vmem:[%s2668_s5 + $0x350] sm:$0xff] }
  0xa8   : > { %1589 = vmatmul.mubr.msk.f32.vlgmr.msra.gmra.mrb[0].mxu0 %vm525_vm0, %v503_v41  ;;  %v429_v3 = vadd.f32 %v421_v56, %v377_v60  ;;  %v1674_v44 = vpack.c.bf16 %v769_v39, %v761_v38  ;;  %v667_v38 = vld [vmem:[%s2668_s5 + $0x20] sm:$0xff] }
  0xa9   : > { %v397_v49 = vpop.permute.xlu1 %396  ;;  %1651 = vmatpush1.bf16.msra.mxu0 %v1650_v40  ;;  %v675_v39 = vld [vmem:[%s2668_s5 + $0x60] sm:$0xff] }
  0xaa   : > { %v422_v51 = vmul.f32 %v2045_v11, %v397_v49  ;;  %1653 = vmatprep.subr.bf16.mxu0 %v1652_v42  ;;  %v476_v42 = vmul.f32 %v2056_v18, %v457_v16 }
  0xac   : > { %v430_v59 = vadd.f32 %v422_v51, %v378_v48  ;;  %v359_v35 = vpop.permute.xlu0 %358 }
  0xad   : > { %1655 = vmatpush1.bf16.msra.mxu0 %v1654_v50  ;;  %v380_v40 = vmul.f32 %v2050_v13, %v359_v35 }
  0xae   : > { %v482_v62 = vadd.f32 %v474_v52, %v430_v59  ;;  %v445_v63 = vpop.permute.xlu1 %444  ;;  %1657 = vmatprep.subr.bf16.mxu0 %v1656_v53 }
  0xaf   : > { %v473_v4 = vmul.f32 %v2056_v18, %v445_v63 }
  0xb0   : > { %v497_v15 = vadd.f32 %v2063_v24, %v482_v62  ;;  %v369_v58 = vpop.permute.xlu0 %368 }
  0xb1   : > { %v481_v10 = vadd.f32 %v473_v4, %v429_v3  ;;  %1659 = vmatpush1.bf16.msra.mxu0 %v1658_v61  ;;  %v382_v62 = vmul.f32 %v2050_v13, %v369_v58  ;;  %v700_v58 = vld [vmem:[%s2668_s5 + $0x128] sm:$0xff] }
  0xb2   : > { %1661 = vmatprep.subr.bf16.mxu0 %v1660_v0  ;;  %v505_v28 = vmax.f32 %v497_v15, 0.0 }
  0xb3   : > { %v496_v21 = vadd.f32 %v2063_v24, %v481_v10  ;;  %v354_v22 = vpop.permute.xlu1 %353 }
  0xb4   : > { %v379_v47 = vmul.f32 %v2050_v13, %v354_v22 }
  0xb5   : > { %v504_v26 = vmax.f32 %v496_v21, 0.0  ;;  %1663 = vmatpush1.bf16.msra.mxu0 %v1662_v14  ;;  %v465_v60 = vpop.permute.xlu0 %464  ;;  %v775_v21 = vld [vmem:[%s2668_s5 + $0x380] sm:$0xff] }
  0xb6   : > { %1665 = vmatprep.subr.bf16.mxu0 %v1664_v17  ;;  %v478_v0 = vmul.f32 %v2056_v18, %v465_v60  ;;  %v702_v60 = vld [vmem:[%s2668_s5 + $0x138] sm:$0xff] }
  0xb7   : > { %1591 = vmatprep.mubr.msk.f32.mxu0 %vm525_vm0, %v504_v26  ;;  %v785_v26 = vld [vmem:[%s2668_s5 + $0x3d0] sm:$0xff] }
  0xb8   : > { %v401_v34 = vpop.permute.xlu1 %400  ;;  %1592 = vmatmul.mubr.msk.f32.gmra.mrb[2].mxu0 %vm525_vm0, %v505_v28  ;;  %v1678_v28 = vpack.c.bf16 %v785_v26, %v777_v25  ;;  %v734_v25 = vld [vmem:[%s2668_s5 + $0x238] sm:$0xff] }
  0xb9   : > { %1667 = vmatpush1.bf16.msra.mxu0 %v1666_v27  ;;  %v423_v45 = vmul.f32 %v2045_v11, %v401_v34  ;;  %v1646_v27 = vpack.c.bf16 %v783_v23, %v775_v21  ;;  %v678_v34 = vld [vmem:[%s2668_s5 + $0x78] sm:$0xff]  ;;  %v725_v21 = vld [vmem:[%s2668_s5 + $0x1f0] sm:$0xff]  ;;  %v740_v23 = vld [vmem:[%s2668_s5 + $0x268] sm:$0xff] }
  0xba   : > { %1669 = vmatprep.subr.bf16.mxu0 %v1668_v29  ;;  %v1834_v29 = vmov 0.0   ;;  %v2217_v35 = vpack.c.bf16 %v678_v34, %v670_v32  ;;  %v742_v26 = vld [vmem:[%s2668_s5 + $0x278] sm:$0xff]  ;;  %v739_v32 = vld [vmem:[%s2668_s5 + $0x260] sm:$0xff] }
  0xbb   : > { %v431_v50 = vadd.f32 %v423_v45, %v379_v47  ;;  %897 = vmatprep.mubr.f32.mxu1 %v1834_v29  ;;  %v692_v45 = vld [vmem:[%s2668_s5 + $0xe8] sm:$0xff]  ;;  %v694_v47 = vld [vmem:[%s2668_s5 + $0xf8] sm:$0xff] }
  0xbc   : > { %v405_v41 = vpop.permute.xlu1 %404 }
  0xbd   : > { %v424_v43 = vmul.f32 %v2045_v11, %v405_v41  ;;  %1671 = vmatpush1.bf16.msra.mxu0 %v1670_v36  ;;  %v2223_v36 = vld [vmem:[%s2667_s4] ss:$0 sm:$0xff]  ;;  %v669_v41 = vld [vmem:[%s2668_s5 + $0x30] sm:$0xff] }
  0xbe   : > { %1673 = vmatprep.subr.bf16.mxu0 %v1672_v37 }
  0xbf   : > { %v432_v46 = vadd.f32 %v424_v43, %v380_v40  ;;  %v684_v43 = vld [vmem:[%s2668_s5 + $0xa8] sm:$0xff] }
  0xc1   : > { %v484_v48 = vadd.f32 %v476_v42, %v432_v46  ;;  %v453_v49 = vpop.permute.xlu1 %452  ;;  %1675 = vmatpush1.bf16.msra.mxu0 %v1674_v44  ;;  %v677_v42 = vld [vmem:[%s2668_s5 + $0x70] sm:$0xff]  ;;  %v686_v46 = vld [vmem:[%s2668_s5 + $0xb8] sm:$0xff] }
  0xc2   : > { %v475_v51 = vmul.f32 %v2056_v18, %v453_v49 }
  0xc3   : > { %v499_v53 = vadd.f32 %v2063_v24, %v484_v48 }
  0xc4   : > { %v483_v52 = vadd.f32 %v475_v51, %v431_v50  ;;  %v1682_v50 = vpack.c.bf16 %v675_v39, %v667_v38  ;;  %v2253_v51 = vpack.c.bf16 %v677_v42, %v669_v41  ;;  %v733_v38 = vld [vmem:[%s2668_s5 + $0x230] sm:$0xff]  ;;  %v756_v42 = vld [vmem:[%s2668_s5 + $0x2e8] sm:$0xff] }
  0xc5   : > { %v507_v57 = vmax.f32 %v499_v53, 0.0  ;;  %v691_v53 = vld [vmem:[%s2668_s5 + $0xe0] sm:$0xff]  ;;  %v741_v39 = vld [vmem:[%s2668_s5 + $0x270] sm:$0xff] }
  0xc6   : > { %v498_v54 = vadd.f32 %v2063_v24, %v483_v52  ;;  %v364_v55 = vpop.permute.xlu1 %363  ;;  %v683_v52 = vld [vmem:[%s2668_s5 + $0xa0] sm:$0xff] }
  0xc7   : > { %v381_v3 = vmul.f32 %v2050_v13, %v364_v55  ;;  %v784_v13 = vld [vmem:[%s2668_s5 + $0x3c8] sm:$0xff]  ;;  %v2261_v55 = vpack.c.bf16 %v694_v47, %v686_v46  ;;  %v1698_v47 = vpack.c.bf16 %v739_v32, %v731_v31 }
  0xc8   : > { %v506_v56 = vmax.f32 %v498_v54, 0.0  ;;  %v1684_v54 = vpack.c.bf16 %v692_v45, %v684_v43  ;;  %v750_v43 = vld [vmem:[%s2668_s5 + $0x2b8] sm:$0xff] }
  0xca   : > { %1594 = vmatprep.mubr.msk.f32.mxu0 %vm525_vm0, %v506_v56  ;;  %v685_v56 = vld [vmem:[%s2668_s5 + $0xb0] sm:$0xff] }
  0xcb   : > { %v409_v59 = vpop.permute.xlu1 %408  ;;  %1595 = vmatmul.mubr.msk.f32.gmra.mrb[4].mxu0 %vm525_vm0, %v507_v57  ;;  %v693_v57 = vld [vmem:[%s2668_s5 + $0xf0] sm:$0xff] }
  0xcc   : > { %v425_v1 = vmul.f32 %v2045_v11, %v409_v59  ;;  %v708_v59 = vld [vmem:[%s2668_s5 + $0x168] sm:$0xff] }
  0xce   : > { %v433_v9 = vadd.f32 %v425_v1, %v381_v3  ;;  %v699_v1 = vld [vmem:[%s2668_s5 + $0x120] sm:$0xff]  ;;  %v1688_v3 = vpack.c.bf16 %v708_v59, %v700_v58  ;;  %v764_v58 = vld [vmem:[%s2668_s5 + $0x328] sm:$0xff] }
  0xcf   : > { %v413_v61 = vpop.permute.xlu1 %412  ;;  %v772_v59 = vld [vmem:[%s2668_s5 + $0x368] sm:$0xff] }
  0xd0   : > { %v426_v63 = vmul.f32 %v2045_v11, %v413_v61  ;;  %v776_v11 = vld [vmem:[%s2668_s5 + $0x388] sm:$0xff]  ;;  %v710_v61 = vld [vmem:[%s2668_s5 + $0x178] sm:$0xff] }
  0xd1   : > { %v1644_v20 = vpack.c.bf16 %v784_v13, %v776_v11  ;;  %v715_v11 = vld [vmem:[%s2668_s5 + $0x1a0] sm:$0xff] }
  0xd2   : > { %v434_v2 = vadd.f32 %v426_v63, %v382_v62  ;;  %v1686_v63 = vpack.c.bf16 %v691_v53, %v683_v52  ;;  %v723_v13 = vld [vmem:[%s2668_s5 + $0x1e0] sm:$0xff] }
  0xd3   : > { %1645 = vmatprep.subr.bf16.mxu1 %v1644_v20  ;;  %v755_v52 = vld [vmem:[%s2668_s5 + $0x2e0] sm:$0xff] }
  0xd4   : > { %v486_v4 = vadd.f32 %v478_v0, %v434_v2  ;;  %v461_v8 = vpop.permute.xlu1 %460  ;;  %1647 = vmatpush1.bf16.msra.mxu1 %v1646_v27  ;;  %v2288_v0 = vpack.c.bf16 %v693_v57, %v685_v56  ;;  %v707_v2 = vld [vmem:[%s2668_s5 + $0x160] sm:$0xff]  ;;  %v749_v56 = vld [vmem:[%s2668_s5 + $0x2b0] sm:$0xff] }
  0xd5   : > { %v477_v10 = vmul.f32 %v2056_v18, %v461_v8  ;;  %v778_v18 = vld [vmem:[%s2668_s5 + $0x398] sm:$0xff]  ;;  %1681 = vmatprep.subr.bf16.mxu1 %v1680_v33  ;;  %v701_v8 = vld [vmem:[%s2668_s5 + $0x130] sm:$0xff] }
  0xd6   : > { %v501_v15 = vadd.f32 %v2063_v24, %v486_v4  ;;  %v2297_v4 = vpack.c.bf16 %v710_v61, %v702_v60  ;;  %v757_v57 = vld [vmem:[%s2668_s5 + $0x2f0] sm:$0xff]  ;;  %v766_v60 = vld [vmem:[%s2668_s5 + $0x338] sm:$0xff] }
  0xd7   : > { %v485_v14 = vadd.f32 %v477_v10, %v433_v9  ;;  %v709_v9 = vld [vmem:[%s2668_s5 + $0x170] sm:$0xff]  ;;  %v716_v10 = vld [vmem:[%s2668_s5 + $0x1a8] sm:$0xff]  ;;  %v774_v61 = vld [vmem:[%s2668_s5 + $0x378] sm:$0xff] }
  0xd8   : > { %v509_v19 = vmax.f32 %v501_v15, 0.0  ;;  %v718_v15 = vld [vmem:[%s2668_s5 + $0x1b8] sm:$0xff] }
  0xd9   : > { %v500_v16 = vadd.f32 %v2063_v24, %v485_v14  ;;  %v786_v24 = vld [vmem:[%s2668_s5 + $0x3d8] sm:$0xff]  ;;  %v724_v14 = vld [vmem:[%s2668_s5 + $0x1e8] sm:$0xff] }
  0xda   : > { %v1676_v22 = vpack.c.bf16 %v786_v24, %v778_v18  ;;  %v1692_v18 = vpack.c.bf16 %v724_v14, %v716_v10  ;;  %v717_v24 = vld [vmem:[%s2668_s5 + $0x1b0] sm:$0xff]  ;;  %v2431_v10 = vpack.c.bf16 %v774_v61, %v766_v60 }
  0xdb   : > { %v508_v17 = vmax.f32 %v500_v16, 0.0  ;;  %v726_v16 = vld [vmem:[%s2668_s5 + $0x1f8] sm:$0xff]  ;;  %v2352_v30 = vpack.c.bf16 %v725_v21, %v717_v24  ;;  %v765_v14 = vld [vmem:[%s2668_s5 + $0x330] sm:$0xff]  ;;  %v779_v21 = vld [vmem:[%s2668_s5 + $0x3a0] sm:$0xff] }
  0xdc   : > { %1677 = vmatprep.subr.bf16.mxu0 %v1676_v22  ;;  %v2331_v20 = vpack.c.bf16 %v726_v16, %v718_v15  ;;  %v732_v22 = vld [vmem:[%s2668_s5 + $0x228] sm:$0xff]  ;;  %v773_v15 = vld [vmem:[%s2668_s5 + $0x370] sm:$0xff] }
  0xdd   : > { %1597 = vmatprep.mubr.msk.f32.mxu0 %vm525_vm0, %v508_v17  ;;  %1679 = vmatpush1.bf16.msra.mxu0 %v1678_v28  ;;  %v1690_v17 = vpack.c.bf16 %v707_v2, %v699_v1  ;;  %v1694_v28 = vpack.c.bf16 %v723_v13, %v715_v11  ;;  %v1696_v34 = vpack.c.bf16 %v740_v23, %v732_v22  ;;  %v780_v16 = vld [vmem:[%s2668_s5 + $0x3a8] sm:$0xff]  ;;  %v782_v11 = vld [vmem:[%s2668_s5 + $0x3b8] sm:$0xff]  ;;  %v787_v23 = vld [vmem:[%s2668_s5 + $0x3e0] sm:$0xff] }
  0xde   : > { %1598 = vmatmul.mubr.msk.f32.gmra.mrb[6].mxu0 %vm525_vm0, %v509_v19  ;;  %1713 = vmatprep.subr.bf16.mxu0 %v2217_v35  ;;  %v2322_v19 = vpack.c.bf16 %v709_v9, %v701_v8  ;;  %v2422_v2 = vpack.c.bf16 %v757_v57, %v749_v56  ;;  %v771_v8 = vld [vmem:[%s2668_s5 + $0x360] sm:$0xff]  ;;  %v1704_v9 = vpack.c.bf16 %v772_v59, %v764_v58  ;;  %v790_v13 = vld [vmem:[%s2668_s5 + $0x3f8] sm:$0xff] }
  0xdf   : > { %1010 = vmatprep.mubr.f32.mxu0 %v1834_v29  ;;  %v2456_v24 = vpack.c.bf16 %v773_v15, %v765_v14 }
 0x17b   : > { %v1590_v37 = vpop.f32.mrb[0].mxu0 }
 0x17c   : > { %v616_v40 = vpop.f32.mrb[1].mxu0  ;;  %v622_v48 = vadd.f32 %v1590_v37, %v2223_v36  ;;  %v2361_v37 = vpack.c.bf16 %v742_v26, %v734_v25  ;;  %v2465_v25 = vpack.c.bf16 %v790_v13, %v782_v11  ;;  %v781_v26 = vld [vmem:[%s2668_s5 + $0x3b0] sm:$0xff] }
 0x17d   : > { %v617_v44 = vadd.f32 %v2223_v36, %v616_v40  ;;  %v748_v40 = vld [vmem:[%s2668_s5 + $0x2a8] sm:$0xff] }
 0x17e   : > { %v2285_v62 = vmax.f32 %v622_v48, 0.0  ;;  %v2386_v48 = vpack.c.bf16 %v741_v39, %v733_v38  ;;  %v1700_v53 = vpack.c.bf16 %v756_v42, %v748_v40 }
 0x17f   : > { %v2251_v49 = vmax.f32 %v617_v44, 0.0  ;;  %v758_v44 = vld [vmem:[%s2668_s5 + $0x2f8] sm:$0xff] }
 0x181   : > { %898 = vmatmul.mubr.f32.vlgmr.msra.gmra.mrb[0].mxu1 %v2251_v49  ;;  %1011 = vmatmul.mubr.f32.vlgmr.msra.gmra.mrb[8].mxu0 %v2251_v49 }
 0x182   : > { %903 = vmatprep.mubr.f32.mxu1 %v1834_v29  ;;  %1016 = vmatprep.mubr.f32.mxu0 %v1834_v29 }
 0x183   : > { %1683 = vmatpush1.bf16.msra.mxu1 %v1682_v50  ;;  %1715 = vmatpush1.bf16.msra.mxu0 %v2253_v51  ;;  %v747_v50 = vld [vmem:[%s2668_s5 + $0x2a0] sm:$0xff] }
 0x184   : > { %1685 = vmatprep.subr.bf16.mxu1 %v1684_v54  ;;  %1717 = vmatprep.subr.bf16.mxu0 %v2261_v55  ;;  %v2395_v54 = vpack.c.bf16 %v758_v44, %v750_v43  ;;  %v1702_v1 = vpack.c.bf16 %v755_v52, %v747_v50 }
 0x185   : > { %904 = vmatmul.mubr.f32.gmra.mrb[2].mxu1 %v2285_v62  ;;  %1017 = vmatmul.mubr.f32.gmra.mrb[10].mxu0 %v2285_v62 }
 0x186   : > { %909 = vmatprep.mubr.f32.mxu1 %v1834_v29  ;;  %1022 = vmatprep.mubr.f32.mxu0 %v1834_v29 }
 0x187   : > { %1687 = vmatpush1.bf16.msra.mxu1 %v1686_v63  ;;  %1719 = vmatpush1.bf16.msra.mxu0 %v2288_v0 }
 0x188   : > { %1689 = vmatprep.subr.bf16.mxu1 %v1688_v3  ;;  %1721 = vmatprep.subr.bf16.mxu0 %v2297_v4  ;;  %v763_v3 = vld [vmem:[%s2668_s5 + $0x320] sm:$0xff] }
 0x18b   : > { %v1593_v27 = vpop.f32.mrb[2].mxu0  ;;  %1691 = vmatpush1.bf16.msra.mxu1 %v1690_v17  ;;  %1723 = vmatpush1.bf16.msra.mxu0 %v2322_v19  ;;  %v788_v17 = vld [vmem:[%s2668_s5 + $0x3e8] sm:$0xff] }
 0x18c   : > { %v626_v33 = vpop.f32.mrb[3].mxu0  ;;  %1693 = vmatprep.subr.bf16.mxu1 %v1692_v18  ;;  %1725 = vmatprep.subr.bf16.mxu0 %v2331_v20  ;;  %v632_v45 = vadd.f32 %v1593_v27, %v2223_v36  ;;  %v1706_v18 = vpack.c.bf16 %v771_v8, %v763_v3  ;;  %v1708_v22 = vpack.c.bf16 %v788_v17, %v780_v16  ;;  %v789_v27 = vld [vmem:[%s2668_s5 + $0x3f0] sm:$0xff] }
 0x18d   : > { %v627_v41 = vadd.f32 %v2223_v36, %v626_v33  ;;  %v2474_v31 = vpack.c.bf16 %v789_v27, %v781_v26 }
 0x18e   : > { %v2419_v63 = vmax.f32 %v632_v45, 0.0 }
 0x18f   : > { %v2383_v46 = vmax.f32 %v627_v41, 0.0  ;;  %1695 = vmatpush1.bf16.msra.mxu1 %v1694_v28  ;;  %1727 = vmatpush1.bf16.msra.mxu0 %v2352_v30  ;;  %v1710_v28 = vpack.c.bf16 %v787_v23, %v779_v21 }
 0x190   : > { %1697 = vmatprep.subr.bf16.mxu1 %v1696_v34  ;;  %1729 = vmatprep.subr.bf16.mxu0 %v2361_v37 }
 0x191   : > { %910 = vmatmul.mubr.f32.gmra.mrb[4].mxu1 %v2383_v46  ;;  %1023 = vmatmul.mubr.f32.gmra.mrb[12].mxu0 %v2383_v46 }
 0x192   : > { %915 = vmatprep.mubr.f32.mxu1 %v1834_v29  ;;  %1028 = vmatprep.mubr.f32.mxu0 %v1834_v29 }
 0x193   : > { %1699 = vmatpush1.bf16.msra.mxu1 %v1698_v47  ;;  %1731 = vmatpush1.bf16.msra.mxu0 %v2386_v48 }
 0x194   : > { %1701 = vmatprep.subr.bf16.mxu1 %v1700_v53  ;;  %1733 = vmatprep.subr.bf16.mxu0 %v2395_v54 }
 0x195   : > { %916 = vmatmul.mubr.f32.gmra.mrb[6].mxu1 %v2419_v63  ;;  %1029 = vmatmul.mubr.f32.gmra.mrb[14].mxu0 %v2419_v63 }
 0x196   : > { %921 = vmatprep.mubr.f32.mxu1 %v1834_v29  ;;  %1034 = vmatprep.mubr.f32.mxu0 %v1834_v29 }
 0x197   : > { %1703 = vmatpush1.bf16.msra.mxu1 %v1702_v1  ;;  %1735 = vmatpush1.bf16.msra.mxu0 %v2422_v2 }
 0x198   : > { %1705 = vmatprep.subr.bf16.mxu1 %v1704_v9  ;;  %1737 = vmatprep.subr.bf16.mxu0 %v2431_v10 }
 0x19b   : > { %1707 = vmatpush1.bf16.msra.mxu1 %v1706_v18  ;;  %1739 = vmatpush1.bf16.msra.mxu0 %v2456_v24 }
 0x19c   : > { %1709 = vmatprep.subr.bf16.mxu1 %v1708_v22  ;;  %1741 = vmatprep.subr.bf16.mxu0 %v2465_v25 }
 0x19e   : > { %v1596_v32 = vpop.f32.mrb[4].mxu0 }
 0x19f   : > { %v636_v33 = vpop.f32.mrb[5].mxu0  ;;  %1711 = vmatpush1.bf16.msra.mxu1 %v1710_v28  ;;  %1743 = vmatpush1.bf16.msra.mxu0 %v2474_v31  ;;  %v642_v38 = vadd.f32 %v1596_v32, %v2223_v36 }
 0x1a0   : > { %v637_v34 = vadd.f32 %v2223_v36, %v636_v33  ;;  %1744 = vmatprep.subr.bf16.mxu1 %v2217_v35 }
 0x1a1   : > { %v660_v40 = vmax.f32 %v642_v38, 0.0 }
 0x1a2   : > { %v659_v39 = vmax.f32 %v637_v34, 0.0 }
 0x1a4   : > { %922 = vmatmul.mubr.f32.gmra.mrb[8].mxu1 %v659_v39  ;;  %1035 = vmatmul.mubr.f32.gmra.mrb[16].mxu0 %v659_v39 }
 0x1a5   : > { %927 = vmatprep.mubr.f32.mxu1 %v1834_v29  ;;  %1040 = vmatprep.mubr.f32.mxu0 %v1834_v29 }
 0x1a8   : > { %928 = vmatmul.mubr.f32.gmra.mrb[10].mxu1 %v660_v40  ;;  %1041 = vmatmul.mubr.f32.gmra.mrb[18].mxu0 %v660_v40 }
 0x1a9   : > { %933 = vmatprep.mubr.f32.mxu1 %v1834_v29  ;;  %1046 = vmatprep.mubr.f32.mxu0 %v1834_v29 }
 0x1b1   : > { %v1599_v41 = vpop.f32.mrb[6].mxu0 }
 0x1b2   : > { %v646_v42 = vpop.f32.mrb[7].mxu0  ;;  %v652_v43 = vadd.f32 %v1599_v41, %v2223_v36 }
 0x1b3   : > { %v647_v35 = vadd.f32 %v2223_v36, %v646_v42  ;;  %v2531_v36 = vld [vmem:[%s2669_s6] sm:$0xff] }
 0x1b4   : > { %v662_v45 = vmax.f32 %v652_v43, 0.0 }
 0x1b5   : > { %v661_v44 = vmax.f32 %v647_v35, 0.0 }
 0x1b7   : > { %934 = vmatmul.mubr.f32.gmra.mrb[12].mxu1 %v661_v44  ;;  %1047 = vmatmul.mubr.f32.gmra.mrb[20].mxu0 %v661_v44 }
 0x1b8   : > { %939 = vmatprep.mubr.f32.mxu1 %v1834_v29  ;;  %1052 = vmatprep.mubr.f32.mxu0 %v1834_v29 }
 0x1bb   : > { %940 = vmatmul.mubr.f32.gmra.mrb[14].mxu1 %v662_v45  ;;  %1053 = vmatmul.mubr.f32.gmra.mrb[22].mxu0 %v662_v45 }
 0x1bc   : > { %1123 = vmatprep.mubr.f32.mxu1 %v1834_v29  ;;  %1236 = vmatprep.mubr.f32.mxu0 %v1834_v29 }
 0x1bf   : > { %1124 = vmatmul.mubr.f32.vlgmr.msra.gmra.mrb[16].mxu1 %v2251_v49  ;;  %1237 = vmatmul.mubr.f32.vlgmr.msra.gmra.mrb[24].mxu0 %v2251_v49  ;;  %v807_v49 = vsub.s32 3, %v2036_v5 }
 0x1c0   : > { %1752 = vmatpush1.bf16.msra.mxu1 %v2253_v51  ;;  %1129 = vmatprep.mubr.f32.mxu1 %v1834_v29 }
 0x1c1   : > { %1745 = vmatprep.subr.bf16.mxu1 %v2261_v55  ;;  %1242 = vmatprep.mubr.f32.mxu0 %v1834_v29 }
 0x1c3   : > { %1130 = vmatmul.mubr.f32.gmra.mrb[18].mxu1 %v2285_v62  ;;  %1243 = vmatmul.mubr.f32.gmra.mrb[26].mxu0 %v2285_v62  ;;  %v2537_v62 = vrot.slane %v2531_v36, %v373_v7 }
 0x1c4   : > { %1753 = vmatpush1.bf16.msra.mxu1 %v2288_v0  ;;  %1135 = vmatprep.mubr.f32.mxu1 %v1834_v29  ;;  %v2542_v0 = vrot.slane %v2531_v36, %v469_v12 }
 0x1c5   : > { %1746 = vmatprep.subr.bf16.mxu1 %v2297_v4  ;;  %1248 = vmatprep.mubr.f32.mxu0 %v1834_v29 }
 0x1c7   : > { %1136 = vmatmul.mubr.f32.gmra.mrb[20].mxu1 %v2383_v46  ;;  %1249 = vmatmul.mubr.f32.gmra.mrb[28].mxu0 %v2383_v46 }
 0x1c8   : > { %1754 = vmatpush1.bf16.msra.mxu1 %v2322_v19  ;;  %1141 = vmatprep.mubr.f32.mxu1 %v1834_v29  ;;  %v2547_v19 = vrot.slane %v2531_v36, %v417_v6 }
 0x1c9   : > { %1747 = vmatprep.subr.bf16.mxu1 %v2331_v20  ;;  %1254 = vmatprep.mubr.f32.mxu0 %v1834_v29  ;;  %v2550_v20 = vrot.slane %v2531_v36, %v807_v49 }
 0x1cb   : > { %1142 = vmatmul.mubr.f32.gmra.mrb[22].mxu1 %v2419_v63  ;;  %1255 = vmatmul.mubr.f32.gmra.mrb[30].mxu0 %v2419_v63 }
 0x1cc   : > { %1755 = vmatpush1.bf16.msra.mxu1 %v2352_v30  ;;  %1147 = vmatprep.mubr.f32.mxu1 %v1834_v29 }
 0x1cd   : > { %1748 = vmatprep.subr.bf16.mxu1 %v2361_v37  ;;  %1260 = vmatprep.mubr.f32.mxu0 %v1834_v29 }
 0x1cf   : > { %1148 = vmatmul.mubr.f32.gmra.mrb[24].mxu1 %v659_v39  ;;  %1261 = vmatmul.mubr.f32.gmra.mrb[32].mxu0 %v659_v39 }
 0x1d0   : > { %1756 = vmatpush1.bf16.msra.mxu1 %v2386_v48  ;;  %1153 = vmatprep.mubr.f32.mxu1 %v1834_v29 }
 0x1d1   : > { %1749 = vmatprep.subr.bf16.mxu1 %v2395_v54  ;;  %1266 = vmatprep.mubr.f32.mxu0 %v1834_v29 }
 0x1d3   : > { %1154 = vmatmul.mubr.f32.gmra.mrb[26].mxu1 %v660_v40  ;;  %1267 = vmatmul.mubr.f32.gmra.mrb[34].mxu0 %v660_v40 }
 0x1d4   : > { %1757 = vmatpush1.bf16.msra.mxu1 %v2422_v2  ;;  %1159 = vmatprep.mubr.f32.mxu1 %v1834_v29 }
 0x1d5   : > { %1750 = vmatprep.subr.bf16.mxu1 %v2431_v10 }
 0x1d7   : > { %1160 = vmatmul.mubr.f32.gmra.mrb[28].mxu1 %v661_v44 }
 0x1d8   : > { %1758 = vmatpush1.bf16.msra.mxu1 %v2456_v24  ;;  %1165 = vmatprep.mubr.f32.mxu1 %v1834_v29 }
 0x1d9   : > { %1751 = vmatprep.subr.bf16.mxu1 %v2465_v25 }
 0x1db   : > { %1166 = vmatmul.mubr.f32.gmra.mrb[30].mxu1 %v662_v45 }
 0x1dc   : > { %1759 = vmatpush1.bf16.msra.mxu1 %v2474_v31  ;;  %1272 = vmatprep.mubr.f32.mxu1 %v1834_v29 }
 0x1df   : > { %1273 = vmatmul.mubr.f32.vlgmr.msra.gmra.mrb[32].mxu1 %v661_v44 }
 0x1e0   : > { %1278 = vmatprep.mubr.f32.mxu1 %v1834_v29 }
 0x1e3   : > { %1279 = vmatmul.mubr.f32.gmra.mrb[34].mxu1 %v662_v45 }
 0x254   : > { %v899_v51 = vpop.f32.mrb[0].mxu1  ;;  %v1012_v55 = vpop.f32.mrb[8].mxu0 }
 0x255   : > { %v901_v29 = vpop.f32.mrb[1].mxu1  ;;  %v1014_v4 = vpop.f32.mrb[9].mxu0  ;;  %v900_v7 = vadd.f32 %v899_v51, %v2537_v62  ;;  %v1013_v46 = vadd.f32 %v1012_v55, %v2542_v0 }
 0x256   : > { %v902_v52 = vadd.f32 %v901_v29, %v2547_v19  ;;  %v1015_v6 = vadd.f32 %v1014_v4, %v2550_v20 }
 0x258   : > { %v905_v30 = vpop.f32.mrb[2].mxu1  ;;  %v1018_v37 = vpop.f32.mrb[10].mxu0 }
 0x259   : > { %v906_v47 = vadd.f32 %v905_v30, %v2537_v62  ;;  %v1019_v12 = vadd.f32 %v1018_v37, %v2542_v0  ;;  %v907_v48 = vpop.f32.mrb[3].mxu1  ;;  %v1020_v50 = vpop.f32.mrb[11].mxu0 }
 0x25a   : > { %v908_v53 = vadd.f32 %v907_v48, %v2547_v19  ;;  %v1021_v54 = vadd.f32 %v1020_v50, %v2550_v20 }
 0x25b   : > { %v1285_v56 = vmax.f32 %v900_v7, %v906_v47  ;;  %v1311_v57 = vmax.f32 %v1013_v46, %v1019_v12 }
 0x25c   : > { %v1298_v58 = vmax.f32 %v902_v52, %v908_v53  ;;  %v1324_v59 = vmax.f32 %v1015_v6, %v1021_v54 }
 0x264   : > { %v911_v60 = vpop.f32.mrb[4].mxu1  ;;  %v1024_v61 = vpop.f32.mrb[12].mxu0 }
 0x265   : > { %v912_v63 = vadd.f32 %v911_v60, %v2537_v62  ;;  %v1025_v1 = vadd.f32 %v1024_v61, %v2542_v0  ;;  %v913_v2 = vpop.f32.mrb[5].mxu1  ;;  %v1026_v3 = vpop.f32.mrb[13].mxu0 }
 0x266   : > { %v914_v8 = vadd.f32 %v913_v2, %v2547_v19  ;;  %v1027_v9 = vadd.f32 %v1026_v3, %v2550_v20 }
 0x267   : > { %v1286_v10 = vmax.f32 %v1285_v56, %v912_v63  ;;  %v1312_v14 = vmax.f32 %v1311_v57, %v1025_v1  ;;  %v811_v63 = vsub.s32 4, %v2036_v5  ;;  %v819_v1 = vsub.s32 6, %v2036_v5 }
 0x268   : > { %v1299_v15 = vmax.f32 %v1298_v58, %v914_v8  ;;  %v1325_v16 = vmax.f32 %v1324_v59, %v1027_v9  ;;  %v917_v17 = vpop.f32.mrb[6].mxu1  ;;  %v1030_v11 = vpop.f32.mrb[14].mxu0  ;;  %v1835_v58 = vmov 1966171168  }
 0x269   : > { %v918_v13 = vadd.f32 %v917_v17, %v2537_v62  ;;  %v1031_v18 = vadd.f32 %v1030_v11, %v2542_v0  ;;  %v919_v24 = vpop.f32.mrb[7].mxu1  ;;  %v1032_v21 = vpop.f32.mrb[15].mxu0  ;;  %v1408_v59 = vunpack.c.l.s4 %v1835_v58 }
 0x26a   : > { %v920_v22 = vadd.f32 %v919_v24, %v2547_v19  ;;  %v1033_v23 = vadd.f32 %v1032_v21, %v2550_v20 }
 0x26b   : > { %v1287_v25 = vmax.f32 %v1286_v10, %v918_v13  ;;  %v1313_v26 = vmax.f32 %v1312_v14, %v1031_v18  ;;  %v815_v10 = vsub.s32 5, %v2036_v5  ;;  %v823_v14 = vsub.s32 7, %v2036_v5 }
 0x26c   : > { %v1300_v27 = vmax.f32 %v1299_v15, %v920_v22  ;;  %v1326_v28 = vmax.f32 %v1325_v16, %v1033_v23  ;;  %v1409_v18 = vunpack.c.0.s8 %v1408_v59  ;;  %v2589_v23 = vrot.slane %v2531_v36, %v811_v63 }
 0x277   : > { %v923_v31 = vpop.f32.mrb[8].mxu1  ;;  %v1036_v32 = vpop.f32.mrb[16].mxu0 }
 0x278   : > { %v924_v33 = vadd.f32 %v923_v31, %v2537_v62  ;;  %v1037_v34 = vadd.f32 %v1036_v32, %v2542_v0  ;;  %v925_v38 = vpop.f32.mrb[9].mxu1  ;;  %v1038_v39 = vpop.f32.mrb[17].mxu0 }
 0x279   : > { %v926_v40 = vadd.f32 %v925_v38, %v2547_v19  ;;  %v1039_v41 = vadd.f32 %v1038_v39, %v2550_v20  ;;  %v2601_v38 = vsub.s32 %v1409_v18, %v2036_v5 }
 0x27a   : > { %v1288_v42 = vmax.f32 %v1287_v25, %v924_v33  ;;  %v1314_v35 = vmax.f32 %v1313_v26, %v1037_v34  ;;  %v2592_v25 = vrot.slane %v2531_v36, %v819_v1 }
 0x27b   : > { %v1301_v43 = vmax.f32 %v1300_v27, %v926_v40  ;;  %v1327_v44 = vmax.f32 %v1326_v28, %v1039_v41  ;;  %v929_v45 = vpop.f32.mrb[10].mxu1  ;;  %v1042_v49 = vpop.f32.mrb[18].mxu0 }
 0x27c   : > { %v930_v51 = vadd.f32 %v929_v45, %v2537_v62  ;;  %v1043_v55 = vadd.f32 %v1042_v49, %v2542_v0  ;;  %v931_v29 = vpop.f32.mrb[11].mxu1  ;;  %v1044_v4 = vpop.f32.mrb[19].mxu0 }
 0x27d   : > { %v932_v30 = vadd.f32 %v931_v29, %v2547_v19  ;;  %v1045_v37 = vadd.f32 %v1044_v4, %v2550_v20 }
 0x27e   : > { %v1289_v7 = vmax.f32 %v1288_v42, %v930_v51  ;;  %v1315_v46 = vmax.f32 %v1314_v35, %v1043_v55 }
 0x27f   : > { %v1302_v47 = vmax.f32 %v1301_v43, %v932_v30  ;;  %v1328_v12 = vmax.f32 %v1327_v44, %v1045_v37 }
 0x28a   : > { %v935_v48 = vpop.f32.mrb[12].mxu1  ;;  %v1048_v50 = vpop.f32.mrb[20].mxu0 }
 0x28b   : > { %v936_v52 = vadd.f32 %v935_v48, %v2537_v62  ;;  %v1049_v6 = vadd.f32 %v1048_v50, %v2542_v0  ;;  %v937_v53 = vpop.f32.mrb[13].mxu1  ;;  %v1050_v54 = vpop.f32.mrb[21].mxu0 }
 0x28c   : > { %v938_v56 = vadd.f32 %v937_v53, %v2547_v19  ;;  %v1051_v57 = vadd.f32 %v1050_v54, %v2550_v20 }
 0x28d   : > { %v1290_v60 = vmax.f32 %v1289_v7, %v936_v52  ;;  %v1316_v61 = vmax.f32 %v1315_v46, %v1049_v6 }
 0x28e   : > { %v1303_v2 = vmax.f32 %v1302_v47, %v938_v56  ;;  %v1329_v3 = vmax.f32 %v1328_v12, %v1051_v57  ;;  %v941_v8 = vpop.f32.mrb[14].mxu1  ;;  %v1054_v9 = vpop.f32.mrb[22].mxu0 }
 0x28f   : > { %v942_v15 = vadd.f32 %v941_v8, %v2537_v62  ;;  %v1055_v16 = vadd.f32 %v1054_v9, %v2542_v0  ;;  %v943_v17 = vpop.f32.mrb[15].mxu1  ;;  %v1056_v11 = vpop.f32.mrb[23].mxu0  ;;  %v2595_v0 = vrot.slane %v2531_v36, %v815_v10 }
 0x290   : > { %v944_v13 = vadd.f32 %v943_v17, %v2547_v19  ;;  %v1057_v24 = vadd.f32 %v1056_v11, %v2550_v20  ;;  %v2598_v19 = vrot.slane %v2531_v36, %v823_v14 }
 0x291   : > { %v1291_v21 = vmax.f32 %v1290_v60, %v942_v15  ;;  %v1317_v22 = vmax.f32 %v1316_v61, %v1055_v16 }
 0x292   : > { %v1304_v26 = vmax.f32 %v1303_v2, %v944_v13  ;;  %v1330_v27 = vmax.f32 %v1329_v3, %v1057_v24  ;;  %v1125_v62 = vpop.f32.mrb[16].mxu1  ;;  %v1238_v28 = vpop.f32.mrb[24].mxu0 }
 0x293   : > { %v1292_v31 = vrot.slane %v1291_v21, 4  ;;  %v1318_v20 = vrot.slane %v1317_v22, 4  ;;  %v1127_v32 = vpop.f32.mrb[17].mxu1  ;;  %v1240_v33 = vpop.f32.mrb[25].mxu0  ;;  %v1126_v42 = vadd.f32 %v1125_v62, %v2589_v23  ;;  %v1239_v35 = vadd.f32 %v1238_v28, %v2592_v25 }
 0x294   : > { %v1305_v34 = vrot.slane %v1304_v26, 4  ;;  %v1331_v39 = vrot.slane %v1330_v27, 4  ;;  %v1128_v36 = vadd.f32 %v1127_v32, %v2595_v0  ;;  %v1241_v45 = vadd.f32 %v1240_v33, %v2598_v19 }
 0x295   : > { %v1293_v40 = vmax.f32 %v1291_v21, %v1292_v31  ;;  %v1319_v41 = vmax.f32 %v1317_v22, %v1318_v20 }
 0x296   : > { %v1306_v43 = vmax.f32 %v1304_v26, %v1305_v34  ;;  %v1332_v44 = vmax.f32 %v1330_v27, %v1331_v39  ;;  %v1131_v49 = vpop.f32.mrb[18].mxu1  ;;  %v1244_v51 = vpop.f32.mrb[26].mxu0 }
 0x297   : > { %v1294_v55 = vrot.slane %v1293_v40, 2  ;;  %v1320_v29 = vrot.slane %v1319_v41, 2  ;;  %v1132_v5 = vadd.f32 %v1131_v49, %v2589_v23  ;;  %v1245_v4 = vadd.f32 %v1244_v51, %v2592_v25  ;;  %v1133_v30 = vpop.f32.mrb[19].mxu1  ;;  %v1246_v37 = vpop.f32.mrb[27].mxu0 }
 0x298   : > { %v1307_v7 = vrot.slane %v1306_v43, 2  ;;  %v1333_v46 = vrot.slane %v1332_v44, 2  ;;  %v1134_v47 = vadd.f32 %v1133_v30, %v2595_v0  ;;  %v1247_v12 = vadd.f32 %v1246_v37, %v2598_v19 }
 0x299   : > { %v1295_v48 = vmax.f32 %v1293_v40, %v1294_v55  ;;  %v1321_v50 = vmax.f32 %v1319_v41, %v1320_v29  ;;  %v1337_v52 = vmax.f32 %v1126_v42, %v1132_v5  ;;  %v1363_v6 = vmax.f32 %v1239_v35, %v1245_v4 }
 0x29a   : > { %v1308_v53 = vmax.f32 %v1306_v43, %v1307_v7  ;;  %v1334_v54 = vmax.f32 %v1332_v44, %v1333_v46  ;;  %v1350_v56 = vmax.f32 %v1128_v36, %v1134_v47  ;;  %v1376_v57 = vmax.f32 %v1241_v45, %v1247_v12  ;;  %v1137_v58 = vpop.f32.mrb[20].mxu1  ;;  %v1250_v59 = vpop.f32.mrb[28].mxu0 }
 0x29b   : > { %v1296_v60 = vrot.slane %v1295_v48, 1  ;;  %v1322_v61 = vrot.slane %v1321_v50, 1  ;;  %v1138_v63 = vadd.f32 %v1137_v58, %v2589_v23  ;;  %v1251_v1 = vadd.f32 %v1250_v59, %v2592_v25  ;;  %v1139_v2 = vpop.f32.mrb[21].mxu1  ;;  %v1252_v3 = vpop.f32.mrb[29].mxu0 }
 0x29c   : > { %v1309_v8 = vrot.slane %v1308_v53, 1  ;;  %v1335_v9 = vrot.slane %v1334_v54, 1  ;;  %v1140_v10 = vadd.f32 %v1139_v2, %v2595_v0  ;;  %v1253_v14 = vadd.f32 %v1252_v3, %v2598_v19 }
 0x29d   : > { %v1297_v15 = vmax.f32 %v1295_v48, %v1296_v60  ;;  %v1323_v16 = vmax.f32 %v1321_v50, %v1322_v61  ;;  %v1338_v17 = vmax.f32 %v1337_v52, %v1138_v63  ;;  %v1364_v11 = vmax.f32 %v1363_v6, %v1251_v1 }
 0x29e   : > { %v1310_v13 = vmax.f32 %v1308_v53, %v1309_v8  ;;  %v1336_v18 = vmax.f32 %v1334_v54, %v1335_v9  ;;  %v1351_v24 = vmax.f32 %v1350_v56, %v1140_v10  ;;  %v1377_v21 = vmax.f32 %v1376_v57, %v1253_v14  ;;  %v1143_v22 = vpop.f32.mrb[22].mxu1  ;;  %v1256_v26 = vpop.f32.mrb[30].mxu0 }
 0x29f   : > { %v1144_v27 = vadd.f32 %v1143_v22, %v2589_v23  ;;  %v1257_v62 = vadd.f32 %v1256_v26, %v2592_v25  ;;  %v1145_v28 = vpop.f32.mrb[23].mxu1  ;;  %v1258_v31 = vpop.f32.mrb[31].mxu0 }
 0x2a0   : > { %v1403_v20 = vcombine.low %v1297_v15, %v1310_v13  ;;  %v1404_v32 = vcombine.low %v1323_v16, %v1336_v18  ;;  %v1146_v33 = vadd.f32 %v1145_v28, %v2595_v0  ;;  %v1259_v34 = vadd.f32 %v1258_v31, %v2598_v19 }
 0x2a1   : > { %v1339_v39 = vmax.f32 %v1338_v17, %v1144_v27  ;;  %v1365_v40 = vmax.f32 %v1364_v11, %v1257_v62 }
 0x2a2   : > { %v2620_v41 = vrot.slane %v1403_v20, %v2601_v38  ;;  %v2623_v42 = vrot.slane %v1404_v32, %v2601_v38  ;;  %v1352_v35 = vmax.f32 %v1351_v24, %v1146_v33  ;;  %v1378_v43 = vmax.f32 %v1377_v21, %v1259_v34  ;;  %v1149_v44 = vpop.f32.mrb[24].mxu1  ;;  %v1262_v36 = vpop.f32.mrb[32].mxu0 }
 0x2a3   : > { %v1150_v45 = vadd.f32 %v1149_v44, %v2589_v23  ;;  %v1263_v49 = vadd.f32 %v1262_v36, %v2592_v25  ;;  %v1151_v51 = vpop.f32.mrb[25].mxu1  ;;  %v1264_v55 = vpop.f32.mrb[33].mxu0 }
 0x2a4   : > { %v1435_v29 = vcombine.low %v2620_v41, %v2623_v42  ;;  %v1152_v5 = vadd.f32 %v1151_v51, %v2595_v0  ;;  %v1265_v4 = vadd.f32 %v1264_v55, %v2598_v19 }
 0x2a5   : > { %v1340_v30 = vmax.f32 %v1339_v39, %v1150_v45  ;;  %v1366_v37 = vmax.f32 %v1365_v40, %v1263_v49 }
 0x2a6   : > { %v1353_v7 = vmax.f32 %v1352_v35, %v1152_v5  ;;  %v1379_v46 = vmax.f32 %v1378_v43, %v1265_v4  ;;  %v1155_v47 = vpop.f32.mrb[26].mxu1  ;;  %v1268_v12 = vpop.f32.mrb[34].mxu0 }
 0x2a7   : > { %v1156_v48 = vadd.f32 %v1155_v47, %v2589_v23  ;;  %v1269_v50 = vadd.f32 %v1268_v12, %v2592_v25  ;;  %v1157_v52 = vpop.f32.mrb[27].mxu1  ;;  %v1270_v6 = vpop.f32.mrb[35].mxu0 }
 0x2a8   : > { %v1158_v53 = vadd.f32 %v1157_v52, %v2595_v0  ;;  %v1271_v54 = vadd.f32 %v1270_v6, %v2598_v19  ;;  %v1443_v6 = vrot.slane %v1435_v29, %v2601_v38 }
 0x2a9   : > { %v1341_v56 = vmax.f32 %v1340_v30, %v1156_v48  ;;  %v1367_v57 = vmax.f32 %v1366_v37, %v1269_v50 }
 0x2aa   : > { %v1354_v58 = vmax.f32 %v1353_v7, %v1158_v53  ;;  %v1380_v59 = vmax.f32 %v1379_v46, %v1271_v54  ;;  %v1161_v60 = vpop.f32.mrb[28].mxu1 }
 0x2ab   : > { %v1162_v61 = vadd.f32 %v1161_v60, %v2589_v23  ;;  %v1163_v63 = vpop.f32.mrb[29].mxu1 }
 0x2ac   : > { %v1164_v1 = vadd.f32 %v1163_v63, %v2595_v0 }
 0x2ad   : > { %v1342_v2 = vmax.f32 %v1341_v56, %v1162_v61 }
 0x2ae   : > { %v1355_v3 = vmax.f32 %v1354_v58, %v1164_v1  ;;  %v1167_v8 = vpop.f32.mrb[30].mxu1 }
 0x2af   : > { %v1168_v9 = vadd.f32 %v1167_v8, %v2589_v23  ;;  %v1169_v10 = vpop.f32.mrb[31].mxu1 }
 0x2b0   : > { %v1170_v14 = vadd.f32 %v1169_v10, %v2595_v0 }
 0x2b1   : > { %v1343_v15 = vmax.f32 %v1342_v2, %v1168_v9 }
 0x2b2   : > { %v1356_v16 = vmax.f32 %v1355_v3, %v1170_v14  ;;  %v1274_v17 = vpop.f32.mrb[32].mxu1 }
 0x2b3   : > { %v1344_v11 = vrot.slane %v1343_v15, 4  ;;  %v1275_v13 = vadd.f32 %v1274_v17, %v2592_v25  ;;  %v1276_v18 = vpop.f32.mrb[33].mxu1 }
 0x2b4   : > { %v1357_v24 = vrot.slane %v1356_v16, 4  ;;  %v1277_v21 = vadd.f32 %v1276_v18, %v2598_v19 }
 0x2b5   : > { %v1345_v22 = vmax.f32 %v1343_v15, %v1344_v11  ;;  %v1368_v26 = vmax.f32 %v1367_v57, %v1275_v13 }
 0x2b6   : > { %v1358_v27 = vmax.f32 %v1356_v16, %v1357_v24  ;;  %v1381_v62 = vmax.f32 %v1380_v59, %v1277_v21  ;;  %v1280_v28 = vpop.f32.mrb[34].mxu1 }
 0x2b7   : > { %v1346_v31 = vrot.slane %v1345_v22, 2  ;;  %v1281_v23 = vadd.f32 %v1280_v28, %v2592_v25  ;;  %v1282_v20 = vpop.f32.mrb[35].mxu1 }
 0x2b8   : > { %v1359_v0 = vrot.slane %v1358_v27, 2  ;;  %v1283_v32 = vadd.f32 %v1282_v20, %v2598_v19 }
 0x2b9   : > { %v1347_v33 = vmax.f32 %v1345_v22, %v1346_v31  ;;  %v1369_v34 = vmax.f32 %v1368_v26, %v1281_v23 }
 0x2ba   : > { %v1360_v39 = vmax.f32 %v1358_v27, %v1359_v0  ;;  %v1382_v40 = vmax.f32 %v1381_v62, %v1283_v32 }
 0x2bb   : > { %v1348_v35 = vrot.slane %v1347_v33, 1  ;;  %v1370_v43 = vrot.slane %v1369_v34, 4 }
 0x2bc   : > { %v1361_v44 = vrot.slane %v1360_v39, 1  ;;  %v1383_v36 = vrot.slane %v1382_v40, 4 }
 0x2bd   : > { %v1349_v45 = vmax.f32 %v1347_v33, %v1348_v35  ;;  %v1371_v49 = vmax.f32 %v1369_v34, %v1370_v43 }
 0x2be   : > { %v1362_v51 = vmax.f32 %v1360_v39, %v1361_v44  ;;  %v1384_v55 = vmax.f32 %v1382_v40, %v1383_v36 }
 0x2bf   : > { %v1372_v5 = vrot.slane %v1371_v49, 2 }
 0x2c0   : > { %v1405_v4 = vcombine.low %v1349_v45, %v1362_v51  ;;  %v1385_v25 = vrot.slane %v1384_v55, 2 }
 0x2c1   : > { %v1373_v30 = vmax.f32 %v1371_v49, %v1372_v5 }
 0x2c2   : > { %v1386_v37 = vmax.f32 %v1384_v55, %v1385_v25  ;;  %v1427_v48 = vrot.slane %v1405_v4, %v2601_v38 }
 0x2c3   : > { %v1374_v7 = vrot.slane %v1373_v30, 1 }
 0x2c4   : > { %v1387_v19 = vrot.slane %v1386_v37, 1 }
 0x2c5   : > { %v1375_v46 = vmax.f32 %v1373_v30, %v1374_v7 }
 0x2c6   : > { %v1388_v47 = vmax.f32 %v1386_v37, %v1387_v19 }
 0x2c8   : > { %v1406_v12 = vcombine.low %v1375_v46, %v1388_v47 }
 0x2ca   : > { %v1434_v50 = vrot.slane %v1406_v12, %v2601_v38 }
 0x2cc   : > { %v1436_v52 = vcombine.low %v1427_v48, %v1434_v50 }
 0x2ce   : > { %v1450_v53 = vrot.slane %v1436_v52, %v2601_v38 }
 0x2d0   : > { %v1451_v54 = vcombine.low %v1443_v6, %v1450_v53 }
 0x2d2   : > { %1454 = vst [vmem:[%s321_s10] sm:$0xff] %v1451_v54 }
 0x2d3 PF: > { %s17_s26 = sadd.s32 1, %s1829_s26   ;;  %s2671_s24 = smov %s1825_s25 }
 0x2d4   : > { %p14_p5 = scmp.ge.s32.totalorder %s17_s26, 4   ;;  %s2672_s25 = smov %s2674_s27 }
 0x2d6   :  { %16 = sbr.rel (!%p14_p5) target bundleno = 2 (0x2), region = 85 }

// kernel: pointnet_autoencoder_forward.5
= control target key start
LH: loop header
LB: loop body
LE: loop exit
PB: predicated region body
PF: predicated region fallthrough
CT: control target
= control target key end

     0   :  { %12 = vsyncpa [#allocation3], 0  ;;  %s2856_s0 = inlined_call_operand.vmem [shape: f32[2,64,3], index: 0, kind: input, shape index: {}]   ;;  %s2857_s1 = inlined_call_operand.hbm [shape: f32[1,3,64], index: 1, kind: input, shape index: {}]   ;;  %s2858_s2 = inlined_call_operand.hbm [shape: f32[1,64], index: 2, kind: input, shape index: {}]   ;;  %s2859_s3 = inlined_call_operand.hbm [shape: f32[64,128], index: 3, kind: input, shape index: {}]   ;;  %s2860_s4 = inlined_call_operand.hbm [shape: f32[1,128], index: 4, kind: input, shape index: {}]   ;;  %s2861_s5 = inlined_call_operand.hbm [shape: f32[128,1024], index: 5, kind: input, shape index: {}]   ;;  %s2862_s6 = inlined_call_operand.hbm [shape: f32[1,1024], index: 6, kind: input, shape index: {}]   ;;  %s2863_s7 = inlined_call_operand.vmem [shape: f32[2,1,1024], index: 7, kind: output, shape index: {}]  }
   0x1   :  { %13 = vsyncpa [#allocation5], 0 }
   0x2   :  { %14 = vsyncpa [#allocation8], 0 }
   0x3   :  { %15 = vsyncpa [#allocation11], 0  ;;  %s2323_s24 = smov 0   ;;  %s2325_s25 = smov 0  }
   0x4   :  { %s2327_s26 = smov 0  }
   0x5 LB: > { %s2268_s27 = smov [#allocation4]   ;;  %s1710_s29 = sadd.s32 4294967295, %s2266_s26   ;;  %s2266_s26 = sphi %s2327_s26, %s21_s26   ;;  %s2262_s25 = sphi %s2325_s25, %s2876_s25   ;;  %s2258_s24 = sphi %s2323_s24, %s2875_s24  }
   0x6   : > { %s242_s28 = sshll.u32 %s2268_s27, 4  ;;  %p1712_p0 = scmp.ge.s32.totalorder %s2266_s26, 1  ;;  %s243_s28 = int_to_ptr.vmem [resolvable:$true] %s242_s28 }
   0x7   : > { %p218_p1 = scmp.lt.s32.totalorder %s2266_s26, 3  ;;  %p2341_p2 = scmp.eq.s32.totalorder %s1710_s29, 0 }
   0x8   : > { %s2269_s9 = smov [#allocation7]   ;;  %s33_s12 = sadd.s32 1, %s2262_s25 }
   0x9   : > { %s2867_s30 = scalar_select %p2341_p2, 1, 0 }
   0xa   : > { %p2345_p3 = pnand %p1712_p0, %p218_p1  ;;  %s266_s10 = sshll.u32 %s2269_s9, 4  ;;  %s2351_s10 = int_to_ptr.vmem [resolvable:$true] %s266_s10 }
   0xb   : > { %p2362_p6 = scmp.ge.s32.totalorder %s33_s12, 2  ;;  %s2060_s16 = scalar_lea.hbm %s2858_s2, 16 }
   0xc   : > { %s2868_s8 = scalar_select %p2345_p3, 1, 0 }
   0xd   : > { %p1971_p4 = pneg %p2345_p3  ;;  %p2061_p7 = scmp.ne.s32.totalorder %s2858_s2, %s2060_s16 }
   0xe   : > { %s2870_s13 = scalar_select %p2362_p6, 1, 0 }
   0xf   : > { %p2355_p5 = pnand %p2341_p2, %p1971_p4  ;;  %p2067_p11 = scmp.lt.u32.totalorder %s2060_s16, %s2858_s2 }
  0x11   : > { %p2374_p8 = pneg %p2355_p5 }
  0x13   : > { %p2063_p9 = pnand %p2374_p8, %p2061_p7 }
  0x15   : > { %p2064_p10 = pneg %p2063_p9 }
  0x17   : > { %p2069_p12 = pnand %p2067_p11, %p2064_p10 }
  0x19   : > { %2072 = shalt.err (!%p2069_p12)
}
  0x1a   : > { %s2073_s22 = scalar_lea.vmem %s243_s28, 16  ;;  %s2080_s23 = scalar_lea.vmem %s243_s28, 32 }
  0x1b   : > { %p2074_p13 = scmp.ne.s32.totalorder %s243_s28, %s2073_s22  ;;  %p2081_p4 = scmp.lt.s32.totalorder %s243_s28, %s243_s28 }
  0x1c   : > { %p2082_p2 = scmp.lt.s32.totalorder %s2080_s23, %s2073_s22 }
  0x1d   : > { %p2076_p0 = pnand %p2074_p13, %p2374_p8 }
  0x1e   : > { %p2083_p3 = por %p2082_p2, %p2081_p4 }
  0x1f   : > { %p2077_p1 = pneg %p2076_p0 }
  0x21   : > { %p2084_p6 = pnand %p2083_p3, %p2077_p1 }
  0x23   : > { %2087 = shalt.err (!%p2084_p6)
}
  0x24   : > { %1977 = dma.hbm_to_vmem [thread:$0]  (!%p2355_p5), %s2858_s2, 16, %s243_s28, [#allocation5]  }
  0x25   : > { %s2088_s15 = scalar_lea.hbm %s2860_s4, 16 }
  0x26   : > { %p2089_p7 = scmp.ne.s32.totalorder %s2860_s4, %s2088_s15  ;;  %p2095_p3 = scmp.lt.u32.totalorder %s2088_s15, %s2860_s4 }
  0x28   : > { %p2091_p9 = pnand %p2089_p7, %p2374_p8 }
  0x2a   : > { %p2092_p2 = pneg %p2091_p9 }
  0x2c   : > { %p2097_p6 = pnand %p2095_p3, %p2092_p2 }
  0x2e   : > { %2100 = shalt.err (!%p2097_p6)
}
  0x2f   : > { %s2101_s28 = scalar_lea.vmem %s2351_s10, 16  ;;  %s2108_s21 = scalar_lea.vmem %s2351_s10, 32 }
  0x30   : > { %p2102_p10 = scmp.ne.s32.totalorder %s2351_s10, %s2101_s28  ;;  %p2109_p13 = scmp.lt.s32.totalorder %s2351_s10, %s2351_s10 }
  0x31   : > { %p2110_p0 = scmp.lt.s32.totalorder %s2108_s21, %s2101_s28 }
  0x32   : > { %p2104_p11 = pnand %p2102_p10, %p2374_p8 }
  0x33   : > { %p2111_p1 = por %p2110_p0, %p2109_p13 }
  0x34   : > { %p2105_p12 = pneg %p2104_p11 }
  0x36   : > { %p2112_p4 = pnand %p2111_p1, %p2105_p12 }
  0x38   : > { %2115 = shalt.err (!%p2112_p4)
}
  0x39   : > { %1983 = dma.hbm_to_vmem [thread:$0]  (!%p2355_p5), %s2860_s4, 16, %s2351_s10, [#allocation8]  }
  0x3a   : > { %p2872_p7 = scmp.ne.s32.totalorder %s2870_s13, 0  ;;  %s2270_s27 = smov [#allocation2]  }
  0x3b   : > { %s231_s29 = sshll.u32 %s2270_s27, 4  ;;  %s2271_s9 = smov [#allocation6]   ;;  %s232_s29 = int_to_ptr.vmem [resolvable:$true] %s231_s29 }
  0x3c   : > { %s2878_s12 = smov (%p2872_p7, %s33_s12), 0  ;;  %s252_s14 = sshll.u32 %s2271_s9, 4  ;;  %s253_s14 = int_to_ptr.vmem [resolvable:$true] %s252_s14 }
  0x3d   : > { %s2116_s17 = scalar_lea.hbm %s2857_s1, 64 }
  0x3e   : > { %p2117_p9 = scmp.ne.s32.totalorder %s2857_s1, %s2116_s17  ;;  %p2123_p6 = scmp.lt.u32.totalorder %s2116_s17, %s2857_s1 }
  0x40   : > { %p2119_p2 = pnand %p2117_p9, %p2374_p8 }
  0x42   : > { %p2120_p3 = pneg %p2119_p2 }
  0x44   : > { %p2125_p10 = pnand %p2123_p6, %p2120_p3 }
  0x46   : > { %2128 = shalt.err (!%p2125_p10)
}
  0x47   : > { %s2129_s28 = scalar_lea.vmem %s232_s29, 64  ;;  %p2137_p0 = scmp.lt.s32.totalorder %s232_s29, %s232_s29 }
  0x48   : > { %p2130_p11 = scmp.ne.s32.totalorder %s232_s29, %s2129_s28  ;;  %p2138_p1 = scmp.lt.s32.totalorder %s2129_s28, %s2129_s28 }
  0x4a   : > { %p2132_p12 = pnand %p2130_p11, %p2374_p8  ;;  %p2139_p4 = por %p2138_p1, %p2137_p0 }
  0x4c   : > { %p2133_p13 = pneg %p2132_p12 }
  0x4e   : > { %p2140_p7 = pnand %p2139_p4, %p2133_p13 }
  0x50   : > { %2143 = shalt.err (!%p2140_p7)
}
  0x51   : > { %1974 = dma.hbm_to_vmem [thread:$0]  (!%p2355_p5), %s2857_s1, 64, %s232_s29, [#allocation3]  }
  0x52   : > { %s2144_s9 = scalar_lea.hbm %s2859_s3, 1024 }
  0x53   : > { %p2145_p9 = scmp.ne.s32.totalorder %s2859_s3, %s2144_s9  ;;  %p2151_p6 = scmp.lt.u32.totalorder %s2144_s9, %s2859_s3 }
  0x55   : > { %p2147_p2 = pnand %p2145_p9, %p2374_p8 }
  0x57   : > { %p2148_p3 = pneg %p2147_p2 }
  0x59   : > { %p2153_p10 = pnand %p2151_p6, %p2148_p3 }
  0x5b   : > { %2156 = shalt.err (!%p2153_p10)
}
  0x5c   : > { %s2157_s20 = scalar_lea.vmem %s253_s14, 1024  ;;  %p2165_p0 = scmp.lt.s32.totalorder %s253_s14, %s253_s14 }
  0x5d   : > { %p2158_p11 = scmp.ne.s32.totalorder %s253_s14, %s2157_s20  ;;  %p2166_p1 = scmp.lt.s32.totalorder %s2157_s20, %s2157_s20 }
  0x5f   : > { %p2160_p12 = pnand %p2158_p11, %p2374_p8  ;;  %p2167_p4 = por %p2166_p1, %p2165_p0 }
  0x61   : > { %p2161_p13 = pneg %p2160_p12 }
  0x63   : > { %p2168_p7 = pnand %p2167_p4, %p2161_p13 }
  0x65   : > { %2171 = shalt.err (!%p2168_p7)
}
  0x66   : > { %s2272_s29 = smov 128   ;;  %s2273_s10 = smov 8  }
  0x67   : > { %1980 = dma.hbm_to_vmem [thread:$0]  (!%p2355_p5), %s2859_s3, 1024, %s253_s14, [#allocation5], %s2272_s29, %s2272_s29, %s2273_s10  }
  0x68   : > { %s2274_s21 = smov [#allocation9]   ;;  %s2172_s9 = scalar_lea.hbm %s2861_s5, 16384 }
  0x69   : > { %s276_s22 = sshll.u32 %s2274_s21, 4  ;;  %p2173_p9 = scmp.ne.s32.totalorder %s2861_s5, %s2172_s9  ;;  %s277_s22 = int_to_ptr.vmem [resolvable:$true] %s276_s22 }
  0x6a   : > { %p2179_p6 = scmp.lt.u32.totalorder %s2172_s9, %s2861_s5 }
  0x6b   : > { %p2175_p2 = pnand %p2173_p9, %p2374_p8 }
  0x6d   : > { %p2176_p3 = pneg %p2175_p2 }
  0x6f   : > { %p2181_p10 = pnand %p2179_p6, %p2176_p3 }
  0x71   : > { %2184 = shalt.err (!%p2181_p10)
}
  0x72   : > { %s2185_s14 = scalar_lea.vmem %s277_s22, 16384  ;;  %p2193_p0 = scmp.lt.s32.totalorder %s277_s22, %s277_s22 }
  0x73   : > { %p2186_p11 = scmp.ne.s32.totalorder %s277_s22, %s2185_s14  ;;  %p2194_p1 = scmp.lt.s32.totalorder %s2185_s14, %s2185_s14 }
  0x75   : > { %p2188_p12 = pnand %p2186_p11, %p2374_p8  ;;  %p2195_p4 = por %p2194_p1, %p2193_p0 }
  0x77   : > { %p2189_p13 = pneg %p2188_p12 }
  0x79   : > { %p2196_p7 = pnand %p2195_p4, %p2189_p13 }
  0x7b   : > { %2199 = shalt.err (!%p2196_p7)
}
  0x7c   : > { %s2275_s20 = smov 1024   ;;  %s2276_s29 = smov 64  }
  0x7d   : > { %1986 = dma.hbm_to_vmem [thread:$0]  (!%p2355_p5), %s2861_s5, 16384, %s277_s22, [#allocation8], %s2275_s20, %s2275_s20, %s2276_s29  }
  0x7e   : > { %s2277_s28 = smov [#allocation10]   ;;  %s2200_s9 = scalar_lea.hbm %s2862_s6, 128 }
  0x7f   : > { %s290_s21 = sshll.u32 %s2277_s28, 4  ;;  %p2201_p9 = scmp.ne.s32.totalorder %s2862_s6, %s2200_s9  ;;  %s291_s21 = int_to_ptr.vmem [resolvable:$true] %s290_s21 }
  0x80   : > { %p2207_p6 = scmp.lt.u32.totalorder %s2200_s9, %s2862_s6 }
  0x81   : > { %p2203_p2 = pnand %p2201_p9, %p2374_p8 }
  0x83   : > { %p2204_p3 = pneg %p2203_p2 }
  0x85   : > { %p2209_p10 = pnand %p2207_p6, %p2204_p3 }
  0x87   : > { %2212 = shalt.err (!%p2209_p10)
}
  0x88   : > { %s2213_s22 = scalar_lea.vmem %s291_s21, 128  ;;  %p2221_p0 = scmp.lt.s32.totalorder %s291_s21, %s291_s21 }
  0x89   : > { %p2214_p11 = scmp.ne.s32.totalorder %s291_s21, %s2213_s22  ;;  %p2222_p1 = scmp.lt.s32.totalorder %s2213_s22, %s2213_s22 }
  0x8b   : > { %p2216_p12 = pnand %p2214_p11, %p2374_p8  ;;  %p2223_p4 = por %p2222_p1, %p2221_p0 }
  0x8d   : > { %p2217_p13 = pneg %p2216_p12 }
  0x8f   : > { %p2224_p7 = pnand %p2223_p4, %p2217_p13 }
  0x91   : > { %2227 = shalt.err (!%p2224_p7)
}
  0x92   : > { %1989 = dma.hbm_to_vmem [thread:$0]  (!%p2355_p5), %s2862_s6, 128, %s291_s21, [#allocation11]  }
  0x93   : > { %p2873_p9 = scmp.ne.s32.totalorder %s2868_s8, 0 }
  0x94   : > { %p2874_p2 = scmp.ne.s32.totalorder (!%p2873_p9), %s2867_s30, 0 }
  0x95   : > { %316 = sbr.rel (%p2873_p9) target bundleno = 876 (0x36c), region = 48 }
  0x9c   : > { %2241 = dma.done.wait (%p2874_p2), [#allocation3], 64  }
  0x9d   : > { %2243 = vsyncadd (%p2874_p2), [#allocation3], 4294967232 }
  0x9e   : > { %2245 = dma.done.wait (%p2874_p2), [#allocation5], 1040  }
  0x9f   : > { %2247 = vsyncadd (%p2874_p2), [#allocation5], 4294966256 }
  0xa0   : > { %2249 = dma.done.wait (%p2874_p2), [#allocation8], 16400  }
  0xa1   : > { %2251 = vsyncadd (%p2874_p2), [#allocation8], 4294950896 }
  0xa2   : > { %2253 = dma.done.wait (%p2874_p2), [#allocation11], 128  }
  0xa3   : > { %2255 = vsyncadd (%p2874_p2), [#allocation11], 4294967168  ;;  %p372_p5 = scmp.lt.s32.totalorder %s2258_s24, 1  ;;  %v2278_v0 = vmov 0   ;;  %v2279_v3 = vmov 1   ;;  %v573_v4 = vld [vmem:[#allocation6] sm:$0xff] }
  0xa4   : > { %2044 = vset.pattern.permute.xlu1 %v2278_v0  ;;  %2042 = vset.pattern.permute.xlu0 %v2278_v0  ;;  %v574_v5 = vld [vmem:[#allocation6 + $0x8] sm:$0xff]  ;;  %v575_v8 = vld [vmem:[#allocation6 + $0x10] sm:$0xff]  ;;  %v576_v9 = vld [vmem:[#allocation6 + $0x18] sm:$0xff]  ;;  %v2280_v10 = vmov 2   ;;  %vm588_vm0 = vcmask 523264  }
  0xa5   : > { %s2880_s24 = smov (!%p372_p5, %s2258_s24), 1  ;;  %v1787_v6 = vpack.c.bf16 %v574_v5, %v573_v4  ;;  %v1791_v11 = vpack.c.bf16 %v576_v9, %v575_v8  ;;  %v577_v13 = vld [vmem:[#allocation6 + $0x20] sm:$0xff]  ;;  %v578_v14 = vld [vmem:[#allocation6 + $0x28] sm:$0xff]  ;;  %v579_v16 = vld [vmem:[#allocation6 + $0x30] sm:$0xff]  ;;  %v434_v4 = vlaneseq }
  0xa6   : > { %s1742_s8 = sshll.u32 %s2880_s24, 6  ;;  %v1795_v15 = vpack.c.bf16 %v578_v14, %v577_v13  ;;  %v580_v17 = vld [vmem:[#allocation6 + $0x38] sm:$0xff]  ;;  %v727_v23 = vld [vmem:[#allocation9 + $0x8] sm:$0xff]  ;;  %v726_v28 = vld [vmem:[#allocation9] sm:$0xff]  ;;  %s1729_s30 = sshll.u32 %s2880_s24, 3 }
  0xa7   : > { %s2520_s29 = scalar_lea.vmem %s2856_s0, %s1742_s8  ;;  %1788 = vmatprep.subr.bf16.mxu0 %v1787_v6  ;;  %v1799_v18 = vpack.c.bf16 %v580_v17, %v579_v16  ;;  %v735_v24 = vld [vmem:[#allocation9 + $0x48] sm:$0xff]  ;;  %v729_v25 = vld [vmem:[#allocation9 + $0x18] sm:$0xff]  ;;  %v734_v29 = vld [vmem:[#allocation9 + $0x40] sm:$0xff]  ;;  %v2535_v5 = vshrl.u32 %v434_v4, 7  ;;  %s384_s28 = scalar_lea.vmem %s2863_s7, %s1729_s30 }
  0xa8   : > { %v386_v1 = vld [vmem:[%s2520_s29 + $0x8] sm:$0xff]  ;;  %v385_v2 = vld [vmem:[%s2520_s29] sm:$0xff]  ;;  %v388_v7 = vld [vmem:[%s2520_s29 + $0x18] sm:$0xff]  ;;  %1790 = vmatpush3.bf16.msra.mxu0 %v1787_v6  ;;  %v1803_v26 = vpack.c.bf16 %v735_v24, %v727_v23  ;;  %v1805_v31 = vpack.c.bf16 %v734_v29, %v726_v28 }
  0xa9   : > { %401 = vperm.xlu1 %2044, %v386_v1   ;;  %396 = vperm.xlu0 %2042, %v385_v2   ;;  %v387_v12 = vld [vmem:[%s2520_s29 + $0x10] sm:$0xff]  ;;  %v390_v19 = vld [vmem:[%s2520_s29 + $0x28] sm:$0xff]  ;;  %v392_v20 = vld [vmem:[%s2520_s29 + $0x38] sm:$0xff]  ;;  %v436_v6 = vsub.s32 0, %v2535_v5 }
  0xaa   : > { %1792 = vmatprep.subr.bf16.mxu0 %v1791_v11  ;;  %v389_v21 = vld [vmem:[%s2520_s29 + $0x20] sm:$0xff]  ;;  %v391_v22 = vld [vmem:[%s2520_s29 + $0x30] sm:$0xff]  ;;  %1804 = vmatprep.subr.bf16.mxu1 %v1803_v26  ;;  %v742_v35 = vld [vmem:[#allocation9 + $0x80] sm:$0xff] }
  0xab   : > { %v737_v27 = vld [vmem:[#allocation9 + $0x58] sm:$0xff]  ;;  %v743_v32 = vld [vmem:[#allocation9 + $0x88] sm:$0xff]  ;;  %1806 = vmatpush1.bf16.msra.mxu1 %v1805_v31  ;;  %v750_v36 = vld [vmem:[#allocation9 + $0xc0] sm:$0xff] }
  0xac   : > { %1794 = vmatpush3.bf16.msra.mxu0 %v1791_v11  ;;  %v1835_v30 = vpack.c.bf16 %v737_v27, %v729_v25  ;;  %v751_v33 = vld [vmem:[#allocation9 + $0xc8] sm:$0xff]  ;;  %v1809_v37 = vpack.c.bf16 %v750_v36, %v742_v35  ;;  %v758_v41 = vld [vmem:[#allocation9 + $0x100] sm:$0xff]  ;;  %v2556_v24 = vld [vmem:[#allocation4] ss:$0 sm:$0xff] }
  0xad   : > { %2045 = vset.pattern.permute.xlu1 %v2279_v3  ;;  %2043 = vset.pattern.permute.xlu0 %v2279_v3  ;;  %v1807_v34 = vpack.c.bf16 %v751_v33, %v743_v32  ;;  %v759_v38 = vld [vmem:[#allocation9 + $0x108] sm:$0xff]  ;;  %v766_v42 = vld [vmem:[#allocation9 + $0x140] sm:$0xff]  ;;  %v736_v35 = vld [vmem:[#allocation9 + $0x50] sm:$0xff] }
  0xae   : > { %451 = vperm.xlu1 %2045, %v386_v1   ;;  %447 = vperm.xlu0 %2043, %v385_v2   ;;  %v767_v39 = vld [vmem:[#allocation9 + $0x148] sm:$0xff]  ;;  %v1813_v43 = vpack.c.bf16 %v766_v42, %v758_v41  ;;  %v774_v47 = vld [vmem:[#allocation9 + $0x180] sm:$0xff]  ;;  %v745_v36 = vld [vmem:[#allocation9 + $0x98] sm:$0xff] }
  0xaf   : > { %1796 = vmatprep.subr.bf16.mxu0 %v1795_v15  ;;  %1808 = vmatprep.subr.bf16.mxu1 %v1807_v34  ;;  %v1811_v40 = vpack.c.bf16 %v767_v39, %v759_v38  ;;  %v775_v44 = vld [vmem:[#allocation9 + $0x188] sm:$0xff]  ;;  %v782_v48 = vld [vmem:[#allocation9 + $0x1c0] sm:$0xff]  ;;  %v728_v34 = vld [vmem:[#allocation9 + $0x10] sm:$0xff] }
  0xb0   : > { %1798 = vmatpush3.bf16.msra.mxu0 %v1795_v15  ;;  %1810 = vmatpush1.bf16.msra.mxu1 %v1809_v37  ;;  %v783_v45 = vld [vmem:[#allocation9 + $0x1c8] sm:$0xff]  ;;  %v1817_v51 = vpack.c.bf16 %v782_v48, %v774_v47  ;;  %v790_v53 = vld [vmem:[#allocation9 + $0x200] sm:$0xff]  ;;  %v753_v37 = vld [vmem:[#allocation9 + $0xd8] sm:$0xff] }
  0xb1   : > { %1800 = vmatprep.subr.bf16.mxu0 %v1799_v18  ;;  %1812 = vmatprep.subr.bf16.mxu1 %v1811_v40  ;;  %v1815_v46 = vpack.c.bf16 %v783_v45, %v775_v44  ;;  %v791_v49 = vld [vmem:[#allocation9 + $0x208] sm:$0xff]  ;;  %v798_v54 = vld [vmem:[#allocation9 + $0x240] sm:$0xff]  ;;  %v1837_v40 = vpack.c.bf16 %v736_v35, %v728_v34  ;;  %v744_v44 = vld [vmem:[#allocation9 + $0x90] sm:$0xff] }
  0xb2   : > { %2046 = vset.pattern.permute.xlu1 %v2280_v10  ;;  %2049 = vset.pattern.permute.xlu0 %v2278_v0  ;;  %v799_v50 = vld [vmem:[#allocation9 + $0x248] sm:$0xff]  ;;  %v1821_v57 = vpack.c.bf16 %v798_v54, %v790_v53  ;;  %v806_v59 = vld [vmem:[#allocation9 + $0x280] sm:$0xff]  ;;  %v752_v45 = vld [vmem:[#allocation9 + $0xd0] sm:$0xff] }
  0xb3   : > { %499 = vperm.xlu1 %2046, %v385_v2   ;;  %411 = vperm.xlu0 %2049, %v388_v7   ;;  %v1819_v52 = vpack.c.bf16 %v799_v50, %v791_v49  ;;  %v807_v55 = vld [vmem:[#allocation9 + $0x288] sm:$0xff]  ;;  %v814_v60 = vld [vmem:[#allocation9 + $0x2c0] sm:$0xff]  ;;  %v761_v47 = vld [vmem:[#allocation9 + $0x118] sm:$0xff] }
  0xb4   : > { %1802 = vmatpush3.bf16.msra.mxu0 %v1799_v18  ;;  %1814 = vmatpush1.bf16.msra.mxu1 %v1813_v43  ;;  %v815_v56 = vld [vmem:[#allocation9 + $0x2c8] sm:$0xff]  ;;  %v1825_v63 = vpack.c.bf16 %v814_v60, %v806_v59  ;;  %v830_v2 = vld [vmem:[#allocation9 + $0x340] sm:$0xff]  ;;  %v1839_v43 = vpack.c.bf16 %v753_v37, %v745_v36  ;;  %v769_v48 = vld [vmem:[#allocation9 + $0x158] sm:$0xff] }
  0xb5   : > { %1836 = vmatprep.subr.bf16.mxu0 %v1835_v30  ;;  %1816 = vmatprep.subr.bf16.mxu1 %v1815_v46  ;;  %v1823_v58 = vpack.c.bf16 %v815_v56, %v807_v55  ;;  %v823_v61 = vld [vmem:[#allocation9 + $0x308] sm:$0xff]  ;;  %v1843_v54 = vpack.c.bf16 %v769_v48, %v761_v47  ;;  %v760_v55 = vld [vmem:[#allocation9 + $0x110] sm:$0xff]  ;;  %v785_v59 = vld [vmem:[#allocation9 + $0x1d8] sm:$0xff] }
  0xb6   : > { %v831_v62 = vld [vmem:[#allocation9 + $0x348] sm:$0xff]  ;;  %v768_v56 = vld [vmem:[#allocation9 + $0x150] sm:$0xff]  ;;  %v825_v34 = vld [vmem:[#allocation9 + $0x318] sm:$0xff] }
  0xb7   : > { %2047 = vset.pattern.permute.xlu1 %v2278_v0  ;;  %2050 = vset.pattern.permute.xlu0 %v2280_v10  ;;  %v784_v4 = vld [vmem:[#allocation9 + $0x1d0] sm:$0xff]  ;;  %v833_v35 = vld [vmem:[#allocation9 + $0x358] sm:$0xff] }
  0xb8   : > { %406 = vperm.xlu1 %2047, %v387_v12   ;;  %503 = vperm.xlu0 %2050, %v386_v1   ;;  %v822_v1 = vld [vmem:[#allocation9 + $0x300] sm:$0xff] }
  0xb9   : > { %1818 = vmatpush1.bf16.msra.mxu1 %v1817_v51 }
  0xba   : > { %1820 = vmatprep.subr.bf16.mxu1 %v1819_v52  ;;  %v1841_v52 = vpack.c.bf16 %v752_v45, %v744_v44 }
  0xbc   : > { %2048 = vset.pattern.permute.xlu1 %v2279_v3  ;;  %511 = vperm.xlu0 %2050, %v388_v7  }
  0xbd   : > { %455 = vperm.xlu1 %2048, %v387_v12   ;;  %1822 = vmatpush1.bf16.msra.mxu1 %v1821_v57 }
  0xbe   : > { %1824 = vmatprep.subr.bf16.mxu1 %v1823_v58  ;;  %v777_v58 = vld [vmem:[#allocation9 + $0x198] sm:$0xff] }
  0xc0   : > { %519 = vperm.xlu0 %2050, %v390_v19  }
  0xc1   : > { %459 = vperm.xlu1 %2048, %v388_v7   ;;  %1826 = vmatpush1.bf16.msra.mxu1 %v1825_v63  ;;  %v393_v7 = vld [vmem:[#allocation2] sm:$0x7]  ;;  %v1845_v63 = vpack.c.bf16 %v768_v56, %v760_v55 }
  0xc2   : > { %v2541_v11 = vrot.slane %v393_v7, %v436_v6 }
  0xc4   : > { %2055 = vset.pattern.permute.xlu0 %v2278_v0 }
  0xc5   : > { %2051 = vset.pattern.permute.xlu1 %v2280_v10  ;;  %421 = vperm.xlu0 %2055, %v390_v19  }
  0xc6   : > { %507 = vperm.xlu1 %2051, %v387_v12   ;;  %v532_v12 = vsub.s32 2, %v2535_v5 }
  0xc8   : > { %v2552_v18 = vrot.slane %v393_v7, %v532_v12 }
  0xc9   : > { %431 = vperm.xlu0 %2055, %v392_v20  }
  0xca   : > { %2052 = vset.pattern.permute.xlu1 %v2278_v0 }
  0xcb   : > { %416 = vperm.xlu1 %2052, %v389_v21  }
  0xcd   : > { %2059 = vset.pattern.permute.xlu0 %v2280_v10 }
  0xce   : > { %527 = vperm.xlu0 %2059, %v392_v20  }
  0xcf   : > { %2053 = vset.pattern.permute.xlu1 %v2279_v3 }
  0xd0   : > { %463 = vperm.xlu1 %2053, %v389_v21  }
  0xd4   : > { %467 = vperm.xlu1 %2053, %v390_v19  }
  0xd8   : > { %2054 = vset.pattern.permute.xlu1 %v2280_v10 }
  0xd9   : > { %515 = vperm.xlu1 %2054, %v389_v21  }
  0xdd   : > { %2056 = vset.pattern.permute.xlu1 %v2278_v0  ;;  %v1827_v0 = vpack.c.bf16 %v831_v62, %v823_v61 }
  0xde   : > { %426 = vperm.xlu1 %2056, %v391_v22  }
  0xdf   : > { %1828 = vmatprep.subr.bf16.mxu1 %v1827_v0 }
  0xe2   : > { %2057 = vset.pattern.permute.xlu1 %v2279_v3  ;;  %v1829_v3 = vpack.c.bf16 %v830_v2, %v822_v1  ;;  %v1847_v2 = vpack.c.bf16 %v785_v59, %v777_v58 }
  0xe3   : > { %471 = vperm.xlu1 %2057, %v391_v22  }
  0xe4   : > { %1830 = vmatpush1.bf16.msra.mxu1 %v1829_v3  ;;  %v776_v3 = vld [vmem:[#allocation9 + $0x190] sm:$0xff] }
  0xe7   : > { %475 = vperm.xlu1 %2057, %v392_v20  }
  0xeb   : > { %2058 = vset.pattern.permute.xlu1 %v2280_v10  ;;  %v480_v10 = vsub.s32 1, %v2535_v5 }
  0xec   : > { %523 = vperm.xlu1 %2058, %v391_v22  }
  0xed   : > { %v2546_v13 = vrot.slane %v393_v7, %v480_v10  ;;  %v793_v7 = vld [vmem:[#allocation9 + $0x218] sm:$0xff] }
 0x128   : > { %v402_v8 = vpop.permute.xlu1 %401  ;;  %v397_v9 = vpop.permute.xlu0 %396 }
 0x129   : > { %v438_v14 = vmul.f32 %v2541_v11, %v397_v9  ;;  %v439_v26 = vmul.f32 %v2541_v11, %v402_v8  ;;  %v801_v8 = vld [vmem:[#allocation9 + $0x258] sm:$0xff] }
 0x12d   : > { %v452_v15 = vpop.permute.xlu1 %451  ;;  %v448_v16 = vpop.permute.xlu0 %447 }
 0x12e   : > { %v482_v17 = vmul.f32 %v2546_v13, %v448_v16  ;;  %v483_v23 = vmul.f32 %v2546_v13, %v452_v15  ;;  %v1849_v16 = vpack.c.bf16 %v784_v4, %v776_v3 }
 0x130   : > { %v490_v19 = vadd.f32 %v482_v17, %v438_v14  ;;  %v491_v30 = vadd.f32 %v483_v23, %v439_v26  ;;  %v809_v23 = vld [vmem:[#allocation9 + $0x298] sm:$0xff] }
 0x132   : > { %v500_v20 = vpop.permute.xlu1 %499  ;;  %v412_v21 = vpop.permute.xlu0 %411 }
 0x133   : > { %v534_v22 = vmul.f32 %v2552_v18, %v500_v20  ;;  %v441_v46 = vmul.f32 %v2541_v11, %v412_v21  ;;  %v1851_v20 = vpack.c.bf16 %v801_v8, %v793_v7  ;;  %v792_v21 = vld [vmem:[#allocation9 + $0x210] sm:$0xff] }
 0x135   : > { %v542_v25 = vadd.f32 %v534_v22, %v490_v19  ;;  %v800_v22 = vld [vmem:[#allocation9 + $0x250] sm:$0xff] }
 0x137   : > { %v407_v27 = vpop.permute.xlu1 %406  ;;  %v504_v28 = vpop.permute.xlu0 %503  ;;  %v557_v29 = vadd.f32 %v2556_v24, %v542_v25  ;;  %v817_v25 = vld [vmem:[#allocation9 + $0x2d8] sm:$0xff] }
 0x138   : > { %v535_v31 = vmul.f32 %v2552_v18, %v504_v28  ;;  %v440_v60 = vmul.f32 %v2541_v11, %v407_v27  ;;  %v1853_v28 = vpack.c.bf16 %v800_v22, %v792_v21  ;;  %v841_v21 = vld [vmem:[#allocation9 + $0x398] sm:$0xff] }
 0x139   : > { %v565_v32 = vmax.f32 %v557_v29, 0.0  ;;  %v1855_v29 = vpack.c.bf16 %v817_v25, %v809_v23  ;;  %v849_v22 = vld [vmem:[#allocation9 + $0x3d8] sm:$0xff]  ;;  %v838_v23 = vld [vmem:[#allocation9 + $0x380] sm:$0xff] }
 0x13a   : > { %v543_v33 = vadd.f32 %v535_v31, %v491_v30  ;;  %v808_v30 = vld [vmem:[#allocation9 + $0x290] sm:$0xff]  ;;  %v1863_v25 = vpack.c.bf16 %v849_v22, %v841_v21  ;;  %v786_v21 = vld [vmem:[#allocation9 + $0x1e0] sm:$0xff] }
 0x13b   : > { %1775 = vmatprep.mubr.msk.f32.mxu0 %vm588_vm0, %v565_v32  ;;  %v512_v42 = vpop.permute.xlu0 %511  ;;  %v816_v31 = vld [vmem:[#allocation9 + $0x2d0] sm:$0xff] }
 0x13c   : > { %v558_v38 = vadd.f32 %v2556_v24, %v543_v33  ;;  %v456_v39 = vpop.permute.xlu1 %455  ;;  %v537_v51 = vmul.f32 %v2552_v18, %v512_v42  ;;  %v1857_v36 = vpack.c.bf16 %v816_v31, %v808_v30  ;;  %v731_v30 = vld [vmem:[#allocation9 + $0x28] sm:$0xff]  ;;  %v780_v22 = vld [vmem:[#allocation9 + $0x1b0] sm:$0xff] }
 0x13d   : > { %v484_v53 = vmul.f32 %v2546_v13, %v456_v39  ;;  %v824_v39 = vld [vmem:[#allocation9 + $0x310] sm:$0xff]  ;;  %v739_v31 = vld [vmem:[#allocation9 + $0x68] sm:$0xff] }
 0x13e   : > { %v566_v41 = vmax.f32 %v558_v38, 0.0  ;;  %v1859_v38 = vpack.c.bf16 %v833_v35, %v825_v34  ;;  %v741_v34 = vld [vmem:[#allocation9 + $0x78] sm:$0xff] }
 0x13f   : > { %v492_v0 = vadd.f32 %v484_v53, %v440_v60  ;;  %v520_v15 = vpop.permute.xlu0 %519 }
 0x140   : > { %v460_v49 = vpop.permute.xlu1 %459  ;;  %1776 = vmatmul.mubr.msk.f32.vlgmr.msra.gmra.mrb[0].mxu0 %vm588_vm0, %v566_v41  ;;  %v539_v42 = vmul.f32 %v2552_v18, %v520_v15 }
 0x141   : > { %v485_v50 = vmul.f32 %v2546_v13, %v460_v49  ;;  %1838 = vmatpush1.bf16.msra.mxu0 %v1837_v40  ;;  %v832_v40 = vld [vmem:[#allocation9 + $0x350] sm:$0xff] }
 0x142   : > { %1840 = vmatprep.subr.bf16.mxu0 %v1839_v43  ;;  %v1861_v45 = vpack.c.bf16 %v832_v40, %v824_v39  ;;  %v738_v39 = vld [vmem:[#allocation9 + $0x60] sm:$0xff] }
 0x143   : > { %v493_v57 = vadd.f32 %v485_v50, %v441_v46 }
 0x144   : > { %v422_v33 = vpop.permute.xlu0 %421 }
 0x145   : > { %v545_v61 = vadd.f32 %v537_v51, %v493_v57  ;;  %v508_v62 = vpop.permute.xlu1 %507  ;;  %1842 = vmatpush1.bf16.msra.mxu0 %v1841_v52  ;;  %v443_v37 = vmul.f32 %v2541_v11, %v422_v33  ;;  %v1867_v33 = vpack.c.bf16 %v739_v31, %v731_v30  ;;  %v794_v30 = vld [vmem:[#allocation9 + $0x220] sm:$0xff]  ;;  %v797_v31 = vld [vmem:[#allocation9 + $0x238] sm:$0xff] }
 0x146   : > { %v536_v1 = vmul.f32 %v2552_v18, %v508_v62  ;;  %1844 = vmatprep.subr.bf16.mxu0 %v1843_v54 }
 0x147   : > { %v560_v14 = vadd.f32 %v2556_v24, %v545_v61 }
 0x148   : > { %v544_v9 = vadd.f32 %v536_v1, %v492_v0  ;;  %v432_v58 = vpop.permute.xlu0 %431 }
 0x149   : > { %1846 = vmatpush1.bf16.msra.mxu0 %v1845_v63  ;;  %v568_v27 = vmax.f32 %v560_v14, 0.0  ;;  %v445_v62 = vmul.f32 %v2541_v11, %v432_v58  ;;  %v763_v58 = vld [vmem:[#allocation9 + $0x128] sm:$0xff] }
 0x14a   : > { %v559_v17 = vadd.f32 %v2556_v24, %v544_v9  ;;  %v417_v19 = vpop.permute.xlu1 %416  ;;  %1848 = vmatprep.subr.bf16.mxu0 %v1847_v2 }
 0x14b   : > { %v442_v47 = vmul.f32 %v2541_v11, %v417_v19 }
 0x14c   : > { %v567_v26 = vmax.f32 %v559_v17, 0.0 }
 0x14d   : > { %1850 = vmatpush1.bf16.msra.mxu0 %v1849_v16  ;;  %v528_v60 = vpop.permute.xlu0 %527 }
 0x14e   : > { %1778 = vmatprep.mubr.msk.f32.mxu0 %vm588_vm0, %v567_v26  ;;  %1852 = vmatprep.subr.bf16.mxu0 %v1851_v20  ;;  %v541_v0 = vmul.f32 %v2552_v18, %v528_v60  ;;  %v847_v20 = vld [vmem:[#allocation9 + $0x3c8] sm:$0xff]  ;;  %v846_v26 = vld [vmem:[#allocation9 + $0x3c0] sm:$0xff]  ;;  %v765_v60 = vld [vmem:[#allocation9 + $0x138] sm:$0xff] }
 0x14f   : > { %v464_v32 = vpop.permute.xlu1 %463  ;;  %1779 = vmatmul.mubr.msk.f32.gmra.mrb[2].mxu0 %vm588_vm0, %v568_v27  ;;  %v848_v27 = vld [vmem:[#allocation9 + $0x3d0] sm:$0xff] }
 0x150   : > { %v486_v44 = vmul.f32 %v2546_v13, %v464_v32  ;;  %v733_v32 = vld [vmem:[#allocation9 + $0x38] sm:$0xff] }
 0x151   : > { %1854 = vmatpush1.bf16.msra.mxu0 %v1853_v28  ;;  %v1833_v28 = vpack.c.bf16 %v846_v26, %v838_v23  ;;  %v2596_v35 = vpack.c.bf16 %v741_v34, %v733_v32  ;;  %v788_v23 = vld [vmem:[#allocation9 + $0x1f0] sm:$0xff]  ;;  %v795_v26 = vld [vmem:[#allocation9 + $0x228] sm:$0xff]  ;;  %v805_v32 = vld [vmem:[#allocation9 + $0x278] sm:$0xff] }
 0x152   : > { %1856 = vmatprep.subr.bf16.mxu0 %v1855_v29  ;;  %v494_v50 = vadd.f32 %v486_v44, %v442_v47  ;;  %v757_v47 = vld [vmem:[#allocation9 + $0xf8] sm:$0xff]  ;;  %v802_v34 = vld [vmem:[#allocation9 + $0x260] sm:$0xff] }
 0x153   : > { %v468_v41 = vpop.permute.xlu1 %467 }
 0x154   : > { %v487_v43 = vmul.f32 %v2546_v13, %v468_v41  ;;  %v732_v41 = vld [vmem:[#allocation9 + $0x30] sm:$0xff] }
 0x155   : > { %1858 = vmatpush1.bf16.msra.mxu0 %v1857_v36  ;;  %v2599_v36 = vld [vmem:[#allocation7] ss:$0 sm:$0xff] }
 0x156   : > { %v495_v46 = vadd.f32 %v487_v43, %v443_v37  ;;  %1860 = vmatprep.subr.bf16.mxu0 %v1859_v38  ;;  %v730_v38 = vld [vmem:[#allocation9 + $0x20] sm:$0xff]  ;;  %v747_v43 = vld [vmem:[#allocation9 + $0xa8] sm:$0xff] }
 0x158   : > { %v547_v48 = vadd.f32 %v539_v42, %v495_v46  ;;  %v516_v49 = vpop.permute.xlu1 %515  ;;  %v740_v42 = vld [vmem:[#allocation9 + $0x70] sm:$0xff]  ;;  %v749_v46 = vld [vmem:[#allocation9 + $0xb8] sm:$0xff] }
 0x159   : > { %v538_v51 = vmul.f32 %v2552_v18, %v516_v49  ;;  %1862 = vmatpush1.bf16.msra.mxu0 %v1861_v45  ;;  %v755_v45 = vld [vmem:[#allocation9 + $0xe8] sm:$0xff] }
 0x15a   : > { %v562_v53 = vadd.f32 %v2556_v24, %v547_v48  ;;  %1864 = vmatprep.subr.bf16.mxu0 %v1863_v25 }
 0x15b   : > { %v546_v52 = vadd.f32 %v538_v51, %v494_v50  ;;  %v1869_v50 = vpack.c.bf16 %v738_v39, %v730_v38  ;;  %v2605_v51 = vpack.c.bf16 %v740_v42, %v732_v41  ;;  %v804_v38 = vld [vmem:[#allocation9 + $0x270] sm:$0xff]  ;;  %v2639_v42 = vpack.c.bf16 %v805_v32, %v797_v31 }
 0x15c   : > { %v570_v57 = vmax.f32 %v562_v53, 0.0  ;;  %v754_v53 = vld [vmem:[#allocation9 + $0xe0] sm:$0xff] }
 0x15d   : > { %v561_v54 = vadd.f32 %v2556_v24, %v546_v52  ;;  %v427_v55 = vpop.permute.xlu1 %426  ;;  %v746_v52 = vld [vmem:[#allocation9 + $0xa0] sm:$0xff] }
 0x15e   : > { %v444_v3 = vmul.f32 %v2541_v11, %v427_v55  ;;  %v2607_v55 = vpack.c.bf16 %v757_v47, %v749_v46  ;;  %v1885_v46 = vpack.c.bf16 %v802_v34, %v794_v30 }
 0x15f   : > { %v569_v56 = vmax.f32 %v561_v54, 0.0  ;;  %v1871_v54 = vpack.c.bf16 %v755_v45, %v747_v43  ;;  %v811_v43 = vld [vmem:[#allocation9 + $0x2a8] sm:$0xff]  ;;  %v813_v45 = vld [vmem:[#allocation9 + $0x2b8] sm:$0xff] }
 0x161   : > { %1781 = vmatprep.mubr.msk.f32.mxu0 %vm588_vm0, %v569_v56  ;;  %v748_v56 = vld [vmem:[#allocation9 + $0xb0] sm:$0xff] }
 0x162   : > { %v472_v59 = vpop.permute.xlu1 %471  ;;  %1782 = vmatmul.mubr.msk.f32.gmra.mrb[4].mxu0 %vm588_vm0, %v570_v57  ;;  %v756_v57 = vld [vmem:[#allocation9 + $0xf0] sm:$0xff] }
 0x163   : > { %v488_v1 = vmul.f32 %v2546_v13, %v472_v59  ;;  %v771_v59 = vld [vmem:[#allocation9 + $0x168] sm:$0xff] }
 0x165   : > { %v496_v8 = vadd.f32 %v488_v1, %v444_v3  ;;  %v762_v1 = vld [vmem:[#allocation9 + $0x120] sm:$0xff]  ;;  %v1875_v3 = vpack.c.bf16 %v771_v59, %v763_v58  ;;  %v829_v58 = vld [vmem:[#allocation9 + $0x338] sm:$0xff] }
 0x166   : > { %v476_v61 = vpop.permute.xlu1 %475  ;;  %v837_v59 = vld [vmem:[#allocation9 + $0x378] sm:$0xff] }
 0x167   : > { %v489_v63 = vmul.f32 %v2546_v13, %v476_v61  ;;  %v839_v13 = vld [vmem:[#allocation9 + $0x388] sm:$0xff]  ;;  %v773_v61 = vld [vmem:[#allocation9 + $0x178] sm:$0xff] }
 0x168   : > { %v1831_v11 = vpack.c.bf16 %v847_v20, %v839_v13  ;;  %v778_v13 = vld [vmem:[#allocation9 + $0x1a0] sm:$0xff] }
 0x169   : > { %v497_v2 = vadd.f32 %v489_v63, %v445_v62  ;;  %v1873_v63 = vpack.c.bf16 %v754_v53, %v746_v52  ;;  %v821_v52 = vld [vmem:[#allocation9 + $0x2f8] sm:$0xff]  ;;  %v812_v53 = vld [vmem:[#allocation9 + $0x2b0] sm:$0xff] }
 0x16a   : > { %1832 = vmatprep.subr.bf16.mxu1 %v1831_v11 }
 0x16b   : > { %v549_v4 = vadd.f32 %v541_v0, %v497_v2  ;;  %v524_v7 = vpop.permute.xlu1 %523  ;;  %1834 = vmatpush1.bf16.msra.mxu1 %v1833_v28  ;;  %v2616_v0 = vpack.c.bf16 %v756_v57, %v748_v56  ;;  %v770_v2 = vld [vmem:[#allocation9 + $0x160] sm:$0xff]  ;;  %v1881_v28 = vpack.c.bf16 %v786_v21, %v778_v13  ;;  %v827_v56 = vld [vmem:[#allocation9 + $0x328] sm:$0xff]  ;;  %v845_v13 = vld [vmem:[#allocation9 + $0x3b8] sm:$0xff] }
 0x16c   : > { %v540_v9 = vmul.f32 %v2552_v18, %v524_v7  ;;  %v840_v18 = vld [vmem:[#allocation9 + $0x390] sm:$0xff]  ;;  %1868 = vmatprep.subr.bf16.mxu1 %v1867_v33  ;;  %v835_v57 = vld [vmem:[#allocation9 + $0x368] sm:$0xff] }
 0x16d   : > { %v564_v15 = vadd.f32 %v2556_v24, %v549_v4  ;;  %v1865_v29 = vpack.c.bf16 %v848_v27, %v840_v18  ;;  %v2619_v4 = vpack.c.bf16 %v773_v61, %v765_v60  ;;  %v764_v7 = vld [vmem:[#allocation9 + $0x130] sm:$0xff]  ;;  %v803_v18 = vld [vmem:[#allocation9 + $0x268] sm:$0xff] }
 0x16e   : > { %v548_v14 = vadd.f32 %v540_v9, %v496_v8  ;;  %v772_v8 = vld [vmem:[#allocation9 + $0x170] sm:$0xff]  ;;  %v779_v9 = vld [vmem:[#allocation9 + $0x1a8] sm:$0xff]  ;;  %v1883_v41 = vpack.c.bf16 %v803_v18, %v795_v26  ;;  %v850_v26 = vld [vmem:[#allocation9 + $0x3e0] sm:$0xff] }
 0x16f   : > { %v572_v19 = vmax.f32 %v564_v15, 0.0  ;;  %1866 = vmatpush1.bf16.msra.mxu0 %v1865_v29  ;;  %v781_v15 = vld [vmem:[#allocation9 + $0x1b8] sm:$0xff]  ;;  %v2632_v29 = vpack.c.bf16 %v788_v23, %v780_v22  ;;  %v842_v23 = vld [vmem:[#allocation9 + $0x3a0] sm:$0xff] }
 0x170   : > { %v563_v16 = vadd.f32 %v2556_v24, %v548_v14  ;;  %v2281_v24 = vmov 0.0   ;;  %1900 = vmatprep.subr.bf16.mxu0 %v2596_v35  ;;  %v787_v14 = vld [vmem:[#allocation9 + $0x1e8] sm:$0xff]  ;;  %v1897_v30 = vpack.c.bf16 %v850_v26, %v842_v23 }
 0x171   : > { %960 = vmatprep.mubr.f32.mxu1 %v2281_v24  ;;  %v1879_v20 = vpack.c.bf16 %v787_v14, %v779_v9  ;;  %v2658_v9 = vpack.c.bf16 %v837_v59, %v829_v58  ;;  %v828_v14 = vld [vmem:[#allocation9 + $0x330] sm:$0xff] }
 0x172   : > { %v571_v17 = vmax.f32 %v563_v16, 0.0  ;;  %v789_v16 = vld [vmem:[#allocation9 + $0x1f8] sm:$0xff] }
 0x173   : > { %v2629_v11 = vpack.c.bf16 %v789_v16, %v781_v15  ;;  %v836_v15 = vld [vmem:[#allocation9 + $0x370] sm:$0xff]  ;;  %v843_v16 = vld [vmem:[#allocation9 + $0x3a8] sm:$0xff] }
 0x174   : > { %1784 = vmatprep.mubr.msk.f32.mxu0 %vm588_vm0, %v571_v17  ;;  %v1877_v17 = vpack.c.bf16 %v770_v2, %v762_v1  ;;  %v2664_v22 = vpack.c.bf16 %v836_v15, %v828_v14 }
 0x175   : > { %1785 = vmatmul.mubr.msk.f32.gmra.mrb[6].mxu0 %vm588_vm0, %v572_v19  ;;  %v2626_v19 = vpack.c.bf16 %v772_v8, %v764_v7  ;;  %v834_v7 = vld [vmem:[#allocation9 + $0x360] sm:$0xff]  ;;  %v1891_v8 = vpack.c.bf16 %v835_v57, %v827_v56 }
 0x176   : > { %1073 = vmatprep.mubr.f32.mxu0 %v2281_v24 }
 0x213   : > { %v1777_v37 = vpop.f32.mrb[0].mxu0 }
 0x214   : > { %v679_v40 = vpop.f32.mrb[1].mxu0  ;;  %v685_v48 = vadd.f32 %v1777_v37, %v2599_v36  ;;  %v796_v37 = vld [vmem:[#allocation9 + $0x230] sm:$0xff] }
 0x215   : > { %v680_v44 = vadd.f32 %v2599_v36, %v679_v40  ;;  %v2642_v47 = vpack.c.bf16 %v804_v38, %v796_v37 }
 0x216   : > { %v2613_v62 = vmax.f32 %v685_v48, 0.0  ;;  %v810_v48 = vld [vmem:[#allocation9 + $0x2a0] sm:$0xff] }
 0x217   : > { %v2603_v49 = vmax.f32 %v680_v44, 0.0  ;;  %v819_v44 = vld [vmem:[#allocation9 + $0x2e8] sm:$0xff] }
 0x218   : > { %v1887_v61 = vpack.c.bf16 %v819_v44, %v811_v43 }
 0x219   : > { %961 = vmatmul.mubr.f32.vlgmr.msra.gmra.mrb[0].mxu1 %v2603_v49  ;;  %1074 = vmatmul.mubr.f32.vlgmr.msra.gmra.mrb[8].mxu0 %v2603_v49 }
 0x21a   : > { %966 = vmatprep.mubr.f32.mxu1 %v2281_v24  ;;  %1079 = vmatprep.mubr.f32.mxu0 %v2281_v24 }
 0x21b   : > { %1870 = vmatpush1.bf16.msra.mxu1 %v1869_v50  ;;  %1902 = vmatpush1.bf16.msra.mxu0 %v2605_v51  ;;  %v818_v50 = vld [vmem:[#allocation9 + $0x2e0] sm:$0xff] }
 0x21c   : > { %1872 = vmatprep.subr.bf16.mxu1 %v1871_v54  ;;  %1904 = vmatprep.subr.bf16.mxu0 %v2607_v55  ;;  %v820_v54 = vld [vmem:[#allocation9 + $0x2f0] sm:$0xff]  ;;  %v1889_v1 = vpack.c.bf16 %v818_v50, %v810_v48 }
 0x21d   : > { %967 = vmatmul.mubr.f32.gmra.mrb[2].mxu1 %v2613_v62  ;;  %1080 = vmatmul.mubr.f32.gmra.mrb[10].mxu0 %v2613_v62  ;;  %v2654_v2 = vpack.c.bf16 %v820_v54, %v812_v53 }
 0x21e   : > { %972 = vmatprep.mubr.f32.mxu1 %v2281_v24  ;;  %1085 = vmatprep.mubr.f32.mxu0 %v2281_v24 }
 0x21f   : > { %1874 = vmatpush1.bf16.msra.mxu1 %v1873_v63  ;;  %1906 = vmatpush1.bf16.msra.mxu0 %v2616_v0  ;;  %v2651_v63 = vpack.c.bf16 %v821_v52, %v813_v45 }
 0x220   : > { %1876 = vmatprep.subr.bf16.mxu1 %v1875_v3  ;;  %1908 = vmatprep.subr.bf16.mxu0 %v2619_v4  ;;  %v826_v3 = vld [vmem:[#allocation9 + $0x320] sm:$0xff] }
 0x221   : > { %v1893_v21 = vpack.c.bf16 %v834_v7, %v826_v3 }
 0x222   : > { %v1780_v25 = vpop.f32.mrb[2].mxu0 }
 0x223   : > { %v689_v27 = vpop.f32.mrb[3].mxu0  ;;  %1878 = vmatpush1.bf16.msra.mxu1 %v1877_v17  ;;  %1910 = vmatpush1.bf16.msra.mxu0 %v2626_v19  ;;  %v695_v39 = vadd.f32 %v1780_v25, %v2599_v36  ;;  %v851_v17 = vld [vmem:[#allocation9 + $0x3e8] sm:$0xff] }
 0x224   : > { %v690_v33 = vadd.f32 %v2599_v36, %v689_v27  ;;  %1880 = vmatprep.subr.bf16.mxu1 %v1879_v20  ;;  %1912 = vmatprep.subr.bf16.mxu0 %v2629_v11  ;;  %v853_v20 = vld [vmem:[#allocation9 + $0x3f8] sm:$0xff]  ;;  %v1895_v25 = vpack.c.bf16 %v851_v17, %v843_v16  ;;  %v844_v27 = vld [vmem:[#allocation9 + $0x3b0] sm:$0xff] }
 0x225   : > { %v2648_v60 = vmax.f32 %v695_v39, 0.0  ;;  %v2667_v18 = vpack.c.bf16 %v853_v20, %v845_v13 }
 0x226   : > { %v2637_v40 = vmax.f32 %v690_v33, 0.0 }
 0x227   : > { %1882 = vmatpush1.bf16.msra.mxu1 %v1881_v28  ;;  %1914 = vmatpush1.bf16.msra.mxu0 %v2632_v29  ;;  %v852_v28 = vld [vmem:[#allocation9 + $0x3f0] sm:$0xff] }
 0x228   : > { %973 = vmatmul.mubr.f32.gmra.mrb[4].mxu1 %v2637_v40  ;;  %1086 = vmatmul.mubr.f32.gmra.mrb[12].mxu0 %v2637_v40  ;;  %v2670_v31 = vpack.c.bf16 %v852_v28, %v844_v27 }
 0x229   : > { %978 = vmatprep.mubr.f32.mxu1 %v2281_v24  ;;  %1091 = vmatprep.mubr.f32.mxu0 %v2281_v24 }
 0x22a   : > { %1884 = vmatprep.subr.bf16.mxu1 %v1883_v41  ;;  %1916 = vmatprep.subr.bf16.mxu0 %v2639_v42 }
 0x22b   : > { %1886 = vmatpush1.bf16.msra.mxu1 %v1885_v46  ;;  %1918 = vmatpush1.bf16.msra.mxu0 %v2642_v47 }
 0x22c   : > { %979 = vmatmul.mubr.f32.gmra.mrb[6].mxu1 %v2648_v60  ;;  %1092 = vmatmul.mubr.f32.gmra.mrb[14].mxu0 %v2648_v60 }
 0x22d   : > { %984 = vmatprep.mubr.f32.mxu1 %v2281_v24  ;;  %1097 = vmatprep.mubr.f32.mxu0 %v2281_v24 }
 0x22e   : > { %1888 = vmatprep.subr.bf16.mxu1 %v1887_v61  ;;  %1920 = vmatprep.subr.bf16.mxu0 %v2651_v63 }
 0x22f   : > { %1890 = vmatpush1.bf16.msra.mxu1 %v1889_v1  ;;  %1922 = vmatpush1.bf16.msra.mxu0 %v2654_v2 }
 0x230   : > { %1892 = vmatprep.subr.bf16.mxu1 %v1891_v8  ;;  %1924 = vmatprep.subr.bf16.mxu0 %v2658_v9 }
 0x233   : > { %1894 = vmatpush1.bf16.msra.mxu1 %v1893_v21  ;;  %1926 = vmatpush1.bf16.msra.mxu0 %v2664_v22 }
 0x234   : > { %1896 = vmatprep.subr.bf16.mxu1 %v1895_v25  ;;  %1928 = vmatprep.subr.bf16.mxu0 %v2667_v18 }
 0x235   : > { %v1783_v32 = vpop.f32.mrb[4].mxu0 }
 0x236   : > { %v699_v33 = vpop.f32.mrb[5].mxu0  ;;  %v705_v37 = vadd.f32 %v1783_v32, %v2599_v36 }
 0x237   : > { %v700_v34 = vadd.f32 %v2599_v36, %v699_v33  ;;  %1898 = vmatpush1.bf16.msra.mxu1 %v1897_v30  ;;  %1930 = vmatpush1.bf16.msra.mxu0 %v2670_v31 }
 0x238   : > { %1931 = vmatprep.subr.bf16.mxu1 %v2596_v35  ;;  %v723_v39 = vmax.f32 %v705_v37, 0.0 }
 0x239   : > { %v722_v38 = vmax.f32 %v700_v34, 0.0 }
 0x23b   : > { %985 = vmatmul.mubr.f32.gmra.mrb[8].mxu1 %v722_v38  ;;  %1098 = vmatmul.mubr.f32.gmra.mrb[16].mxu0 %v722_v38 }
 0x23c   : > { %990 = vmatprep.mubr.f32.mxu1 %v2281_v24  ;;  %1103 = vmatprep.mubr.f32.mxu0 %v2281_v24 }
 0x23f   : > { %991 = vmatmul.mubr.f32.gmra.mrb[10].mxu1 %v723_v39  ;;  %1104 = vmatmul.mubr.f32.gmra.mrb[18].mxu0 %v723_v39 }
 0x240   : > { %996 = vmatprep.mubr.f32.mxu1 %v2281_v24  ;;  %1109 = vmatprep.mubr.f32.mxu0 %v2281_v24 }
 0x248   : > { %v1786_v41 = vpop.f32.mrb[6].mxu0 }
 0x249   : > { %v709_v43 = vpop.f32.mrb[7].mxu0  ;;  %v715_v44 = vadd.f32 %v1786_v41, %v2599_v36 }
 0x24a   : > { %v710_v35 = vadd.f32 %v2599_v36, %v709_v43  ;;  %v2724_v36 = vld [vmem:[#allocation10] sm:$0xff] }
 0x24b   : > { %v725_v46 = vmax.f32 %v715_v44, 0.0 }
 0x24c   : > { %v724_v45 = vmax.f32 %v710_v35, 0.0 }
 0x24e   : > { %997 = vmatmul.mubr.f32.gmra.mrb[12].mxu1 %v724_v45  ;;  %1110 = vmatmul.mubr.f32.gmra.mrb[20].mxu0 %v724_v45 }
 0x24f   : > { %1002 = vmatprep.mubr.f32.mxu1 %v2281_v24  ;;  %1115 = vmatprep.mubr.f32.mxu0 %v2281_v24 }
 0x252   : > { %1003 = vmatmul.mubr.f32.gmra.mrb[14].mxu1 %v725_v46  ;;  %1116 = vmatmul.mubr.f32.gmra.mrb[22].mxu0 %v725_v46 }
 0x253   : > { %1186 = vmatprep.mubr.f32.mxu1 %v2281_v24  ;;  %1299 = vmatprep.mubr.f32.mxu0 %v2281_v24 }
 0x256   : > { %1187 = vmatmul.mubr.f32.vlgmr.msra.gmra.mrb[16].mxu1 %v2603_v49  ;;  %1300 = vmatmul.mubr.f32.vlgmr.msra.gmra.mrb[24].mxu0 %v2603_v49  ;;  %v870_v49 = vsub.s32 3, %v2535_v5 }
 0x257   : > { %1939 = vmatpush1.bf16.msra.mxu1 %v2605_v51  ;;  %1192 = vmatprep.mubr.f32.mxu1 %v2281_v24  ;;  %v2730_v51 = vrot.slane %v2724_v36, %v436_v6 }
 0x258   : > { %1932 = vmatprep.subr.bf16.mxu1 %v2607_v55  ;;  %1305 = vmatprep.mubr.f32.mxu0 %v2281_v24  ;;  %v2735_v55 = vrot.slane %v2724_v36, %v532_v12 }
 0x25a   : > { %1193 = vmatmul.mubr.f32.gmra.mrb[18].mxu1 %v2613_v62  ;;  %1306 = vmatmul.mubr.f32.gmra.mrb[26].mxu0 %v2613_v62 }
 0x25b   : > { %1940 = vmatpush1.bf16.msra.mxu1 %v2616_v0  ;;  %1198 = vmatprep.mubr.f32.mxu1 %v2281_v24 }
 0x25c   : > { %1933 = vmatprep.subr.bf16.mxu1 %v2619_v4  ;;  %1311 = vmatprep.mubr.f32.mxu0 %v2281_v24  ;;  %v2743_v4 = vrot.slane %v2724_v36, %v870_v49 }
 0x25e   : > { %1199 = vmatmul.mubr.f32.gmra.mrb[20].mxu1 %v2637_v40  ;;  %1312 = vmatmul.mubr.f32.gmra.mrb[28].mxu0 %v2637_v40 }
 0x25f   : > { %1941 = vmatpush1.bf16.msra.mxu1 %v2626_v19  ;;  %1204 = vmatprep.mubr.f32.mxu1 %v2281_v24 }
 0x260   : > { %1934 = vmatprep.subr.bf16.mxu1 %v2629_v11  ;;  %1317 = vmatprep.mubr.f32.mxu0 %v2281_v24 }
 0x262   : > { %1205 = vmatmul.mubr.f32.gmra.mrb[22].mxu1 %v2648_v60  ;;  %1318 = vmatmul.mubr.f32.gmra.mrb[30].mxu0 %v2648_v60 }
 0x263   : > { %1942 = vmatpush1.bf16.msra.mxu1 %v2632_v29  ;;  %1210 = vmatprep.mubr.f32.mxu1 %v2281_v24 }
 0x264   : > { %1935 = vmatprep.subr.bf16.mxu1 %v2639_v42  ;;  %1323 = vmatprep.mubr.f32.mxu0 %v2281_v24 }
 0x266   : > { %1211 = vmatmul.mubr.f32.gmra.mrb[24].mxu1 %v722_v38  ;;  %1324 = vmatmul.mubr.f32.gmra.mrb[32].mxu0 %v722_v38 }
 0x267   : > { %1943 = vmatpush1.bf16.msra.mxu1 %v2642_v47  ;;  %1216 = vmatprep.mubr.f32.mxu1 %v2281_v24 }
 0x268   : > { %1936 = vmatprep.subr.bf16.mxu1 %v2651_v63  ;;  %1329 = vmatprep.mubr.f32.mxu0 %v2281_v24 }
 0x26a   : > { %1217 = vmatmul.mubr.f32.gmra.mrb[26].mxu1 %v723_v39  ;;  %1330 = vmatmul.mubr.f32.gmra.mrb[34].mxu0 %v723_v39 }
 0x26b   : > { %1944 = vmatpush1.bf16.msra.mxu1 %v2654_v2  ;;  %1222 = vmatprep.mubr.f32.mxu1 %v2281_v24 }
 0x26c   : > { %1937 = vmatprep.subr.bf16.mxu1 %v2658_v9 }
 0x26e   : > { %1223 = vmatmul.mubr.f32.gmra.mrb[28].mxu1 %v724_v45 }
 0x26f   : > { %1945 = vmatpush1.bf16.msra.mxu1 %v2664_v22  ;;  %1228 = vmatprep.mubr.f32.mxu1 %v2281_v24 }
 0x270   : > { %1938 = vmatprep.subr.bf16.mxu1 %v2667_v18 }
 0x272   : > { %1229 = vmatmul.mubr.f32.gmra.mrb[30].mxu1 %v725_v46 }
 0x273   : > { %1946 = vmatpush1.bf16.msra.mxu1 %v2670_v31  ;;  %1335 = vmatprep.mubr.f32.mxu1 %v2281_v24 }
 0x276   : > { %1336 = vmatmul.mubr.f32.vlgmr.msra.gmra.mrb[32].mxu1 %v724_v45 }
 0x277   : > { %1341 = vmatprep.mubr.f32.mxu1 %v2281_v24  ;;  %v2740_v24 = vrot.slane %v2724_v36, %v480_v10 }
 0x27a   : > { %1342 = vmatmul.mubr.f32.gmra.mrb[34].mxu1 %v725_v46 }
 0x2ec   : > { %v962_v62 = vpop.f32.mrb[0].mxu1  ;;  %v1075_v0 = vpop.f32.mrb[8].mxu0 }
 0x2ed   : > { %v964_v19 = vpop.f32.mrb[1].mxu1  ;;  %v1077_v11 = vpop.f32.mrb[9].mxu0  ;;  %v963_v6 = vadd.f32 %v962_v62, %v2730_v51  ;;  %v1076_v29 = vadd.f32 %v1075_v0, %v2735_v55 }
 0x2ee   : > { %v965_v40 = vadd.f32 %v964_v19, %v2740_v24  ;;  %v1078_v12 = vadd.f32 %v1077_v11, %v2743_v4 }
 0x2ef   : > { %v1348_v56 = vmax.f32 %v963_v6, 0.0  ;;  %v1350_v57 = vmax.f32 %v1076_v29, 0.0 }
 0x2f0   : > { %v968_v42 = vpop.f32.mrb[2].mxu1  ;;  %v1081_v47 = vpop.f32.mrb[10].mxu0  ;;  %v1349_v60 = vmax.f32 %v965_v40, 0.0  ;;  %v1351_v61 = vmax.f32 %v1078_v12, 0.0 }
 0x2f1   : > { %v969_v48 = vadd.f32 %v968_v42, %v2730_v51  ;;  %v1082_v10 = vadd.f32 %v1081_v47, %v2735_v55  ;;  %v970_v50 = vpop.f32.mrb[3].mxu1  ;;  %v1083_v52 = vpop.f32.mrb[11].mxu0 }
 0x2f2   : > { %v971_v53 = vadd.f32 %v970_v50, %v2740_v24  ;;  %v1084_v54 = vadd.f32 %v1083_v52, %v2743_v4 }
 0x2f3   : > { %v1356_v58 = vmax.f32 %v969_v48, 0.0  ;;  %v1358_v59 = vmax.f32 %v1082_v10, 0.0 }
 0x2f4   : > { %v1357_v63 = vmax.f32 %v971_v53, 0.0  ;;  %v1359_v1 = vmax.f32 %v1084_v54, 0.0 }
 0x2f5   : > { %v1412_v2 = vmax.f32 %v1348_v56, %v1356_v58  ;;  %v1438_v3 = vmax.f32 %v1350_v57, %v1358_v59 }
 0x2f6   : > { %v1425_v7 = vmax.f32 %v1349_v60, %v1357_v63  ;;  %v1451_v8 = vmax.f32 %v1351_v61, %v1359_v1 }
 0x2fb   : > { %v974_v9 = vpop.f32.mrb[4].mxu1  ;;  %v1087_v14 = vpop.f32.mrb[12].mxu0 }
 0x2fc   : > { %v975_v15 = vadd.f32 %v974_v9, %v2730_v51  ;;  %v1088_v16 = vadd.f32 %v1087_v14, %v2735_v55  ;;  %v976_v17 = vpop.f32.mrb[5].mxu1  ;;  %v1089_v13 = vpop.f32.mrb[13].mxu0 }
 0x2fd   : > { %v977_v20 = vadd.f32 %v976_v17, %v2740_v24  ;;  %v1090_v21 = vadd.f32 %v1089_v13, %v2743_v4 }
 0x2fe   : > { %v1364_v22 = vmax.f32 %v975_v15, 0.0  ;;  %v1366_v23 = vmax.f32 %v1088_v16, 0.0 }
 0x2ff   : > { %v1365_v25 = vmax.f32 %v977_v20, 0.0  ;;  %v1367_v26 = vmax.f32 %v1090_v21, 0.0  ;;  %v980_v18 = vpop.f32.mrb[6].mxu1  ;;  %v1093_v27 = vpop.f32.mrb[14].mxu0  ;;  %v874_v20 = vsub.s32 4, %v2535_v5  ;;  %v882_v21 = vsub.s32 6, %v2535_v5 }
 0x300   : > { %v1413_v28 = vmax.f32 %v1412_v2, %v1364_v22  ;;  %v1439_v30 = vmax.f32 %v1438_v3, %v1366_v23  ;;  %v981_v31 = vadd.f32 %v980_v18, %v2730_v51  ;;  %v1094_v32 = vadd.f32 %v1093_v27, %v2735_v55  ;;  %v982_v33 = vpop.f32.mrb[7].mxu1  ;;  %v1095_v34 = vpop.f32.mrb[15].mxu0 }
 0x301   : > { %v1426_v37 = vmax.f32 %v1425_v7, %v1365_v25  ;;  %v1452_v38 = vmax.f32 %v1451_v8, %v1367_v26  ;;  %v983_v39 = vadd.f32 %v982_v33, %v2740_v24  ;;  %v1096_v41 = vadd.f32 %v1095_v34, %v2743_v4 }
 0x302   : > { %v1372_v43 = vmax.f32 %v981_v31, 0.0  ;;  %v1374_v35 = vmax.f32 %v1094_v32, 0.0  ;;  %v878_v22 = vsub.s32 5, %v2535_v5  ;;  %v2282_v26 = vmov 1966171168  }
 0x303   : > { %v1373_v44 = vmax.f32 %v983_v39, 0.0  ;;  %v1375_v45 = vmax.f32 %v1096_v41, 0.0  ;;  %v1535_v18 = vunpack.c.l.s4 %v2282_v26  ;;  %v886_v27 = vsub.s32 7, %v2535_v5 }
 0x304   : > { %v1414_v46 = vmax.f32 %v1413_v28, %v1372_v43  ;;  %v1440_v49 = vmax.f32 %v1439_v30, %v1374_v35  ;;  %v2781_v41 = vrot.slane %v2724_v36, %v882_v21  ;;  %v2784_v43 = vrot.slane %v2724_v36, %v878_v22 }
 0x305   : > { %v1427_v62 = vmax.f32 %v1426_v37, %v1373_v44  ;;  %v1453_v0 = vmax.f32 %v1452_v38, %v1375_v45  ;;  %v2778_v37 = vrot.slane %v2724_v36, %v874_v20 }
 0x30e   : > { %v986_v19 = vpop.f32.mrb[8].mxu1  ;;  %v1099_v11 = vpop.f32.mrb[16].mxu0 }
 0x30f   : > { %v987_v6 = vadd.f32 %v986_v19, %v2730_v51  ;;  %v1100_v29 = vadd.f32 %v1099_v11, %v2735_v55  ;;  %v988_v40 = vpop.f32.mrb[9].mxu1  ;;  %v1101_v12 = vpop.f32.mrb[17].mxu0 }
 0x310   : > { %v989_v42 = vadd.f32 %v988_v40, %v2740_v24  ;;  %v1102_v47 = vadd.f32 %v1101_v12, %v2743_v4 }
 0x311   : > { %v1380_v48 = vmax.f32 %v987_v6, 0.0  ;;  %v1382_v10 = vmax.f32 %v1100_v29, 0.0 }
 0x312   : > { %v1381_v50 = vmax.f32 %v989_v42, 0.0  ;;  %v1383_v52 = vmax.f32 %v1102_v47, 0.0  ;;  %v992_v53 = vpop.f32.mrb[10].mxu1  ;;  %v1105_v54 = vpop.f32.mrb[18].mxu0 }
 0x313   : > { %v1415_v56 = vmax.f32 %v1414_v46, %v1380_v48  ;;  %v1441_v57 = vmax.f32 %v1440_v49, %v1382_v10  ;;  %v993_v58 = vadd.f32 %v992_v53, %v2730_v51  ;;  %v1106_v59 = vadd.f32 %v1105_v54, %v2735_v55  ;;  %v994_v60 = vpop.f32.mrb[11].mxu1  ;;  %v1107_v61 = vpop.f32.mrb[19].mxu0 }
 0x314   : > { %v1428_v63 = vmax.f32 %v1427_v62, %v1381_v50  ;;  %v1454_v1 = vmax.f32 %v1453_v0, %v1383_v52  ;;  %v995_v2 = vadd.f32 %v994_v60, %v2740_v24  ;;  %v1108_v3 = vadd.f32 %v1107_v61, %v2743_v4 }
 0x315   : > { %v1388_v7 = vmax.f32 %v993_v58, 0.0  ;;  %v1390_v8 = vmax.f32 %v1106_v59, 0.0  ;;  %v1536_v49 = vunpack.c.0.s8 %v1535_v18  ;;  %v2787_v62 = vrot.slane %v2724_v36, %v886_v27 }
 0x316   : > { %v1389_v9 = vmax.f32 %v995_v2, 0.0  ;;  %v1391_v14 = vmax.f32 %v1108_v3, 0.0 }
 0x317   : > { %v1416_v15 = vmax.f32 %v1415_v56, %v1388_v7  ;;  %v1442_v16 = vmax.f32 %v1441_v57, %v1390_v8  ;;  %v2794_v36 = vsub.s32 %v1536_v49, %v2535_v5 }
 0x318   : > { %v1429_v17 = vmax.f32 %v1428_v63, %v1389_v9  ;;  %v1455_v13 = vmax.f32 %v1454_v1, %v1391_v14 }
 0x321   : > { %v998_v23 = vpop.f32.mrb[12].mxu1  ;;  %v1111_v25 = vpop.f32.mrb[20].mxu0 }
 0x322   : > { %v999_v28 = vadd.f32 %v998_v23, %v2730_v51  ;;  %v1112_v30 = vadd.f32 %v1111_v25, %v2735_v55  ;;  %v1000_v31 = vpop.f32.mrb[13].mxu1  ;;  %v1113_v32 = vpop.f32.mrb[21].mxu0 }
 0x323   : > { %v1001_v33 = vadd.f32 %v1000_v31, %v2740_v24  ;;  %v1114_v34 = vadd.f32 %v1113_v32, %v2743_v4 }
 0x324   : > { %v1396_v38 = vmax.f32 %v999_v28, 0.0  ;;  %v1398_v39 = vmax.f32 %v1112_v30, 0.0 }
 0x325   : > { %v1397_v35 = vmax.f32 %v1001_v33, 0.0  ;;  %v1399_v44 = vmax.f32 %v1114_v34, 0.0  ;;  %v1004_v45 = vpop.f32.mrb[14].mxu1  ;;  %v1117_v46 = vpop.f32.mrb[22].mxu0 }
 0x326   : > { %v1417_v0 = vmax.f32 %v1416_v15, %v1396_v38  ;;  %v1443_v19 = vmax.f32 %v1442_v16, %v1398_v39  ;;  %v1005_v11 = vadd.f32 %v1004_v45, %v2730_v51  ;;  %v1118_v6 = vadd.f32 %v1117_v46, %v2735_v55  ;;  %v1006_v29 = vpop.f32.mrb[15].mxu1  ;;  %v1119_v40 = vpop.f32.mrb[23].mxu0 }
 0x327   : > { %v1430_v12 = vmax.f32 %v1429_v17, %v1397_v35  ;;  %v1456_v42 = vmax.f32 %v1455_v13, %v1399_v44  ;;  %v1007_v47 = vadd.f32 %v1006_v29, %v2740_v24  ;;  %v1120_v48 = vadd.f32 %v1119_v40, %v2743_v4 }
 0x328   : > { %v1404_v10 = vmax.f32 %v1005_v11, 0.0  ;;  %v1406_v50 = vmax.f32 %v1118_v6, 0.0 }
 0x329   : > { %v1405_v52 = vmax.f32 %v1007_v47, 0.0  ;;  %v1407_v53 = vmax.f32 %v1120_v48, 0.0  ;;  %v1188_v54 = vpop.f32.mrb[16].mxu1  ;;  %v1301_v56 = vpop.f32.mrb[24].mxu0 }
 0x32a   : > { %v1418_v51 = vmax.f32 %v1417_v0, %v1404_v10  ;;  %v1444_v57 = vmax.f32 %v1443_v19, %v1406_v50  ;;  %v1189_v55 = vadd.f32 %v1188_v54, %v2778_v37  ;;  %v1302_v58 = vadd.f32 %v1301_v56, %v2781_v41  ;;  %v1190_v59 = vpop.f32.mrb[17].mxu1  ;;  %v1303_v60 = vpop.f32.mrb[25].mxu0 }
 0x32b   : > { %v1431_v24 = vmax.f32 %v1430_v12, %v1405_v52  ;;  %v1457_v61 = vmax.f32 %v1456_v42, %v1407_v53  ;;  %v1191_v4 = vadd.f32 %v1190_v59, %v2784_v43  ;;  %v1304_v63 = vadd.f32 %v1303_v60, %v2787_v62 }
 0x32c   : > { %v1419_v1 = vrot.slane %v1418_v51, 4  ;;  %v1445_v5 = vrot.slane %v1444_v57, 4  ;;  %v1352_v2 = vmax.f32 %v1189_v55, 0.0  ;;  %v1354_v3 = vmax.f32 %v1302_v58, 0.0 }
 0x32d   : > { %v1432_v7 = vrot.slane %v1431_v24, 4  ;;  %v1458_v8 = vrot.slane %v1457_v61, 4  ;;  %v1353_v9 = vmax.f32 %v1191_v4, 0.0  ;;  %v1355_v14 = vmax.f32 %v1304_v63, 0.0  ;;  %v1194_v15 = vpop.f32.mrb[18].mxu1  ;;  %v1307_v16 = vpop.f32.mrb[26].mxu0 }
 0x32e   : > { %v1420_v17 = vmax.f32 %v1418_v51, %v1419_v1  ;;  %v1446_v13 = vmax.f32 %v1444_v57, %v1445_v5  ;;  %v1195_v20 = vadd.f32 %v1194_v15, %v2778_v37  ;;  %v1308_v21 = vadd.f32 %v1307_v16, %v2781_v41  ;;  %v1196_v22 = vpop.f32.mrb[19].mxu1  ;;  %v1309_v23 = vpop.f32.mrb[27].mxu0 }
 0x32f   : > { %v1433_v25 = vmax.f32 %v1431_v24, %v1432_v7  ;;  %v1459_v26 = vmax.f32 %v1457_v61, %v1458_v8  ;;  %v1197_v18 = vadd.f32 %v1196_v22, %v2784_v43  ;;  %v1310_v27 = vadd.f32 %v1309_v23, %v2787_v62 }
 0x330   : > { %v1421_v28 = vrot.slane %v1420_v17, 2  ;;  %v1447_v30 = vrot.slane %v1446_v13, 2  ;;  %v1360_v31 = vmax.f32 %v1195_v20, 0.0  ;;  %v1362_v32 = vmax.f32 %v1308_v21, 0.0 }
 0x331   : > { %v1434_v33 = vrot.slane %v1433_v25, 2  ;;  %v1460_v34 = vrot.slane %v1459_v26, 2  ;;  %v1361_v38 = vmax.f32 %v1197_v18, 0.0  ;;  %v1363_v39 = vmax.f32 %v1310_v27, 0.0  ;;  %v1200_v35 = vpop.f32.mrb[20].mxu1  ;;  %v1313_v44 = vpop.f32.mrb[28].mxu0 }
 0x332   : > { %v1422_v45 = vmax.f32 %v1420_v17, %v1421_v28  ;;  %v1448_v46 = vmax.f32 %v1446_v13, %v1447_v30  ;;  %v1464_v49 = vmax.f32 %v1352_v2, %v1360_v31  ;;  %v1490_v0 = vmax.f32 %v1354_v3, %v1362_v32  ;;  %v1202_v19 = vpop.f32.mrb[21].mxu1  ;;  %v1315_v11 = vpop.f32.mrb[29].mxu0 }
 0x333   : > { %v1435_v6 = vmax.f32 %v1433_v25, %v1434_v33  ;;  %v1461_v29 = vmax.f32 %v1459_v26, %v1460_v34  ;;  %v1477_v40 = vmax.f32 %v1353_v9, %v1361_v38  ;;  %v1503_v12 = vmax.f32 %v1355_v14, %v1363_v39 }
 0x334   : > { %v1423_v42 = vrot.slane %v1422_v45, 1  ;;  %v1449_v47 = vrot.slane %v1448_v46, 1  ;;  %v1201_v48 = vadd.f32 %v1200_v35, %v2778_v37  ;;  %v1314_v10 = vadd.f32 %v1313_v44, %v2781_v41 }
 0x335   : > { %v1436_v50 = vrot.slane %v1435_v6, 1  ;;  %v1462_v52 = vrot.slane %v1461_v29, 1  ;;  %v1203_v53 = vadd.f32 %v1202_v19, %v2784_v43  ;;  %v1316_v54 = vadd.f32 %v1315_v11, %v2787_v62  ;;  %v1206_v56 = vpop.f32.mrb[22].mxu1  ;;  %v1319_v51 = vpop.f32.mrb[30].mxu0 }
 0x336   : > { %v1424_v57 = vmax.f32 %v1422_v45, %v1423_v42  ;;  %v1450_v55 = vmax.f32 %v1448_v46, %v1449_v47  ;;  %v1368_v58 = vmax.f32 %v1201_v48, 0.0  ;;  %v1370_v59 = vmax.f32 %v1314_v10, 0.0  ;;  %v1208_v60 = vpop.f32.mrb[23].mxu1  ;;  %v1321_v24 = vpop.f32.mrb[31].mxu0 }
 0x337   : > { %v1437_v61 = vmax.f32 %v1435_v6, %v1436_v50  ;;  %v1463_v4 = vmax.f32 %v1461_v29, %v1462_v52  ;;  %v1369_v63 = vmax.f32 %v1203_v53, 0.0  ;;  %v1371_v1 = vmax.f32 %v1316_v54, 0.0 }
 0x338   : > { %v1465_v5 = vmax.f32 %v1464_v49, %v1368_v58  ;;  %v1491_v2 = vmax.f32 %v1490_v0, %v1370_v59  ;;  %v1207_v3 = vadd.f32 %v1206_v56, %v2778_v37  ;;  %v1320_v7 = vadd.f32 %v1319_v51, %v2781_v41 }
 0x339   : > { %v1530_v8 = vcombine.low %v1424_v57, %v1437_v61  ;;  %v1531_v9 = vcombine.low %v1450_v55, %v1463_v4  ;;  %v1478_v14 = vmax.f32 %v1477_v40, %v1369_v63  ;;  %v1504_v15 = vmax.f32 %v1503_v12, %v1371_v1  ;;  %v1212_v16 = vpop.f32.mrb[24].mxu1  ;;  %v1325_v17 = vpop.f32.mrb[32].mxu0 }
 0x33a   : > { %v1376_v13 = vmax.f32 %v1207_v3, 0.0  ;;  %v1378_v20 = vmax.f32 %v1320_v7, 0.0  ;;  %v1209_v21 = vadd.f32 %v1208_v60, %v2784_v43  ;;  %v1322_v22 = vadd.f32 %v1321_v24, %v2787_v62  ;;  %v1214_v23 = vpop.f32.mrb[25].mxu1  ;;  %v1327_v25 = vpop.f32.mrb[33].mxu0 }
 0x33b   : > { %v2813_v26 = vrot.slane %v1530_v8, %v2794_v36  ;;  %v2816_v18 = vrot.slane %v1531_v9, %v2794_v36  ;;  %v1213_v27 = vadd.f32 %v1212_v16, %v2778_v37  ;;  %v1326_v28 = vadd.f32 %v1325_v17, %v2781_v41 }
 0x33c   : > { %v1466_v30 = vmax.f32 %v1465_v5, %v1376_v13  ;;  %v1492_v31 = vmax.f32 %v1491_v2, %v1378_v20  ;;  %v1377_v32 = vmax.f32 %v1209_v21, 0.0  ;;  %v1379_v33 = vmax.f32 %v1322_v22, 0.0 }
 0x33d   : > { %v1562_v34 = vcombine.low %v2813_v26, %v2816_v18  ;;  %v1384_v38 = vmax.f32 %v1213_v27, 0.0  ;;  %v1386_v39 = vmax.f32 %v1326_v28, 0.0  ;;  %v1215_v35 = vadd.f32 %v1214_v23, %v2784_v43  ;;  %v1218_v44 = vpop.f32.mrb[26].mxu1  ;;  %v1331_v45 = vpop.f32.mrb[34].mxu0 }
 0x33e   : > { %v1479_v46 = vmax.f32 %v1478_v14, %v1377_v32  ;;  %v1505_v49 = vmax.f32 %v1504_v15, %v1379_v33  ;;  %v1328_v0 = vadd.f32 %v1327_v25, %v2787_v62  ;;  %v1219_v19 = vadd.f32 %v1218_v44, %v2778_v37  ;;  %v1220_v11 = vpop.f32.mrb[27].mxu1  ;;  %v1333_v6 = vpop.f32.mrb[35].mxu0 }
 0x33f   : > { %v1467_v29 = vmax.f32 %v1466_v30, %v1384_v38  ;;  %v1493_v40 = vmax.f32 %v1492_v31, %v1386_v39  ;;  %v1385_v12 = vmax.f32 %v1215_v35, 0.0  ;;  %v1332_v48 = vadd.f32 %v1331_v45, %v2781_v41 }
 0x340   : > { %v1387_v42 = vmax.f32 %v1328_v0, 0.0  ;;  %v1392_v47 = vmax.f32 %v1219_v19, 0.0  ;;  %v1221_v10 = vadd.f32 %v1220_v11, %v2784_v43  ;;  %v1334_v52 = vadd.f32 %v1333_v6, %v2787_v62 }
 0x341   : > { %v1480_v50 = vmax.f32 %v1479_v46, %v1385_v12  ;;  %v1224_v53 = vpop.f32.mrb[28].mxu1  ;;  %v1394_v51 = vmax.f32 %v1332_v48, 0.0 }
 0x342   : > { %v1506_v54 = vmax.f32 %v1505_v49, %v1387_v42  ;;  %v1468_v56 = vmax.f32 %v1467_v29, %v1392_v47  ;;  %v1393_v57 = vmax.f32 %v1221_v10, 0.0  ;;  %v1226_v55 = vpop.f32.mrb[29].mxu1  ;;  %v1395_v58 = vmax.f32 %v1334_v52, 0.0 }
 0x343   : > { %v1225_v59 = vadd.f32 %v1224_v53, %v2778_v37  ;;  %v1227_v60 = vadd.f32 %v1226_v55, %v2784_v43  ;;  %v1494_v24 = vmax.f32 %v1493_v40, %v1394_v51 }
 0x344   : > { %v1481_v61 = vmax.f32 %v1480_v50, %v1393_v57  ;;  %v1507_v4 = vmax.f32 %v1506_v54, %v1395_v58 }
 0x345   : > { %v1400_v63 = vmax.f32 %v1225_v59, 0.0  ;;  %v1401_v1 = vmax.f32 %v1227_v60, 0.0  ;;  %v1230_v5 = vpop.f32.mrb[30].mxu1 }
 0x346   : > { %v1231_v2 = vadd.f32 %v1230_v5, %v2778_v37  ;;  %v1232_v3 = vpop.f32.mrb[31].mxu1 }
 0x347   : > { %v1469_v7 = vmax.f32 %v1468_v56, %v1400_v63  ;;  %v1482_v8 = vmax.f32 %v1481_v61, %v1401_v1  ;;  %v1233_v9 = vadd.f32 %v1232_v3, %v2784_v43 }
 0x348   : > { %v1408_v14 = vmax.f32 %v1231_v2, 0.0 }
 0x349   : > { %v1409_v15 = vmax.f32 %v1233_v9, 0.0  ;;  %v1337_v16 = vpop.f32.mrb[32].mxu1 }
 0x34a   : > { %v1470_v17 = vmax.f32 %v1469_v7, %v1408_v14  ;;  %v1338_v13 = vadd.f32 %v1337_v16, %v2781_v41  ;;  %v1339_v20 = vpop.f32.mrb[33].mxu1 }
 0x34b   : > { %v1483_v21 = vmax.f32 %v1482_v8, %v1409_v15  ;;  %v1340_v22 = vadd.f32 %v1339_v20, %v2787_v62 }
 0x34c   : > { %v1471_v23 = vrot.slane %v1470_v17, 4  ;;  %v1402_v25 = vmax.f32 %v1338_v13, 0.0 }
 0x34d   : > { %v1484_v27 = vrot.slane %v1483_v21, 4  ;;  %v1403_v28 = vmax.f32 %v1340_v22, 0.0  ;;  %v1343_v37 = vpop.f32.mrb[34].mxu1 }
 0x34e   : > { %v1472_v30 = vmax.f32 %v1470_v17, %v1471_v23  ;;  %v1495_v31 = vmax.f32 %v1494_v24, %v1402_v25  ;;  %v1344_v32 = vadd.f32 %v1343_v37, %v2781_v41  ;;  %v1345_v43 = vpop.f32.mrb[35].mxu1  ;;  %v1570_v24 = vrot.slane %v1562_v34, %v2794_v36 }
 0x34f   : > { %v1485_v33 = vmax.f32 %v1483_v21, %v1484_v27  ;;  %v1508_v38 = vmax.f32 %v1507_v4, %v1403_v28  ;;  %v1346_v39 = vadd.f32 %v1345_v43, %v2787_v62 }
 0x350   : > { %v1473_v35 = vrot.slane %v1472_v30, 2  ;;  %v1410_v44 = vmax.f32 %v1344_v32, 0.0 }
 0x351   : > { %v1486_v45 = vrot.slane %v1485_v33, 2  ;;  %v1411_v46 = vmax.f32 %v1346_v39, 0.0 }
 0x352   : > { %v1474_v49 = vmax.f32 %v1472_v30, %v1473_v35  ;;  %v1496_v0 = vmax.f32 %v1495_v31, %v1410_v44 }
 0x353   : > { %v1487_v19 = vmax.f32 %v1485_v33, %v1486_v45  ;;  %v1509_v11 = vmax.f32 %v1508_v38, %v1411_v46 }
 0x354   : > { %v1475_v6 = vrot.slane %v1474_v49, 1  ;;  %v1497_v29 = vrot.slane %v1496_v0, 4 }
 0x355   : > { %v1488_v40 = vrot.slane %v1487_v19, 1  ;;  %v1510_v12 = vrot.slane %v1509_v11, 4 }
 0x356   : > { %v1476_v42 = vmax.f32 %v1474_v49, %v1475_v6  ;;  %v1498_v47 = vmax.f32 %v1496_v0, %v1497_v29 }
 0x357   : > { %v1489_v41 = vmax.f32 %v1487_v19, %v1488_v40  ;;  %v1511_v48 = vmax.f32 %v1509_v11, %v1510_v12 }
 0x358   : > { %v1499_v10 = vrot.slane %v1498_v47, 2 }
 0x359   : > { %v1532_v50 = vcombine.low %v1476_v42, %v1489_v41  ;;  %v1512_v62 = vrot.slane %v1511_v48, 2 }
 0x35a   : > { %v1500_v52 = vmax.f32 %v1498_v47, %v1499_v10 }
 0x35b   : > { %v1513_v53 = vmax.f32 %v1511_v48, %v1512_v62  ;;  %v1554_v58 = vrot.slane %v1532_v50, %v2794_v36 }
 0x35c   : > { %v1501_v54 = vrot.slane %v1500_v52, 1 }
 0x35d   : > { %v1514_v56 = vrot.slane %v1513_v53, 1 }
 0x35e   : > { %v1502_v51 = vmax.f32 %v1500_v52, %v1501_v54 }
 0x35f   : > { %v1515_v57 = vmax.f32 %v1513_v53, %v1514_v56 }
 0x361   : > { %v1533_v55 = vcombine.low %v1502_v51, %v1515_v57 }
 0x363   : > { %v1561_v59 = vrot.slane %v1533_v55, %v2794_v36 }
 0x365   : > { %v1563_v60 = vcombine.low %v1554_v58, %v1561_v59 }
 0x367   : > { %v1577_v61 = vrot.slane %v1563_v60, %v2794_v36 }
 0x369   : > { %v1578_v4 = vcombine.low %v1570_v24, %v1577_v61 }
 0x36b   : > { %1581 = vst [vmem:[%s384_s28] sm:$0xff] %v1578_v4 }
 0x36c PF: > { %s21_s26 = sadd.s32 1, %s2266_s26   ;;  %s2875_s24 = smov %s2262_s25 }
 0x36d   : > { %p18_p8 = scmp.ge.s32.totalorder %s21_s26, 4   ;;  %s2876_s25 = smov %s2878_s12 }
 0x36f   :  { %20 = sbr.rel (!%p18_p8) target bundleno = 5 (0x5), region = 107 }
 0x376   :  { %1601 = vsyncpa [#allocation3], 1 }
 0x377   :  { %1603 = vsyncpa [#allocation3 + $0x1], 1 }
 0x378   :  { %1604 = vsyncpa [#allocation5], 1 }
 0x379   :  { %1605 = vsyncpa [#allocation8], 1 }
 0x37a   :  { %1606 = vsyncpa [#allocation11], 1 }

// kernel: pointnet_autoencoder_forward.8
= control target key start
LH: loop header
LB: loop body
LE: loop exit
PB: predicated region body
PF: predicated region fallthrough
CT: control target
= control target key end

     0   :  { %v1255_v47 = vmov 1983009808   ;;  %v181_v49 = vlaneseq  ;;  %vm1258_vm0 = vmmov 0   ;;  %vm516_vm1 = vcmask 588800   ;;  %s1881_s2 = inlined_call_operand.vmem [shape: f32[1024,72], index: 2, kind: input, shape index: {}]   ;;  %s1882_s0 = inlined_call_operand.vmem [shape: f32[2,1024], index: 0, kind: input, shape index: {}]   ;;  %s1883_s4 = inlined_call_operand.vmem [shape: f32[72,104], index: 4, kind: input, shape index: {}]   ;;  %s1884_s6 = inlined_call_operand.vmem [shape: f32[104,104], index: 6, kind: input, shape index: {}]   ;;  %s1885_s3 = inlined_call_operand.vmem [shape: f32[1,72], index: 3, kind: input, shape index: {}]   ;;  %s1886_s8 = inlined_call_operand.vmem [shape: f32[104,104], index: 8, kind: input, shape index: {}]   ;;  %s1887_s5 = inlined_call_operand.vmem [shape: f32[1,104], index: 5, kind: input, shape index: {}]   ;;  %s1888_s10 = inlined_call_operand.vmem [shape: f32[2,104], index: 10, kind: output, shape index: {0}]   ;;  %s1889_s9 = inlined_call_operand.vmem [shape: f32[1,104], index: 9, kind: input, shape index: {}]   ;;  %s1890_s1 = inlined_call_operand.vmem [shape: f32[2,104], index: 1, kind: input, shape index: {}]   ;;  %s1891_s7 = inlined_call_operand.vmem [shape: f32[1,104], index: 7, kind: input, shape index: {}]   ;;  %s1892_s11 = inlined_call_operand.vmem [shape: f32[2,104], index: 11, kind: output, shape index: {1}]   ;;  %s1893_s12 = inlined_call_operand.vmem [shape: f32[2,1], index: 12, kind: output, shape index: {2}]  }
   0x1   :  { %v56_v0 = vld [vmem:[%s1881_s2 + $0x80] sm:$0xff]  ;;  %v57_v1 = vld [vmem:[%s1881_s2 + $0x88] sm:$0xff]  ;;  %v58_v11 = vld [vmem:[%s1881_s2 + $0x90] sm:$0xff]  ;;  %v179_v48 = vunpack.c.l.s4 %v1255_v47  ;;  %vm610_vm2 = vcmask 850944   ;;  %vm787_vm3 = vcmask 844800   ;;  %vm793_vm4 = vcmask 1024  }
   0x2   :  { %v40_v2 = vld [vmem:[%s1881_s2] sm:$0xff]  ;;  %v1071_v3 = vpack.c.bf16 %v57_v1, %v56_v0  ;;  %v41_v4 = vld [vmem:[%s1881_s2 + $0x8] sm:$0xff]  ;;  %v59_v13 = vld [vmem:[%s1881_s2 + $0x98] sm:$0xff]  ;;  %v182_v0 = vshrl.u32 %v181_v49, 7 }
   0x3   :  { %v88_v5 = vld [vmem:[%s1881_s2 + $0x180] sm:$0xff]  ;;  %v89_v6 = vld [vmem:[%s1881_s2 + $0x188] sm:$0xff]  ;;  %v1073_v7 = vpack.c.bf16 %v41_v4, %v40_v2  ;;  %v42_v14 = vld [vmem:[%s1881_s2 + $0x10] sm:$0xff]  ;;  %v1075_v16 = vpack.c.bf16 %v59_v13, %v58_v11  ;;  %v180_v63 = vunpack.c.0.s8 %v179_v48 }
   0x4   :  { %v1103_v8 = vpack.c.bf16 %v89_v6, %v88_v5  ;;  %v72_v9 = vld [vmem:[%s1881_s2 + $0x100] sm:$0xff]  ;;  %v73_v10 = vld [vmem:[%s1881_s2 + $0x108] sm:$0xff]  ;;  %1072 = vmatprep.subr.bf16.mxu0 %v1071_v3  ;;  %v43_v15 = vld [vmem:[%s1881_s2 + $0x18] sm:$0xff] }
   0x5   :  { %v1105_v12 = vpack.c.bf16 %v73_v10, %v72_v9  ;;  %1074 = vmatpush3.bf16.msra.mxu0 %v1073_v7  ;;  %v1077_v17 = vpack.c.bf16 %v43_v15, %v42_v14  ;;  %v90_v18 = vld [vmem:[%s1881_s2 + $0x190] sm:$0xff]  ;;  %v91_v19 = vld [vmem:[%s1881_s2 + $0x198] sm:$0xff]  ;;  %v60_v23 = vld [vmem:[%s1881_s2 + $0xa0] sm:$0xff]  ;;  %v183_v13 = vsub.s32 %v180_v63, %v182_v0 }
   0x6   :  { %1104 = vmatprep.subr.bf16.mxu1 %v1103_v8  ;;  %v74_v20 = vld [vmem:[%s1881_s2 + $0x110] sm:$0xff]  ;;  %v1107_v21 = vpack.c.bf16 %v91_v19, %v90_v18  ;;  %v75_v22 = vld [vmem:[%s1881_s2 + $0x118] sm:$0xff]  ;;  %v61_v24 = vld [vmem:[%s1881_s2 + $0xa8] sm:$0xff]  ;;  %1076 = vmatprep.subr.bf16.mxu0 %v1075_v16 }
   0x7   :  { %1106 = vmatpush3.bf16.msra.mxu1 %v1105_v12  ;;  %v1109_v25 = vpack.c.bf16 %v75_v22, %v74_v20  ;;  %v1079_v26 = vpack.c.bf16 %v61_v24, %v60_v23  ;;  %v44_v27 = vld [vmem:[%s1881_s2 + $0x20] sm:$0xff]  ;;  %v45_v28 = vld [vmem:[%s1881_s2 + $0x28] sm:$0xff]  ;;  %v62_v35 = vld [vmem:[%s1881_s2 + $0xb0] sm:$0xff] }
   0x8   :  { %v92_v29 = vld [vmem:[%s1881_s2 + $0x1a0] sm:$0xff]  ;;  %1108 = vmatprep.subr.bf16.mxu1 %v1107_v21  ;;  %v93_v30 = vld [vmem:[%s1881_s2 + $0x1a8] sm:$0xff]  ;;  %v1081_v33 = vpack.c.bf16 %v45_v28, %v44_v27  ;;  %v63_v36 = vld [vmem:[%s1881_s2 + $0xb8] sm:$0xff] }
   0x9   :  { %v76_v31 = vld [vmem:[%s1881_s2 + $0x120] sm:$0xff]  ;;  %v77_v32 = vld [vmem:[%s1881_s2 + $0x128] sm:$0xff]  ;;  %1078 = vmatpush3.bf16.msra.mxu0 %v1077_v17  ;;  %v1111_v34 = vpack.c.bf16 %v93_v30, %v92_v29  ;;  %v46_v37 = vld [vmem:[%s1881_s2 + $0x30] sm:$0xff]  ;;  %v1083_v39 = vpack.c.bf16 %v63_v36, %v62_v35 }
   0xa   :  { %1080 = vmatprep.subr.bf16.mxu0 %v1079_v26  ;;  %v1113_v38 = vpack.c.bf16 %v77_v32, %v76_v31  ;;  %v47_v40 = vld [vmem:[%s1881_s2 + $0x38] sm:$0xff]  ;;  %v94_v41 = vld [vmem:[%s1881_s2 + $0x1b0] sm:$0xff]  ;;  %v64_v46 = vld [vmem:[%s1881_s2 + $0xc0] sm:$0xff] }
   0xb   :  { %1110 = vmatpush3.bf16.msra.mxu1 %v1109_v25  ;;  %v95_v42 = vld [vmem:[%s1881_s2 + $0x1b8] sm:$0xff]  ;;  %v78_v44 = vld [vmem:[%s1881_s2 + $0x130] sm:$0xff]  ;;  %v65_v50 = vld [vmem:[%s1881_s2 + $0xc8] sm:$0xff]  ;;  %v1085_v51 = vpack.c.bf16 %v47_v40, %v46_v37 }
   0xc   :  { %1112 = vmatprep.subr.bf16.mxu1 %v1111_v34  ;;  %v1115_v43 = vpack.c.bf16 %v95_v42, %v94_v41  ;;  %v79_v45 = vld [vmem:[%s1881_s2 + $0x138] sm:$0xff]  ;;  %v96_v52 = vld [vmem:[%s1881_s2 + $0x1c0] sm:$0xff]  ;;  %v97_v53 = vld [vmem:[%s1881_s2 + $0x1c8] sm:$0xff]  ;;  %v1087_v55 = vpack.c.bf16 %v65_v50, %v64_v46 }
   0xd   :  { %1082 = vmatpush3.bf16.msra.mxu0 %v1081_v33  ;;  %v1117_v54 = vpack.c.bf16 %v79_v45, %v78_v44  ;;  %v48_v56 = vld [vmem:[%s1881_s2 + $0x40] sm:$0xff]  ;;  %v49_v57 = vld [vmem:[%s1881_s2 + $0x48] sm:$0xff]  ;;  %v1119_v59 = vpack.c.bf16 %v97_v53, %v96_v52  ;;  %v66_v61 = vld [vmem:[%s1881_s2 + $0xd0] sm:$0xff] }
   0xe   :  { %1084 = vmatprep.subr.bf16.mxu0 %v1083_v39  ;;  %v80_v58 = vld [vmem:[%s1881_s2 + $0x140] sm:$0xff]  ;;  %v81_v60 = vld [vmem:[%s1881_s2 + $0x148] sm:$0xff]  ;;  %v67_v62 = vld [vmem:[%s1881_s2 + $0xd8] sm:$0xff]  ;;  %v1089_v3 = vpack.c.bf16 %v49_v57, %v48_v56 }
   0xf   :  { %1114 = vmatpush3.bf16.msra.mxu1 %v1113_v38  ;;  %v98_v1 = vld [vmem:[%s1881_s2 + $0x1d0] sm:$0xff]  ;;  %v99_v2 = vld [vmem:[%s1881_s2 + $0x1d8] sm:$0xff]  ;;  %v1121_v4 = vpack.c.bf16 %v81_v60, %v80_v58  ;;  %v1091_v5 = vpack.c.bf16 %v67_v62, %v66_v61  ;;  %v68_v11 = vld [vmem:[%s1881_s2 + $0xe0] sm:$0xff] }
  0x10   :  { %1116 = vmatprep.subr.bf16.mxu1 %v1115_v43  ;;  %v50_v6 = vld [vmem:[%s1881_s2 + $0x50] sm:$0xff]  ;;  %v51_v7 = vld [vmem:[%s1881_s2 + $0x58] sm:$0xff]  ;;  %v1123_v9 = vpack.c.bf16 %v99_v2, %v98_v1  ;;  %v69_v12 = vld [vmem:[%s1881_s2 + $0xe8] sm:$0xff] }
  0x11   :  { %1086 = vmatpush3.bf16.msra.mxu0 %v1085_v51  ;;  %v82_v8 = vld [vmem:[%s1881_s2 + $0x150] sm:$0xff]  ;;  %v83_v10 = vld [vmem:[%s1881_s2 + $0x158] sm:$0xff]  ;;  %v100_v14 = vld [vmem:[%s1881_s2 + $0x1e0] sm:$0xff]  ;;  %v1093_v16 = vpack.c.bf16 %v51_v7, %v50_v6  ;;  %v1095_v19 = vpack.c.bf16 %v69_v12, %v68_v11 }
  0x12   :  { %1088 = vmatprep.subr.bf16.mxu0 %v1087_v55  ;;  %v101_v15 = vld [vmem:[%s1881_s2 + $0x1e8] sm:$0xff]  ;;  %v52_v17 = vld [vmem:[%s1881_s2 + $0x60] sm:$0xff]  ;;  %v1125_v18 = vpack.c.bf16 %v83_v10, %v82_v8  ;;  %v70_v25 = vld [vmem:[%s1881_s2 + $0xf0] sm:$0xff] }
  0x13   :  { %1118 = vmatpush3.bf16.msra.mxu1 %v1117_v54  ;;  %v53_v20 = vld [vmem:[%s1881_s2 + $0x68] sm:$0xff]  ;;  %v84_v21 = vld [vmem:[%s1881_s2 + $0x160] sm:$0xff]  ;;  %v1127_v23 = vpack.c.bf16 %v101_v15, %v100_v14  ;;  %v71_v26 = vld [vmem:[%s1881_s2 + $0xf8] sm:$0xff] }
  0x14   :  { %1120 = vmatprep.subr.bf16.mxu1 %v1119_v59  ;;  %v38_v22 = vld [vmem:[%s1882_s0] sm:$0xff]  ;;  %v85_v24 = vld [vmem:[%s1881_s2 + $0x168] sm:$0xff]  ;;  %v102_v29 = vld [vmem:[%s1881_s2 + $0x1f0] sm:$0xff]  ;;  %v1097_v31 = vpack.c.bf16 %v53_v20, %v52_v17  ;;  %v1099_v36 = vpack.c.bf16 %v71_v26, %v70_v25 }
  0x15   :  { %1090 = vmatpush3.bf16.msra.mxu0 %v1089_v3  ;;  %v184_v27 = vrot.slane %v38_v22, %v183_v13  ;;  %v177_v28 = vcombine.high %v38_v22, %v38_v22  ;;  %v103_v30 = vld [vmem:[%s1881_s2 + $0x1f8] sm:$0xff]  ;;  %v39_v32 = vld [vmem:[%s1882_s0 + $0x8] sm:$0xff]  ;;  %v1129_v35 = vpack.c.bf16 %v85_v24, %v84_v21  ;;  %v54_v37 = vld [vmem:[%s1881_s2 + $0x70] sm:$0xff] }
  0x16   :  { %1092 = vmatprep.subr.bf16.mxu0 %v1091_v5  ;;  %v55_v38 = vld [vmem:[%s1881_s2 + $0x78] sm:$0xff]  ;;  %v86_v39 = vld [vmem:[%s1881_s2 + $0x170] sm:$0xff]  ;;  %v1131_v40 = vpack.c.bf16 %v103_v30, %v102_v29  ;;  %v120_v42 = vld [vmem:[%s1881_s2 + $0x280] sm:$0xff]  ;;  %v194_v45 = vcombine.high %v39_v32, %v39_v32  ;;  %v1552_v58 = vrot.slane %v39_v32, %v183_v13 }
  0x17   :  { %1122 = vmatpush3.bf16.msra.mxu1 %v1121_v4  ;;  %v192_v33 = vcombine.high %v184_v27, %v184_v27  ;;  %v191_v34 = vrot.slane %v177_v28, %v183_v13  ;;  %v87_v41 = vld [vmem:[%s1881_s2 + $0x178] sm:$0xff]  ;;  %v121_v43 = vld [vmem:[%s1881_s2 + $0x288] sm:$0xff]  ;;  %v152_v46 = vld [vmem:[%s1881_s2 + $0x380] sm:$0xff]  ;;  %v1101_v48 = vpack.c.bf16 %v55_v38, %v54_v37 }
  0x18   :  { %1124 = vmatprep.subr.bf16.mxu1 %v1123_v9  ;;  %v153_v47 = vld [vmem:[%s1881_s2 + $0x388] sm:$0xff]  ;;  %v1133_v49 = vpack.c.bf16 %v87_v41, %v86_v39  ;;  %v1135_v50 = vpack.c.bf16 %v121_v43, %v120_v42  ;;  %v104_v51 = vld [vmem:[%s1881_s2 + $0x200] sm:$0xff]  ;;  %v122_v56 = vld [vmem:[%s1881_s2 + $0x290] sm:$0xff]  ;;  %v1560_v61 = vrot.slane %v194_v45, %v183_v13  ;;  %v209_v8 = vcombine.high %v1552_v58, %v1552_v58 }
  0x19   :  { %1094 = vmatpush3.bf16.msra.mxu0 %v1093_v16  ;;  %283 = vmatprep.mubr.f32.mxu0 %v192_v33  ;;  %v193_v44 = vcombine.high %v191_v34, %v191_v34  ;;  %v105_v52 = vld [vmem:[%s1881_s2 + $0x208] sm:$0xff]  ;;  %v136_v53 = vld [vmem:[%s1881_s2 + $0x300] sm:$0xff]  ;;  %v1167_v54 = vpack.c.bf16 %v153_v47, %v152_v46  ;;  %v123_v57 = vld [vmem:[%s1881_s2 + $0x298] sm:$0xff] }
  0x1a   :  { %1096 = vmatprep.subr.bf16.mxu0 %v1095_v19  ;;  %v137_v55 = vld [vmem:[%s1881_s2 + $0x308] sm:$0xff]  ;;  %v154_v59 = vld [vmem:[%s1881_s2 + $0x390] sm:$0xff]  ;;  %v155_v60 = vld [vmem:[%s1881_s2 + $0x398] sm:$0xff]  ;;  %v1137_v62 = vpack.c.bf16 %v105_v52, %v104_v51  ;;  %v1139_v0 = vpack.c.bf16 %v123_v57, %v122_v56  ;;  %v210_v11 = vcombine.high %v1560_v61, %v1560_v61 }
  0x1b   :  { %1126 = vmatpush3.bf16.msra.mxu1 %v1125_v18  ;;  %353 = vmatprep.mubr.f32.mxu1 %v193_v44  ;;  %v1169_v63 = vpack.c.bf16 %v137_v55, %v136_v53  ;;  %v106_v1 = vld [vmem:[%s1881_s2 + $0x210] sm:$0xff]  ;;  %v107_v2 = vld [vmem:[%s1881_s2 + $0x218] sm:$0xff]  ;;  %v1171_v4 = vpack.c.bf16 %v155_v60, %v154_v59  ;;  %v124_v6 = vld [vmem:[%s1881_s2 + $0x2a0] sm:$0xff] }
  0x1c   :  { %1128 = vmatprep.subr.bf16.mxu1 %v1127_v23  ;;  %v138_v3 = vld [vmem:[%s1881_s2 + $0x310] sm:$0xff]  ;;  %v139_v5 = vld [vmem:[%s1881_s2 + $0x318] sm:$0xff]  ;;  %v125_v7 = vld [vmem:[%s1881_s2 + $0x2a8] sm:$0xff]  ;;  %v1141_v12 = vpack.c.bf16 %v107_v2, %v106_v1 }
  0x1d   :  { %1098 = vmatpush3.bf16.msra.mxu0 %v1097_v31  ;;  %v156_v9 = vld [vmem:[%s1881_s2 + $0x3a0] sm:$0xff]  ;;  %v157_v10 = vld [vmem:[%s1881_s2 + $0x3a8] sm:$0xff]  ;;  %v1173_v13 = vpack.c.bf16 %v139_v5, %v138_v3  ;;  %v1143_v14 = vpack.c.bf16 %v125_v7, %v124_v6  ;;  %v126_v20 = vld [vmem:[%s1881_s2 + $0x2b0] sm:$0xff] }
  0x1e   :  { %1100 = vmatprep.subr.bf16.mxu0 %v1099_v36  ;;  %v108_v15 = vld [vmem:[%s1881_s2 + $0x220] sm:$0xff]  ;;  %v109_v16 = vld [vmem:[%s1881_s2 + $0x228] sm:$0xff]  ;;  %v1175_v18 = vpack.c.bf16 %v157_v10, %v156_v9  ;;  %v127_v21 = vld [vmem:[%s1881_s2 + $0x2b8] sm:$0xff] }
  0x1f   :  { %1130 = vmatpush3.bf16.msra.mxu1 %v1129_v35  ;;  %v140_v17 = vld [vmem:[%s1881_s2 + $0x320] sm:$0xff]  ;;  %v141_v19 = vld [vmem:[%s1881_s2 + $0x328] sm:$0xff]  ;;  %v158_v22 = vld [vmem:[%s1881_s2 + $0x3b0] sm:$0xff]  ;;  %v1145_v24 = vpack.c.bf16 %v109_v16, %v108_v15  ;;  %v1147_v26 = vpack.c.bf16 %v127_v21, %v126_v20  ;;  %v1256_v20 = vmov 0.0|0.0  }
  0x20   :  { %1132 = vmatprep.subr.bf16.mxu1 %v1131_v40  ;;  %v159_v23 = vld [vmem:[%s1881_s2 + $0x3b8] sm:$0xff]  ;;  %v1177_v25 = vpack.c.bf16 %v141_v19, %v140_v17  ;;  %v142_v29 = vld [vmem:[%s1881_s2 + $0x330] sm:$0xff]  ;;  %v128_v32 = vld [vmem:[%s1881_s2 + $0x2c0] sm:$0xff] }
  0x21   :  { %1102 = vmatpush3.bf16.msra.mxu0 %v1101_v48  ;;  %v111_v28 = vld [vmem:[%s1881_s2 + $0x238] sm:$0xff]  ;;  %v1179_v30 = vpack.c.bf16 %v159_v23, %v158_v22  ;;  %v129_v33 = vld [vmem:[%s1881_s2 + $0x2c8] sm:$0xff]  ;;  %v112_v39 = vld [vmem:[%s1881_s2 + $0x240] sm:$0xff] }
  0x22   :  { %1136 = vmatprep.subr.bf16.mxu0 %v1135_v50  ;;  %v143_v31 = vld [vmem:[%s1881_s2 + $0x338] sm:$0xff]  ;;  %v161_v35 = vld [vmem:[%s1881_s2 + $0x3c8] sm:$0xff]  ;;  %v1151_v38 = vpack.c.bf16 %v129_v33, %v128_v32  ;;  %v144_v41 = vld [vmem:[%s1881_s2 + $0x340] sm:$0xff] }
  0x23   :  { %1134 = vmatpush3.bf16.msra.mxu1 %v1133_v49  ;;  %v1181_v37 = vpack.c.bf16 %v143_v31, %v142_v29  ;;  %v113_v40 = vld [vmem:[%s1881_s2 + $0x248] sm:$0xff]  ;;  %v130_v44 = vld [vmem:[%s1881_s2 + $0x2d0] sm:$0xff]  ;;  %v131_v45 = vld [vmem:[%s1881_s2 + $0x2d8] sm:$0xff]  ;;  %v1257_v31 = vmov 0.0  }
  0x24   :  { %1168 = vmatprep.subr.bf16.mxu1 %v1167_v54  ;;  %284 = vmatmul.mubr.f32.vlgmr.msra.gmra.mrb[0].mxu0 %v184_v27  ;;  %v110_v27 = vld [vmem:[%s1881_s2 + $0x230] sm:$0xff]  ;;  %v145_v43 = vld [vmem:[%s1881_s2 + $0x348] sm:$0xff]  ;;  %v163_v47 = vld [vmem:[%s1881_s2 + $0x3d8] sm:$0xff]  ;;  %v1153_v48 = vpack.c.bf16 %v113_v40, %v112_v39  ;;  %v1155_v50 = vpack.c.bf16 %v131_v45, %v130_v44 }
  0x25   :  { %1138 = vmatpush3.bf16.msra.mxu0 %v1137_v62  ;;  %423 = vmatprep.mubr.f32.mxu0 %v209_v8  ;;  %v1149_v36 = vpack.c.bf16 %v111_v28, %v110_v27  ;;  %v162_v46 = vld [vmem:[%s1881_s2 + $0x3d0] sm:$0xff]  ;;  %v1185_v49 = vpack.c.bf16 %v145_v43, %v144_v41  ;;  %v115_v52 = vld [vmem:[%s1881_s2 + $0x258] sm:$0xff]  ;;  %v132_v56 = vld [vmem:[%s1881_s2 + $0x2e0] sm:$0xff] }
  0x26   :  { %354 = vmatmul.mubr.f32.vlgmr.msra.gmra.mrb[0].mxu1 %v191_v34  ;;  %1140 = vmatprep.subr.bf16.mxu0 %v1139_v0  ;;  %v160_v34 = vld [vmem:[%s1881_s2 + $0x3c0] sm:$0xff]  ;;  %v114_v51 = vld [vmem:[%s1881_s2 + $0x250] sm:$0xff]  ;;  %v1187_v54 = vpack.c.bf16 %v163_v47, %v162_v46  ;;  %v147_v55 = vld [vmem:[%s1881_s2 + $0x358] sm:$0xff] }
  0x27   :  { %1170 = vmatpush3.bf16.msra.mxu1 %v1169_v63  ;;  %493 = vmatprep.mubr.f32.mxu1 %v210_v11  ;;  %v1183_v42 = vpack.c.bf16 %v161_v35, %v160_v34  ;;  %v146_v53 = vld [vmem:[%s1881_s2 + $0x350] sm:$0xff]  ;;  %v133_v57 = vld [vmem:[%s1881_s2 + $0x2e8] sm:$0xff]  ;;  %v164_v59 = vld [vmem:[%s1881_s2 + $0x3e0] sm:$0xff]  ;;  %v1157_v62 = vpack.c.bf16 %v115_v52, %v114_v51 }
  0x28   :  { %1172 = vmatprep.subr.bf16.mxu1 %v1171_v4  ;;  %v165_v60 = vld [vmem:[%s1881_s2 + $0x3e8] sm:$0xff]  ;;  %v1189_v63 = vpack.c.bf16 %v147_v55, %v146_v53  ;;  %v1159_v0 = vpack.c.bf16 %v133_v57, %v132_v56  ;;  %v116_v1 = vld [vmem:[%s1881_s2 + $0x260] sm:$0xff]  ;;  %v134_v6 = vld [vmem:[%s1881_s2 + $0x2f0] sm:$0xff] }
  0x29   :  { %1142 = vmatpush3.bf16.msra.mxu0 %v1141_v12  ;;  %v117_v2 = vld [vmem:[%s1881_s2 + $0x268] sm:$0xff]  ;;  %v148_v3 = vld [vmem:[%s1881_s2 + $0x360] sm:$0xff]  ;;  %v1191_v4 = vpack.c.bf16 %v165_v60, %v164_v59  ;;  %v135_v7 = vld [vmem:[%s1881_s2 + $0x2f8] sm:$0xff] }
  0x2a   :  { %1144 = vmatprep.subr.bf16.mxu0 %v1143_v14  ;;  %v149_v5 = vld [vmem:[%s1881_s2 + $0x368] sm:$0xff]  ;;  %v166_v8 = vld [vmem:[%s1881_s2 + $0x3f0] sm:$0xff]  ;;  %v167_v9 = vld [vmem:[%s1881_s2 + $0x3f8] sm:$0xff]  ;;  %v1161_v10 = vpack.c.bf16 %v117_v2, %v116_v1  ;;  %v1163_v12 = vpack.c.bf16 %v135_v7, %v134_v6 }
  0x2b   :  { %1174 = vmatpush3.bf16.msra.mxu1 %v1173_v13  ;;  %v1193_v11 = vpack.c.bf16 %v149_v5, %v148_v3  ;;  %v118_v13 = vld [vmem:[%s1881_s2 + $0x270] sm:$0xff]  ;;  %v119_v14 = vld [vmem:[%s1881_s2 + $0x278] sm:$0xff]  ;;  %v1195_v15 = vpack.c.bf16 %v167_v9, %v166_v8  ;;  %v500_v21 = vld [vmem:[%s1883_s4] sm:$0xff] }
  0x2c   :  { %1176 = vmatprep.subr.bf16.mxu1 %v1175_v18  ;;  %v150_v16 = vld [vmem:[%s1881_s2 + $0x370] sm:$0xff]  ;;  %v151_v17 = vld [vmem:[%s1881_s2 + $0x378] sm:$0xff]  ;;  %v1165_v18 = vpack.c.bf16 %v119_v14, %v118_v13  ;;  %v501_v22 = vld [vmem:[%s1883_s4 + $0x8] sm:$0xff] }
  0x2d   :  { %1146 = vmatpush3.bf16.msra.mxu0 %v1145_v24  ;;  %v1197_v19 = vpack.c.bf16 %v151_v17, %v150_v16  ;;  %v502_v23 = vld [vmem:[%s1883_s4 + $0x10] sm:$0xff]  ;;  %v507_v29 = vld [vmem:[%s1883_s4 + $0x38] sm:$0xff]  ;;  %v508_v32 = vld [vmem:[%s1883_s4 + $0x40] sm:$0xff] }
  0x2e   :  { %1148 = vmatprep.subr.bf16.mxu0 %v1147_v26  ;;  %v505_v26 = vld [vmem:[%s1883_s4 + $0x28] sm:$0xff]  ;;  %v506_v28 = vld [vmem:[%s1883_s4 + $0x30] sm:$0xff]  ;;  %v590_v33 = vld [vmem:[%s1884_s6] sm:$0xff] }
  0x2f   :  { %1178 = vmatpush3.bf16.msra.mxu1 %v1177_v25  ;;  %v504_v25 = vld [vmem:[%s1883_s4 + $0x20] sm:$0xff]  ;;  %v591_v34 = vld [vmem:[%s1884_s6 + $0x8] sm:$0xff]  ;;  %v597_v43 = vld [vmem:[%s1884_s6 + $0x38] sm:$0xff] }
  0x30   :  { %1180 = vmatprep.subr.bf16.mxu1 %v1179_v30  ;;  %v1206_v27 = vpack.c.bf16 %v505_v26, %v504_v25  ;;  %v1209_v30 = vpack.c.bf16 %v507_v29, %v506_v28  ;;  %v1212_v35 = vpack.c.bf16 %v591_v34, %v590_v33  ;;  %v594_v39 = vld [vmem:[%s1884_s6 + $0x20] sm:$0xff]  ;;  %v595_v40 = vld [vmem:[%s1884_s6 + $0x28] sm:$0xff]  ;;  %v690_v16 = vld [vmem:[%s1886_s8 + $0x30] sm:$0xff] }
  0x31   :  { %1150 = vmatpush3.bf16.msra.mxu0 %v1149_v36  ;;  %v592_v36 = vld [vmem:[%s1884_s6 + $0x10] sm:$0xff]  ;;  %v1218_v41 = vpack.c.bf16 %v595_v40, %v594_v39  ;;  %v598_v45 = vld [vmem:[%s1884_s6 + $0x40] sm:$0xff]  ;;  %v599_v46 = vld [vmem:[%s1884_s6 + $0x48] sm:$0xff] }
  0x32   :  { %1152 = vmatprep.subr.bf16.mxu0 %v1151_v38  ;;  %v1224_v47 = vpack.c.bf16 %v599_v46, %v598_v45  ;;  %v807_v52 = vld [vmem:[%s1885_s3] ss:$0 sm:$0xff]  ;;  %v685_v6 = vld [vmem:[%s1886_s8 + $0x8] sm:$0xff]  ;;  %v691_v17 = vld [vmem:[%s1886_s8 + $0x38] sm:$0xff] }
  0x33   :  { %1182 = vmatpush3.bf16.msra.mxu1 %v1181_v37  ;;  %v593_v37 = vld [vmem:[%s1884_s6 + $0x18] sm:$0xff]  ;;  %v684_v5 = vld [vmem:[%s1886_s8] sm:$0xff]  ;;  %v689_v14 = vld [vmem:[%s1886_s8 + $0x28] sm:$0xff] }
  0x34   :  { %1184 = vmatprep.subr.bf16.mxu1 %v1183_v42  ;;  %v1215_v38 = vpack.c.bf16 %v593_v37, %v592_v36  ;;  %v596_v42 = vld [vmem:[%s1884_s6 + $0x30] sm:$0xff]  ;;  %v1230_v8 = vpack.c.bf16 %v685_v6, %v684_v5  ;;  %v688_v13 = vld [vmem:[%s1886_s8 + $0x20] sm:$0xff] }
  0x35   :  { %1154 = vmatpush3.bf16.msra.mxu0 %v1153_v48  ;;  %v1221_v44 = vpack.c.bf16 %v597_v43, %v596_v42  ;;  %v600_v48 = vld [vmem:[%s1884_s6 + $0x50] sm:$0xff]  ;;  %v696_v25 = vld [vmem:[%s1886_s8 + $0x60] sm:$0xff] }
  0x36   :  { %1156 = vmatprep.subr.bf16.mxu0 %v1155_v50  ;;  %v808_v26 = vld [vmem:[%s1887_s5] ss:$0 sm:$0xff] }
  0x37   :  { %1186 = vmatpush3.bf16.msra.mxu1 %v1185_v49  ;;  %v601_v49 = vld [vmem:[%s1884_s6 + $0x58] sm:$0xff]  ;;  %v812_v29 = vld [vmem:[%s1889_s9] ss:$0 sm:$0xff] }
  0x38   :  { %1188 = vmatprep.subr.bf16.mxu1 %v1187_v54  ;;  %v1227_v50 = vpack.c.bf16 %v601_v49, %v600_v48  ;;  %v777_v37 = vld [vmem:[%s1890_s1] sm:$0x3] }
  0x39   :  { %1158 = vmatpush3.bf16.msra.mxu0 %v1157_v62  ;;  %v781_v39 = vmul.f32 0.5, %v777_v37 }
  0x3a   :  { %1160 = vmatprep.subr.bf16.mxu0 %v1159_v0 }
  0x3b   :  { %1190 = vmatpush3.bf16.msra.mxu1 %v1189_v63  ;;  %v782_v45 = vmul.f32 %v781_v39, %v777_v37 }
  0x3c   :  { %1192 = vmatprep.subr.bf16.mxu1 %v1191_v4 }
  0x3d   :  { %1162 = vmatpush3.bf16.msra.mxu0 %v1161_v10  ;;  %v686_v10 = vld [vmem:[%s1886_s8 + $0x10] sm:$0xff] }
  0x3e   :  { %1164 = vmatprep.subr.bf16.mxu0 %v1163_v12 }
  0x3f   :  { %1194 = vmatpush3.bf16.msra.mxu1 %v1193_v11  ;;  %v687_v11 = vld [vmem:[%s1886_s8 + $0x18] sm:$0xff] }
  0x40   :  { %1196 = vmatprep.subr.bf16.mxu1 %v1195_v15  ;;  %v1233_v12 = vpack.c.bf16 %v687_v11, %v686_v10  ;;  %v1236_v15 = vpack.c.bf16 %v689_v14, %v688_v13 }
  0x41   :  { %1166 = vmatpush3.bf16.msra.mxu0 %v1165_v18  ;;  %v1239_v18 = vpack.c.bf16 %v691_v17, %v690_v16 }
  0x42   :  { %1199 = vmatprep.subr.bf16.mxu0 %v1256_v20 }
  0x43   :  { %1198 = vmatpush3.bf16.msra.mxu1 %v1197_v19  ;;  %v692_v19 = vld [vmem:[%s1886_s8 + $0x40] sm:$0xff] }
  0x44   :  { %424 = vmatmul.mubr.f32.vlgmr.msra.gmra.mrb[2].mxu0 %v1552_v58  ;;  %1211 = vmatprep.subr.bf16.mxu1 %v1256_v20  ;;  %v1200_v58 = vpack.c.bf16 %v501_v22, %v500_v21  ;;  %v693_v21 = vld [vmem:[%s1886_s8 + $0x48] sm:$0xff] }
  0x45   :  { %1010 = vmatprep.mubr.msk.f32.mxu0 %vm1258_vm0, %v1257_v31  ;;  %v1242_v22 = vpack.c.bf16 %v693_v21, %v692_v19 }
  0x46   :  { %494 = vmatmul.mubr.f32.vlgmr.msra.gmra.mrb[2].mxu1 %v1560_v61  ;;  %v503_v61 = vld [vmem:[%s1883_s4 + $0x18] sm:$0xff]  ;;  %1201 = vmatpush3.bf16.msra.mxu0 %v1200_v58 }
  0x47   :  { %v1203_v24 = vpack.c.bf16 %v503_v61, %v502_v23  ;;  %1202 = vmatprep.subr.bf16.mxu0 %v1256_v20  ;;  %1039 = vmatprep.mubr.msk.f32.mxu1 %vm1258_vm0, %v1257_v31  ;;  %v694_v23 = vld [vmem:[%s1886_s8 + $0x50] sm:$0xff]  ;;  %v695_v58 = vld [vmem:[%s1886_s8 + $0x58] sm:$0xff] }
  0x48   :  { %1213 = vmatpush3.bf16.msra.mxu1 %v1212_v35  ;;  %v1245_v61 = vpack.c.bf16 %v695_v58, %v694_v23 }
  0x49   :  { %1214 = vmatprep.subr.bf16.mxu1 %v1256_v20 }
  0x4a   :  { %1204 = vmatpush3.bf16.msra.mxu0 %v1203_v24  ;;  %v602_v24 = vld [vmem:[%s1884_s6 + $0x60] sm:$0xff] }
  0x4b   :  { %1205 = vmatprep.subr.bf16.mxu0 %v1256_v20 }
  0x4c   :  { %1216 = vmatpush3.bf16.msra.mxu1 %v1215_v38  ;;  %v810_v38 = vld [vmem:[%s1891_s7] ss:$0 sm:$0xff] }
  0x4d   :  { %1217 = vmatprep.subr.bf16.mxu1 %v1256_v20 }
  0x4e   :  { %1207 = vmatpush3.bf16.msra.mxu0 %v1206_v27 }
  0x4f   :  { %1208 = vmatprep.subr.bf16.mxu0 %v1256_v20 }
  0x50   :  { %1219 = vmatpush3.bf16.msra.mxu1 %v1218_v41 }
  0x51   :  { %1220 = vmatprep.subr.bf16.mxu1 %v1256_v20 }
  0x52   :  { %1210 = vmatpush3.bf16.msra.mxu0 %v1209_v30 }
  0x53   :  { %1008 = vmatprep.subr.mxu0 %v1257_v31 }
  0x54   :  { %1222 = vmatpush3.bf16.msra.mxu1 %v1221_v44 }
  0x55   :  { %1223 = vmatprep.subr.bf16.mxu1 %v1256_v20 }
  0x56   :  { %1009 = vmatpush3.msra.mxu0 %v508_v32 }
  0x57   :  { %1229 = vmatprep.subr.bf16.mxu0 %v1256_v20 }
  0x58   :  { %1225 = vmatpush3.bf16.msra.mxu1 %v1224_v47 }
  0x59   :  { %1226 = vmatprep.subr.bf16.mxu1 %v1256_v20 }
  0x5c   :  { %1228 = vmatpush3.bf16.msra.mxu1 %v1227_v50 }
  0x5d   :  { %1037 = vmatprep.subr.mxu1 %v1257_v31 }
  0x60   :  { %1038 = vmatpush3.msra.mxu1 %v602_v24 }
  0xf7   :  { %v846_v51 = vpop.f32.mrb[0].mxu0 }
  0xf8   :  { %v847_v53 = vpop.f32.mrb[1].mxu0 }
  0xf9   :  { %v881_v54 = vpop.f32.mrb[0].mxu1  ;;  %v848_v55 = vadd.f32 %v847_v53, %v846_v51 }
  0xfa   :  { %v882_v56 = vpop.f32.mrb[1].mxu1 }
  0xfb   :  { %v883_v57 = vadd.f32 %v882_v56, %v881_v54  ;;  %v286_v59 = vadd.f32 %v848_v55, %v807_v52 }
  0xfd   :  { %v356_v60 = vadd.f32 %v883_v57, %v286_v59 }
 0x117   :  { %v916_v62 = vpop.f32.mrb[2].mxu0 }
 0x118   :  { %v917_v63 = vpop.f32.mrb[3].mxu0 }
 0x119   :  { %v951_v0 = vpop.f32.mrb[2].mxu1  ;;  %v918_v1 = vadd.f32 %v917_v63, %v916_v62 }
 0x11a   :  { %v952_v2 = vpop.f32.mrb[3].mxu1 }
 0x11b   :  { %v953_v3 = vadd.f32 %v952_v2, %v951_v0  ;;  %v426_v4 = vadd.f32 %v918_v1, %v356_v60 }
 0x11d   :  { %v496_v7 = vadd.f32 %v953_v3, %v426_v4 }
 0x11f   :  { %v499_v9 = vmax.f32 %v496_v7, 0.0 }
 0x121   :  { %1011 = vmatmul.mubr.msk.f32.vlgmr.msra.gmra.mrb[4].mxu0 %vm516_vm1, %v499_v9 }
 0x122   :  { %1231 = vmatpush3.bf16.msra.mxu0 %v1230_v8  ;;  %1068 = vmatprep.mubr.msk.f32.mxu0 %vm1258_vm0, %v1257_v31 }
 0x123   :  { %1232 = vmatprep.subr.bf16.mxu0 %v1256_v20 }
 0x126   :  { %1234 = vmatpush3.bf16.msra.mxu0 %v1233_v12 }
 0x127   :  { %1235 = vmatprep.subr.bf16.mxu0 %v1256_v20 }
 0x12a   :  { %1237 = vmatpush3.bf16.msra.mxu0 %v1236_v15 }
 0x12b   :  { %1238 = vmatprep.subr.bf16.mxu0 %v1256_v20 }
 0x12e   :  { %1240 = vmatpush3.bf16.msra.mxu0 %v1239_v18 }
 0x12f   :  { %1241 = vmatprep.subr.bf16.mxu0 %v1256_v20 }
 0x132   :  { %1243 = vmatpush3.bf16.msra.mxu0 %v1242_v22 }
 0x133   :  { %1244 = vmatprep.subr.bf16.mxu0 %v1256_v20 }
 0x136   :  { %1246 = vmatpush3.bf16.msra.mxu0 %v1245_v61 }
 0x137   :  { %1066 = vmatprep.subr.mxu0 %v1257_v31 }
 0x13a   :  { %1067 = vmatpush3.msra.mxu0 %v696_v25 }
 0x1f4   :  { %v586_v27 = vpop.f32.mrb[4].mxu0 }
 0x1f5   :  { %v587_v20 = vadd.f32 %v808_v26, %v586_v27  ;;  %v1012_v28 = vpop.f32.mrb[5].mxu0 }
 0x1f7   :  { %1040 = vmatmul.mubr.msk.f32.vlgmr.msra.gmra.mrb[4].mxu1 %vm610_vm2, %v587_v20  ;;  %1069 = vmatmul.mubr.msk.f32.vlgmr.msra.gmra.mrb[6].mxu0 %vm610_vm2, %v587_v20  ;;  %791 = vst.msk [vmem:[%s1888_s10] sm:$0x3] %vm787_vm3, %v587_v20 }
 0x2ca   :  { %v680_v30 = vpop.f32.mrb[4].mxu1  ;;  %v770_v31 = vpop.f32.mrb[6].mxu0 }
 0x2cb   :  { %v771_v32 = vadd.f32 %v812_v29, %v770_v31  ;;  %v1041_v33 = vpop.f32.mrb[5].mxu1  ;;  %v1070_v34 = vpop.f32.mrb[7].mxu0  ;;  %v681_v41 = vadd.f32 %v810_v38, %v680_v30 }
 0x2cd   :  { %v774_v35 = vmul.f32 0.5, %v771_v32  ;;  %v780_v43 = vmul.f32 -0.5, %v771_v32 }
 0x2cf   :  { %v775_v36 = vmul.f32 1.442695, %v774_v35  ;;  %v783_v47 = vsub.f32 %v780_v43, %v782_v45 }
 0x2d1   :  { %1253 = vpow2.f32 %v775_v36 }
 0x2db   :  { %v1254_v40 = vpop.eup %1253 }
 0x2dc   :  { %v778_v42 = vmul.f32 %v1254_v40, %v777_v37 }
 0x2de   :  { %v779_v44 = vadd.f32 %v778_v42, %v681_v41 }
 0x2e0   :  { %v784_v46 = vmul.f32 0.5, %v779_v44  ;;  %792 = vst.msk [vmem:[%s1892_s11] sm:$0x3] %vm787_vm3, %v779_v44 }
 0x2e2   :  { %v785_v48 = vmul.f32 %v784_v46, %v779_v44 }
 0x2e4   :  { %v786_v49 = vadd.f32 %v785_v48, %v783_v47 }
 0x2e6   :  { %v788_v50 = vsel %vm787_vm3, %v786_v49, 0.0 }
 0x2e7   :  { %789 = vadd.xlane.f32.xlu0 %v788_v50 }
 0x374   :  { %v790_v51 = vpop.xlane.xlu0 %789 }
 0x375   :  { %794 = vst.msk [vmem:[%s1893_s12] sm:$0x3] %vm793_vm4, %v790_v51 }

// kernel: pointnet_autoencoder_forward.6
= control target key start
LH: loop header
LB: loop body
LE: loop exit
PB: predicated region body
PF: predicated region fallthrough
CT: control target
= control target key end

     0   :  { %12 = vsyncpa [#allocation3], 0  ;;  %s2791_s0 = inlined_call_operand.vmem [shape: f32[2,1024], index: 0, kind: input, shape index: {}]   ;;  %s2792_s1 = inlined_call_operand.hbm [shape: f32[1024,512], index: 1, kind: input, shape index: {}]   ;;  %s2793_s2 = inlined_call_operand.hbm [shape: f32[1,512], index: 2, kind: input, shape index: {}]   ;;  %s2794_s3 = inlined_call_operand.hbm [shape: f32[512,256], index: 3, kind: input, shape index: {}]   ;;  %s2795_s4 = inlined_call_operand.hbm [shape: f32[1,256], index: 4, kind: input, shape index: {}]   ;;  %s2796_s5 = inlined_call_operand.vmem [shape: f32[256,9], index: 5, kind: input, shape index: {}]   ;;  %s2797_s6 = inlined_call_operand.hbm [shape: f32[1,9], index: 6, kind: input, shape index: {}]   ;;  %s2798_s7 = inlined_call_operand.vmem [shape: f32[2,9], index: 7, kind: output, shape index: {}]  }
   0x1   :  { %13 = vsyncpa [#allocation5], 0 }
   0x2   :  { %14 = vsyncpa [#allocation8], 0  ;;  %s2498_s24 = smov [#allocation4]   ;;  %s2499_s26 = smov [#allocation7]  }
   0x3   :  { %s35_s25 = sshll.u32 %s2498_s24, 4  ;;  %s57_s27 = sshll.u32 %s2499_s26, 4  ;;  %s36_s25 = int_to_ptr.vmem [resolvable:$true] %s35_s25  ;;  %s58_s27 = int_to_ptr.vmem [resolvable:$true] %s57_s27 }
   0x4   :  { %s2382_s30 = scalar_lea.hbm %s2793_s2, 64 }
   0x5   :  { %p2383_p0 = scmp.ne.s32.totalorder %s2793_s2, %s2382_s30  ;;  %p2386_p1 = scmp.lt.u32.totalorder %s2382_s30, %s2793_s2 }
   0x7   :  { %p2388_p2 = pnand %p2386_p1, %p2383_p0 }
   0x9   :  { %2391 = shalt.err (!%p2388_p2)
}
   0xa   :  { %s2392_s12 = scalar_lea.vmem %s36_s25, 64  ;;  %p2397_p4 = scmp.lt.s32.totalorder %s36_s25, %s36_s25 }
   0xb   :  { %p2393_p3 = scmp.ne.s32.totalorder %s36_s25, %s2392_s12  ;;  %p2398_p5 = scmp.lt.s32.totalorder %s2392_s12, %s2392_s12 }
   0xd   :  { %p2399_p6 = por %p2398_p5, %p2397_p4 }
   0xf   :  { %p2400_p7 = pnand %p2399_p6, %p2393_p3 }
  0x11   :  { %2403 = shalt.err (!%p2400_p7)
}
  0x12   :  { %38 = dma.hbm_to_vmem [thread:$0]  %s2793_s2, 64, %s36_s25, [#allocation5]  }
  0x13   :  { %s2404_s17 = scalar_lea.hbm %s2795_s4, 32 }
  0x14   :  { %p2405_p8 = scmp.ne.s32.totalorder %s2795_s4, %s2404_s17  ;;  %p2408_p9 = scmp.lt.u32.totalorder %s2404_s17, %s2795_s4 }
  0x16   :  { %p2410_p10 = pnand %p2408_p9, %p2405_p8 }
  0x18   :  { %2413 = shalt.err (!%p2410_p10)
}
  0x19   :  { %s2414_s22 = scalar_lea.vmem %s58_s27, 32  ;;  %p2419_p12 = scmp.lt.s32.totalorder %s58_s27, %s58_s27 }
  0x1a   :  { %p2415_p11 = scmp.ne.s32.totalorder %s58_s27, %s2414_s22  ;;  %p2420_p13 = scmp.lt.s32.totalorder %s2414_s22, %s2414_s22 }
  0x1c   :  { %p2421_p0 = por %p2420_p13, %p2419_p12 }
  0x1e   :  { %p2422_p1 = pnand %p2421_p0, %p2415_p11 }
  0x20   :  { %2425 = shalt.err (!%p2422_p1)
}
  0x21   :  { %60 = dma.hbm_to_vmem [thread:$0]  %s2795_s4, 32, %s58_s27, [#allocation8]  }
  0x22   :  { %s2500_s24 = smov [#allocation2]   ;;  %s2426_s29 = scalar_lea.hbm %s2792_s1, 65536 }
  0x23   :  { %s22_s25 = sshll.u32 %s2500_s24, 4  ;;  %p2427_p2 = scmp.ne.s32.totalorder %s2792_s1, %s2426_s29  ;;  %s23_s25 = int_to_ptr.vmem [resolvable:$true] %s22_s25 }
  0x24   :  { %p2430_p3 = scmp.lt.u32.totalorder %s2426_s29, %s2792_s1 }
  0x26   :  { %p2432_p4 = pnand %p2430_p3, %p2427_p2 }
  0x28   :  { %2435 = shalt.err (!%p2432_p4)
}
  0x29   :  { %s2436_s11 = scalar_lea.vmem %s23_s25, 65536  ;;  %p2441_p6 = scmp.lt.s32.totalorder %s23_s25, %s23_s25 }
  0x2a   :  { %p2437_p5 = scmp.ne.s32.totalorder %s23_s25, %s2436_s11  ;;  %p2442_p7 = scmp.lt.s32.totalorder %s2436_s11, %s2436_s11 }
  0x2c   :  { %p2443_p8 = por %p2442_p7, %p2441_p6 }
  0x2e   :  { %p2444_p9 = pnand %p2443_p8, %p2437_p5 }
  0x30   :  { %2447 = shalt.err (!%p2444_p9)
}
  0x31   :  { %s2501_s4 = smov 512   ;;  %s2502_s27 = smov 32  }
  0x32   :  { %28 = dma.hbm_to_vmem [thread:$0]  %s2792_s1, 65536, %s23_s25, [#allocation3], %s2501_s4, %s2501_s4, %s2502_s27  }
  0x33   :  { %s2503_s14 = smov [#allocation6]   ;;  %s2448_s18 = scalar_lea.hbm %s2794_s3, 16384 }
  0x34   :  { %s44_s15 = sshll.u32 %s2503_s14, 4  ;;  %p2449_p10 = scmp.ne.s32.totalorder %s2794_s3, %s2448_s18  ;;  %s45_s15 = int_to_ptr.vmem [resolvable:$true] %s44_s15 }
  0x35   :  { %p2452_p11 = scmp.lt.u32.totalorder %s2448_s18, %s2794_s3 }
  0x37   :  { %p2454_p12 = pnand %p2452_p11, %p2449_p10 }
  0x39   :  { %2457 = shalt.err (!%p2454_p12)
}
  0x3a   :  { %s2458_s2 = scalar_lea.vmem %s45_s15, 16384  ;;  %p2463_p0 = scmp.lt.s32.totalorder %s45_s15, %s45_s15 }
  0x3b   :  { %p2459_p13 = scmp.ne.s32.totalorder %s45_s15, %s2458_s2  ;;  %p2464_p1 = scmp.lt.s32.totalorder %s2458_s2, %s2458_s2 }
  0x3d   :  { %p2465_p2 = por %p2464_p1, %p2463_p0 }
  0x3f   :  { %p2466_p3 = pnand %p2465_p2, %p2459_p13 }
  0x41   :  { %2469 = shalt.err (!%p2466_p3)
}
  0x42   :  { %s2504_s1 = smov 256   ;;  %s2505_s23 = smov 16  }
  0x43   :  { %50 = dma.hbm_to_vmem [thread:$0]  %s2794_s3, 16384, %s45_s15, [#allocation5], %s2504_s1, %s2504_s1, %s2505_s23  }
  0x44   :  { %s2506_s26 = smov [#allocation9]   ;;  %s2470_s8 = scalar_lea.hbm %s2797_s6, 16 }
  0x45   :  { %s69_s28 = sshll.u32 %s2506_s26, 4  ;;  %p2471_p4 = scmp.ne.s32.totalorder %s2797_s6, %s2470_s8  ;;  %s70_s28 = int_to_ptr.vmem [resolvable:$true] %s69_s28 }
  0x46   :  { %p2474_p5 = scmp.lt.u32.totalorder %s2470_s8, %s2797_s6 }
  0x48   :  { %p2476_p6 = pnand %p2474_p5, %p2471_p4 }
  0x4a   :  { %2479 = shalt.err (!%p2476_p6)
}
  0x4b   :  { %s2480_s27 = scalar_lea.vmem %s70_s28, 16  ;;  %s2484_s3 = scalar_lea.vmem %s70_s28, 32 }
  0x4c   :  { %p2481_p7 = scmp.ne.s32.totalorder %s70_s28, %s2480_s27  ;;  %p2485_p8 = scmp.lt.s32.totalorder %s70_s28, %s70_s28 }
  0x4d   :  { %p2486_p9 = scmp.lt.s32.totalorder %s2484_s3, %s2480_s27 }
  0x4f   :  { %p2487_p10 = por %p2486_p9, %p2485_p8 }
  0x51   :  { %p2488_p11 = pnand %p2487_p10, %p2481_p7 }
  0x53   :  { %2491 = shalt.err (!%p2488_p11)
}
  0x54   :  { %72 = dma.hbm_to_vmem [thread:$0]  %s2797_s6, 16, %s70_s28, [#allocation8]  }
  0x55   :  { %2492 = dma.done.wait [#allocation3], 65536  }
  0x56   :  { %2493 = vsyncadd [#allocation3], 4294901760 }
  0x57   :  { %2494 = dma.done.wait [#allocation5], 16448  }
  0x58   :  { %2495 = vsyncadd [#allocation5], 4294950848 }
  0x59   :  { %2496 = dma.done.wait [#allocation8], 48  }
  0x5a   :  { %2497 = vsyncadd [#allocation8], 4294967248  ;;  %v91_v0 = vld [vmem:[#allocation2 + $0x8] sm:$0xff]  ;;  %v90_v5 = vld [vmem:[#allocation2] sm:$0xff]  ;;  %vm1633_vm0 = vcmask 66560  }
  0x5b   :  { %v95_v1 = vld [vmem:[#allocation2 + $0x28] sm:$0xff]  ;;  %v94_v6 = vld [vmem:[#allocation2 + $0x20] sm:$0xff] }
  0x5c   :  { %v219_v2 = vld [vmem:[#allocation2 + $0x408] sm:$0xff]  ;;  %v1678_v3 = vpack.c.bf16 %v95_v1, %v91_v0  ;;  %v1680_v8 = vpack.c.bf16 %v94_v6, %v90_v5  ;;  %v218_v9 = vld [vmem:[#allocation2 + $0x400] sm:$0xff] }
  0x5d   :  { %v223_v4 = vld [vmem:[#allocation2 + $0x428] sm:$0xff]  ;;  %v222_v10 = vld [vmem:[#allocation2 + $0x420] sm:$0xff] }
  0x5e   :  { %v1742_v7 = vpack.c.bf16 %v223_v4, %v219_v2  ;;  %v99_v11 = vld [vmem:[#allocation2 + $0x48] sm:$0xff]  ;;  %1679 = vmatprep.subr.bf16.mxu1 %v1678_v3  ;;  %v1744_v12 = vpack.c.bf16 %v222_v10, %v218_v9  ;;  %v98_v18 = vld [vmem:[#allocation2 + $0x40] sm:$0xff] }
  0x5f   :  { %v103_v13 = vld [vmem:[#allocation2 + $0x68] sm:$0xff]  ;;  %1681 = vmatpush1.bf16.msra.mxu1 %v1680_v8  ;;  %v102_v19 = vld [vmem:[#allocation2 + $0x60] sm:$0xff] }
  0x60   :  { %v227_v14 = vld [vmem:[#allocation2 + $0x448] sm:$0xff]  ;;  %1743 = vmatprep.subr.bf16.mxu0 %v1742_v7  ;;  %v1682_v16 = vpack.c.bf16 %v103_v13, %v99_v11  ;;  %v226_v20 = vld [vmem:[#allocation2 + $0x440] sm:$0xff]  ;;  %v1684_v21 = vpack.c.bf16 %v102_v19, %v98_v18 }
  0x61   :  { %v231_v15 = vld [vmem:[#allocation2 + $0x468] sm:$0xff]  ;;  %1745 = vmatpush1.bf16.msra.mxu0 %v1744_v12  ;;  %v230_v22 = vld [vmem:[#allocation2 + $0x460] sm:$0xff] }
  0x62   :  { %v1746_v17 = vpack.c.bf16 %v231_v15, %v227_v14  ;;  %v107_v23 = vld [vmem:[#allocation2 + $0x88] sm:$0xff]  ;;  %1683 = vmatprep.subr.bf16.mxu1 %v1682_v16  ;;  %v1748_v25 = vpack.c.bf16 %v230_v22, %v226_v20  ;;  %v106_v29 = vld [vmem:[#allocation2 + $0x80] sm:$0xff] }
  0x63   :  { %v111_v24 = vld [vmem:[#allocation2 + $0xa8] sm:$0xff]  ;;  %v110_v31 = vld [vmem:[#allocation2 + $0xa0] sm:$0xff]  ;;  %1685 = vmatpush1.bf16.msra.mxu1 %v1684_v21 }
  0x64   :  { %1747 = vmatprep.subr.bf16.mxu0 %v1746_v17  ;;  %v1686_v26 = vpack.c.bf16 %v111_v24, %v107_v23  ;;  %v235_v27 = vld [vmem:[#allocation2 + $0x488] sm:$0xff]  ;;  %v234_v32 = vld [vmem:[#allocation2 + $0x480] sm:$0xff]  ;;  %v1688_v34 = vpack.c.bf16 %v110_v31, %v106_v29 }
  0x65   :  { %v239_v28 = vld [vmem:[#allocation2 + $0x4a8] sm:$0xff]  ;;  %v238_v33 = vld [vmem:[#allocation2 + $0x4a0] sm:$0xff]  ;;  %1749 = vmatpush1.bf16.msra.mxu0 %v1748_v25 }
  0x66   :  { %v1750_v30 = vpack.c.bf16 %v239_v28, %v235_v27  ;;  %v115_v35 = vld [vmem:[#allocation2 + $0xc8] sm:$0xff]  ;;  %1687 = vmatprep.subr.bf16.mxu1 %v1686_v26  ;;  %v1752_v38 = vpack.c.bf16 %v238_v33, %v234_v32  ;;  %v114_v41 = vld [vmem:[#allocation2 + $0xc0] sm:$0xff] }
  0x67   :  { %v119_v36 = vld [vmem:[#allocation2 + $0xe8] sm:$0xff]  ;;  %v118_v42 = vld [vmem:[#allocation2 + $0xe0] sm:$0xff]  ;;  %1689 = vmatpush1.bf16.msra.mxu1 %v1688_v34 }
  0x68   :  { %v243_v37 = vld [vmem:[#allocation2 + $0x4c8] sm:$0xff]  ;;  %v1690_v39 = vpack.c.bf16 %v119_v36, %v115_v35  ;;  %1751 = vmatprep.subr.bf16.mxu0 %v1750_v30  ;;  %v242_v44 = vld [vmem:[#allocation2 + $0x4c0] sm:$0xff]  ;;  %v1692_v50 = vpack.c.bf16 %v118_v42, %v114_v41 }
  0x69   :  { %v247_v40 = vld [vmem:[#allocation2 + $0x4e8] sm:$0xff]  ;;  %v246_v45 = vld [vmem:[#allocation2 + $0x4e0] sm:$0xff]  ;;  %1753 = vmatpush1.bf16.msra.mxu0 %v1752_v38 }
  0x6a   :  { %v1754_v43 = vpack.c.bf16 %v247_v40, %v243_v37  ;;  %v123_v46 = vld [vmem:[#allocation2 + $0x108] sm:$0xff]  ;;  %1691 = vmatprep.subr.bf16.mxu1 %v1690_v39  ;;  %v1756_v51 = vpack.c.bf16 %v246_v45, %v242_v44  ;;  %v122_v53 = vld [vmem:[#allocation2 + $0x100] sm:$0xff] }
  0x6b   :  { %v127_v47 = vld [vmem:[#allocation2 + $0x128] sm:$0xff]  ;;  %v126_v54 = vld [vmem:[#allocation2 + $0x120] sm:$0xff]  ;;  %1693 = vmatpush1.bf16.msra.mxu1 %v1692_v50 }
  0x6c   :  { %v251_v48 = vld [vmem:[#allocation2 + $0x508] sm:$0xff]  ;;  %v1694_v52 = vpack.c.bf16 %v127_v47, %v123_v46  ;;  %v250_v55 = vld [vmem:[#allocation2 + $0x500] sm:$0xff]  ;;  %1755 = vmatprep.subr.bf16.mxu0 %v1754_v43  ;;  %v1696_v62 = vpack.c.bf16 %v126_v54, %v122_v53  ;;  %v604_v46 = vlaneseq  ;;  %v2507_v47 = vmov 1983009808  }
  0x6d   :  { %v255_v49 = vld [vmem:[#allocation2 + $0x528] sm:$0xff]  ;;  %v254_v57 = vld [vmem:[#allocation2 + $0x520] sm:$0xff]  ;;  %1757 = vmatpush1.bf16.msra.mxu0 %v1756_v51 }
  0x6e   :  { %v1758_v56 = vpack.c.bf16 %v255_v49, %v251_v48  ;;  %v131_v58 = vld [vmem:[#allocation2 + $0x148] sm:$0xff]  ;;  %1695 = vmatprep.subr.bf16.mxu1 %v1694_v52  ;;  %v1760_v63 = vpack.c.bf16 %v254_v57, %v250_v55  ;;  %v130_v1 = vld [vmem:[#allocation2 + $0x140] sm:$0xff]  ;;  %v628_v48 = vunpack.c.l.s4 %v2507_v47 }
  0x6f   :  { %v135_v59 = vld [vmem:[#allocation2 + $0x168] sm:$0xff]  ;;  %v134_v2 = vld [vmem:[#allocation2 + $0x160] sm:$0xff]  ;;  %1697 = vmatpush1.bf16.msra.mxu1 %v1696_v62 }
  0x70   :  { %v259_v60 = vld [vmem:[#allocation2 + $0x548] sm:$0xff]  ;;  %v1698_v0 = vpack.c.bf16 %v135_v59, %v131_v58  ;;  %v258_v3 = vld [vmem:[#allocation2 + $0x540] sm:$0xff]  ;;  %1759 = vmatprep.subr.bf16.mxu0 %v1758_v56  ;;  %v1700_v10 = vpack.c.bf16 %v134_v2, %v130_v1  ;;  %v629_v62 = vunpack.c.0.s8 %v628_v48 }
  0x71   :  { %v263_v61 = vld [vmem:[#allocation2 + $0x568] sm:$0xff]  ;;  %v262_v5 = vld [vmem:[#allocation2 + $0x560] sm:$0xff]  ;;  %1761 = vmatpush1.bf16.msra.mxu0 %v1760_v63 }
  0x72   :  { %v1762_v4 = vpack.c.bf16 %v263_v61, %v259_v60  ;;  %v139_v6 = vld [vmem:[#allocation2 + $0x188] sm:$0xff]  ;;  %1699 = vmatprep.subr.bf16.mxu1 %v1698_v0  ;;  %v1764_v11 = vpack.c.bf16 %v262_v5, %v258_v3  ;;  %v138_v13 = vld [vmem:[#allocation2 + $0x180] sm:$0xff]  ;;  %v2608_v61 = vshrl.u32 %v604_v46, 7 }
  0x73   :  { %v143_v7 = vld [vmem:[#allocation2 + $0x1a8] sm:$0xff]  ;;  %v142_v14 = vld [vmem:[#allocation2 + $0x1a0] sm:$0xff]  ;;  %1701 = vmatpush1.bf16.msra.mxu1 %v1700_v10 }
  0x74   :  { %v267_v8 = vld [vmem:[#allocation2 + $0x588] sm:$0xff]  ;;  %v1702_v12 = vpack.c.bf16 %v143_v7, %v139_v6  ;;  %v266_v15 = vld [vmem:[#allocation2 + $0x580] sm:$0xff]  ;;  %1763 = vmatprep.subr.bf16.mxu0 %v1762_v4  ;;  %v1704_v22 = vpack.c.bf16 %v142_v14, %v138_v13 }
  0x75   :  { %v271_v9 = vld [vmem:[#allocation2 + $0x5a8] sm:$0xff]  ;;  %v270_v17 = vld [vmem:[#allocation2 + $0x5a0] sm:$0xff]  ;;  %1765 = vmatpush1.bf16.msra.mxu0 %v1764_v11  ;;  %v2611_v11 = vsub.s32 %v629_v62, %v2608_v61 }
  0x76   :  { %v1766_v16 = vpack.c.bf16 %v271_v9, %v267_v8  ;;  %v147_v18 = vld [vmem:[#allocation2 + $0x1c8] sm:$0xff]  ;;  %1703 = vmatprep.subr.bf16.mxu1 %v1702_v12  ;;  %v1768_v23 = vpack.c.bf16 %v270_v17, %v266_v15  ;;  %v146_v25 = vld [vmem:[#allocation2 + $0x1c0] sm:$0xff] }
  0x77   :  { %v151_v19 = vld [vmem:[#allocation2 + $0x1e8] sm:$0xff]  ;;  %v150_v26 = vld [vmem:[#allocation2 + $0x1e0] sm:$0xff]  ;;  %1705 = vmatpush1.bf16.msra.mxu1 %v1704_v22 }
  0x78   :  { %v275_v20 = vld [vmem:[#allocation2 + $0x5c8] sm:$0xff]  ;;  %v1706_v24 = vpack.c.bf16 %v151_v19, %v147_v18  ;;  %v274_v27 = vld [vmem:[#allocation2 + $0x5c0] sm:$0xff]  ;;  %1767 = vmatprep.subr.bf16.mxu0 %v1766_v16  ;;  %v1708_v34 = vpack.c.bf16 %v150_v26, %v146_v25 }
  0x79   :  { %v279_v21 = vld [vmem:[#allocation2 + $0x5e8] sm:$0xff]  ;;  %v278_v29 = vld [vmem:[#allocation2 + $0x5e0] sm:$0xff]  ;;  %1769 = vmatpush1.bf16.msra.mxu0 %v1768_v23 }
  0x7a   :  { %v1770_v28 = vpack.c.bf16 %v279_v21, %v275_v20  ;;  %v155_v30 = vld [vmem:[#allocation2 + $0x208] sm:$0xff]  ;;  %1707 = vmatprep.subr.bf16.mxu1 %v1706_v24  ;;  %v1772_v35 = vpack.c.bf16 %v278_v29, %v274_v27  ;;  %v154_v37 = vld [vmem:[#allocation2 + $0x200] sm:$0xff] }
  0x7b   :  { %v159_v31 = vld [vmem:[#allocation2 + $0x228] sm:$0xff]  ;;  %v158_v38 = vld [vmem:[#allocation2 + $0x220] sm:$0xff]  ;;  %1709 = vmatpush1.bf16.msra.mxu1 %v1708_v34 }
  0x7c   :  { %v283_v32 = vld [vmem:[#allocation2 + $0x608] sm:$0xff]  ;;  %v1710_v36 = vpack.c.bf16 %v159_v31, %v155_v30  ;;  %v282_v39 = vld [vmem:[#allocation2 + $0x600] sm:$0xff]  ;;  %1771 = vmatprep.subr.bf16.mxu0 %v1770_v28  ;;  %v1712_v49 = vpack.c.bf16 %v158_v38, %v154_v37 }
  0x7d   :  { %v287_v33 = vld [vmem:[#allocation2 + $0x628] sm:$0xff]  ;;  %v286_v41 = vld [vmem:[#allocation2 + $0x620] sm:$0xff]  ;;  %1773 = vmatpush1.bf16.msra.mxu0 %v1772_v35 }
  0x7e   :  { %v1774_v40 = vpack.c.bf16 %v287_v33, %v283_v32  ;;  %v163_v42 = vld [vmem:[#allocation2 + $0x248] sm:$0xff]  ;;  %1711 = vmatprep.subr.bf16.mxu1 %v1710_v36  ;;  %v1776_v50 = vpack.c.bf16 %v286_v41, %v282_v39  ;;  %v162_v52 = vld [vmem:[#allocation2 + $0x240] sm:$0xff] }
  0x7f   :  { %v167_v43 = vld [vmem:[#allocation2 + $0x268] sm:$0xff]  ;;  %v166_v53 = vld [vmem:[#allocation2 + $0x260] sm:$0xff]  ;;  %1713 = vmatpush1.bf16.msra.mxu1 %v1712_v49 }
  0x80   :  { %v291_v44 = vld [vmem:[#allocation2 + $0x648] sm:$0xff]  ;;  %v1714_v51 = vpack.c.bf16 %v167_v43, %v163_v42  ;;  %v290_v54 = vld [vmem:[#allocation2 + $0x640] sm:$0xff]  ;;  %1775 = vmatprep.subr.bf16.mxu0 %v1774_v40  ;;  %v1716_v63 = vpack.c.bf16 %v166_v53, %v162_v52 }
  0x81   :  { %v295_v45 = vld [vmem:[#allocation2 + $0x668] sm:$0xff]  ;;  %v294_v56 = vld [vmem:[#allocation2 + $0x660] sm:$0xff]  ;;  %1777 = vmatpush1.bf16.msra.mxu0 %v1776_v50 }
  0x82   :  { %v1778_v55 = vpack.c.bf16 %v295_v45, %v291_v44  ;;  %v171_v57 = vld [vmem:[#allocation2 + $0x288] sm:$0xff]  ;;  %1715 = vmatprep.subr.bf16.mxu1 %v1714_v51  ;;  %v1780_v0 = vpack.c.bf16 %v294_v56, %v290_v54  ;;  %v170_v2 = vld [vmem:[#allocation2 + $0x280] sm:$0xff] }
  0x83   :  { %v175_v58 = vld [vmem:[#allocation2 + $0x2a8] sm:$0xff]  ;;  %v174_v3 = vld [vmem:[#allocation2 + $0x2a0] sm:$0xff]  ;;  %1717 = vmatpush1.bf16.msra.mxu1 %v1716_v63 }
  0x84   :  { %v299_v59 = vld [vmem:[#allocation2 + $0x688] sm:$0xff]  ;;  %v1718_v1 = vpack.c.bf16 %v175_v58, %v171_v57  ;;  %v298_v4 = vld [vmem:[#allocation2 + $0x680] sm:$0xff]  ;;  %1779 = vmatprep.subr.bf16.mxu0 %v1778_v55  ;;  %v1720_v12 = vpack.c.bf16 %v174_v3, %v170_v2 }
  0x85   :  { %v303_v60 = vld [vmem:[#allocation2 + $0x6a8] sm:$0xff]  ;;  %v302_v6 = vld [vmem:[#allocation2 + $0x6a0] sm:$0xff]  ;;  %1781 = vmatpush1.bf16.msra.mxu0 %v1780_v0 }
  0x86   :  { %v1782_v5 = vpack.c.bf16 %v303_v60, %v299_v59  ;;  %v179_v7 = vld [vmem:[#allocation2 + $0x2c8] sm:$0xff]  ;;  %v178_v13 = vld [vmem:[#allocation2 + $0x2c0] sm:$0xff]  ;;  %1719 = vmatprep.subr.bf16.mxu1 %v1718_v1  ;;  %v1784_v14 = vpack.c.bf16 %v302_v6, %v298_v4 }
  0x87   :  { %v183_v8 = vld [vmem:[#allocation2 + $0x2e8] sm:$0xff]  ;;  %v182_v16 = vld [vmem:[#allocation2 + $0x2e0] sm:$0xff]  ;;  %1721 = vmatpush1.bf16.msra.mxu1 %v1720_v12  ;;  %v93_v12 = vld [vmem:[#allocation2 + $0x18] sm:$0xff] }
  0x88   :  { %v307_v9 = vld [vmem:[#allocation2 + $0x6c8] sm:$0xff]  ;;  %v1722_v15 = vpack.c.bf16 %v183_v8, %v179_v7  ;;  %v306_v17 = vld [vmem:[#allocation2 + $0x6c0] sm:$0xff]  ;;  %1783 = vmatprep.subr.bf16.mxu0 %v1782_v5  ;;  %v1724_v27 = vpack.c.bf16 %v182_v16, %v178_v13  ;;  %v97_v13 = vld [vmem:[#allocation2 + $0x38] sm:$0xff] }
  0x89   :  { %v311_v10 = vld [vmem:[#allocation2 + $0x6e8] sm:$0xff]  ;;  %v310_v18 = vld [vmem:[#allocation2 + $0x6e0] sm:$0xff]  ;;  %1785 = vmatpush1.bf16.msra.mxu0 %v1784_v14 }
  0x8a   :  { %v1786_v19 = vpack.c.bf16 %v311_v10, %v307_v9  ;;  %v187_v20 = vld [vmem:[#allocation2 + $0x308] sm:$0xff]  ;;  %v88_v22 = vld [vmem:[%s2791_s0] sm:$0xff]  ;;  %v1788_v28 = vpack.c.bf16 %v310_v18, %v306_v17  ;;  %1723 = vmatprep.subr.bf16.mxu1 %v1722_v15  ;;  %v1934_v18 = vpack.c.bf16 %v97_v13, %v93_v12  ;;  %v133_v13 = vld [vmem:[#allocation2 + $0x158] sm:$0xff] }
  0x8b   :  { %v191_v21 = vld [vmem:[#allocation2 + $0x328] sm:$0xff]  ;;  %v2617_v25 = vrot.slane %v88_v22, %v2611_v11  ;;  %v626_v26 = vcombine.high %v88_v22, %v88_v22  ;;  %v186_v30 = vld [vmem:[#allocation2 + $0x300] sm:$0xff]  ;;  %1725 = vmatpush1.bf16.msra.mxu1 %v1724_v27 }
  0x8c   :  { %v315_v23 = vld [vmem:[#allocation2 + $0x708] sm:$0xff]  ;;  %v1726_v29 = vpack.c.bf16 %v191_v21, %v187_v20  ;;  %v190_v31 = vld [vmem:[#allocation2 + $0x320] sm:$0xff]  ;;  %1787 = vmatprep.subr.bf16.mxu0 %v1786_v19  ;;  %v92_v20 = vld [vmem:[#allocation2 + $0x10] sm:$0xff] }
  0x8d   :  { %v319_v24 = vld [vmem:[#allocation2 + $0x728] sm:$0xff]  ;;  %v314_v32 = vld [vmem:[#allocation2 + $0x700] sm:$0xff]  ;;  %v2621_v33 = vcombine.high %v2617_v25, %v2617_v25  ;;  %v2624_v34 = vrot.slane %v626_v26, %v2611_v11  ;;  %v1728_v42 = vpack.c.bf16 %v190_v31, %v186_v30  ;;  %1789 = vmatpush1.bf16.msra.mxu0 %v1788_v28  ;;  %v96_v21 = vld [vmem:[#allocation2 + $0x30] sm:$0xff] }
  0x8e   :  { %v1790_v35 = vpack.c.bf16 %v319_v24, %v315_v23  ;;  %v318_v36 = vld [vmem:[#allocation2 + $0x720] sm:$0xff]  ;;  %v195_v37 = vld [vmem:[#allocation2 + $0x348] sm:$0xff]  ;;  %1727 = vmatprep.subr.bf16.mxu1 %v1726_v29  ;;  %v101_v24 = vld [vmem:[#allocation2 + $0x58] sm:$0xff]  ;;  %v1936_v29 = vpack.c.bf16 %v96_v21, %v92_v20 }
  0x8f   :  { %v199_v38 = vld [vmem:[#allocation2 + $0x368] sm:$0xff]  ;;  %732 = vmatprep.mubr.f32.mxu1 %v2621_v33  ;;  %v2629_v41 = vcombine.high %v2624_v34, %v2624_v34  ;;  %v1792_v43 = vpack.c.bf16 %v318_v36, %v314_v32  ;;  %v194_v45 = vld [vmem:[#allocation2 + $0x340] sm:$0xff]  ;;  %1729 = vmatpush1.bf16.msra.mxu1 %v1728_v42  ;;  %v105_v26 = vld [vmem:[#allocation2 + $0x78] sm:$0xff] }
  0x90   :  { %v323_v39 = vld [vmem:[#allocation2 + $0x748] sm:$0xff]  ;;  %v1730_v44 = vpack.c.bf16 %v199_v38, %v195_v37  ;;  %v198_v46 = vld [vmem:[#allocation2 + $0x360] sm:$0xff]  ;;  %1791 = vmatprep.subr.bf16.mxu0 %v1790_v35  ;;  %v1938_v31 = vpack.c.bf16 %v105_v26, %v101_v24  ;;  %v100_v35 = vld [vmem:[#allocation2 + $0x50] sm:$0xff] }
  0x91   :  { %v327_v40 = vld [vmem:[#allocation2 + $0x768] sm:$0xff]  ;;  %v322_v47 = vld [vmem:[#allocation2 + $0x740] sm:$0xff]  ;;  %803 = vmatprep.mubr.f32.mxu0 %v2629_v41  ;;  %v1732_v54 = vpack.c.bf16 %v198_v46, %v194_v45  ;;  %1793 = vmatpush1.bf16.msra.mxu0 %v1792_v43  ;;  %v104_v36 = vld [vmem:[#allocation2 + $0x70] sm:$0xff] }
  0x92   :  { %v1794_v48 = vpack.c.bf16 %v327_v40, %v323_v39  ;;  %v326_v49 = vld [vmem:[#allocation2 + $0x760] sm:$0xff]  ;;  %v203_v50 = vld [vmem:[#allocation2 + $0x388] sm:$0xff]  ;;  %1731 = vmatprep.subr.bf16.mxu1 %v1730_v44  ;;  %v109_v39 = vld [vmem:[#allocation2 + $0x98] sm:$0xff]  ;;  %v1940_v44 = vpack.c.bf16 %v104_v36, %v100_v35 }
  0x93   :  { %v207_v51 = vld [vmem:[#allocation2 + $0x3a8] sm:$0xff]  ;;  %v1796_v55 = vpack.c.bf16 %v326_v49, %v322_v47  ;;  %v202_v57 = vld [vmem:[#allocation2 + $0x380] sm:$0xff]  ;;  %1733 = vmatpush1.bf16.msra.mxu1 %v1732_v54  ;;  %v113_v40 = vld [vmem:[#allocation2 + $0xb8] sm:$0xff] }
  0x94   :  { %v331_v52 = vld [vmem:[#allocation2 + $0x788] sm:$0xff]  ;;  %v1734_v56 = vpack.c.bf16 %v207_v51, %v203_v50  ;;  %v206_v58 = vld [vmem:[#allocation2 + $0x3a0] sm:$0xff]  ;;  %1795 = vmatprep.subr.bf16.mxu0 %v1794_v48  ;;  %v1942_v46 = vpack.c.bf16 %v113_v40, %v109_v39  ;;  %v108_v48 = vld [vmem:[#allocation2 + $0x90] sm:$0xff] }
  0x95   :  { %v335_v53 = vld [vmem:[#allocation2 + $0x7a8] sm:$0xff]  ;;  %v330_v59 = vld [vmem:[#allocation2 + $0x780] sm:$0xff]  ;;  %v1736_v3 = vpack.c.bf16 %v206_v58, %v202_v57  ;;  %1797 = vmatpush1.bf16.msra.mxu0 %v1796_v55  ;;  %v112_v49 = vld [vmem:[#allocation2 + $0xb0] sm:$0xff] }
  0x96   :  { %v1798_v60 = vpack.c.bf16 %v335_v53, %v331_v52  ;;  %v334_v62 = vld [vmem:[#allocation2 + $0x7a0] sm:$0xff]  ;;  %v211_v63 = vld [vmem:[#allocation2 + $0x3c8] sm:$0xff]  ;;  %1735 = vmatprep.subr.bf16.mxu1 %v1734_v56  ;;  %v117_v52 = vld [vmem:[#allocation2 + $0xd8] sm:$0xff]  ;;  %v1944_v56 = vpack.c.bf16 %v112_v49, %v108_v48 }
  0x97   :  { %v215_v0 = vld [vmem:[#allocation2 + $0x3e8] sm:$0xff]  ;;  %v1800_v4 = vpack.c.bf16 %v334_v62, %v330_v59  ;;  %v210_v6 = vld [vmem:[#allocation2 + $0x3c0] sm:$0xff]  ;;  %1737 = vmatpush1.bf16.msra.mxu1 %v1736_v3  ;;  %v121_v53 = vld [vmem:[#allocation2 + $0xf8] sm:$0xff] }
  0x98   :  { %v339_v1 = vld [vmem:[#allocation2 + $0x7c8] sm:$0xff]  ;;  %v1738_v5 = vpack.c.bf16 %v215_v0, %v211_v63  ;;  %v214_v7 = vld [vmem:[#allocation2 + $0x3e0] sm:$0xff]  ;;  %1799 = vmatprep.subr.bf16.mxu0 %v1798_v60  ;;  %v1946_v58 = vpack.c.bf16 %v121_v53, %v117_v52  ;;  %v116_v60 = vld [vmem:[#allocation2 + $0xd0] sm:$0xff] }
  0x99   :  { %v343_v2 = vld [vmem:[#allocation2 + $0x7e8] sm:$0xff]  ;;  %v338_v8 = vld [vmem:[#allocation2 + $0x7c0] sm:$0xff]  ;;  %v1740_v16 = vpack.c.bf16 %v214_v7, %v210_v6  ;;  %1801 = vmatpush1.bf16.msra.mxu0 %v1800_v4  ;;  %v120_v62 = vld [vmem:[#allocation2 + $0xf0] sm:$0xff] }
  0x9a   :  { %v1802_v9 = vpack.c.bf16 %v343_v2, %v339_v1  ;;  %v342_v10 = vld [vmem:[#allocation2 + $0x7e0] sm:$0xff]  ;;  %v347_v14 = vld [vmem:[#allocation2 + $0x808] sm:$0xff]  ;;  %1739 = vmatprep.subr.bf16.mxu1 %v1738_v5  ;;  %v125_v1 = vld [vmem:[#allocation2 + $0x118] sm:$0xff] }
  0x9b   :  { %v351_v15 = vld [vmem:[#allocation2 + $0x828] sm:$0xff]  ;;  %v1804_v17 = vpack.c.bf16 %v342_v10, %v338_v8  ;;  %v346_v19 = vld [vmem:[#allocation2 + $0x800] sm:$0xff]  ;;  %1741 = vmatpush1.bf16.msra.mxu1 %v1740_v16  ;;  %v129_v2 = vld [vmem:[#allocation2 + $0x138] sm:$0xff] }
  0x9c   :  { %1803 = vmatprep.subr.bf16.mxu0 %v1802_v9  ;;  %v1806_v22 = vpack.c.bf16 %v351_v15, %v347_v14  ;;  %v350_v23 = vld [vmem:[#allocation2 + $0x820] sm:$0xff]  ;;  %v355_v27 = vld [vmem:[#allocation2 + $0x848] sm:$0xff]  ;;  %1935 = vmatprep.subr.bf16.mxu1 %v1934_v18  ;;  %v1950_v6 = vpack.c.bf16 %v129_v2, %v125_v1  ;;  %v124_v8 = vld [vmem:[#allocation2 + $0x110] sm:$0xff] }
  0x9d   :  { %v359_v28 = vld [vmem:[#allocation2 + $0x868] sm:$0xff]  ;;  %1805 = vmatpush1.bf16.msra.mxu0 %v1804_v17  ;;  %v1808_v30 = vpack.c.bf16 %v350_v23, %v346_v19  ;;  %v354_v32 = vld [vmem:[#allocation2 + $0x840] sm:$0xff]  ;;  %v128_v9 = vld [vmem:[#allocation2 + $0x130] sm:$0xff] }
  0x9e   :  { %1807 = vmatprep.subr.bf16.mxu0 %v1806_v22  ;;  %v1810_v37 = vpack.c.bf16 %v359_v28, %v355_v27  ;;  %v358_v38 = vld [vmem:[#allocation2 + $0x860] sm:$0xff]  ;;  %733 = vmatmul.mubr.f32.vlgmr.msra.gmra.mrb[0].mxu1 %v2617_v25  ;;  %v363_v42 = vld [vmem:[#allocation2 + $0x888] sm:$0xff]  ;;  %v137_v14 = vld [vmem:[#allocation2 + $0x178] sm:$0xff]  ;;  %v1952_v17 = vpack.c.bf16 %v128_v9, %v124_v8 }
  0x9f   :  { %v367_v43 = vld [vmem:[#allocation2 + $0x8a8] sm:$0xff]  ;;  %1937 = vmatpush1.bf16.msra.mxu1 %v1936_v29  ;;  %v1812_v45 = vpack.c.bf16 %v358_v38, %v354_v32  ;;  %v362_v47 = vld [vmem:[#allocation2 + $0x880] sm:$0xff]  ;;  %1016 = vmatprep.mubr.f32.mxu1 %v2621_v33  ;;  %v1948_v33 = vpack.c.bf16 %v120_v62, %v116_v60  ;;  %v1954_v19 = vpack.c.bf16 %v137_v14, %v133_v13  ;;  %v132_v21 = vld [vmem:[#allocation2 + $0x150] sm:$0xff] }
  0xa0   :  { %804 = vmatmul.mubr.f32.vlgmr.msra.gmra.mrb[0].mxu0 %v2624_v34  ;;  %1939 = vmatprep.subr.bf16.mxu1 %v1938_v31  ;;  %v1814_v50 = vpack.c.bf16 %v367_v43, %v363_v42  ;;  %v366_v51 = vld [vmem:[#allocation2 + $0x8a0] sm:$0xff]  ;;  %v371_v54 = vld [vmem:[#allocation2 + $0x8c8] sm:$0xff]  ;;  %v136_v22 = vld [vmem:[#allocation2 + $0x170] sm:$0xff] }
  0xa1   :  { %1809 = vmatpush1.bf16.msra.mxu0 %v1808_v30  ;;  %v375_v55 = vld [vmem:[#allocation2 + $0x8e8] sm:$0xff]  ;;  %v1816_v57 = vpack.c.bf16 %v366_v51, %v362_v47  ;;  %v370_v59 = vld [vmem:[#allocation2 + $0x8c0] sm:$0xff]  ;;  %v141_v26 = vld [vmem:[#allocation2 + $0x198] sm:$0xff]  ;;  %v1956_v30 = vpack.c.bf16 %v136_v22, %v132_v21 }
  0xa2   :  { %1811 = vmatprep.subr.bf16.mxu0 %v1810_v37  ;;  %v1818_v63 = vpack.c.bf16 %v375_v55, %v371_v54  ;;  %v374_v0 = vld [vmem:[#allocation2 + $0x8e0] sm:$0xff]  ;;  %v379_v3 = vld [vmem:[#allocation2 + $0x908] sm:$0xff]  ;;  %v145_v27 = vld [vmem:[#allocation2 + $0x1b8] sm:$0xff] }
  0xa3   :  { %1941 = vmatpush1.bf16.msra.mxu1 %v1940_v44  ;;  %v383_v4 = vld [vmem:[#allocation2 + $0x928] sm:$0xff]  ;;  %v1820_v5 = vpack.c.bf16 %v374_v0, %v370_v59  ;;  %v378_v7 = vld [vmem:[#allocation2 + $0x900] sm:$0xff]  ;;  %v1958_v35 = vpack.c.bf16 %v145_v27, %v141_v26  ;;  %v140_v36 = vld [vmem:[#allocation2 + $0x190] sm:$0xff] }
  0xa4   :  { %1943 = vmatprep.subr.bf16.mxu1 %v1942_v46  ;;  %v1822_v10 = vpack.c.bf16 %v383_v4, %v379_v3  ;;  %v382_v12 = vld [vmem:[#allocation2 + $0x920] sm:$0xff]  ;;  %v387_v15 = vld [vmem:[#allocation2 + $0x948] sm:$0xff]  ;;  %v144_v37 = vld [vmem:[#allocation2 + $0x1b0] sm:$0xff] }
  0xa5   :  { %1813 = vmatpush1.bf16.msra.mxu0 %v1812_v45  ;;  %v391_v16 = vld [vmem:[#allocation2 + $0x968] sm:$0xff]  ;;  %v1824_v18 = vpack.c.bf16 %v382_v12, %v378_v7  ;;  %v386_v20 = vld [vmem:[#allocation2 + $0x940] sm:$0xff]  ;;  %v149_v42 = vld [vmem:[#allocation2 + $0x1d8] sm:$0xff]  ;;  %v1960_v47 = vpack.c.bf16 %v144_v37, %v140_v36 }
  0xa6   :  { %1815 = vmatprep.subr.bf16.mxu0 %v1814_v50  ;;  %v1826_v23 = vpack.c.bf16 %v391_v16, %v387_v15  ;;  %v390_v24 = vld [vmem:[#allocation2 + $0x960] sm:$0xff]  ;;  %v395_v28 = vld [vmem:[#allocation2 + $0x988] sm:$0xff]  ;;  %v153_v43 = vld [vmem:[#allocation2 + $0x1f8] sm:$0xff] }
  0xa7   :  { %1945 = vmatpush1.bf16.msra.mxu1 %v1944_v56  ;;  %v399_v29 = vld [vmem:[#allocation2 + $0x9a8] sm:$0xff]  ;;  %v394_v31 = vld [vmem:[#allocation2 + $0x980] sm:$0xff]  ;;  %v1828_v32 = vpack.c.bf16 %v390_v24, %v386_v20  ;;  %v1962_v50 = vpack.c.bf16 %v153_v43, %v149_v42  ;;  %v148_v52 = vld [vmem:[#allocation2 + $0x1d0] sm:$0xff] }
  0xa8   :  { %1947 = vmatprep.subr.bf16.mxu1 %v1946_v58  ;;  %v2638_v38 = vld [vmem:[%s2791_s0 + $0x8] sm:$0xff]  ;;  %v1830_v39 = vpack.c.bf16 %v399_v29, %v395_v28  ;;  %v398_v40 = vld [vmem:[#allocation2 + $0x9a0] sm:$0xff]  ;;  %v152_v53 = vld [vmem:[#allocation2 + $0x1f0] sm:$0xff] }
  0xa9   :  { %1817 = vmatpush1.bf16.msra.mxu0 %v1816_v57  ;;  %v2642_v44 = vrot.slane %v2638_v38, %v2611_v11  ;;  %v403_v45 = vld [vmem:[#allocation2 + $0x9c8] sm:$0xff]  ;;  %v1832_v49 = vpack.c.bf16 %v398_v40, %v394_v31  ;;  %v402_v51 = vld [vmem:[#allocation2 + $0x9c0] sm:$0xff]  ;;  %v157_v56 = vld [vmem:[#allocation2 + $0x218] sm:$0xff]  ;;  %v1964_v60 = vpack.c.bf16 %v152_v53, %v148_v52 }
  0xaa   :  { %1819 = vmatprep.subr.bf16.mxu0 %v1818_v63  ;;  %v407_v46 = vld [vmem:[#allocation2 + $0x9e8] sm:$0xff]  ;;  %v406_v55 = vld [vmem:[#allocation2 + $0x9e0] sm:$0xff]  ;;  %v161_v57 = vld [vmem:[#allocation2 + $0x238] sm:$0xff] }
  0xab   :  { %1949 = vmatpush1.bf16.msra.mxu1 %v1948_v33  ;;  %v2646_v48 = vcombine.high %v2642_v44, %v2642_v44  ;;  %v1834_v54 = vpack.c.bf16 %v407_v46, %v403_v45  ;;  %v411_v58 = vld [vmem:[#allocation2 + $0xa08] sm:$0xff]  ;;  %v1836_v62 = vpack.c.bf16 %v406_v55, %v402_v51  ;;  %v1966_v63 = vpack.c.bf16 %v161_v57, %v157_v56  ;;  %v410_v0 = vld [vmem:[#allocation2 + $0xa00] sm:$0xff]  ;;  %v156_v1 = vld [vmem:[#allocation2 + $0x210] sm:$0xff] }
  0xac   :  { %1951 = vmatprep.subr.bf16.mxu1 %v1950_v6  ;;  %v415_v59 = vld [vmem:[#allocation2 + $0xa28] sm:$0xff]  ;;  %v160_v2 = vld [vmem:[#allocation2 + $0x230] sm:$0xff]  ;;  %v414_v4 = vld [vmem:[#allocation2 + $0xa20] sm:$0xff] }
  0xad   :  { %1821 = vmatpush1.bf16.msra.mxu0 %v1820_v5  ;;  %874 = vmatprep.mubr.f32.mxu0 %v2646_v48  ;;  %v1838_v3 = vpack.c.bf16 %v415_v59, %v411_v58  ;;  %v165_v33 = vld [vmem:[#allocation2 + $0x258] sm:$0xff]  ;;  %v419_v6 = vld [vmem:[#allocation2 + $0xa48] sm:$0xff]  ;;  %v1968_v8 = vpack.c.bf16 %v160_v2, %v156_v1  ;;  %v1840_v9 = vpack.c.bf16 %v414_v4, %v410_v0  ;;  %v418_v12 = vld [vmem:[#allocation2 + $0xa40] sm:$0xff] }
  0xae   :  { %1823 = vmatprep.subr.bf16.mxu0 %v1822_v10  ;;  %v169_v5 = vld [vmem:[#allocation2 + $0x278] sm:$0xff]  ;;  %v423_v7 = vld [vmem:[#allocation2 + $0xa68] sm:$0xff]  ;;  %v164_v13 = vld [vmem:[#allocation2 + $0x250] sm:$0xff] }
  0xaf   :  { %1953 = vmatpush1.bf16.msra.mxu1 %v1952_v17  ;;  %v1970_v10 = vpack.c.bf16 %v169_v5, %v165_v33  ;;  %v168_v14 = vld [vmem:[#allocation2 + $0x270] sm:$0xff]  ;;  %v1842_v15 = vpack.c.bf16 %v423_v7, %v419_v6  ;;  %v422_v16 = vld [vmem:[#allocation2 + $0xa60] sm:$0xff]  ;;  %v173_v17 = vld [vmem:[#allocation2 + $0x298] sm:$0xff] }
  0xb0   :  { %1955 = vmatprep.subr.bf16.mxu1 %v1954_v19  ;;  %v427_v19 = vld [vmem:[#allocation2 + $0xa88] sm:$0xff]  ;;  %v1972_v21 = vpack.c.bf16 %v168_v14, %v164_v13  ;;  %v1844_v22 = vpack.c.bf16 %v422_v16, %v418_v12  ;;  %v426_v24 = vld [vmem:[#allocation2 + $0xa80] sm:$0xff]  ;;  %v172_v26 = vld [vmem:[#allocation2 + $0x290] sm:$0xff] }
  0xb1   :  { %1825 = vmatpush1.bf16.msra.mxu0 %v1824_v18  ;;  %v177_v18 = vld [vmem:[#allocation2 + $0x2b8] sm:$0xff]  ;;  %v431_v20 = vld [vmem:[#allocation2 + $0xaa8] sm:$0xff]  ;;  %v176_v27 = vld [vmem:[#allocation2 + $0x2b0] sm:$0xff] }
  0xb2   :  { %1827 = vmatprep.subr.bf16.mxu0 %v1826_v23  ;;  %v1974_v23 = vpack.c.bf16 %v177_v18, %v173_v17  ;;  %v1846_v28 = vpack.c.bf16 %v431_v20, %v427_v19  ;;  %v430_v29 = vld [vmem:[#allocation2 + $0xaa0] sm:$0xff]  ;;  %v185_v31 = vld [vmem:[#allocation2 + $0x2f8] sm:$0xff]  ;;  %v1976_v36 = vpack.c.bf16 %v176_v27, %v172_v26  ;;  %v180_v42 = vld [vmem:[#allocation2 + $0x2d0] sm:$0xff] }
  0xb3   :  { %1957 = vmatpush1.bf16.msra.mxu1 %v1956_v30  ;;  %v181_v30 = vld [vmem:[#allocation2 + $0x2d8] sm:$0xff]  ;;  %v1848_v37 = vpack.c.bf16 %v430_v29, %v426_v24  ;;  %v434_v40 = vld [vmem:[#allocation2 + $0xac0] sm:$0xff]  ;;  %v184_v43 = vld [vmem:[#allocation2 + $0x2f0] sm:$0xff] }
  0xb4   :  { %1959 = vmatprep.subr.bf16.mxu1 %v1958_v35  ;;  %v439_v35 = vld [vmem:[#allocation2 + $0xae8] sm:$0xff]  ;;  %v438_v46 = vld [vmem:[#allocation2 + $0xae0] sm:$0xff]  ;;  %v1980_v52 = vpack.c.bf16 %v184_v43, %v180_v42  ;;  %v188_v56 = vld [vmem:[#allocation2 + $0x310] sm:$0xff] }
  0xb5   :  { %1829 = vmatpush1.bf16.msra.mxu0 %v1828_v32  ;;  %v435_v32 = vld [vmem:[#allocation2 + $0xac8] sm:$0xff]  ;;  %v1852_v53 = vpack.c.bf16 %v438_v46, %v434_v40  ;;  %v442_v55 = vld [vmem:[#allocation2 + $0xb00] sm:$0xff]  ;;  %v192_v57 = vld [vmem:[#allocation2 + $0x330] sm:$0xff] }
  0xb6   :  { %1831 = vmatprep.subr.bf16.mxu0 %v1830_v39  ;;  %v1978_v39 = vpack.c.bf16 %v185_v31, %v181_v30  ;;  %v1850_v45 = vpack.c.bf16 %v439_v35, %v435_v32  ;;  %v447_v51 = vld [vmem:[#allocation2 + $0xb28] sm:$0xff]  ;;  %v446_v59 = vld [vmem:[#allocation2 + $0xb20] sm:$0xff]  ;;  %v1984_v1 = vpack.c.bf16 %v192_v57, %v188_v56  ;;  %v196_v33 = vld [vmem:[#allocation2 + $0x350] sm:$0xff] }
  0xb7   :  { %1961 = vmatpush1.bf16.msra.mxu1 %v1960_v47  ;;  %v189_v47 = vld [vmem:[#allocation2 + $0x318] sm:$0xff]  ;;  %v455_v0 = vld [vmem:[#allocation2 + $0xb68] sm:$0xff]  ;;  %v1856_v2 = vpack.c.bf16 %v446_v59, %v442_v55  ;;  %v450_v4 = vld [vmem:[#allocation2 + $0xb40] sm:$0xff] }
  0xb8   :  { %1963 = vmatprep.subr.bf16.mxu1 %v1962_v50  ;;  %v443_v50 = vld [vmem:[#allocation2 + $0xb08] sm:$0xff]  ;;  %v200_v5 = vld [vmem:[#allocation2 + $0x370] sm:$0xff]  ;;  %v454_v7 = vld [vmem:[#allocation2 + $0xb60] sm:$0xff] }
  0xb9   :  { %1833 = vmatpush1.bf16.msra.mxu0 %v1832_v49  ;;  %v193_v49 = vld [vmem:[#allocation2 + $0x338] sm:$0xff]  ;;  %v1854_v58 = vpack.c.bf16 %v447_v51, %v443_v50  ;;  %v463_v12 = vld [vmem:[#allocation2 + $0xba8] sm:$0xff]  ;;  %v1988_v13 = vpack.c.bf16 %v200_v5, %v196_v33  ;;  %v1860_v14 = vpack.c.bf16 %v454_v7, %v450_v4  ;;  %v458_v16 = vld [vmem:[#allocation2 + $0xb80] sm:$0xff] }
  0xba   :  { %1835 = vmatprep.subr.bf16.mxu0 %v1834_v54  ;;  %v1982_v54 = vpack.c.bf16 %v193_v49, %v189_v47  ;;  %v204_v17 = vld [vmem:[#allocation2 + $0x390] sm:$0xff]  ;;  %v462_v20 = vld [vmem:[#allocation2 + $0xba0] sm:$0xff]  ;;  %v471_v24 = vld [vmem:[#allocation2 + $0xbe8] sm:$0xff] }
  0xbb   :  { %1965 = vmatpush1.bf16.msra.mxu1 %v1964_v60  ;;  %v197_v60 = vld [vmem:[#allocation2 + $0x358] sm:$0xff]  ;;  %v208_v18 = vld [vmem:[#allocation2 + $0x3b0] sm:$0xff]  ;;  %v1864_v27 = vpack.c.bf16 %v462_v20, %v458_v16  ;;  %v466_v29 = vld [vmem:[#allocation2 + $0xbc0] sm:$0xff] }
  0xbc   :  { %1967 = vmatprep.subr.bf16.mxu1 %v1966_v63  ;;  %v451_v63 = vld [vmem:[#allocation2 + $0xb48] sm:$0xff]  ;;  %v1992_v26 = vpack.c.bf16 %v208_v18, %v204_v17  ;;  %v212_v30 = vld [vmem:[#allocation2 + $0x3d0] sm:$0xff]  ;;  %v470_v35 = vld [vmem:[#allocation2 + $0xbe0] sm:$0xff] }
  0xbd   :  { %1837 = vmatpush1.bf16.msra.mxu0 %v1836_v62  ;;  %v201_v62 = vld [vmem:[#allocation2 + $0x378] sm:$0xff]  ;;  %v1858_v6 = vpack.c.bf16 %v455_v0, %v451_v63  ;;  %v216_v31 = vld [vmem:[#allocation2 + $0x3f0] sm:$0xff]  ;;  %v475_v40 = vld [vmem:[#allocation2 + $0xc08] sm:$0xff] }
  0xbe   :  { %1839 = vmatprep.subr.bf16.mxu0 %v1838_v3  ;;  %v1986_v3 = vpack.c.bf16 %v201_v62, %v197_v60  ;;  %v479_v42 = vld [vmem:[#allocation2 + $0xc28] sm:$0xff]  ;;  %v1996_v43 = vpack.c.bf16 %v216_v31, %v212_v30  ;;  %v474_v47 = vld [vmem:[#allocation2 + $0xc00] sm:$0xff]  ;;  %v220_v49 = vld [vmem:[#allocation2 + $0x410] sm:$0xff] }
  0xbf   :  { %1969 = vmatpush1.bf16.msra.mxu1 %v1968_v8  ;;  %v205_v8 = vld [vmem:[#allocation2 + $0x398] sm:$0xff]  ;;  %v224_v50 = vld [vmem:[#allocation2 + $0x430] sm:$0xff]  ;;  %v1870_v51 = vpack.c.bf16 %v479_v42, %v475_v40  ;;  %v487_v56 = vld [vmem:[#allocation2 + $0xc68] sm:$0xff] }
  0xc0   :  { %1971 = vmatprep.subr.bf16.mxu1 %v1970_v10  ;;  %v459_v10 = vld [vmem:[#allocation2 + $0xb88] sm:$0xff]  ;;  %v2000_v57 = vpack.c.bf16 %v224_v50, %v220_v49  ;;  %v482_v60 = vld [vmem:[#allocation2 + $0xc40] sm:$0xff]  ;;  %v228_v62 = vld [vmem:[#allocation2 + $0x450] sm:$0xff] }
  0xc1   :  { %1841 = vmatpush1.bf16.msra.mxu0 %v1840_v9  ;;  %v209_v9 = vld [vmem:[#allocation2 + $0x3b8] sm:$0xff]  ;;  %v1862_v19 = vpack.c.bf16 %v463_v12, %v459_v10  ;;  %v232_v63 = vld [vmem:[#allocation2 + $0x470] sm:$0xff]  ;;  %v491_v4 = vld [vmem:[#allocation2 + $0xc88] sm:$0xff] }
  0xc2   :  { %1843 = vmatprep.subr.bf16.mxu0 %v1842_v15  ;;  %v1990_v15 = vpack.c.bf16 %v209_v9, %v205_v8  ;;  %v495_v33 = vld [vmem:[#allocation2 + $0xca8] sm:$0xff]  ;;  %v2004_v5 = vpack.c.bf16 %v232_v63, %v228_v62  ;;  %v490_v8 = vld [vmem:[#allocation2 + $0xc80] sm:$0xff]  ;;  %v236_v9 = vld [vmem:[#allocation2 + $0x490] sm:$0xff] }
  0xc3   :  { %1973 = vmatpush1.bf16.msra.mxu1 %v1972_v21  ;;  %v213_v21 = vld [vmem:[#allocation2 + $0x3d8] sm:$0xff]  ;;  %v240_v10 = vld [vmem:[#allocation2 + $0x4b0] sm:$0xff]  ;;  %v1878_v12 = vpack.c.bf16 %v495_v33, %v491_v4  ;;  %v503_v16 = vld [vmem:[#allocation2 + $0xce8] sm:$0xff] }
  0xc4   :  { %1975 = vmatprep.subr.bf16.mxu1 %v1974_v23  ;;  %v467_v23 = vld [vmem:[#allocation2 + $0xbc8] sm:$0xff]  ;;  %v2008_v17 = vpack.c.bf16 %v240_v10, %v236_v9  ;;  %v498_v20 = vld [vmem:[#allocation2 + $0xcc0] sm:$0xff]  ;;  %v261_v40 = vld [vmem:[#allocation2 + $0x558] sm:$0xff] }
  0xc5   :  { %1845 = vmatpush1.bf16.msra.mxu0 %v1844_v22  ;;  %v217_v22 = vld [vmem:[#allocation2 + $0x3f8] sm:$0xff]  ;;  %v1866_v32 = vpack.c.bf16 %v471_v24, %v467_v23  ;;  %v502_v24 = vld [vmem:[#allocation2 + $0xce0] sm:$0xff] }
  0xc6   :  { %1847 = vmatprep.subr.bf16.mxu0 %v1846_v28  ;;  %v1994_v28 = vpack.c.bf16 %v217_v22, %v213_v21  ;;  %v244_v21 = vld [vmem:[#allocation2 + $0x4d0] sm:$0xff]  ;;  %v265_v42 = vld [vmem:[#allocation2 + $0x578] sm:$0xff]  ;;  %v514_v50 = vld [vmem:[#allocation2 + $0xd40] sm:$0xff] }
  0xc7   :  { %1977 = vmatpush1.bf16.msra.mxu1 %v1976_v36  ;;  %v221_v36 = vld [vmem:[#allocation2 + $0x418] sm:$0xff]  ;;  %v248_v22 = vld [vmem:[#allocation2 + $0x4f0] sm:$0xff]  ;;  %v2018_v49 = vpack.c.bf16 %v265_v42, %v261_v40  ;;  %v522_v63 = vld [vmem:[#allocation2 + $0xd80] sm:$0xff] }
  0xc8   :  { %1979 = vmatprep.subr.bf16.mxu1 %v1978_v39  ;;  %v643_v39 = vcombine.high %v2638_v38, %v2638_v38  ;;  %v483_v38 = vld [vmem:[#allocation2 + $0xc48] sm:$0xff]  ;;  %v2012_v30 = vpack.c.bf16 %v248_v22, %v244_v21  ;;  %v277_v4 = vld [vmem:[#allocation2 + $0x5d8] sm:$0xff]  ;;  %v530_v10 = vld [vmem:[#allocation2 + $0xdc0] sm:$0xff] }
  0xc9   :  { %1849 = vmatpush1.bf16.msra.mxu0 %v1848_v37  ;;  %v225_v37 = vld [vmem:[#allocation2 + $0x438] sm:$0xff]  ;;  %v1874_v0 = vpack.c.bf16 %v487_v56, %v483_v38  ;;  %v538_v22 = vld [vmem:[#allocation2 + $0xe00] sm:$0xff] }
  0xca   :  { %1851 = vmatprep.subr.bf16.mxu0 %v1850_v45  ;;  %v1868_v45 = vpack.c.bf16 %v470_v35, %v466_v29  ;;  %v1998_v46 = vpack.c.bf16 %v225_v37, %v221_v36  ;;  %v2652_v55 = vrot.slane %v643_v39, %v2611_v11  ;;  %v511_v29 = vld [vmem:[#allocation2 + $0xd28] sm:$0xff]  ;;  %v252_v35 = vld [vmem:[#allocation2 + $0x510] sm:$0xff]  ;;  %v510_v39 = vld [vmem:[#allocation2 + $0xd20] sm:$0xff] }
  0xcb   :  { %1981 = vmatpush1.bf16.msra.mxu1 %v1980_v52  ;;  %v478_v52 = vld [vmem:[#allocation2 + $0xc20] sm:$0xff]  ;;  %v256_v36 = vld [vmem:[#allocation2 + $0x530] sm:$0xff]  ;;  %v269_v38 = vld [vmem:[#allocation2 + $0x598] sm:$0xff] }
  0xcc   :  { %1983 = vmatprep.subr.bf16.mxu1 %v1982_v54  ;;  %v233_v54 = vld [vmem:[#allocation2 + $0x478] sm:$0xff]  ;;  %v2656_v11 = vcombine.high %v2652_v55, %v2652_v55  ;;  %v550_v42 = vld [vmem:[#allocation2 + $0xe60] sm:$0xff] }
  0xcd   :  { %1853 = vmatpush1.bf16.msra.mxu0 %v1852_v53  ;;  %v229_v53 = vld [vmem:[#allocation2 + $0x458] sm:$0xff] }
  0xce   :  { %1855 = vmatprep.subr.bf16.mxu0 %v1854_v58  ;;  %v1872_v58 = vpack.c.bf16 %v478_v52, %v474_v47  ;;  %v2002_v59 = vpack.c.bf16 %v233_v54, %v229_v53  ;;  %v264_v52 = vld [vmem:[#allocation2 + $0x570] sm:$0xff]  ;;  %v518_v54 = vld [vmem:[#allocation2 + $0xd60] sm:$0xff]  ;;  %v273_v56 = vld [vmem:[#allocation2 + $0x5b8] sm:$0xff] }
  0xcf   :  { %1985 = vmatpush1.bf16.msra.mxu1 %v1984_v1  ;;  %v486_v1 = vld [vmem:[#allocation2 + $0xc60] sm:$0xff]  ;;  %v2022_v62 = vpack.c.bf16 %v273_v56, %v269_v38  ;;  %v281_v33 = vld [vmem:[#allocation2 + $0x5f8] sm:$0xff] }
  0xd0   :  { %1987 = vmatprep.subr.bf16.mxu1 %v1986_v3  ;;  %v241_v3 = vld [vmem:[#allocation2 + $0x4b8] sm:$0xff]  ;;  %v2026_v9 = vpack.c.bf16 %v281_v33, %v277_v4  ;;  %v558_v56 = vld [vmem:[#allocation2 + $0xea0] sm:$0xff] }
  0xd1   :  { %1857 = vmatpush1.bf16.msra.mxu0 %v1856_v2  ;;  %v237_v2 = vld [vmem:[#allocation2 + $0x498] sm:$0xff]  ;;  %v566_v33 = vld [vmem:[#allocation2 + $0xee0] sm:$0xff] }
  0xd2   :  { %1859 = vmatprep.subr.bf16.mxu0 %v1858_v6  ;;  %v1876_v6 = vpack.c.bf16 %v486_v1, %v482_v60  ;;  %v2006_v7 = vpack.c.bf16 %v241_v3, %v237_v2  ;;  %v1892_v60 = vpack.c.bf16 %v518_v54, %v514_v50  ;;  %v272_v1 = vld [vmem:[#allocation2 + $0x5b0] sm:$0xff]  ;;  %v526_v3 = vld [vmem:[#allocation2 + $0xda0] sm:$0xff] }
  0xd3   :  { %1989 = vmatpush1.bf16.msra.mxu1 %v1988_v13  ;;  %v494_v13 = vld [vmem:[#allocation2 + $0xca0] sm:$0xff]  ;;  %v304_v54 = vld [vmem:[#allocation2 + $0x6b0] sm:$0xff] }
  0xd4   :  { %1991 = vmatprep.subr.bf16.mxu1 %v1990_v15  ;;  %v249_v15 = vld [vmem:[#allocation2 + $0x4f8] sm:$0xff]  ;;  %v1880_v18 = vpack.c.bf16 %v494_v13, %v490_v8  ;;  %v1896_v8 = vpack.c.bf16 %v526_v3, %v522_v63  ;;  %v280_v13 = vld [vmem:[#allocation2 + $0x5f0] sm:$0xff] }
  0xd5   :  { %1861 = vmatpush1.bf16.msra.mxu0 %v1860_v14  ;;  %v245_v14 = vld [vmem:[#allocation2 + $0x4d8] sm:$0xff]  ;;  %v312_v3 = vld [vmem:[#allocation2 + $0x6f0] sm:$0xff] }
  0xd6   :  { %1863 = vmatprep.subr.bf16.mxu0 %v1862_v19  ;;  %v2010_v19 = vpack.c.bf16 %v249_v15, %v245_v14  ;;  %v534_v15 = vld [vmem:[#allocation2 + $0xde0] sm:$0xff] }
  0xd7   :  { %1993 = vmatpush1.bf16.msra.mxu1 %v1992_v26  ;;  %v253_v26 = vld [vmem:[#allocation2 + $0x518] sm:$0xff] }
  0xd8   :  { %1995 = vmatprep.subr.bf16.mxu1 %v1994_v28  ;;  %v507_v28 = vld [vmem:[#allocation2 + $0xd08] sm:$0xff] }
  0xd9   :  { %1865 = vmatpush1.bf16.msra.mxu0 %v1864_v27  ;;  %v257_v27 = vld [vmem:[#allocation2 + $0x538] sm:$0xff]  ;;  %v1886_v37 = vpack.c.bf16 %v511_v29, %v507_v28 }
  0xda   :  { %1867 = vmatprep.subr.bf16.mxu0 %v1866_v32  ;;  %v2014_v31 = vpack.c.bf16 %v257_v27, %v253_v26  ;;  %v506_v32 = vld [vmem:[#allocation2 + $0xd00] sm:$0xff]  ;;  %v293_v28 = vld [vmem:[#allocation2 + $0x658] sm:$0xff] }
  0xdb   :  { %1997 = vmatpush1.bf16.msra.mxu1 %v1996_v43  ;;  %v515_v43 = vld [vmem:[#allocation2 + $0xd48] sm:$0xff]  ;;  %v1888_v47 = vpack.c.bf16 %v510_v39, %v506_v32  ;;  %v542_v27 = vld [vmem:[#allocation2 + $0xe20] sm:$0xff]  ;;  %v297_v29 = vld [vmem:[#allocation2 + $0x678] sm:$0xff] }
  0xdc   :  { %1999 = vmatprep.subr.bf16.mxu1 %v1998_v46  ;;  %v2016_v46 = vpack.c.bf16 %v256_v36, %v252_v35  ;;  %v1904_v32 = vpack.c.bf16 %v542_v27, %v538_v22  ;;  %v2034_v35 = vpack.c.bf16 %v297_v29, %v293_v28  ;;  %v546_v36 = vld [vmem:[#allocation2 + $0xe40] sm:$0xff]  ;;  %v296_v39 = vld [vmem:[#allocation2 + $0x670] sm:$0xff] }
  0xdd   :  { %1869 = vmatpush1.bf16.msra.mxu0 %v1868_v45  ;;  %v519_v45 = vld [vmem:[#allocation2 + $0xd68] sm:$0xff]  ;;  %v1908_v50 = vpack.c.bf16 %v550_v42, %v546_v36  ;;  %v328_v27 = vld [vmem:[#allocation2 + $0x770] sm:$0xff]  ;;  %v582_v29 = vld [vmem:[#allocation2 + $0xf60] sm:$0xff] }
  0xde   :  { %1871 = vmatprep.subr.bf16.mxu0 %v1870_v51  ;;  %1017 = vmatmul.mubr.f32.vlgmr.msra.gmra.mrb[2].mxu1 %v2617_v25  ;;  %v499_v25 = vld [vmem:[#allocation2 + $0xcc8] sm:$0xff]  ;;  %v260_v51 = vld [vmem:[#allocation2 + $0x550] sm:$0xff]  ;;  %v1890_v53 = vpack.c.bf16 %v519_v45, %v515_v43  ;;  %v301_v43 = vld [vmem:[#allocation2 + $0x698] sm:$0xff] }
  0xdf   :  { %2001 = vmatpush1.bf16.msra.mxu1 %v2000_v57  ;;  %1087 = vmatprep.mubr.f32.mxu1 %v2629_v41  ;;  %v1882_v23 = vpack.c.bf16 %v503_v16, %v499_v25  ;;  %v1884_v41 = vpack.c.bf16 %v502_v24, %v498_v20  ;;  %v523_v57 = vld [vmem:[#allocation2 + $0xd88] sm:$0xff]  ;;  %v285_v25 = vld [vmem:[#allocation2 + $0x618] sm:$0xff]  ;;  %v1900_v20 = vpack.c.bf16 %v534_v15, %v530_v10  ;;  %v288_v24 = vld [vmem:[#allocation2 + $0x630] sm:$0xff] }
  0xe0   :  { %875 = vmatmul.mubr.f32.vlgmr.msra.gmra.mrb[0].mxu0 %v2642_v44  ;;  %2003 = vmatprep.subr.bf16.mxu1 %v2002_v59  ;;  %v2020_v59 = vpack.c.bf16 %v264_v52, %v260_v51  ;;  %v289_v16 = vld [vmem:[#allocation2 + $0x638] sm:$0xff]  ;;  %v554_v52 = vld [vmem:[#allocation2 + $0xe80] sm:$0xff]  ;;  %v320_v15 = vld [vmem:[#allocation2 + $0x730] sm:$0xff] }
  0xe1   :  { %1873 = vmatpush1.bf16.msra.mxu0 %v1872_v58  ;;  %945 = vmatprep.mubr.f32.mxu0 %v2656_v11  ;;  %v527_v58 = vld [vmem:[#allocation2 + $0xda8] sm:$0xff]  ;;  %v2030_v21 = vpack.c.bf16 %v289_v16, %v285_v25  ;;  %v305_v45 = vld [vmem:[#allocation2 + $0x6b8] sm:$0xff]  ;;  %v1912_v63 = vpack.c.bf16 %v558_v56, %v554_v52  ;;  %v574_v16 = vld [vmem:[#allocation2 + $0xf20] sm:$0xff] }
  0xe2   :  { %1875 = vmatprep.subr.bf16.mxu0 %v1874_v0  ;;  %v268_v0 = vld [vmem:[#allocation2 + $0x590] sm:$0xff]  ;;  %v1894_v2 = vpack.c.bf16 %v527_v58, %v523_v57  ;;  %v2038_v51 = vpack.c.bf16 %v305_v45, %v301_v43  ;;  %v309_v57 = vld [vmem:[#allocation2 + $0x6d8] sm:$0xff]  ;;  %v590_v45 = vld [vmem:[#allocation2 + $0xfa0] sm:$0xff] }
  0xe3   :  { %2005 = vmatpush1.bf16.msra.mxu1 %v2004_v5  ;;  %v531_v5 = vld [vmem:[#allocation2 + $0xdc8] sm:$0xff]  ;;  %v313_v58 = vld [vmem:[#allocation2 + $0x6f8] sm:$0xff]  ;;  %v336_v42 = vld [vmem:[#allocation2 + $0x7b0] sm:$0xff] }
  0xe4   :  { %2007 = vmatprep.subr.bf16.mxu1 %v2006_v7  ;;  %v2024_v7 = vpack.c.bf16 %v272_v1, %v268_v0  ;;  %v2042_v0 = vpack.c.bf16 %v313_v58, %v309_v57  ;;  %v562_v1 = vld [vmem:[#allocation2 + $0xec0] sm:$0xff]  ;;  %v344_v56 = vld [vmem:[#allocation2 + $0x7f0] sm:$0xff] }
  0xe5   :  { %1877 = vmatpush1.bf16.msra.mxu0 %v1876_v6  ;;  %v535_v6 = vld [vmem:[#allocation2 + $0xde8] sm:$0xff]  ;;  %v1916_v10 = vpack.c.bf16 %v566_v33, %v562_v1  ;;  %v598_v58 = vld [vmem:[#allocation2 + $0xfe0] sm:$0xff]  ;;  %v348_v1 = vld [vmem:[#allocation2 + $0x810] sm:$0xff] }
  0xe6   :  { %1879 = vmatprep.subr.bf16.mxu0 %v1878_v12  ;;  %v276_v12 = vld [vmem:[#allocation2 + $0x5d0] sm:$0xff]  ;;  %v1898_v14 = vpack.c.bf16 %v535_v6, %v531_v5  ;;  %v317_v5 = vld [vmem:[#allocation2 + $0x718] sm:$0xff] }
  0xe7   :  { %2009 = vmatpush1.bf16.msra.mxu1 %v2008_v17  ;;  %v539_v17 = vld [vmem:[#allocation2 + $0xe08] sm:$0xff]  ;;  %v321_v6 = vld [vmem:[#allocation2 + $0x738] sm:$0xff] }
  0xe8   :  { %2011 = vmatprep.subr.bf16.mxu1 %v2010_v19  ;;  %v2028_v19 = vpack.c.bf16 %v280_v13, %v276_v12  ;;  %v2046_v12 = vpack.c.bf16 %v321_v6, %v317_v5  ;;  %v570_v13 = vld [vmem:[#allocation2 + $0xf00] sm:$0xff]  ;;  %v356_v6 = vld [vmem:[#allocation2 + $0x850] sm:$0xff] }
  0xe9   :  { %1881 = vmatpush1.bf16.msra.mxu0 %v1880_v18  ;;  %v543_v18 = vld [vmem:[#allocation2 + $0xe28] sm:$0xff]  ;;  %v1920_v22 = vpack.c.bf16 %v574_v16, %v570_v13 }
  0xea   :  { %1883 = vmatprep.subr.bf16.mxu0 %v1882_v23  ;;  %v284_v23 = vld [vmem:[#allocation2 + $0x610] sm:$0xff]  ;;  %v1902_v26 = vpack.c.bf16 %v543_v18, %v539_v17  ;;  %v325_v17 = vld [vmem:[#allocation2 + $0x758] sm:$0xff] }
  0xeb   :  { %2013 = vmatpush1.bf16.msra.mxu1 %v2012_v30  ;;  %v547_v30 = vld [vmem:[#allocation2 + $0xe48] sm:$0xff]  ;;  %v329_v18 = vld [vmem:[#allocation2 + $0x778] sm:$0xff] }
  0xec   :  { %2015 = vmatprep.subr.bf16.mxu1 %v2014_v31  ;;  %v2032_v31 = vpack.c.bf16 %v288_v24, %v284_v23  ;;  %v2050_v23 = vpack.c.bf16 %v329_v18, %v325_v17  ;;  %v578_v24 = vld [vmem:[#allocation2 + $0xf40] sm:$0xff]  ;;  %v1241_v13 = vld [vmem:[#allocation6 + $0x8] sm:$0xff]  ;;  %v1242_v17 = vld [vmem:[#allocation6 + $0x10] sm:$0xff] }
  0xed   :  { %1885 = vmatpush1.bf16.msra.mxu0 %v1884_v41  ;;  %v551_v41 = vld [vmem:[#allocation2 + $0xe68] sm:$0xff]  ;;  %v1924_v36 = vpack.c.bf16 %v582_v29, %v578_v24 }
  0xee   :  { %1887 = vmatprep.subr.bf16.mxu0 %v1886_v37  ;;  %v292_v37 = vld [vmem:[#allocation2 + $0x650] sm:$0xff]  ;;  %v1906_v40 = vpack.c.bf16 %v551_v41, %v547_v30  ;;  %v333_v30 = vld [vmem:[#allocation2 + $0x798] sm:$0xff] }
  0xef   :  { %2017 = vmatpush1.bf16.msra.mxu1 %v2016_v46  ;;  %v555_v46 = vld [vmem:[#allocation2 + $0xe88] sm:$0xff]  ;;  %v337_v41 = vld [vmem:[#allocation2 + $0x7b8] sm:$0xff] }
  0xf0   :  { %2019 = vmatprep.subr.bf16.mxu1 %v2018_v49  ;;  %v2036_v49 = vpack.c.bf16 %v296_v39, %v292_v37  ;;  %v2054_v37 = vpack.c.bf16 %v337_v41, %v333_v30  ;;  %v586_v39 = vld [vmem:[#allocation2 + $0xf80] sm:$0xff]  ;;  %v1245_v18 = vld [vmem:[#allocation6 + $0x28] sm:$0xff] }
  0xf1   :  { %1889 = vmatpush1.bf16.msra.mxu0 %v1888_v47  ;;  %v559_v47 = vld [vmem:[#allocation2 + $0xea8] sm:$0xff]  ;;  %v1928_v52 = vpack.c.bf16 %v590_v45, %v586_v39  ;;  %v372_v41 = vld [vmem:[#allocation2 + $0x8d0] sm:$0xff]  ;;  %v1255_v39 = vld [vmem:[#allocation6 + $0x78] sm:$0xff] }
  0xf2   :  { %1891 = vmatprep.subr.bf16.mxu0 %v1890_v53  ;;  %v300_v53 = vld [vmem:[#allocation2 + $0x690] sm:$0xff]  ;;  %v1910_v38 = vpack.c.bf16 %v559_v47, %v555_v46  ;;  %v341_v46 = vld [vmem:[#allocation2 + $0x7d8] sm:$0xff] }
  0xf3   :  { %2021 = vmatpush1.bf16.msra.mxu1 %v2020_v59  ;;  %v563_v59 = vld [vmem:[#allocation2 + $0xec8] sm:$0xff]  ;;  %v345_v47 = vld [vmem:[#allocation2 + $0x7f8] sm:$0xff] }
  0xf4   :  { %2023 = vmatprep.subr.bf16.mxu1 %v2022_v62  ;;  %v2040_v62 = vpack.c.bf16 %v304_v54, %v300_v53  ;;  %v2058_v53 = vpack.c.bf16 %v345_v47, %v341_v46  ;;  %v594_v54 = vld [vmem:[#allocation2 + $0xfc0] sm:$0xff]  ;;  %v1249_v24 = vld [vmem:[#allocation6 + $0x48] sm:$0xff] }
  0xf5   :  { %1893 = vmatpush1.bf16.msra.mxu0 %v1892_v60  ;;  %v567_v60 = vld [vmem:[#allocation2 + $0xee8] sm:$0xff]  ;;  %v380_v46 = vld [vmem:[#allocation2 + $0x910] sm:$0xff] }
  0xf6   :  { %1895 = vmatprep.subr.bf16.mxu0 %v1894_v2  ;;  %v308_v2 = vld [vmem:[#allocation2 + $0x6d0] sm:$0xff]  ;;  %v1914_v4 = vpack.c.bf16 %v567_v60, %v563_v59  ;;  %v349_v59 = vld [vmem:[#allocation2 + $0x818] sm:$0xff] }
  0xf7   :  { %2025 = vmatpush1.bf16.msra.mxu1 %v2024_v7  ;;  %v571_v7 = vld [vmem:[#allocation2 + $0xf08] sm:$0xff]  ;;  %v353_v60 = vld [vmem:[#allocation2 + $0x838] sm:$0xff] }
  0xf8   :  { %2027 = vmatprep.subr.bf16.mxu1 %v2026_v9  ;;  %v2044_v9 = vpack.c.bf16 %v312_v3, %v308_v2  ;;  %v352_v2 = vld [vmem:[#allocation2 + $0x830] sm:$0xff]  ;;  %v357_v3 = vld [vmem:[#allocation2 + $0x858] sm:$0xff] }
  0xf9   :  { %1897 = vmatpush1.bf16.msra.mxu0 %v1896_v8  ;;  %v575_v8 = vld [vmem:[#allocation2 + $0xf28] sm:$0xff]  ;;  %v2064_v33 = vpack.c.bf16 %v352_v2, %v348_v1  ;;  %v392_v1 = vld [vmem:[#allocation2 + $0x970] sm:$0xff] }
  0xfa   :  { %1899 = vmatprep.subr.bf16.mxu0 %v1898_v14  ;;  %v316_v14 = vld [vmem:[#allocation2 + $0x710] sm:$0xff]  ;;  %v1918_v25 = vpack.c.bf16 %v575_v8, %v571_v7  ;;  %v365_v8 = vld [vmem:[#allocation2 + $0x898] sm:$0xff] }
  0xfb   :  { %2029 = vmatpush1.bf16.msra.mxu1 %v2028_v19  ;;  %v579_v19 = vld [vmem:[#allocation2 + $0xf48] sm:$0xff]  ;;  %v360_v7 = vld [vmem:[#allocation2 + $0x870] sm:$0xff] }
  0xfc   :  { %2031 = vmatprep.subr.bf16.mxu1 %v2030_v21  ;;  %v2048_v21 = vpack.c.bf16 %v320_v15, %v316_v14  ;;  %v1243_v14 = vld [vmem:[#allocation6 + $0x18] sm:$0xff]  ;;  %v1240_v15 = vld [vmem:[#allocation6] sm:$0xff]  ;;  %v1261_v2 = vld [vmem:[#allocation6 + $0xa8] sm:$0xff] }
  0xfd   :  { %1901 = vmatpush1.bf16.msra.mxu0 %v1900_v20  ;;  %v583_v20 = vld [vmem:[#allocation2 + $0xf68] sm:$0xff]  ;;  %v2190_v16 = vpack.c.bf16 %v1243_v14, %v1241_v13  ;;  %v400_v13 = vld [vmem:[#allocation2 + $0x9b0] sm:$0xff] }
  0xfe   :  { %1903 = vmatprep.subr.bf16.mxu0 %v1902_v26  ;;  %v324_v26 = vld [vmem:[#allocation2 + $0x750] sm:$0xff]  ;;  %v1922_v28 = vpack.c.bf16 %v583_v20, %v579_v19  ;;  %v1247_v19 = vld [vmem:[#allocation6 + $0x38] sm:$0xff] }
  0xff   :  { %2033 = vmatpush1.bf16.msra.mxu1 %v2032_v31  ;;  %v587_v31 = vld [vmem:[#allocation2 + $0xf88] sm:$0xff] }
 0x100   :  { %2035 = vmatprep.subr.bf16.mxu1 %v2034_v35  ;;  %v2052_v35 = vpack.c.bf16 %v328_v27, %v324_v26  ;;  %v373_v26 = vld [vmem:[#allocation2 + $0x8d8] sm:$0xff]  ;;  %v1265_v14 = vld [vmem:[#allocation6 + $0xc8] sm:$0xff] }
 0x101   :  { %1905 = vmatpush1.bf16.msra.mxu0 %v1904_v32  ;;  %v591_v32 = vld [vmem:[#allocation2 + $0xfa8] sm:$0xff]  ;;  %v377_v27 = vld [vmem:[#allocation2 + $0x8f8] sm:$0xff] }
 0x102   :  { %1907 = vmatprep.subr.bf16.mxu0 %v1906_v40  ;;  %v332_v40 = vld [vmem:[#allocation2 + $0x790] sm:$0xff]  ;;  %v1926_v43 = vpack.c.bf16 %v591_v32, %v587_v31  ;;  %v1248_v32 = vld [vmem:[#allocation6 + $0x40] sm:$0xff] }
 0x103   :  { %2037 = vmatpush1.bf16.msra.mxu1 %v2036_v49  ;;  %v595_v49 = vld [vmem:[#allocation2 + $0xfc8] sm:$0xff] }
 0x104   :  { %2039 = vmatprep.subr.bf16.mxu1 %v2038_v51  ;;  %v2056_v51 = vpack.c.bf16 %v336_v42, %v332_v40  ;;  %v381_v40 = vld [vmem:[#allocation2 + $0x918] sm:$0xff] }
 0x105   :  { %1909 = vmatpush1.bf16.msra.mxu0 %v1908_v50  ;;  %v599_v50 = vld [vmem:[#allocation2 + $0xfe8] sm:$0xff]  ;;  %v385_v42 = vld [vmem:[#allocation2 + $0x938] sm:$0xff] }
 0x106   :  { %1911 = vmatprep.subr.bf16.mxu0 %v1910_v38  ;;  %v340_v38 = vld [vmem:[#allocation2 + $0x7d0] sm:$0xff]  ;;  %v1930_v57 = vpack.c.bf16 %v599_v50, %v595_v49  ;;  %v1252_v49 = vld [vmem:[#allocation6 + $0x60] sm:$0xff] }
 0x107   :  { %2041 = vmatpush1.bf16.msra.mxu1 %v2040_v62  ;;  %v2060_v62 = vpack.c.bf16 %v344_v56, %v340_v38  ;;  %v1254_v50 = vld [vmem:[#allocation6 + $0x70] sm:$0xff] }
 0x108   :  { %2043 = vmatprep.subr.bf16.mxu1 %v2042_v0  ;;  %v2062_v0 = vpack.c.bf16 %v353_v60, %v349_v59  ;;  %v389_v38 = vld [vmem:[#allocation2 + $0x958] sm:$0xff]  ;;  %v388_v59 = vld [vmem:[#allocation2 + $0x950] sm:$0xff] }
 0x109   :  { %1913 = vmatpush1.bf16.msra.mxu0 %v1912_v63  ;;  %v1932_v63 = vpack.c.bf16 %v598_v58, %v594_v54  ;;  %v1259_v54 = vld [vmem:[#allocation6 + $0x98] sm:$0xff] }
 0x10a   :  { %1915 = vmatprep.subr.bf16.mxu0 %v1914_v4  ;;  %v361_v4 = vld [vmem:[#allocation2 + $0x878] sm:$0xff] }
 0x10b   :  { %2045 = vmatpush1.bf16.msra.mxu1 %v2044_v9  ;;  %v2066_v5 = vpack.c.bf16 %v361_v4, %v357_v3  ;;  %v369_v9 = vld [vmem:[#allocation2 + $0x8b8] sm:$0xff] }
 0x10c   :  { %2047 = vmatprep.subr.bf16.mxu1 %v2046_v12  ;;  %v368_v12 = vld [vmem:[#allocation2 + $0x8b0] sm:$0xff]  ;;  %v2070_v20 = vpack.c.bf16 %v369_v9, %v365_v8  ;;  %v393_v56 = vld [vmem:[#allocation2 + $0x978] sm:$0xff]  ;;  %v1260_v9 = vld [vmem:[#allocation6 + $0xa0] sm:$0xff] }
 0x10d   :  { %1917 = vmatpush1.bf16.msra.mxu0 %v1916_v10  ;;  %v364_v10 = vld [vmem:[#allocation2 + $0x890] sm:$0xff]  ;;  %v1263_v3 = vld [vmem:[#allocation6 + $0xb8] sm:$0xff] }
 0x10e   :  { %1919 = vmatprep.subr.bf16.mxu0 %v1918_v25  ;;  %v2068_v25 = vpack.c.bf16 %v360_v7, %v356_v6  ;;  %v2072_v30 = vpack.c.bf16 %v368_v12, %v364_v10  ;;  %v397_v4 = vld [vmem:[#allocation2 + $0x998] sm:$0xff]  ;;  %v2084_v6 = vpack.c.bf16 %v392_v1, %v388_v59  ;;  %v396_v7 = vld [vmem:[#allocation2 + $0x990] sm:$0xff]  ;;  %v2210_v8 = vpack.c.bf16 %v1263_v3, %v1261_v2 }
 0x10f   :  { %2049 = vmatpush1.bf16.msra.mxu1 %v2048_v21  ;;  %v2192_v21 = vpack.c.bf16 %v1242_v17, %v1240_v15  ;;  %v1262_v10 = vld [vmem:[#allocation6 + $0xb0] sm:$0xff]  ;;  %v1267_v15 = vld [vmem:[#allocation6 + $0xd8] sm:$0xff]  ;;  %v1281_v2 = vld [vmem:[#allocation6 + $0x148] sm:$0xff] }
 0x110   :  { %2051 = vmatprep.subr.bf16.mxu1 %v2050_v23  ;;  %v1246_v23 = vld [vmem:[#allocation6 + $0x30] sm:$0xff]  ;;  %v2212_v17 = vpack.c.bf16 %v1262_v10, %v1260_v9  ;;  %v1283_v3 = vld [vmem:[#allocation6 + $0x158] sm:$0xff]  ;;  %v1280_v9 = vld [vmem:[#allocation6 + $0x140] sm:$0xff] }
 0x111   :  { %1921 = vmatpush1.bf16.msra.mxu0 %v1920_v22  ;;  %v2194_v22 = vpack.c.bf16 %v1247_v19, %v1245_v18  ;;  %v2088_v18 = vpack.c.bf16 %v400_v13, %v396_v7  ;;  %v404_v19 = vld [vmem:[#allocation2 + $0x9d0] sm:$0xff] }
 0x112   :  { %1923 = vmatprep.subr.bf16.mxu0 %v1922_v28  ;;  %v1251_v28 = vld [vmem:[#allocation6 + $0x58] sm:$0xff]  ;;  %v428_v59 = vld [vmem:[#allocation2 + $0xa90] sm:$0xff] }
 0x113   :  { %2053 = vmatpush1.bf16.msra.mxu1 %v2052_v35  ;;  %v2198_v31 = vpack.c.bf16 %v1251_v28, %v1249_v24  ;;  %v1250_v35 = vld [vmem:[#allocation6 + $0x50] sm:$0xff]  ;;  %v1269_v24 = vld [vmem:[#allocation6 + $0xe8] sm:$0xff] }
 0x114   :  { %2055 = vmatprep.subr.bf16.mxu1 %v2054_v37  ;;  %v1253_v37 = vld [vmem:[#allocation6 + $0x68] sm:$0xff]  ;;  %v417_v28 = vld [vmem:[#allocation2 + $0xa38] sm:$0xff] }
 0x115   :  { %1925 = vmatpush1.bf16.msra.mxu0 %v1924_v36  ;;  %v376_v36 = vld [vmem:[#allocation2 + $0x8f0] sm:$0xff]  ;;  %v2202_v47 = vpack.c.bf16 %v1255_v39, %v1253_v37  ;;  %v1275_v39 = vld [vmem:[#allocation6 + $0x118] sm:$0xff] }
 0x116   :  { %1927 = vmatprep.subr.bf16.mxu0 %v1926_v43  ;;  %v2200_v43 = vpack.c.bf16 %v1250_v35, %v1248_v32  ;;  %v2076_v45 = vpack.c.bf16 %v376_v36, %v372_v41  ;;  %v412_v41 = vld [vmem:[#allocation2 + $0xa10] sm:$0xff]  ;;  %v1268_v32 = vld [vmem:[#allocation6 + $0xe0] sm:$0xff] }
 0x117   :  { %2057 = vmatpush1.bf16.msra.mxu1 %v2056_v51  ;;  %v2078_v51 = vpack.c.bf16 %v385_v42, %v381_v40  ;;  %v1270_v35 = vld [vmem:[#allocation6 + $0xf0] sm:$0xff]  ;;  %v1273_v37 = vld [vmem:[#allocation6 + $0x108] sm:$0xff] }
 0x118   :  { %2059 = vmatprep.subr.bf16.mxu1 %v2058_v53  ;;  %v1257_v53 = vld [vmem:[#allocation6 + $0x88] sm:$0xff]  ;;  %v421_v40 = vld [vmem:[#allocation2 + $0xa58] sm:$0xff] }
 0x119   :  { %1929 = vmatpush1.bf16.msra.mxu0 %v1928_v52  ;;  %v384_v52 = vld [vmem:[#allocation2 + $0x930] sm:$0xff]  ;;  %v2206_v60 = vpack.c.bf16 %v1259_v54, %v1257_v53  ;;  %v425_v42 = vld [vmem:[#allocation2 + $0xa78] sm:$0xff] }
 0x11a   :  { %1931 = vmatprep.subr.bf16.mxu0 %v1930_v57  ;;  %v2204_v57 = vpack.c.bf16 %v1254_v50, %v1252_v49  ;;  %v2080_v58 = vpack.c.bf16 %v384_v52, %v380_v46  ;;  %v416_v36 = vld [vmem:[#allocation2 + $0xa30] sm:$0xff]  ;;  %v1272_v49 = vld [vmem:[#allocation6 + $0x100] sm:$0xff]  ;;  %v1279_v54 = vld [vmem:[#allocation6 + $0x138] sm:$0xff] }
 0x11b   :  { %2061 = vmatpush1.bf16.msra.mxu1 %v2060_v62  ;;  %v1256_v62 = vld [vmem:[#allocation6 + $0x80] sm:$0xff]  ;;  %v420_v46 = vld [vmem:[#allocation2 + $0xa50] sm:$0xff] }
 0x11c   :  { %2063 = vmatprep.subr.bf16.mxu1 %v2062_v0  ;;  %v2082_v0 = vpack.c.bf16 %v393_v56, %v389_v38  ;;  %v1274_v50 = vld [vmem:[#allocation6 + $0x110] sm:$0xff]  ;;  %v1277_v53 = vld [vmem:[#allocation6 + $0x128] sm:$0xff] }
 0x11d   :  { %1933 = vmatpush1.bf16.msra.mxu0 %v1932_v63  ;;  %v1258_v63 = vld [vmem:[#allocation6 + $0x90] sm:$0xff] }
 0x11e   :  { %1088 = vmatmul.mubr.f32.vlgmr.msra.gmra.mrb[2].mxu1 %v2624_v34  ;;  %v1244_v34 = vld [vmem:[#allocation6 + $0x20] sm:$0xff]  ;;  %2191 = vmatprep.subr.bf16.mxu0 %v2190_v16  ;;  %v409_v16 = vld [vmem:[#allocation2 + $0x9f8] sm:$0xff]  ;;  %v424_v52 = vld [vmem:[#allocation2 + $0xa70] sm:$0xff] }
 0x11f   :  { %2065 = vmatpush1.bf16.msra.mxu1 %v2064_v33  ;;  %1158 = vmatprep.mubr.f32.mxu1 %v2646_v48  ;;  %v2196_v29 = vpack.c.bf16 %v1246_v23, %v1244_v34  ;;  %v2074_v48 = vpack.c.bf16 %v377_v27, %v373_v26  ;;  %v401_v33 = vld [vmem:[#allocation2 + $0x9b8] sm:$0xff]  ;;  %v408_v23 = vld [vmem:[#allocation2 + $0x9f0] sm:$0xff] }
 0x120   :  { %946 = vmatmul.mubr.f32.vlgmr.msra.gmra.mrb[0].mxu0 %v2652_v55  ;;  %2067 = vmatprep.subr.bf16.mxu1 %v2066_v5  ;;  %v2208_v5 = vpack.c.bf16 %v1258_v63, %v1256_v62  ;;  %v2086_v12 = vpack.c.bf16 %v401_v33, %v397_v4  ;;  %v1271_v26 = vld [vmem:[#allocation6 + $0xf8] sm:$0xff]  ;;  %v1276_v62 = vld [vmem:[#allocation6 + $0x120] sm:$0xff]  ;;  %v1278_v63 = vld [vmem:[#allocation6 + $0x130] sm:$0xff] }
 0x121   :  { %2193 = vmatpush1.bf16.msra.mxu0 %v2192_v21  ;;  %v1264_v21 = vld [vmem:[#allocation6 + $0xc0] sm:$0xff]  ;;  %v413_v27 = vld [vmem:[#allocation2 + $0xa18] sm:$0xff]  ;;  %v432_v1 = vld [vmem:[#allocation2 + $0xab0] sm:$0xff] }
 0x122   :  { %2195 = vmatprep.subr.bf16.mxu0 %v2194_v22  ;;  %v1266_v22 = vld [vmem:[#allocation6 + $0xd0] sm:$0xff] }
 0x123   :  { %2069 = vmatpush1.bf16.msra.mxu1 %v2068_v25  ;;  %v405_v25 = vld [vmem:[#allocation2 + $0x9d8] sm:$0xff]  ;;  %v436_v7 = vld [vmem:[#allocation2 + $0xad0] sm:$0xff] }
 0x124   :  { %2071 = vmatprep.subr.bf16.mxu1 %v2070_v20  ;;  %v2214_v20 = vpack.c.bf16 %v1267_v15, %v1265_v14  ;;  %v2090_v34 = vpack.c.bf16 %v409_v16, %v405_v25  ;;  %v429_v38 = vld [vmem:[#allocation2 + $0xa98] sm:$0xff]  ;;  %v440_v13 = vld [vmem:[#allocation2 + $0xaf0] sm:$0xff] }
 0x125   :  { %2197 = vmatpush1.bf16.msra.mxu0 %v2196_v29  ;;  %v2216_v29 = vpack.c.bf16 %v1266_v22, %v1264_v21  ;;  %v433_v56 = vld [vmem:[#allocation2 + $0xab8] sm:$0xff]  ;;  %v1285_v14 = vld [vmem:[#allocation6 + $0x168] sm:$0xff]  ;;  %v1284_v21 = vld [vmem:[#allocation6 + $0x160] sm:$0xff] }
 0x126   :  { %2199 = vmatprep.subr.bf16.mxu0 %v2198_v31  ;;  %v2218_v31 = vpack.c.bf16 %v1271_v26, %v1269_v24  ;;  %v437_v4 = vld [vmem:[#allocation2 + $0xad8] sm:$0xff]  ;;  %v1289_v24 = vld [vmem:[#allocation6 + $0x188] sm:$0xff] }
 0x127   :  { %2073 = vmatpush1.bf16.msra.mxu1 %v2072_v30  ;;  %v2092_v30 = vpack.c.bf16 %v408_v23, %v404_v19  ;;  %v441_v33 = vld [vmem:[#allocation2 + $0xaf8] sm:$0xff]  ;;  %v444_v19 = vld [vmem:[#allocation2 + $0xb10] sm:$0xff] }
 0x128   :  { %2075 = vmatprep.subr.bf16.mxu1 %v2074_v48  ;;  %v2094_v48 = vpack.c.bf16 %v417_v28, %v413_v27  ;;  %v1282_v10 = vld [vmem:[#allocation6 + $0x150] sm:$0xff]  ;;  %v1287_v15 = vld [vmem:[#allocation6 + $0x178] sm:$0xff] }
 0x129   :  { %2201 = vmatpush1.bf16.msra.mxu0 %v2200_v43  ;;  %v2220_v43 = vpack.c.bf16 %v1270_v35, %v1268_v32  ;;  %v445_v25 = vld [vmem:[#allocation2 + $0xb18] sm:$0xff]  ;;  %v448_v23 = vld [vmem:[#allocation2 + $0xb30] sm:$0xff]  ;;  %v1288_v32 = vld [vmem:[#allocation6 + $0x180] sm:$0xff] }
 0x12a   :  { %2203 = vmatprep.subr.bf16.mxu0 %v2202_v47  ;;  %v2222_v47 = vpack.c.bf16 %v1275_v39, %v1273_v37  ;;  %v449_v16 = vld [vmem:[#allocation2 + $0xb38] sm:$0xff]  ;;  %v1293_v37 = vld [vmem:[#allocation6 + $0x1a8] sm:$0xff] }
 0x12b   :  { %2077 = vmatpush1.bf16.msra.mxu1 %v2076_v45  ;;  %v2096_v45 = vpack.c.bf16 %v416_v36, %v412_v41  ;;  %v1286_v22 = vld [vmem:[#allocation6 + $0x170] sm:$0xff]  ;;  %v1291_v26 = vld [vmem:[#allocation6 + $0x198] sm:$0xff] }
 0x12c   :  { %2079 = vmatprep.subr.bf16.mxu1 %v2078_v51  ;;  %v2098_v51 = vpack.c.bf16 %v425_v42, %v421_v40  ;;  %v453_v27 = vld [vmem:[#allocation2 + $0xb58] sm:$0xff]  ;;  %v452_v41 = vld [vmem:[#allocation2 + $0xb50] sm:$0xff] }
 0x12d   :  { %2205 = vmatpush1.bf16.msra.mxu0 %v2204_v57  ;;  %v2224_v57 = vpack.c.bf16 %v1274_v50, %v1272_v49  ;;  %v457_v28 = vld [vmem:[#allocation2 + $0xb78] sm:$0xff]  ;;  %v456_v36 = vld [vmem:[#allocation2 + $0xb70] sm:$0xff]  ;;  %v1292_v49 = vld [vmem:[#allocation6 + $0x1a0] sm:$0xff] }
 0x12e   :  { %2207 = vmatprep.subr.bf16.mxu0 %v2206_v60  ;;  %v2226_v60 = vpack.c.bf16 %v1279_v54, %v1277_v53  ;;  %v1290_v35 = vld [vmem:[#allocation6 + $0x190] sm:$0xff]  ;;  %v1295_v39 = vld [vmem:[#allocation6 + $0x1b8] sm:$0xff]  ;;  %v1297_v53 = vld [vmem:[#allocation6 + $0x1c8] sm:$0xff] }
 0x12f   :  { %2081 = vmatpush1.bf16.msra.mxu1 %v2080_v58  ;;  %v2100_v58 = vpack.c.bf16 %v424_v52, %v420_v46  ;;  %v461_v40 = vld [vmem:[#allocation2 + $0xb98] sm:$0xff]  ;;  %v460_v46 = vld [vmem:[#allocation2 + $0xb90] sm:$0xff] }
 0x130   :  { %2083 = vmatprep.subr.bf16.mxu1 %v2082_v0  ;;  %v2102_v0 = vpack.c.bf16 %v433_v56, %v429_v38  ;;  %v465_v42 = vld [vmem:[#allocation2 + $0xbb8] sm:$0xff]  ;;  %v464_v52 = vld [vmem:[#allocation2 + $0xbb0] sm:$0xff] }
 0x131   :  { %2209 = vmatpush1.bf16.msra.mxu0 %v2208_v5  ;;  %v2228_v5 = vpack.c.bf16 %v1278_v63, %v1276_v62  ;;  %v1294_v50 = vld [vmem:[#allocation6 + $0x1b0] sm:$0xff]  ;;  %v1299_v54 = vld [vmem:[#allocation6 + $0x1d8] sm:$0xff] }
 0x132   :  { %2211 = vmatprep.subr.bf16.mxu0 %v2210_v8  ;;  %v2230_v8 = vpack.c.bf16 %v1283_v3, %v1281_v2  ;;  %v469_v38 = vld [vmem:[#allocation2 + $0xbd8] sm:$0xff]  ;;  %v468_v62 = vld [vmem:[#allocation2 + $0xbd0] sm:$0xff] }
 0x133   :  { %2085 = vmatpush1.bf16.msra.mxu1 %v2084_v6  ;;  %v2104_v6 = vpack.c.bf16 %v432_v1, %v428_v59  ;;  %v473_v56 = vld [vmem:[#allocation2 + $0xbf8] sm:$0xff]  ;;  %v2246_v59 = vpack.c.bf16 %v1299_v54, %v1297_v53  ;;  %v472_v63 = vld [vmem:[#allocation2 + $0xbf0] sm:$0xff]  ;;  %v1300_v54 = vld [vmem:[#allocation6 + $0x1e0] sm:$0xff] }
 0x134   :  { %2087 = vmatprep.subr.bf16.mxu1 %v2086_v12  ;;  %v2106_v12 = vpack.c.bf16 %v441_v33, %v437_v4  ;;  %v481_v1 = vld [vmem:[#allocation2 + $0xc38] sm:$0xff]  ;;  %v2124_v2 = vpack.c.bf16 %v472_v63, %v468_v62  ;;  %v476_v4 = vld [vmem:[#allocation2 + $0xc10] sm:$0xff] }
 0x135   :  { %2213 = vmatpush1.bf16.msra.mxu0 %v2212_v17  ;;  %v2232_v17 = vpack.c.bf16 %v1282_v10, %v1280_v9  ;;  %v480_v33 = vld [vmem:[#allocation2 + $0xc30] sm:$0xff]  ;;  %v545_v62 = vld [vmem:[#allocation2 + $0xe38] sm:$0xff] }
 0x136   :  { %2215 = vmatprep.subr.bf16.mxu0 %v2214_v20  ;;  %v2234_v20 = vpack.c.bf16 %v1287_v15, %v1285_v14  ;;  %v484_v9 = vld [vmem:[#allocation2 + $0xc50] sm:$0xff] }
 0x137   :  { %2089 = vmatpush1.bf16.msra.mxu1 %v2088_v18  ;;  %v2108_v18 = vpack.c.bf16 %v440_v13, %v436_v7  ;;  %v2128_v7 = vpack.c.bf16 %v480_v33, %v476_v4  ;;  %v488_v10 = vld [vmem:[#allocation2 + $0xc70] sm:$0xff]  ;;  %v497_v13 = vld [vmem:[#allocation2 + $0xcb8] sm:$0xff] }
 0x138   :  { %2091 = vmatprep.subr.bf16.mxu1 %v2090_v34  ;;  %v2110_v34 = vpack.c.bf16 %v449_v16, %v445_v25  ;;  %v2132_v14 = vpack.c.bf16 %v488_v10, %v484_v9  ;;  %v492_v25 = vld [vmem:[#allocation2 + $0xc90] sm:$0xff]  ;;  %v553_v4 = vld [vmem:[#allocation2 + $0xe78] sm:$0xff] }
 0x139   :  { %2217 = vmatpush1.bf16.msra.mxu0 %v2216_v29  ;;  %v2236_v29 = vpack.c.bf16 %v1286_v22, %v1284_v21  ;;  %v496_v16 = vld [vmem:[#allocation2 + $0xcb0] sm:$0xff] }
 0x13a   :  { %2219 = vmatprep.subr.bf16.mxu0 %v2218_v31  ;;  %v2238_v31 = vpack.c.bf16 %v1291_v26, %v1289_v24  ;;  %v500_v21 = vld [vmem:[#allocation2 + $0xcd0] sm:$0xff] }
 0x13b   :  { %2093 = vmatpush1.bf16.msra.mxu1 %v2092_v30  ;;  %v2112_v30 = vpack.c.bf16 %v448_v23, %v444_v19  ;;  %v2136_v19 = vpack.c.bf16 %v496_v16, %v492_v25  ;;  %v504_v22 = vld [vmem:[#allocation2 + $0xcf0] sm:$0xff]  ;;  %v513_v23 = vld [vmem:[#allocation2 + $0xd38] sm:$0xff] }
 0x13c   :  { %2095 = vmatprep.subr.bf16.mxu1 %v2094_v48  ;;  %v2114_v48 = vpack.c.bf16 %v457_v28, %v453_v27  ;;  %v508_v26 = vld [vmem:[#allocation2 + $0xd10] sm:$0xff]  ;;  %v517_v27 = vld [vmem:[#allocation2 + $0xd58] sm:$0xff] }
 0x13d   :  { %2221 = vmatpush1.bf16.msra.mxu0 %v2220_v43  ;;  %v2240_v43 = vpack.c.bf16 %v1290_v35, %v1288_v32  ;;  %v521_v28 = vld [vmem:[#allocation2 + $0xd78] sm:$0xff]  ;;  %v1305_v33 = vld [vmem:[#allocation6 + $0x208] sm:$0xff] }
 0x13e   :  { %2223 = vmatprep.subr.bf16.mxu0 %v2222_v47  ;;  %v2242_v47 = vpack.c.bf16 %v1295_v39, %v1293_v37  ;;  %v525_v32 = vld [vmem:[#allocation2 + $0xd98] sm:$0xff]  ;;  %v548_v9 = vld [vmem:[#allocation2 + $0xe50] sm:$0xff] }
 0x13f   :  { %2097 = vmatpush1.bf16.msra.mxu1 %v2096_v45  ;;  %v2116_v45 = vpack.c.bf16 %v456_v36, %v452_v41  ;;  %v516_v41 = vld [vmem:[#allocation2 + $0xd50] sm:$0xff]  ;;  %v529_v35 = vld [vmem:[#allocation2 + $0xdb8] sm:$0xff]  ;;  %v1296_v36 = vld [vmem:[#allocation6 + $0x1c0] sm:$0xff] }
 0x140   :  { %2099 = vmatprep.subr.bf16.mxu1 %v2098_v51  ;;  %v2118_v51 = vpack.c.bf16 %v465_v42, %v461_v40  ;;  %v1298_v37 = vld [vmem:[#allocation6 + $0x1d0] sm:$0xff]  ;;  %v2150_v39 = vpack.c.bf16 %v529_v35, %v525_v32 }
 0x141   :  { %2225 = vmatpush1.bf16.msra.mxu0 %v2224_v57  ;;  %v2244_v57 = vpack.c.bf16 %v1294_v50, %v1292_v49  ;;  %v524_v40 = vld [vmem:[#allocation2 + $0xd90] sm:$0xff]  ;;  %v589_v32 = vld [vmem:[#allocation2 + $0xf98] sm:$0xff] }
 0x142   :  { %2227 = vmatprep.subr.bf16.mxu0 %v2226_v60  ;;  %v2122_v60 = vpack.c.bf16 %v473_v56, %v469_v38  ;;  %v528_v42 = vld [vmem:[#allocation2 + $0xdb0] sm:$0xff]  ;;  %v593_v35 = vld [vmem:[#allocation2 + $0xfb8] sm:$0xff] }
 0x143   :  { %2101 = vmatpush1.bf16.msra.mxu1 %v2100_v58  ;;  %v2120_v58 = vpack.c.bf16 %v464_v52, %v460_v46  ;;  %v533_v46 = vld [vmem:[#allocation2 + $0xdd8] sm:$0xff]  ;;  %v1301_v50 = vld [vmem:[#allocation6 + $0x1e8] sm:$0xff]  ;;  %v2152_v52 = vpack.c.bf16 %v528_v42, %v524_v40 }
 0x144   :  { %2103 = vmatprep.subr.bf16.mxu1 %v2102_v0  ;;  %v477_v0 = vld [vmem:[#allocation2 + $0xc18] sm:$0xff]  ;;  %v552_v10 = vld [vmem:[#allocation2 + $0xe70] sm:$0xff] }
 0x145   :  { %2229 = vmatpush1.bf16.msra.mxu0 %v2228_v5  ;;  %v2126_v3 = vpack.c.bf16 %v481_v1, %v477_v0  ;;  %v485_v5 = vld [vmem:[#allocation2 + $0xc58] sm:$0xff]  ;;  %v540_v1 = vld [vmem:[#allocation2 + $0xe10] sm:$0xff] }
 0x146   :  { %2231 = vmatprep.subr.bf16.mxu0 %v2230_v8  ;;  %v1302_v38 = vld [vmem:[#allocation6 + $0x1f0] sm:$0xff] }
 0x147   :  { %2105 = vmatpush1.bf16.msra.mxu1 %v2104_v6  ;;  %v489_v6 = vld [vmem:[#allocation2 + $0xc78] sm:$0xff]  ;;  %v556_v25 = vld [vmem:[#allocation2 + $0xe90] sm:$0xff] }
 0x148   :  { %2107 = vmatprep.subr.bf16.mxu1 %v2106_v12  ;;  %v2130_v8 = vpack.c.bf16 %v489_v6, %v485_v5  ;;  %v493_v12 = vld [vmem:[#allocation2 + $0xc98] sm:$0xff]  ;;  %v560_v16 = vld [vmem:[#allocation2 + $0xeb0] sm:$0xff] }
 0x149   :  { %2233 = vmatpush1.bf16.msra.mxu0 %v2232_v17  ;;  %v2134_v15 = vpack.c.bf16 %v497_v13, %v493_v12  ;;  %v501_v17 = vld [vmem:[#allocation2 + $0xcd8] sm:$0xff] }
 0x14a   :  { %2235 = vmatprep.subr.bf16.mxu0 %v2234_v20  ;;  %v1307_v5 = vld [vmem:[#allocation6 + $0x218] sm:$0xff] }
 0x14b   :  { %2109 = vmatpush1.bf16.msra.mxu1 %v2108_v18  ;;  %v505_v18 = vld [vmem:[#allocation2 + $0xcf8] sm:$0xff]  ;;  %v2254_v6 = vpack.c.bf16 %v1307_v5, %v1305_v33  ;;  %v1308_v33 = vld [vmem:[#allocation6 + $0x220] sm:$0xff] }
 0x14c   :  { %2111 = vmatprep.subr.bf16.mxu1 %v2110_v34  ;;  %v2138_v20 = vpack.c.bf16 %v505_v18, %v501_v17  ;;  %v509_v34 = vld [vmem:[#allocation2 + $0xd18] sm:$0xff] }
 0x14d   :  { %2237 = vmatpush1.bf16.msra.mxu0 %v2236_v29  ;;  %v2142_v24 = vpack.c.bf16 %v513_v23, %v509_v34  ;;  %v557_v12 = vld [vmem:[#allocation2 + $0xe98] sm:$0xff] }
 0x14e   :  { %2239 = vmatprep.subr.bf16.mxu0 %v2238_v31  ;;  %v520_v31 = vld [vmem:[#allocation2 + $0xd70] sm:$0xff]  ;;  %v561_v13 = vld [vmem:[#allocation2 + $0xeb8] sm:$0xff] }
 0x14f   :  { %2113 = vmatpush1.bf16.msra.mxu1 %v2112_v30  ;;  %v2146_v30 = vpack.c.bf16 %v521_v28, %v517_v27  ;;  %v565_v17 = vld [vmem:[#allocation2 + $0xed8] sm:$0xff] }
 0x150   :  { %2115 = vmatprep.subr.bf16.mxu1 %v2114_v48  ;;  %v2148_v48 = vpack.c.bf16 %v520_v31, %v516_v41  ;;  %v569_v18 = vld [vmem:[#allocation2 + $0xef8] sm:$0xff]  ;;  %v580_v41 = vld [vmem:[#allocation2 + $0xf50] sm:$0xff] }
 0x151   :  { %2241 = vmatpush1.bf16.msra.mxu0 %v2240_v43  ;;  %v2248_v43 = vpack.c.bf16 %v1298_v37, %v1296_v36  ;;  %v573_v34 = vld [vmem:[#allocation2 + $0xf18] sm:$0xff]  ;;  %v584_v31 = vld [vmem:[#allocation2 + $0xf70] sm:$0xff]  ;;  %v2182_v36 = vpack.c.bf16 %v593_v35, %v589_v32  ;;  %v1316_v32 = vld [vmem:[#allocation6 + $0x260] sm:$0xff] }
 0x152   :  { %2243 = vmatprep.subr.bf16.mxu0 %v2242_v47  ;;  %v537_v47 = vld [vmem:[#allocation2 + $0xdf8] sm:$0xff]  ;;  %v588_v37 = vld [vmem:[#allocation2 + $0xf90] sm:$0xff] }
 0x153   :  { %2117 = vmatpush1.bf16.msra.mxu1 %v2116_v45  ;;  %v2154_v56 = vpack.c.bf16 %v537_v47, %v533_v46  ;;  %v577_v23 = vld [vmem:[#allocation2 + $0xf38] sm:$0xff]  ;;  %v596_v47 = vld [vmem:[#allocation2 + $0xfd0] sm:$0xff] }
 0x154   :  { %2119 = vmatprep.subr.bf16.mxu1 %v2118_v51  ;;  %v1303_v51 = vld [vmem:[#allocation6 + $0x1f8] sm:$0xff]  ;;  %v1318_v35 = vld [vmem:[#allocation6 + $0x270] sm:$0xff] }
 0x155   :  { %2245 = vmatpush1.bf16.msra.mxu0 %v2244_v57  ;;  %v2250_v53 = vpack.c.bf16 %v1303_v51, %v1301_v50  ;;  %v532_v57 = vld [vmem:[#allocation2 + $0xdd0] sm:$0xff]  ;;  %v581_v27 = vld [vmem:[#allocation2 + $0xf58] sm:$0xff] }
 0x156   :  { %2247 = vmatprep.subr.bf16.mxu0 %v2246_v59  ;;  %v2252_v59 = vpack.c.bf16 %v1302_v38, %v1300_v54  ;;  %v585_v28 = vld [vmem:[#allocation2 + $0xf78] sm:$0xff]  ;;  %v600_v50 = vld [vmem:[#allocation2 + $0xff0] sm:$0xff]  ;;  %v610_v54 = vsub.s32 1, %v2608_v61 }
 0x157   :  { %2121 = vmatpush1.bf16.msra.mxu1 %v2120_v58  ;;  %v536_v58 = vld [vmem:[#allocation2 + $0xdf0] sm:$0xff]  ;;  %v597_v40 = vld [vmem:[#allocation2 + $0xfd8] sm:$0xff]  ;;  %v2188_v51 = vpack.c.bf16 %v600_v50, %v596_v47  ;;  %v1549_v47 = vld [vmem:[%s2796_s5 + $0xc8] sm:$0xff] }
 0x158   :  { %2123 = vmatprep.subr.bf16.mxu1 %v2122_v60  ;;  %v541_v60 = vld [vmem:[#allocation2 + $0xe18] sm:$0xff]  ;;  %v2156_v63 = vpack.c.bf16 %v536_v58, %v532_v57 }
 0x159   :  { %2249 = vmatpush1.bf16.msra.mxu0 %v2248_v43  ;;  %v2158_v0 = vpack.c.bf16 %v545_v62, %v541_v60  ;;  %v601_v42 = vld [vmem:[#allocation2 + $0xff8] sm:$0xff]  ;;  %v1304_v62 = vld [vmem:[#allocation6 + $0x200] sm:$0xff] }
 0x15a   :  { %2251 = vmatprep.subr.bf16.mxu0 %v2250_v53  ;;  %v2186_v46 = vpack.c.bf16 %v601_v42, %v597_v40  ;;  %v2673_v53 = vld [vmem:[#allocation4] sm:$0xf]  ;;  %v1530_v40 = vld [vmem:[%s2796_s5 + $0x30] sm:$0xff]  ;;  %v1531_v42 = vld [vmem:[%s2796_s5 + $0x38] sm:$0xff] }
 0x15b   :  { %2125 = vmatpush1.bf16.msra.mxu1 %v2124_v2  ;;  %v544_v2 = vld [vmem:[#allocation2 + $0xe30] sm:$0xff] }
 0x15c   :  { %2127 = vmatprep.subr.bf16.mxu1 %v2126_v3  ;;  %v549_v3 = vld [vmem:[#allocation2 + $0xe58] sm:$0xff] }
 0x15d   :  { %2253 = vmatpush1.bf16.msra.mxu0 %v2252_v59 }
 0x15e   :  { %1159 = vmatmul.mubr.f32.vlgmr.msra.gmra.mrb[2].mxu1 %v2642_v44  ;;  %v2140_v44 = vpack.c.bf16 %v504_v22, %v500_v21  ;;  %2255 = vmatprep.subr.bf16.mxu0 %v2254_v6  ;;  %v564_v21 = vld [vmem:[#allocation2 + $0xed0] sm:$0xff] }
 0x15f   :  { %2129 = vmatpush1.bf16.msra.mxu1 %v2128_v7  ;;  %1229 = vmatprep.mubr.f32.mxu1 %v2656_v11  ;;  %v512_v11 = vld [vmem:[#allocation2 + $0xd30] sm:$0xff]  ;;  %v2160_v7 = vpack.c.bf16 %v544_v2, %v540_v1  ;;  %v1311_v2 = vld [vmem:[#allocation6 + $0x238] sm:$0xff] }
 0x160   :  { %2131 = vmatprep.subr.bf16.mxu1 %v2130_v8  ;;  %v2144_v29 = vpack.c.bf16 %v512_v11, %v508_v26  ;;  %v2162_v8 = vpack.c.bf16 %v553_v4, %v549_v3  ;;  %v568_v22 = vld [vmem:[#allocation2 + $0xef0] sm:$0xff] }
 0x161   :  { %v572_v26 = vld [vmem:[#allocation2 + $0xf10] sm:$0xff] }
 0x162   :  { %v576_v11 = vld [vmem:[#allocation2 + $0xf30] sm:$0xff] }
 0x163   :  { %2133 = vmatpush1.bf16.msra.mxu1 %v2132_v14  ;;  %v2164_v14 = vpack.c.bf16 %v552_v10, %v548_v9  ;;  %v1309_v1 = vld [vmem:[#allocation6 + $0x228] sm:$0xff]  ;;  %v1315_v9 = vld [vmem:[#allocation6 + $0x258] sm:$0xff] }
 0x164   :  { %2135 = vmatprep.subr.bf16.mxu1 %v2134_v15  ;;  %v2166_v15 = vpack.c.bf16 %v561_v13, %v557_v12  ;;  %v2258_v6 = vpack.c.bf16 %v1311_v2, %v1309_v1  ;;  %v1524_v10 = vld [vmem:[%s2796_s5] sm:$0xff]  ;;  %v1525_v13 = vld [vmem:[%s2796_s5 + $0x8] sm:$0xff] }
 0x165   :  { %v1324_v2 = vld [vmem:[#allocation6 + $0x2a0] sm:$0xff] }
 0x167   :  { %2137 = vmatpush1.bf16.msra.mxu1 %v2136_v19  ;;  %v2168_v19 = vpack.c.bf16 %v560_v16, %v556_v25  ;;  %v2320_v16 = vpack.c.bf16 %v1525_v13, %v1524_v10  ;;  %v1330_v13 = vld [vmem:[#allocation6 + $0x2d0] sm:$0xff] }
 0x168   :  { %2139 = vmatprep.subr.bf16.mxu1 %v2138_v20  ;;  %v2170_v20 = vpack.c.bf16 %v569_v18, %v565_v17  ;;  %v1526_v18 = vld [vmem:[%s2796_s5 + $0x10] sm:$0xff] }
 0x16b   :  { %2141 = vmatpush1.bf16.msra.mxu1 %v2140_v44  ;;  %v2172_v44 = vpack.c.bf16 %v568_v22, %v564_v21  ;;  %v1312_v22 = vld [vmem:[#allocation6 + $0x240] sm:$0xff] }
 0x16c   :  { %2143 = vmatprep.subr.bf16.mxu1 %v2142_v24  ;;  %v2174_v24 = vpack.c.bf16 %v577_v23, %v573_v34  ;;  %v1314_v34 = vld [vmem:[#allocation6 + $0x250] sm:$0xff]  ;;  %v1545_v23 = vld [vmem:[%s2796_s5 + $0xa8] sm:$0xff] }
 0x16f   :  { %2145 = vmatpush1.bf16.msra.mxu1 %v2144_v29  ;;  %v2176_v29 = vpack.c.bf16 %v576_v11, %v572_v26 }
 0x170   :  { %2147 = vmatprep.subr.bf16.mxu1 %v2146_v30  ;;  %v2178_v30 = vpack.c.bf16 %v585_v28, %v581_v27  ;;  %v1528_v27 = vld [vmem:[%s2796_s5 + $0x20] sm:$0xff]  ;;  %v1529_v28 = vld [vmem:[%s2796_s5 + $0x28] sm:$0xff] }
 0x171   :  { %v2667_v45 = vpop.f32.mrb[0].mxu1 }
 0x172   :  { %v2669_v49 = vpop.f32.mrb[1].mxu1 }
 0x173   :  { %2149 = vmatpush1.bf16.msra.mxu1 %v2148_v48  ;;  %v2180_v48 = vpack.c.bf16 %v584_v31, %v580_v41  ;;  %v1547_v41 = vld [vmem:[%s2796_s5 + $0xb8] sm:$0xff] }
 0x174   :  { %2151 = vmatprep.subr.bf16.mxu1 %v2150_v39  ;;  %v592_v39 = vld [vmem:[#allocation2 + $0xfb0] sm:$0xff] }
 0x175   :  { %v2184_v43 = vpack.c.bf16 %v592_v39, %v588_v37  ;;  %v2328_v37 = vpack.c.bf16 %v1529_v28, %v1528_v27 }
 0x177   :  { %2153 = vmatpush1.bf16.msra.mxu1 %v2152_v52  ;;  %v606_v52 = vsub.s32 0, %v2608_v61 }
 0x178   :  { %2155 = vmatprep.subr.bf16.mxu1 %v2154_v56  ;;  %v611_v56 = vrot.slane %v2673_v53, %v610_v54 }
 0x179   :  { %v607_v38 = vrot.slane %v2673_v53, %v606_v52 }
 0x17a   :  { %v737_v58 = vadd.f32 %v2669_v49, %v611_v56  ;;  %v1541_v49 = vld [vmem:[%s2796_s5 + $0x88] sm:$0xff] }
 0x17b   :  { %2157 = vmatpush1.bf16.msra.mxu1 %v2156_v63  ;;  %v735_v57 = vadd.f32 %v2667_v45, %v607_v38  ;;  %v1306_v63 = vld [vmem:[#allocation6 + $0x210] sm:$0xff]  ;;  %v1540_v45 = vld [vmem:[%s2796_s5 + $0x80] sm:$0xff]  ;;  %v1325_v56 = vld [vmem:[#allocation6 + $0x2a8] sm:$0xff] }
 0x17c   :  { %2159 = vmatprep.subr.bf16.mxu1 %v2158_v0  ;;  %v2256_v4 = vpack.c.bf16 %v1306_v63, %v1304_v62  ;;  %v2318_v12 = vpack.c.bf16 %v1541_v49, %v1540_v45  ;;  %v1322_v38 = vld [vmem:[#allocation6 + $0x290] sm:$0xff]  ;;  %v1552_v45 = vld [vmem:[%s2796_s5 + $0xe0] sm:$0xff]  ;;  %v1553_v49 = vld [vmem:[%s2796_s5 + $0xe8] sm:$0xff] }
 0x17d   :  { %v1550_v63 = vld [vmem:[%s2796_s5 + $0xd0] sm:$0xff] }
 0x17f   :  { %2161 = vmatpush1.bf16.msra.mxu1 %v2160_v7  ;;  %v1310_v7 = vld [vmem:[#allocation6 + $0x230] sm:$0xff] }
 0x180   :  { %2163 = vmatprep.subr.bf16.mxu1 %v2162_v8  ;;  %v1313_v8 = vld [vmem:[#allocation6 + $0x248] sm:$0xff]  ;;  %v2260_v25 = vpack.c.bf16 %v1310_v7, %v1308_v33  ;;  %v1331_v33 = vld [vmem:[#allocation6 + $0x2d8] sm:$0xff] }
 0x181   :  { %v2262_v21 = vpack.c.bf16 %v1315_v9, %v1313_v8  ;;  %v1534_v7 = vld [vmem:[%s2796_s5 + $0x50] sm:$0xff]  ;;  %v1535_v8 = vld [vmem:[%s2796_s5 + $0x58] sm:$0xff] }
 0x183   :  { %2165 = vmatpush1.bf16.msra.mxu1 %v2164_v14  ;;  %v1542_v14 = vld [vmem:[%s2796_s5 + $0x90] sm:$0xff] }
 0x184   :  { %2167 = vmatprep.subr.bf16.mxu1 %v2166_v15  ;;  %v1543_v15 = vld [vmem:[%s2796_s5 + $0x98] sm:$0xff] }
 0x185   :  { %v2322_v17 = vpack.c.bf16 %v1543_v15, %v1542_v14  ;;  %v1333_v14 = vld [vmem:[#allocation6 + $0x2e8] sm:$0xff]  ;;  %v1335_v15 = vld [vmem:[#allocation6 + $0x2f8] sm:$0xff] }
 0x187   :  { %2169 = vmatpush1.bf16.msra.mxu1 %v2168_v19  ;;  %v1527_v19 = vld [vmem:[%s2796_s5 + $0x18] sm:$0xff] }
 0x188   :  { %2171 = vmatprep.subr.bf16.mxu1 %v2170_v20  ;;  %v1544_v20 = vld [vmem:[%s2796_s5 + $0xa0] sm:$0xff]  ;;  %v2324_v26 = vpack.c.bf16 %v1527_v19, %v1526_v18  ;;  %v2282_v18 = vpack.c.bf16 %v1335_v15, %v1333_v14 }
 0x189   :  { %v2326_v11 = vpack.c.bf16 %v1545_v23, %v1544_v20  ;;  %v1332_v19 = vld [vmem:[#allocation6 + $0x2e0] sm:$0xff]  ;;  %v1334_v20 = vld [vmem:[#allocation6 + $0x2f0] sm:$0xff] }
 0x18b   :  { %2173 = vmatpush1.bf16.msra.mxu1 %v2172_v44  ;;  %v1317_v44 = vld [vmem:[#allocation6 + $0x268] sm:$0xff] }
 0x18c   :  { %2175 = vmatprep.subr.bf16.mxu1 %v2174_v24  ;;  %v1319_v24 = vld [vmem:[#allocation6 + $0x278] sm:$0xff] }
 0x18d   :  { %v2266_v31 = vpack.c.bf16 %v1319_v24, %v1317_v44  ;;  %v1336_v44 = vld [vmem:[#allocation6 + $0x300] sm:$0xff]  ;;  %v1338_v24 = vld [vmem:[#allocation6 + $0x310] sm:$0xff] }
 0x18e   :  { %v2288_v27 = vpack.c.bf16 %v1338_v24, %v1336_v44  ;;  %v1538_v44 = vld [vmem:[%s2796_s5 + $0x70] sm:$0xff]  ;;  %v1539_v24 = vld [vmem:[%s2796_s5 + $0x78] sm:$0xff] }
 0x18f   :  { %2177 = vmatpush1.bf16.msra.mxu1 %v2176_v29  ;;  %v2264_v29 = vpack.c.bf16 %v1314_v34, %v1312_v22  ;;  %v1339_v22 = vld [vmem:[#allocation6 + $0x318] sm:$0xff]  ;;  %v2284_v34 = vpack.c.bf16 %v1334_v20, %v1332_v19 }
 0x190   :  { %2179 = vmatprep.subr.bf16.mxu1 %v2178_v30  ;;  %v1546_v30 = vld [vmem:[%s2796_s5 + $0xb0] sm:$0xff]  ;;  %v1536_v20 = vld [vmem:[%s2796_s5 + $0x60] sm:$0xff] }
 0x191   :  { %v2330_v39 = vpack.c.bf16 %v1547_v41, %v1546_v30  ;;  %v1342_v30 = vld [vmem:[#allocation6 + $0x330] sm:$0xff]  ;;  %v1345_v41 = vld [vmem:[#allocation6 + $0x348] sm:$0xff] }
 0x193   :  { %2181 = vmatpush1.bf16.msra.mxu1 %v2180_v48  ;;  %v1321_v48 = vld [vmem:[#allocation6 + $0x288] sm:$0xff] }
 0x194   :  { %2183 = vmatprep.subr.bf16.mxu1 %v2182_v36  ;;  %v1323_v36 = vld [vmem:[#allocation6 + $0x298] sm:$0xff] }
 0x195   :  { %v2270_v50 = vpack.c.bf16 %v1323_v36, %v1321_v48  ;;  %v1344_v48 = vld [vmem:[#allocation6 + $0x340] sm:$0xff]  ;;  %v1346_v36 = vld [vmem:[#allocation6 + $0x350] sm:$0xff] }
 0x197   :  { %2185 = vmatpush1.bf16.msra.mxu1 %v2184_v43  ;;  %v2268_v43 = vpack.c.bf16 %v1318_v35, %v1316_v32 }
 0x198   :  { %2187 = vmatprep.subr.bf16.mxu1 %v2186_v46  ;;  %v1548_v46 = vld [vmem:[%s2796_s5 + $0xc0] sm:$0xff] }
 0x19b   :  { %2189 = vmatpush1.bf16.msra.mxu1 %v2188_v51  ;;  %v1320_v51 = vld [vmem:[#allocation6 + $0x280] sm:$0xff] }
 0x19c   :  { %2319 = vmatprep.subr.bf16.mxu1 %v2318_v12  ;;  %v2272_v62 = vpack.c.bf16 %v1322_v38, %v1320_v51  ;;  %v1328_v12 = vld [vmem:[#allocation6 + $0x2c0] sm:$0xff] }
 0x19e   :  { %1230 = vmatmul.mubr.f32.vlgmr.msra.gmra.mrb[2].mxu1 %v2652_v55 }
 0x19f   :  { %2321 = vmatpush3.bf16.msra.mxu1 %v2320_v16  ;;  %v2342_v16 = vpack.c.bf16 %v1553_v49, %v1552_v45  ;;  %v1366_v45 = vld [vmem:[#allocation6 + $0x3f0] sm:$0xff] }
 0x1a0   :  { %2323 = vmatprep.subr.bf16.mxu1 %v2322_v17  ;;  %v2280_v17 = vpack.c.bf16 %v1330_v13, %v1328_v12  ;;  %v618_v12 = vsub.s32 3, %v2608_v61 }
 0x1a2   :  { %v619_v14 = vrot.slane %v2673_v53, %v618_v12 }
 0x1a3   :  { %2325 = vmatpush3.bf16.msra.mxu1 %v2324_v26  ;;  %v1341_v26 = vld [vmem:[#allocation6 + $0x328] sm:$0xff] }
 0x1a4   :  { %2327 = vmatprep.subr.bf16.mxu1 %v2326_v11  ;;  %v1343_v11 = vld [vmem:[#allocation6 + $0x338] sm:$0xff] }
 0x1a5   :  { %v2290_v28 = vpack.c.bf16 %v1343_v11, %v1341_v26  ;;  %v2348_v26 = vpack.c.bf16 %v1539_v24, %v1538_v44  ;;  %v1368_v11 = vld [vmem:[#allocation7] sm:$0x3] }
 0x1a7   :  { %2329 = vmatpush3.bf16.msra.mxu1 %v2328_v37  ;;  %v1349_v37 = vld [vmem:[#allocation6 + $0x368] sm:$0xff] }
 0x1a8   :  { %2331 = vmatprep.subr.bf16.mxu1 %v2330_v39  ;;  %v1351_v39 = vld [vmem:[#allocation6 + $0x378] sm:$0xff] }
 0x1f3   :  { %v947_v59 = vpop.f32.mrb[0].mxu0 }
 0x1f4   :  { %v2351_v55 = vadd.f32 %v947_v59, %v735_v57  ;;  %v949_v60 = vpop.f32.mrb[1].mxu0  ;;  %v1327_v57 = vld [vmem:[#allocation6 + $0x2b8] sm:$0xff]  ;;  %v2334_v59 = vpack.c.bf16 %v1549_v47, %v1548_v46  ;;  %v1350_v46 = vld [vmem:[#allocation6 + $0x370] sm:$0xff]  ;;  %v1353_v47 = vld [vmem:[#allocation6 + $0x388] sm:$0xff] }
 0x1f5   :  { %v2353_v0 = vadd.f32 %v949_v60, %v737_v58  ;;  %v2332_v58 = vpack.c.bf16 %v1531_v42, %v1530_v40  ;;  %v1533_v60 = vld [vmem:[%s2796_s5 + $0x48] sm:$0xff]  ;;  %v2274_v1 = vpack.c.bf16 %v1327_v57, %v1325_v56  ;;  %v2296_v40 = vpack.c.bf16 %v1346_v36, %v1344_v48  ;;  %v1354_v57 = vld [vmem:[#allocation6 + $0x390] sm:$0xff]  ;;  %v1642_v36 = vld [vmem:[#allocation9] ss:$0 sm:$0xff] }
 0x1f6   :  { %v1236_v5 = vmax.f32 %v2351_v55, 0.0  ;;  %v1532_v55 = vld [vmem:[%s2796_s5 + $0x40] sm:$0xff]  ;;  %v2298_v42 = vpack.c.bf16 %v1351_v39, %v1349_v37 }
 0x1f7   :  { %v1237_v3 = vmax.f32 %v2353_v0, 0.0  ;;  %v1551_v0 = vld [vmem:[%s2796_s5 + $0xd8] sm:$0xff]  ;;  %2333 = vmatpush3.bf16.msra.mxu1 %v2332_v58  ;;  %v1352_v56 = vld [vmem:[#allocation6 + $0x380] sm:$0xff]  ;;  %v1357_v58 = vld [vmem:[#allocation6 + $0x3a8] sm:$0xff] }
 0x1f8   :  { %2335 = vmatprep.subr.bf16.mxu1 %v2334_v59  ;;  %v1359_v59 = vld [vmem:[#allocation6 + $0x3b8] sm:$0xff] }
 0x1f9   :  { %1444 = vmatprep.mubr.f32.mxu0 %v1237_v3  ;;  %v1326_v3 = vld [vmem:[#allocation6 + $0x2b0] sm:$0xff] }
 0x1fa   :  { %1445 = vmatmul.mubr.f32.vlgmr.msra.gmra.mrb[2].mxu0 %v1236_v5  ;;  %v2336_v5 = vpack.c.bf16 %v1533_v60, %v1532_v55  ;;  %v2276_v9 = vpack.c.bf16 %v1326_v3, %v1324_v2  ;;  %v2304_v55 = vpack.c.bf16 %v1354_v57, %v1352_v56  ;;  %v2306_v60 = vpack.c.bf16 %v1359_v59, %v1357_v58 }
 0x1fb   :  { %2257 = vmatpush1.bf16.msra.mxu0 %v2256_v4  ;;  %v1329_v4 = vld [vmem:[#allocation6 + $0x2c8] sm:$0xff] }
 0x1fc   :  { %2259 = vmatprep.subr.bf16.mxu0 %v2258_v6  ;;  %v2338_v6 = vpack.c.bf16 %v1551_v0, %v1550_v63  ;;  %v2278_v10 = vpack.c.bf16 %v1331_v33, %v1329_v4  ;;  %2337 = vmatpush3.bf16.msra.mxu1 %v2336_v5  ;;  %v1358_v63 = vld [vmem:[#allocation6 + $0x3b0] sm:$0xff]  ;;  %v1361_v0 = vld [vmem:[#allocation6 + $0x3c8] sm:$0xff]  ;;  %v1360_v4 = vld [vmem:[#allocation6 + $0x3c0] sm:$0xff] }
 0x1fd   :  { %v1362_v33 = vld [vmem:[#allocation6 + $0x3d0] sm:$0xff]  ;;  %v1365_v5 = vld [vmem:[#allocation6 + $0x3e8] sm:$0xff] }
 0x1fe   :  { %2339 = vmatprep.subr.bf16.mxu1 %v2338_v6  ;;  %v1367_v6 = vld [vmem:[#allocation6 + $0x3f8] sm:$0xff] }
 0x1ff   :  { %2261 = vmatpush1.bf16.msra.mxu0 %v2260_v25  ;;  %v2340_v25 = vpack.c.bf16 %v1535_v8, %v1534_v7  ;;  %v2312_v7 = vpack.c.bf16 %v1362_v33, %v1360_v4  ;;  %v2314_v8 = vpack.c.bf16 %v1367_v6, %v1365_v5 }
 0x200   :  { %2263 = vmatprep.subr.bf16.mxu0 %v2262_v21  ;;  %v1337_v21 = vld [vmem:[#allocation6 + $0x308] sm:$0xff] }
 0x201   :  { %2341 = vmatpush3.bf16.msra.mxu1 %v2340_v25  ;;  %v2286_v23 = vpack.c.bf16 %v1339_v22, %v1337_v21  ;;  %v1537_v21 = vld [vmem:[%s2796_s5 + $0x68] sm:$0xff] }
 0x202   :  { %2343 = vmatprep.subr.bf16.mxu1 %v2342_v16  ;;  %v2344_v22 = vpack.c.bf16 %v1537_v21, %v1536_v20 }
 0x203   :  { %2265 = vmatpush1.bf16.msra.mxu0 %v2264_v29  ;;  %v1340_v29 = vld [vmem:[#allocation6 + $0x320] sm:$0xff] }
 0x204   :  { %2267 = vmatprep.subr.bf16.mxu0 %v2266_v31  ;;  %v1347_v31 = vld [vmem:[#allocation6 + $0x358] sm:$0xff]  ;;  %v2292_v32 = vpack.c.bf16 %v1342_v30, %v1340_v29 }
 0x205   :  { %v2294_v35 = vpack.c.bf16 %v1347_v31, %v1345_v41  ;;  %2345 = vmatpush3.bf16.msra.mxu1 %v2344_v22 }
 0x207   :  { %2269 = vmatpush1.bf16.msra.mxu0 %v2268_v43  ;;  %v1348_v43 = vld [vmem:[#allocation6 + $0x360] sm:$0xff] }
 0x208   :  { %2271 = vmatprep.subr.bf16.mxu0 %v2270_v50  ;;  %v1355_v50 = vld [vmem:[#allocation6 + $0x398] sm:$0xff]  ;;  %v2300_v51 = vpack.c.bf16 %v1350_v46, %v1348_v43 }
 0x209   :  { %v2302_v38 = vpack.c.bf16 %v1355_v50, %v1353_v47 }
 0x20b   :  { %2273 = vmatpush1.bf16.msra.mxu0 %v2272_v62  ;;  %v1356_v62 = vld [vmem:[#allocation6 + $0x3a0] sm:$0xff] }
 0x20c   :  { %2275 = vmatprep.subr.bf16.mxu0 %v2274_v1  ;;  %v1363_v1 = vld [vmem:[#allocation6 + $0x3d8] sm:$0xff]  ;;  %v2308_v2 = vpack.c.bf16 %v1358_v63, %v1356_v62 }
 0x20d   :  { %v2310_v3 = vpack.c.bf16 %v1363_v1, %v1361_v0 }
 0x20f   :  { %2277 = vmatpush1.bf16.msra.mxu0 %v2276_v9  ;;  %v1364_v9 = vld [vmem:[#allocation6 + $0x3e0] sm:$0xff] }
 0x210   :  { %2279 = vmatprep.subr.bf16.mxu0 %v2278_v10  ;;  %v2316_v49 = vpack.c.bf16 %v1366_v45, %v1364_v9  ;;  %v614_v10 = vsub.s32 2, %v2608_v61 }
 0x212   :  { %v615_v13 = vrot.slane %v2673_v53, %v614_v10  ;;  %v1554_v53 = vld [vmem:[%s2796_s5 + $0xf0] sm:$0xff] }
 0x213   :  { %2281 = vmatpush1.bf16.msra.mxu0 %v2280_v17 }
 0x214   :  { %2283 = vmatprep.subr.bf16.mxu0 %v2282_v18 }
 0x217   :  { %2285 = vmatpush1.bf16.msra.mxu0 %v2284_v34  ;;  %v1555_v34 = vld [vmem:[%s2796_s5 + $0xf8] sm:$0xff] }
 0x218   :  { %2287 = vmatprep.subr.bf16.mxu0 %v2286_v23  ;;  %v2346_v23 = vpack.c.bf16 %v1555_v34, %v1554_v53 }
 0x21a   :  { %2347 = vmatprep.subr.bf16.mxu1 %v2346_v23 }
 0x21b   :  { %2289 = vmatpush1.bf16.msra.mxu0 %v2288_v27  ;;  %2349 = vmatpush3.bf16.msra.mxu1 %v2348_v26  ;;  %v1373_v27 = vrot.slane %v1368_v11, %v606_v52 }
 0x21c   :  { %2291 = vmatprep.subr.bf16.mxu0 %v2290_v28  ;;  %v1377_v28 = vrot.slane %v1368_v11, %v610_v54 }
 0x21f   :  { %2293 = vmatpush1.bf16.msra.mxu0 %v2292_v32 }
 0x220   :  { %2295 = vmatprep.subr.bf16.mxu0 %v2294_v35 }
 0x223   :  { %2297 = vmatpush1.bf16.msra.mxu0 %v2296_v40 }
 0x224   :  { %2299 = vmatprep.subr.bf16.mxu0 %v2298_v42 }
 0x227   :  { %2301 = vmatpush1.bf16.msra.mxu0 %v2300_v51 }
 0x228   :  { %2303 = vmatprep.subr.bf16.mxu0 %v2302_v38 }
 0x22b   :  { %2305 = vmatpush1.bf16.msra.mxu0 %v2304_v55 }
 0x22c   :  { %2307 = vmatprep.subr.bf16.mxu0 %v2306_v60 }
 0x22f   :  { %2309 = vmatpush1.bf16.msra.mxu0 %v2308_v2 }
 0x230   :  { %2311 = vmatprep.subr.bf16.mxu0 %v2310_v3 }
 0x233   :  { %2313 = vmatpush1.bf16.msra.mxu0 %v2312_v7 }
 0x234   :  { %2315 = vmatprep.subr.bf16.mxu0 %v2314_v8 }
 0x237   :  { %2317 = vmatpush1.bf16.msra.mxu0 %v2316_v49 }
 0x271   :  { %v1231_v15 = vpop.f32.mrb[2].mxu1 }
 0x272   :  { %v2354_v25 = vadd.f32 %v1231_v15, %v615_v13  ;;  %v1233_v16 = vpop.f32.mrb[3].mxu1 }
 0x273   :  { %v2355_v17 = vadd.f32 %v1233_v16, %v619_v14 }
 0x274   :  { %v1238_v19 = vmax.f32 %v2354_v25, 0.0 }
 0x275   :  { %v1239_v18 = vmax.f32 %v2355_v17, 0.0 }
 0x277   :  { %1515 = vmatprep.mubr.f32.mxu0 %v1239_v18 }
 0x278   :  { %1516 = vmatmul.mubr.f32.vlgmr.msra.gmra.mrb[2].mxu0 %v1238_v19 }
 0x34b   :  { %v1517_v29 = vpop.f32.mrb[2].mxu0 }
 0x34c   :  { %v2356_v30 = vadd.f32 %v1517_v29, %v1373_v27  ;;  %v1519_v41 = vpop.f32.mrb[3].mxu0 }
 0x34d   :  { %v2357_v31 = vadd.f32 %v1519_v41, %v1377_v28 }
 0x34e   :  { %v1522_v35 = vmax.f32 %v2356_v30, 0.0 }
 0x34f   :  { %v1523_v32 = vmax.f32 %v2357_v31, 0.0 }
 0x351   :  { %1627 = vmatprep.mubr.f32.mxu1 %v1523_v32 }
 0x352   :  { %1628 = vmatmul.mubr.f32.vlgmr.msra.gmra.mrb[4].mxu1 %v1522_v35 }
 0x425   :  { %v1675_v48 = vpop.f32.mrb[4].mxu1 }
 0x426   :  { %v1676_v37 = vpop.f32.mrb[5].mxu1 }
 0x427   :  { %v1677_v39 = vadd.f32 %v1676_v37, %v1675_v48 }
 0x429   :  { %v1630_v40 = vadd.f32 %v1677_v39, %v1642_v36 }
 0x42b   :  { %1634 = vst.msk [vmem:[%s2798_s7] sm:$0x3] %vm1633_vm0, %v1630_v40 }
 0x42c   :  { %1639 = vsyncpa [#allocation3], 1 }
 0x42d   :  { %1640 = vsyncpa [#allocation5], 1 }
 0x42e   :  { %1641 = vsyncpa [#allocation8], 1 }

// kernel: pointnet_autoencoder_forward.9
= control target key start
LH: loop header
LB: loop body
LE: loop exit
PB: predicated region body
PF: predicated region fallthrough
CT: control target
= control target key end

     0   :  { %v2904_v3 = vmov 0.0   ;;  %vm114_vm0 = vcmask 850944   ;;  %vm1414_vm1 = vcmask 1024   ;;  %vm1998_vm2 = vcmask 1041408   ;;  %s5548_s3 = inlined_call_operand.vmem [shape: f32[104,512], index: 3, kind: input, shape index: {}]   ;;  %s5549_s5 = inlined_call_operand.vmem [shape: f32[512,1024], index: 5, kind: input, shape index: {}]   ;;  %s5550_s0 = inlined_call_operand.vmem [shape: f32[4,104], index: 0, kind: input, shape index: {}]   ;;  %s5551_s4 = inlined_call_operand.vmem [shape: f32[1,512], index: 4, kind: input, shape index: {}]   ;;  %s5552_s7 = inlined_call_operand.vmem [shape: f32[1024,192], index: 7, kind: input, shape index: {}]   ;;  %s5553_s6 = inlined_call_operand.vmem [shape: f32[1,1024], index: 6, kind: input, shape index: {}]   ;;  %s5554_s2 = inlined_call_operand.<no memory space> [shape: f32[1,1], index: 2, kind: input, shape index: {}]   ;;  %s5555_s10 = inlined_call_operand.vmem [shape: f32[2,1], index: 10, kind: output, shape index: {1}]   ;;  %s5556_s8 = inlined_call_operand.vmem [shape: f32[1,192], index: 8, kind: input, shape index: {}]   ;;  %s5557_s1 = inlined_call_operand.vmem [shape: f32[2,192], index: 1, kind: input, shape index: {}]   ;;  %s5558_s9 = inlined_call_operand.vmem [shape: f32[2,192], index: 9, kind: output, shape index: {0}]  }
   0x1   :  { %v41_v0 = vld [vmem:[%s5548_s3 + $0x8] sm:$0xff]  ;;  %v40_v2 = vld [vmem:[%s5548_s3] sm:$0xff]  ;;  %182 = vmatprep.mubr.f32.mxu0 %v2904_v3  ;;  %253 = vmatprep.mubr.f32.mxu1 %v2904_v3  ;;  %v43_v26 = vld [vmem:[%s5548_s3 + $0x18] sm:$0xff]  ;;  %s2006_s15 = ssub.f32 0.0, %s5554_s2  ;;  %1415 = vst.msk [vmem:[%s5555_s10] sm:$0x3] %vm1414_vm1, %v2904_v3 }
   0x2   :  { %v45_v1 = vld [vmem:[%s5548_s3 + $0x28] sm:$0xff]  ;;  %v44_v5 = vld [vmem:[%s5548_s3 + $0x20] sm:$0xff]  ;;  %v47_v27 = vld [vmem:[%s5548_s3 + $0x38] sm:$0xff]  ;;  %vm1999_vm3 = vcmask 519170   ;;  %vm2031_vm5 = vcmask 517120  }
   0x3   :  { %v2054_v4 = vpack.c.bf16 %v45_v1, %v41_v0  ;;  %v49_v6 = vld [vmem:[%s5548_s3 + $0x48] sm:$0xff]  ;;  %v2056_v8 = vpack.c.bf16 %v44_v5, %v40_v2  ;;  %v48_v10 = vld [vmem:[%s5548_s3 + $0x40] sm:$0xff]  ;;  %v42_v28 = vld [vmem:[%s5548_s3 + $0x10] sm:$0xff]  ;;  %v2078_v29 = vpack.c.bf16 %v47_v27, %v43_v26  ;;  %s2049_s20 = sadd.f32 -0.9189385, %s2006_s15 }
   0x4   :  { %v53_v7 = vld [vmem:[%s5548_s3 + $0x68] sm:$0xff]  ;;  %v52_v11 = vld [vmem:[%s5548_s3 + $0x60] sm:$0xff]  ;;  %v46_v30 = vld [vmem:[%s5548_s3 + $0x30] sm:$0xff] }
   0x5   :  { %v2058_v9 = vpack.c.bf16 %v53_v7, %v49_v6  ;;  %v57_v12 = vld [vmem:[%s5548_s3 + $0x88] sm:$0xff]  ;;  %2055 = vmatprep.subr.bf16.mxu0 %v2054_v4  ;;  %v2060_v14 = vpack.c.bf16 %v52_v11, %v48_v10  ;;  %v56_v16 = vld [vmem:[%s5548_s3 + $0x80] sm:$0xff]  ;;  %v51_v31 = vld [vmem:[%s5548_s3 + $0x58] sm:$0xff]  ;;  %v2080_v33 = vpack.c.bf16 %v46_v30, %v42_v28  ;;  %2079 = vmatprep.subr.bf16.mxu1 %v2078_v29 }
   0x6   :  { %v61_v13 = vld [vmem:[%s5548_s3 + $0xa8] sm:$0xff]  ;;  %2057 = vmatpush1.bf16.msra.mxu0 %v2056_v8  ;;  %v60_v17 = vld [vmem:[%s5548_s3 + $0xa0] sm:$0xff]  ;;  %v55_v32 = vld [vmem:[%s5548_s3 + $0x78] sm:$0xff] }
   0x7   :  { %2059 = vmatprep.subr.bf16.mxu0 %v2058_v9  ;;  %v2062_v15 = vpack.c.bf16 %v61_v13, %v57_v12  ;;  %v65_v18 = vld [vmem:[%s5548_s3 + $0xc8] sm:$0xff]  ;;  %v64_v20 = vld [vmem:[%s5548_s3 + $0xc0] sm:$0xff]  ;;  %v2064_v21 = vpack.c.bf16 %v60_v17, %v56_v16  ;;  %v2082_v34 = vpack.c.bf16 %v55_v32, %v51_v31  ;;  %v50_v35 = vld [vmem:[%s5548_s3 + $0x50] sm:$0xff]  ;;  %2081 = vmatpush1.bf16.msra.mxu1 %v2080_v33 }
   0x8   :  { %v69_v19 = vld [vmem:[%s5548_s3 + $0xe8] sm:$0xff]  ;;  %v68_v22 = vld [vmem:[%s5548_s3 + $0xe0] sm:$0xff]  ;;  %v54_v36 = vld [vmem:[%s5548_s3 + $0x70] sm:$0xff] }
   0x9   :  { %v73_v23 = vld [vmem:[%s5548_s3 + $0x108] sm:$0xff]  ;;  %v2066_v25 = vpack.c.bf16 %v69_v19, %v65_v18  ;;  %v59_v37 = vld [vmem:[%s5548_s3 + $0x98] sm:$0xff]  ;;  %v2068_v38 = vpack.c.bf16 %v68_v22, %v64_v20  ;;  %v72_v41 = vld [vmem:[%s5548_s3 + $0x100] sm:$0xff]  ;;  %v2084_v44 = vpack.c.bf16 %v54_v36, %v50_v35  ;;  %2083 = vmatprep.subr.bf16.mxu1 %v2082_v34 }
   0xa   :  { %2061 = vmatpush1.bf16.msra.mxu0 %v2060_v14  ;;  %v77_v24 = vld [vmem:[%s5548_s3 + $0x128] sm:$0xff]  ;;  %v63_v39 = vld [vmem:[%s5548_s3 + $0xb8] sm:$0xff]  ;;  %v76_v42 = vld [vmem:[%s5548_s3 + $0x120] sm:$0xff] }
   0xb   :  { %2063 = vmatprep.subr.bf16.mxu0 %v2062_v15  ;;  %v2070_v40 = vpack.c.bf16 %v77_v24, %v73_v23  ;;  %v81_v43 = vld [vmem:[%s5548_s3 + $0x148] sm:$0xff]  ;;  %v2086_v46 = vpack.c.bf16 %v63_v39, %v59_v37  ;;  %v58_v47 = vld [vmem:[%s5548_s3 + $0x90] sm:$0xff]  ;;  %v67_v49 = vld [vmem:[%s5548_s3 + $0xd8] sm:$0xff]  ;;  %v2072_v51 = vpack.c.bf16 %v76_v42, %v72_v41  ;;  %2085 = vmatpush1.bf16.msra.mxu1 %v2084_v44 }
   0xc   :  { %v85_v45 = vld [vmem:[%s5548_s3 + $0x168] sm:$0xff]  ;;  %v62_v48 = vld [vmem:[%s5548_s3 + $0xb0] sm:$0xff]  ;;  %v71_v50 = vld [vmem:[%s5548_s3 + $0xf8] sm:$0xff] }
   0xd   :  { %v2074_v52 = vpack.c.bf16 %v85_v45, %v81_v43  ;;  %v80_v53 = vld [vmem:[%s5548_s3 + $0x140] sm:$0xff]  ;;  %v2088_v55 = vpack.c.bf16 %v62_v48, %v58_v47  ;;  %2087 = vmatprep.subr.bf16.mxu1 %v2086_v46  ;;  %v2090_v56 = vpack.c.bf16 %v71_v50, %v67_v49  ;;  %v66_v57 = vld [vmem:[%s5548_s3 + $0xd0] sm:$0xff]  ;;  %v75_v59 = vld [vmem:[%s5548_s3 + $0x118] sm:$0xff] }
   0xe   :  { %2065 = vmatpush1.bf16.msra.mxu0 %v2064_v21  ;;  %v84_v54 = vld [vmem:[%s5548_s3 + $0x160] sm:$0xff]  ;;  %v70_v58 = vld [vmem:[%s5548_s3 + $0xf0] sm:$0xff]  ;;  %v79_v60 = vld [vmem:[%s5548_s3 + $0x138] sm:$0xff] }
   0xf   :  { %2067 = vmatprep.subr.bf16.mxu0 %v2066_v25  ;;  %v2076_v61 = vpack.c.bf16 %v84_v54, %v80_v53  ;;  %v89_v62 = vld [vmem:[%s5548_s3 + $0x188] sm:$0xff]  ;;  %2089 = vmatpush1.bf16.msra.mxu1 %v2088_v55  ;;  %v2092_v63 = vpack.c.bf16 %v70_v58, %v66_v57  ;;  %v2094_v0 = vpack.c.bf16 %v79_v60, %v75_v59  ;;  %v74_v1 = vld [vmem:[%s5548_s3 + $0x110] sm:$0xff]  ;;  %v83_v4 = vld [vmem:[%s5548_s3 + $0x158] sm:$0xff] }
  0x10   :  { %2091 = vmatprep.subr.bf16.mxu1 %v2090_v56  ;;  %v78_v2 = vld [vmem:[%s5548_s3 + $0x130] sm:$0xff]  ;;  %v87_v5 = vld [vmem:[%s5548_s3 + $0x178] sm:$0xff]  ;;  %v269_v6 = vld [vmem:[%s5549_s5 + $0x28] sm:$0xff] }
  0x11   :  { %v277_v7 = vld [vmem:[%s5549_s5 + $0x68] sm:$0xff]  ;;  %v268_v8 = vld [vmem:[%s5549_s5 + $0x20] sm:$0xff]  ;;  %v2096_v11 = vpack.c.bf16 %v78_v2, %v74_v1  ;;  %v2098_v15 = vpack.c.bf16 %v87_v5, %v83_v4  ;;  %v82_v16 = vld [vmem:[%s5548_s3 + $0x150] sm:$0xff] }
  0x12   :  { %2069 = vmatpush1.bf16.msra.mxu0 %v2068_v38  ;;  %v276_v9 = vld [vmem:[%s5549_s5 + $0x60] sm:$0xff]  ;;  %v285_v12 = vld [vmem:[%s5549_s5 + $0xa8] sm:$0xff]  ;;  %v86_v17 = vld [vmem:[%s5548_s3 + $0x170] sm:$0xff]  ;;  %v2358_v18 = vpack.c.bf16 %v277_v7, %v269_v6 }
  0x13   :  { %2071 = vmatprep.subr.bf16.mxu0 %v2070_v40  ;;  %v88_v10 = vld [vmem:[%s5548_s3 + $0x180] sm:$0xff]  ;;  %2093 = vmatpush1.bf16.msra.mxu1 %v2092_v63  ;;  %v293_v13 = vld [vmem:[%s5549_s5 + $0xe8] sm:$0xff]  ;;  %v2360_v19 = vpack.c.bf16 %v276_v9, %v268_v8  ;;  %v2100_v23 = vpack.c.bf16 %v86_v17, %v82_v16  ;;  %v91_v26 = vld [vmem:[%s5548_s3 + $0x198] sm:$0xff] }
  0x14   :  { %v39_v14 = vld [vmem:[%s5550_s0] sm:$0xf]  ;;  %2095 = vmatprep.subr.bf16.mxu1 %v2094_v0  ;;  %v2362_v20 = vpack.c.bf16 %v293_v13, %v285_v12  ;;  %v301_v24 = vld [vmem:[%s5549_s5 + $0x128] sm:$0xff]  ;;  %v90_v39 = vld [vmem:[%s5548_s3 + $0x190] sm:$0xff] }
  0x15   :  { %v284_v21 = vld [vmem:[%s5549_s5 + $0xa0] sm:$0xff]  ;;  %v309_v25 = vld [vmem:[%s5549_s5 + $0x168] sm:$0xff]  ;;  %vm2000_vm4 = vmor %vm1999_vm3, %vm1998_vm2 }
  0x16   :  { %2073 = vmatpush1.bf16.msra.mxu0 %v2072_v51  ;;  %v292_v22 = vld [vmem:[%s5549_s5 + $0xe0] sm:$0xff]  ;;  %v265_v27 = vld [vmem:[%s5549_s5 + $0x8] sm:$0xff]  ;;  %v2366_v33 = vpack.c.bf16 %v309_v25, %v301_v24 }
  0x17   :  { %2075 = vmatprep.subr.bf16.mxu0 %v2074_v52  ;;  %2097 = vmatpush1.bf16.msra.mxu1 %v2096_v11  ;;  %v273_v28 = vld [vmem:[%s5549_s5 + $0x48] sm:$0xff]  ;;  %v264_v29 = vld [vmem:[%s5549_s5] sm:$0xff]  ;;  %v2364_v31 = vpack.c.bf16 %v292_v22, %v284_v21 }
  0x18   :  { %2099 = vmatprep.subr.bf16.mxu1 %v2098_v15  ;;  %v272_v30 = vld [vmem:[%s5549_s5 + $0x40] sm:$0xff]  ;;  %v281_v32 = vld [vmem:[%s5549_s5 + $0x88] sm:$0xff]  ;;  %v2102_v40 = vpack.c.bf16 %v273_v28, %v265_v27 }
  0x19   :  { %v300_v34 = vld [vmem:[%s5549_s5 + $0x120] sm:$0xff]  ;;  %v289_v36 = vld [vmem:[%s5549_s5 + $0xc8] sm:$0xff]  ;;  %v2104_v41 = vpack.c.bf16 %v272_v30, %v264_v29 }
  0x1a   :  { %2077 = vmatpush1.bf16.msra.mxu0 %v2076_v61  ;;  %v308_v35 = vld [vmem:[%s5549_s5 + $0x160] sm:$0xff]  ;;  %v317_v37 = vld [vmem:[%s5549_s5 + $0x1a8] sm:$0xff]  ;;  %v2106_v45 = vpack.c.bf16 %v289_v36, %v281_v32 }
  0x1b   :  { %142 = vmatprep.subr.mxu0 %v89_v62  ;;  %2101 = vmatpush1.bf16.msra.mxu1 %v2100_v23  ;;  %v325_v38 = vld [vmem:[%s5549_s5 + $0x1e8] sm:$0xff]  ;;  %v280_v42 = vld [vmem:[%s5549_s5 + $0x80] sm:$0xff]  ;;  %v2368_v44 = vpack.c.bf16 %v308_v35, %v300_v34 }
  0x1c   :  { %213 = vmatprep.subr.mxu1 %v91_v26  ;;  %v288_v43 = vld [vmem:[%s5549_s5 + $0xc0] sm:$0xff]  ;;  %v297_v46 = vld [vmem:[%s5549_s5 + $0x108] sm:$0xff]  ;;  %v2370_v47 = vpack.c.bf16 %v325_v38, %v317_v37 }
  0x1d   :  { %v316_v48 = vld [vmem:[%s5549_s5 + $0x1a0] sm:$0xff]  ;;  %v305_v50 = vld [vmem:[%s5549_s5 + $0x148] sm:$0xff]  ;;  %v2108_v53 = vpack.c.bf16 %v288_v43, %v280_v42 }
  0x1e   :  { %143 = vmatpush1.msra.mxu0 %v88_v10  ;;  %v324_v49 = vld [vmem:[%s5549_s5 + $0x1e0] sm:$0xff]  ;;  %v333_v51 = vld [vmem:[%s5549_s5 + $0x228] sm:$0xff]  ;;  %v2110_v57 = vpack.c.bf16 %v305_v50, %v297_v46 }
  0x1f   :  { %2047 = vmatmul.mubr.msk.f32.vlgmr.msra.gmra.mrb[0].mxu0 %vm114_vm0, %v39_v14  ;;  %2359 = vmatprep.subr.bf16.mxu0 %v2358_v18  ;;  %v341_v52 = vld [vmem:[%s5549_s5 + $0x268] sm:$0xff]  ;;  %v296_v54 = vld [vmem:[%s5549_s5 + $0x100] sm:$0xff]  ;;  %v2372_v56 = vpack.c.bf16 %v324_v49, %v316_v48 }
  0x20   :  { %2361 = vmatpush1.bf16.msra.mxu0 %v2360_v19  ;;  %214 = vmatpush1.msra.mxu1 %v90_v39  ;;  %v304_v55 = vld [vmem:[%s5549_s5 + $0x140] sm:$0xff]  ;;  %v313_v58 = vld [vmem:[%s5549_s5 + $0x188] sm:$0xff]  ;;  %v2374_v59 = vpack.c.bf16 %v341_v52, %v333_v51 }
  0x21   :  { %2363 = vmatprep.subr.bf16.mxu0 %v2362_v20  ;;  %2048 = vmatmul.mubr.msk.f32.vlgmr.msra.gmra.mrb[0].mxu1 %vm114_vm0, %v39_v14  ;;  %v332_v60 = vld [vmem:[%s5549_s5 + $0x220] sm:$0xff]  ;;  %v321_v62 = vld [vmem:[%s5549_s5 + $0x1c8] sm:$0xff]  ;;  %v2112_v1 = vpack.c.bf16 %v304_v55, %v296_v54 }
  0x22   :  { %2103 = vmatprep.subr.bf16.mxu1 %v2102_v40  ;;  %v340_v61 = vld [vmem:[%s5549_s5 + $0x260] sm:$0xff]  ;;  %v349_v63 = vld [vmem:[%s5549_s5 + $0x2a8] sm:$0xff]  ;;  %v2114_v6 = vpack.c.bf16 %v321_v62, %v313_v58 }
  0x23   :  { %2105 = vmatpush1.bf16.msra.mxu1 %v2104_v41  ;;  %v357_v0 = vld [vmem:[%s5549_s5 + $0x2e8] sm:$0xff]  ;;  %v312_v2 = vld [vmem:[%s5549_s5 + $0x180] sm:$0xff]  ;;  %v2376_v5 = vpack.c.bf16 %v340_v61, %v332_v60 }
  0x24   :  { %2365 = vmatpush1.bf16.msra.mxu0 %v2364_v31  ;;  %2107 = vmatprep.subr.bf16.mxu1 %v2106_v45  ;;  %v320_v4 = vld [vmem:[%s5549_s5 + $0x1c0] sm:$0xff]  ;;  %v329_v7 = vld [vmem:[%s5549_s5 + $0x208] sm:$0xff]  ;;  %v2378_v8 = vpack.c.bf16 %v357_v0, %v349_v63 }
  0x25   :  { %2367 = vmatprep.subr.bf16.mxu0 %v2366_v33  ;;  %v348_v9 = vld [vmem:[%s5549_s5 + $0x2a0] sm:$0xff]  ;;  %v337_v11 = vld [vmem:[%s5549_s5 + $0x248] sm:$0xff]  ;;  %v2116_v14 = vpack.c.bf16 %v320_v4, %v312_v2 }
  0x26   :  { %v356_v10 = vld [vmem:[%s5549_s5 + $0x2e0] sm:$0xff]  ;;  %v365_v12 = vld [vmem:[%s5549_s5 + $0x328] sm:$0xff]  ;;  %v2118_v18 = vpack.c.bf16 %v337_v11, %v329_v7 }
  0x27   :  { %2109 = vmatpush1.bf16.msra.mxu1 %v2108_v53  ;;  %v373_v13 = vld [vmem:[%s5549_s5 + $0x368] sm:$0xff]  ;;  %v328_v15 = vld [vmem:[%s5549_s5 + $0x200] sm:$0xff]  ;;  %v2380_v17 = vpack.c.bf16 %v356_v10, %v348_v9 }
  0x28   :  { %2369 = vmatpush1.bf16.msra.mxu0 %v2368_v44  ;;  %2111 = vmatprep.subr.bf16.mxu1 %v2110_v57  ;;  %v336_v16 = vld [vmem:[%s5549_s5 + $0x240] sm:$0xff]  ;;  %v345_v19 = vld [vmem:[%s5549_s5 + $0x288] sm:$0xff]  ;;  %v2382_v20 = vpack.c.bf16 %v373_v13, %v365_v12 }
  0x29   :  { %2371 = vmatprep.subr.bf16.mxu0 %v2370_v47  ;;  %v364_v21 = vld [vmem:[%s5549_s5 + $0x320] sm:$0xff]  ;;  %v353_v23 = vld [vmem:[%s5549_s5 + $0x2c8] sm:$0xff]  ;;  %v2120_v26 = vpack.c.bf16 %v336_v16, %v328_v15 }
  0x2a   :  { %v372_v22 = vld [vmem:[%s5549_s5 + $0x360] sm:$0xff]  ;;  %v381_v24 = vld [vmem:[%s5549_s5 + $0x3a8] sm:$0xff]  ;;  %v2122_v30 = vpack.c.bf16 %v353_v23, %v345_v19 }
  0x2b   :  { %2113 = vmatpush1.bf16.msra.mxu1 %v2112_v1  ;;  %v389_v25 = vld [vmem:[%s5549_s5 + $0x3e8] sm:$0xff]  ;;  %v344_v27 = vld [vmem:[%s5549_s5 + $0x280] sm:$0xff]  ;;  %v2384_v29 = vpack.c.bf16 %v372_v22, %v364_v21 }
  0x2c   :  { %2373 = vmatpush1.bf16.msra.mxu0 %v2372_v56  ;;  %2115 = vmatprep.subr.bf16.mxu1 %v2114_v6  ;;  %v352_v28 = vld [vmem:[%s5549_s5 + $0x2c0] sm:$0xff]  ;;  %v361_v31 = vld [vmem:[%s5549_s5 + $0x308] sm:$0xff]  ;;  %v2386_v32 = vpack.c.bf16 %v389_v25, %v381_v24 }
  0x2d   :  { %2375 = vmatprep.subr.bf16.mxu0 %v2374_v59  ;;  %v380_v33 = vld [vmem:[%s5549_s5 + $0x3a0] sm:$0xff]  ;;  %v369_v35 = vld [vmem:[%s5549_s5 + $0x348] sm:$0xff]  ;;  %v2124_v38 = vpack.c.bf16 %v352_v28, %v344_v27 }
  0x2e   :  { %v388_v34 = vld [vmem:[%s5549_s5 + $0x3e0] sm:$0xff]  ;;  %v397_v36 = vld [vmem:[%s5549_s5 + $0x428] sm:$0xff]  ;;  %v2126_v42 = vpack.c.bf16 %v369_v35, %v361_v31 }
  0x2f   :  { %2117 = vmatpush1.bf16.msra.mxu1 %v2116_v14  ;;  %v405_v37 = vld [vmem:[%s5549_s5 + $0x468] sm:$0xff]  ;;  %v360_v39 = vld [vmem:[%s5549_s5 + $0x300] sm:$0xff]  ;;  %v2388_v41 = vpack.c.bf16 %v388_v34, %v380_v33 }
  0x30   :  { %2377 = vmatpush1.bf16.msra.mxu0 %v2376_v5  ;;  %2119 = vmatprep.subr.bf16.mxu1 %v2118_v18  ;;  %v368_v40 = vld [vmem:[%s5549_s5 + $0x340] sm:$0xff]  ;;  %v377_v43 = vld [vmem:[%s5549_s5 + $0x388] sm:$0xff]  ;;  %v2390_v44 = vpack.c.bf16 %v405_v37, %v397_v36 }
  0x31   :  { %2379 = vmatprep.subr.bf16.mxu0 %v2378_v8  ;;  %v396_v45 = vld [vmem:[%s5549_s5 + $0x420] sm:$0xff]  ;;  %v385_v47 = vld [vmem:[%s5549_s5 + $0x3c8] sm:$0xff]  ;;  %v2128_v50 = vpack.c.bf16 %v368_v40, %v360_v39 }
  0x32   :  { %v404_v46 = vld [vmem:[%s5549_s5 + $0x460] sm:$0xff]  ;;  %v413_v48 = vld [vmem:[%s5549_s5 + $0x4a8] sm:$0xff]  ;;  %v2130_v54 = vpack.c.bf16 %v385_v47, %v377_v43 }
  0x33   :  { %2121 = vmatpush1.bf16.msra.mxu1 %v2120_v26  ;;  %v421_v49 = vld [vmem:[%s5549_s5 + $0x4e8] sm:$0xff]  ;;  %v376_v51 = vld [vmem:[%s5549_s5 + $0x380] sm:$0xff]  ;;  %v2392_v53 = vpack.c.bf16 %v404_v46, %v396_v45 }
  0x34   :  { %2381 = vmatpush1.bf16.msra.mxu0 %v2380_v17  ;;  %2123 = vmatprep.subr.bf16.mxu1 %v2122_v30  ;;  %v384_v52 = vld [vmem:[%s5549_s5 + $0x3c0] sm:$0xff]  ;;  %v393_v55 = vld [vmem:[%s5549_s5 + $0x408] sm:$0xff]  ;;  %v2394_v56 = vpack.c.bf16 %v421_v49, %v413_v48 }
  0x35   :  { %2383 = vmatprep.subr.bf16.mxu0 %v2382_v20  ;;  %v412_v57 = vld [vmem:[%s5549_s5 + $0x4a0] sm:$0xff]  ;;  %v401_v59 = vld [vmem:[%s5549_s5 + $0x448] sm:$0xff]  ;;  %v2132_v62 = vpack.c.bf16 %v384_v52, %v376_v51 }
  0x36   :  { %v420_v58 = vld [vmem:[%s5549_s5 + $0x4e0] sm:$0xff]  ;;  %v429_v60 = vld [vmem:[%s5549_s5 + $0x528] sm:$0xff]  ;;  %v2134_v2 = vpack.c.bf16 %v401_v59, %v393_v55 }
  0x37   :  { %2125 = vmatpush1.bf16.msra.mxu1 %v2124_v38  ;;  %v437_v61 = vld [vmem:[%s5549_s5 + $0x568] sm:$0xff]  ;;  %v392_v63 = vld [vmem:[%s5549_s5 + $0x400] sm:$0xff]  ;;  %v2396_v1 = vpack.c.bf16 %v420_v58, %v412_v57 }
  0x38   :  { %2385 = vmatpush1.bf16.msra.mxu0 %v2384_v29  ;;  %2127 = vmatprep.subr.bf16.mxu1 %v2126_v42  ;;  %v400_v0 = vld [vmem:[%s5549_s5 + $0x440] sm:$0xff]  ;;  %v409_v4 = vld [vmem:[%s5549_s5 + $0x488] sm:$0xff]  ;;  %v2398_v5 = vpack.c.bf16 %v437_v61, %v429_v60 }
  0x39   :  { %2387 = vmatprep.subr.bf16.mxu0 %v2386_v32  ;;  %v428_v6 = vld [vmem:[%s5549_s5 + $0x520] sm:$0xff]  ;;  %v417_v8 = vld [vmem:[%s5549_s5 + $0x4c8] sm:$0xff]  ;;  %v2136_v11 = vpack.c.bf16 %v400_v0, %v392_v63 }
  0x3a   :  { %v436_v7 = vld [vmem:[%s5549_s5 + $0x560] sm:$0xff]  ;;  %v445_v9 = vld [vmem:[%s5549_s5 + $0x5a8] sm:$0xff]  ;;  %v2138_v15 = vpack.c.bf16 %v417_v8, %v409_v4 }
  0x3b   :  { %2129 = vmatpush1.bf16.msra.mxu1 %v2128_v50  ;;  %v453_v10 = vld [vmem:[%s5549_s5 + $0x5e8] sm:$0xff]  ;;  %v408_v12 = vld [vmem:[%s5549_s5 + $0x480] sm:$0xff]  ;;  %v2400_v14 = vpack.c.bf16 %v436_v7, %v428_v6 }
  0x3c   :  { %2389 = vmatpush1.bf16.msra.mxu0 %v2388_v41  ;;  %2131 = vmatprep.subr.bf16.mxu1 %v2130_v54  ;;  %v416_v13 = vld [vmem:[%s5549_s5 + $0x4c0] sm:$0xff]  ;;  %v425_v16 = vld [vmem:[%s5549_s5 + $0x508] sm:$0xff]  ;;  %v2402_v17 = vpack.c.bf16 %v453_v10, %v445_v9 }
  0x3d   :  { %2391 = vmatprep.subr.bf16.mxu0 %v2390_v44  ;;  %v444_v18 = vld [vmem:[%s5549_s5 + $0x5a0] sm:$0xff]  ;;  %v433_v20 = vld [vmem:[%s5549_s5 + $0x548] sm:$0xff]  ;;  %v2140_v23 = vpack.c.bf16 %v416_v13, %v408_v12 }
  0x3e   :  { %v452_v19 = vld [vmem:[%s5549_s5 + $0x5e0] sm:$0xff]  ;;  %v461_v21 = vld [vmem:[%s5549_s5 + $0x628] sm:$0xff]  ;;  %v2142_v27 = vpack.c.bf16 %v433_v20, %v425_v16 }
  0x3f   :  { %2133 = vmatpush1.bf16.msra.mxu1 %v2132_v62  ;;  %v469_v22 = vld [vmem:[%s5549_s5 + $0x668] sm:$0xff]  ;;  %v424_v24 = vld [vmem:[%s5549_s5 + $0x500] sm:$0xff]  ;;  %v2404_v26 = vpack.c.bf16 %v452_v19, %v444_v18 }
  0x40   :  { %2393 = vmatpush1.bf16.msra.mxu0 %v2392_v53  ;;  %2135 = vmatprep.subr.bf16.mxu1 %v2134_v2  ;;  %v432_v25 = vld [vmem:[%s5549_s5 + $0x540] sm:$0xff]  ;;  %v441_v28 = vld [vmem:[%s5549_s5 + $0x588] sm:$0xff]  ;;  %v2406_v29 = vpack.c.bf16 %v469_v22, %v461_v21 }
  0x41   :  { %2395 = vmatprep.subr.bf16.mxu0 %v2394_v56  ;;  %v460_v30 = vld [vmem:[%s5549_s5 + $0x620] sm:$0xff]  ;;  %v449_v32 = vld [vmem:[%s5549_s5 + $0x5c8] sm:$0xff]  ;;  %v2144_v35 = vpack.c.bf16 %v432_v25, %v424_v24  ;;  %v94_v24 = vlaneseq }
  0x42   :  { %v468_v31 = vld [vmem:[%s5549_s5 + $0x660] sm:$0xff]  ;;  %v477_v33 = vld [vmem:[%s5549_s5 + $0x6a8] sm:$0xff]  ;;  %v2146_v39 = vpack.c.bf16 %v449_v32, %v441_v28 }
  0x43   :  { %2137 = vmatpush1.bf16.msra.mxu1 %v2136_v11  ;;  %v485_v34 = vld [vmem:[%s5549_s5 + $0x6e8] sm:$0xff]  ;;  %v440_v36 = vld [vmem:[%s5549_s5 + $0x580] sm:$0xff]  ;;  %v2408_v38 = vpack.c.bf16 %v468_v31, %v460_v30  ;;  %v3520_v25 = vshrl.u32 %v94_v24, 7 }
  0x44   :  { %2397 = vmatpush1.bf16.msra.mxu0 %v2396_v1  ;;  %2139 = vmatprep.subr.bf16.mxu1 %v2138_v15  ;;  %v448_v37 = vld [vmem:[%s5549_s5 + $0x5c0] sm:$0xff]  ;;  %v457_v40 = vld [vmem:[%s5549_s5 + $0x608] sm:$0xff]  ;;  %v2410_v41 = vpack.c.bf16 %v485_v34, %v477_v33 }
  0x45   :  { %2399 = vmatprep.subr.bf16.mxu0 %v2398_v5  ;;  %v476_v42 = vld [vmem:[%s5549_s5 + $0x6a0] sm:$0xff]  ;;  %v465_v44 = vld [vmem:[%s5549_s5 + $0x648] sm:$0xff]  ;;  %v2148_v47 = vpack.c.bf16 %v448_v37, %v440_v36  ;;  %v3531_v28 = vsub.s32 1, %v3520_v25 }
  0x46   :  { %v484_v43 = vld [vmem:[%s5549_s5 + $0x6e0] sm:$0xff]  ;;  %v493_v45 = vld [vmem:[%s5549_s5 + $0x728] sm:$0xff]  ;;  %v2150_v50 = vpack.c.bf16 %v465_v44, %v457_v40 }
  0x47   :  { %2141 = vmatpush1.bf16.msra.mxu1 %v2140_v23  ;;  %v501_v46 = vld [vmem:[%s5549_s5 + $0x768] sm:$0xff]  ;;  %v456_v48 = vld [vmem:[%s5549_s5 + $0x600] sm:$0xff]  ;;  %v2412_v49 = vpack.c.bf16 %v484_v43, %v476_v42  ;;  %v108_v43 = vsub.s32 3, %v3520_v25 }
  0x48   :  { %2401 = vmatpush1.bf16.msra.mxu0 %v2400_v14  ;;  %2143 = vmatprep.subr.bf16.mxu1 %v2142_v27  ;;  %v464_v51 = vld [vmem:[%s5549_s5 + $0x640] sm:$0xff]  ;;  %v2414_v52 = vpack.c.bf16 %v501_v46, %v493_v45  ;;  %v473_v55 = vld [vmem:[%s5549_s5 + $0x688] sm:$0xff] }
  0x49   :  { %2403 = vmatprep.subr.bf16.mxu0 %v2402_v17  ;;  %v492_v53 = vld [vmem:[%s5549_s5 + $0x720] sm:$0xff]  ;;  %v481_v56 = vld [vmem:[%s5549_s5 + $0x6c8] sm:$0xff]  ;;  %v2152_v57 = vpack.c.bf16 %v464_v51, %v456_v48 }
  0x4a   :  { %v500_v54 = vld [vmem:[%s5549_s5 + $0x760] sm:$0xff]  ;;  %v2154_v59 = vpack.c.bf16 %v481_v56, %v473_v55  ;;  %v489_v62 = vld [vmem:[%s5549_s5 + $0x708] sm:$0xff] }
  0x4b   :  { %2145 = vmatpush1.bf16.msra.mxu1 %v2144_v35  ;;  %v2416_v58 = vpack.c.bf16 %v500_v54, %v492_v53  ;;  %v472_v60 = vld [vmem:[%s5549_s5 + $0x680] sm:$0xff]  ;;  %v497_v63 = vld [vmem:[%s5549_s5 + $0x748] sm:$0xff] }
  0x4c   :  { %2405 = vmatpush1.bf16.msra.mxu0 %v2404_v26  ;;  %2147 = vmatprep.subr.bf16.mxu1 %v2146_v39  ;;  %v480_v61 = vld [vmem:[%s5549_s5 + $0x6c0] sm:$0xff]  ;;  %v2158_v1 = vpack.c.bf16 %v497_v63, %v489_v62  ;;  %v505_v6 = vld [vmem:[%s5549_s5 + $0x788] sm:$0xff]  ;;  %v3523_v26 = vsub.s32 0, %v3520_v25 }
  0x4d   :  { %2407 = vmatprep.subr.bf16.mxu0 %v2406_v29  ;;  %v2156_v0 = vpack.c.bf16 %v480_v61, %v472_v60  ;;  %v488_v2 = vld [vmem:[%s5549_s5 + $0x700] sm:$0xff]  ;;  %v513_v7 = vld [vmem:[%s5549_s5 + $0x7c8] sm:$0xff] }
  0x4e   :  { %v496_v4 = vld [vmem:[%s5549_s5 + $0x740] sm:$0xff]  ;;  %v509_v8 = vld [vmem:[%s5549_s5 + $0x7a8] sm:$0xff]  ;;  %v2162_v9 = vpack.c.bf16 %v513_v7, %v505_v6 }
  0x4f   :  { %2149 = vmatpush1.bf16.msra.mxu1 %v2148_v47  ;;  %v2160_v5 = vpack.c.bf16 %v496_v4, %v488_v2  ;;  %v517_v10 = vld [vmem:[%s5549_s5 + $0x7e8] sm:$0xff]  ;;  %v504_v11 = vld [vmem:[%s5549_s5 + $0x780] sm:$0xff] }
  0x50   :  { %2409 = vmatpush1.bf16.msra.mxu0 %v2408_v38  ;;  %2151 = vmatprep.subr.bf16.mxu1 %v2150_v50  ;;  %v512_v12 = vld [vmem:[%s5549_s5 + $0x7c0] sm:$0xff]  ;;  %v2418_v13 = vpack.c.bf16 %v517_v10, %v509_v8  ;;  %v521_v18 = vld [vmem:[%s5549_s5 + $0x808] sm:$0xff] }
  0x51   :  { %2411 = vmatprep.subr.bf16.mxu0 %v2410_v41  ;;  %v2164_v14 = vpack.c.bf16 %v512_v12, %v504_v11  ;;  %v508_v15 = vld [vmem:[%s5549_s5 + $0x7a0] sm:$0xff]  ;;  %v529_v19 = vld [vmem:[%s5549_s5 + $0x848] sm:$0xff] }
  0x52   :  { %v516_v16 = vld [vmem:[%s5549_s5 + $0x7e0] sm:$0xff]  ;;  %v525_v20 = vld [vmem:[%s5549_s5 + $0x828] sm:$0xff]  ;;  %v2166_v21 = vpack.c.bf16 %v529_v19, %v521_v18 }
  0x53   :  { %2153 = vmatpush1.bf16.msra.mxu1 %v2152_v57  ;;  %v2420_v17 = vpack.c.bf16 %v516_v16, %v508_v15  ;;  %v533_v22 = vld [vmem:[%s5549_s5 + $0x868] sm:$0xff]  ;;  %v3528_v27 = vld [vmem:[%s5551_s4] sm:$0xf] }
  0x54   :  { %2413 = vmatpush1.bf16.msra.mxu0 %v2412_v49  ;;  %2155 = vmatprep.subr.bf16.mxu1 %v2154_v59  ;;  %v2422_v23 = vpack.c.bf16 %v533_v22, %v525_v20  ;;  %v97_v29 = vrot.slane %v3528_v27, %v3523_v26  ;;  %v101_v30 = vrot.slane %v3528_v27, %v3531_v28  ;;  %v520_v32 = vld [vmem:[%s5549_s5 + $0x800] sm:$0xff]  ;;  %v537_v38 = vld [vmem:[%s5549_s5 + $0x888] sm:$0xff] }
  0x55   :  { %2415 = vmatprep.subr.bf16.mxu0 %v2414_v52  ;;  %v528_v33 = vld [vmem:[%s5549_s5 + $0x840] sm:$0xff]  ;;  %v545_v40 = vld [vmem:[%s5549_s5 + $0x8c8] sm:$0xff] }
  0x56   :  { %v524_v36 = vld [vmem:[%s5549_s5 + $0x820] sm:$0xff]  ;;  %v541_v41 = vld [vmem:[%s5549_s5 + $0x8a8] sm:$0xff]  ;;  %v2168_v45 = vpack.c.bf16 %v528_v33, %v520_v32  ;;  %v2170_v50 = vpack.c.bf16 %v545_v40, %v537_v38 }
  0x57   :  { %2157 = vmatpush1.bf16.msra.mxu1 %v2156_v0  ;;  %v532_v37 = vld [vmem:[%s5549_s5 + $0x860] sm:$0xff]  ;;  %v549_v42 = vld [vmem:[%s5549_s5 + $0x8e8] sm:$0xff] }
  0x58   :  { %2417 = vmatpush1.bf16.msra.mxu0 %v2416_v58  ;;  %2159 = vmatprep.subr.bf16.mxu1 %v2158_v1  ;;  %v2424_v46 = vpack.c.bf16 %v532_v37, %v524_v36  ;;  %v536_v47 = vld [vmem:[%s5549_s5 + $0x880] sm:$0xff]  ;;  %v2426_v51 = vpack.c.bf16 %v549_v42, %v541_v41  ;;  %v553_v54 = vld [vmem:[%s5549_s5 + $0x908] sm:$0xff]  ;;  %v109_v58 = vrot.slane %v3528_v27, %v108_v43 }
  0x59   :  { %2419 = vmatprep.subr.bf16.mxu0 %v2418_v13  ;;  %v544_v48 = vld [vmem:[%s5549_s5 + $0x8c0] sm:$0xff]  ;;  %v561_v55 = vld [vmem:[%s5549_s5 + $0x948] sm:$0xff] }
  0x5a   :  { %v540_v52 = vld [vmem:[%s5549_s5 + $0x8a0] sm:$0xff]  ;;  %v557_v56 = vld [vmem:[%s5549_s5 + $0x928] sm:$0xff]  ;;  %v2172_v59 = vpack.c.bf16 %v544_v48, %v536_v47  ;;  %v2174_v63 = vpack.c.bf16 %v561_v55, %v553_v54 }
  0x5b   :  { %2161 = vmatpush1.bf16.msra.mxu1 %v2160_v5  ;;  %v548_v53 = vld [vmem:[%s5549_s5 + $0x8e0] sm:$0xff]  ;;  %v565_v57 = vld [vmem:[%s5549_s5 + $0x968] sm:$0xff] }
  0x5c   :  { %2163 = vmatprep.subr.bf16.mxu1 %v2162_v9  ;;  %2421 = vmatpush1.bf16.msra.mxu0 %v2420_v17  ;;  %v2428_v60 = vpack.c.bf16 %v548_v53, %v540_v52  ;;  %v552_v61 = vld [vmem:[%s5549_s5 + $0x900] sm:$0xff]  ;;  %v2430_v0 = vpack.c.bf16 %v565_v57, %v557_v56  ;;  %v569_v4 = vld [vmem:[%s5549_s5 + $0x988] sm:$0xff] }
  0x5d   :  { %2423 = vmatprep.subr.bf16.mxu0 %v2422_v23  ;;  %v560_v62 = vld [vmem:[%s5549_s5 + $0x940] sm:$0xff]  ;;  %v577_v6 = vld [vmem:[%s5549_s5 + $0x9c8] sm:$0xff] }
  0x5e   :  { %v556_v1 = vld [vmem:[%s5549_s5 + $0x920] sm:$0xff]  ;;  %v573_v7 = vld [vmem:[%s5549_s5 + $0x9a8] sm:$0xff]  ;;  %v2176_v11 = vpack.c.bf16 %v560_v62, %v552_v61  ;;  %v2178_v15 = vpack.c.bf16 %v577_v6, %v569_v4 }
  0x5f   :  { %2165 = vmatpush1.bf16.msra.mxu1 %v2164_v14  ;;  %v564_v2 = vld [vmem:[%s5549_s5 + $0x960] sm:$0xff]  ;;  %v581_v8 = vld [vmem:[%s5549_s5 + $0x9e8] sm:$0xff] }
  0x60   :  { %2167 = vmatprep.subr.bf16.mxu1 %v2166_v21  ;;  %v2432_v12 = vpack.c.bf16 %v564_v2, %v556_v1  ;;  %v568_v13 = vld [vmem:[%s5549_s5 + $0x980] sm:$0xff]  ;;  %v2434_v16 = vpack.c.bf16 %v581_v8, %v573_v7  ;;  %v585_v19 = vld [vmem:[%s5549_s5 + $0xa08] sm:$0xff] }
  0x61   :  { %v576_v14 = vld [vmem:[%s5549_s5 + $0x9c0] sm:$0xff]  ;;  %v593_v21 = vld [vmem:[%s5549_s5 + $0xa48] sm:$0xff] }
  0x62   :  { %v572_v17 = vld [vmem:[%s5549_s5 + $0x9a0] sm:$0xff]  ;;  %v589_v22 = vld [vmem:[%s5549_s5 + $0xa28] sm:$0xff]  ;;  %v2180_v24 = vpack.c.bf16 %v576_v14, %v568_v13  ;;  %v2182_v32 = vpack.c.bf16 %v593_v21, %v585_v19 }
  0x63   :  { %v580_v18 = vld [vmem:[%s5549_s5 + $0x9e0] sm:$0xff]  ;;  %v597_v23 = vld [vmem:[%s5549_s5 + $0xa68] sm:$0xff] }
  0x64   :  { %v2438_v33 = vpack.c.bf16 %v597_v23, %v589_v22  ;;  %v601_v36 = vld [vmem:[%s5549_s5 + $0xa88] sm:$0xff]  ;;  %v600_v42 = vld [vmem:[%s5549_s5 + $0xa80] sm:$0xff] }
  0x65   :  { %v609_v37 = vld [vmem:[%s5549_s5 + $0xac8] sm:$0xff]  ;;  %v604_v48 = vld [vmem:[%s5549_s5 + $0xaa0] sm:$0xff] }
  0x66   :  { %v605_v38 = vld [vmem:[%s5549_s5 + $0xaa8] sm:$0xff]  ;;  %v616_v57 = vld [vmem:[%s5549_s5 + $0xb00] sm:$0xff] }
  0x67   :  { %v625_v52 = vld [vmem:[%s5549_s5 + $0xb48] sm:$0xff]  ;;  %v620_v61 = vld [vmem:[%s5549_s5 + $0xb20] sm:$0xff] }
  0x68   :  { %v621_v53 = vld [vmem:[%s5549_s5 + $0xb28] sm:$0xff]  ;;  %v628_v62 = vld [vmem:[%s5549_s5 + $0xb60] sm:$0xff] }
  0x69   :  { %v629_v54 = vld [vmem:[%s5549_s5 + $0xb68] sm:$0xff]  ;;  %v2448_v6 = vpack.c.bf16 %v628_v62, %v620_v61  ;;  %v632_v7 = vld [vmem:[%s5549_s5 + $0xb80] sm:$0xff] }
  0x6a   :  { %v637_v1 = vld [vmem:[%s5549_s5 + $0xba8] sm:$0xff]  ;;  %v640_v8 = vld [vmem:[%s5549_s5 + $0xbc0] sm:$0xff] }
  0x6b   :  { %v645_v2 = vld [vmem:[%s5549_s5 + $0xbe8] sm:$0xff]  ;;  %v648_v19 = vld [vmem:[%s5549_s5 + $0xc00] sm:$0xff] }
  0x6c   :  { %v649_v13 = vld [vmem:[%s5549_s5 + $0xc08] sm:$0xff]  ;;  %v656_v21 = vld [vmem:[%s5549_s5 + $0xc40] sm:$0xff] }
  0x6d   :  { %v657_v14 = vld [vmem:[%s5549_s5 + $0xc48] sm:$0xff] }
  0x6e   :  { %v2198_v22 = vpack.c.bf16 %v657_v14, %v649_v13  ;;  %v712_v13 = vld [vmem:[%s5549_s5 + $0xe00] sm:$0xff] }
  0x6f   :  { %v720_v14 = vld [vmem:[%s5549_s5 + $0xe40] sm:$0xff] }
  0xf2   :  { %v184_v31 = vpop.f32.mrb[0].mxu0 }
  0xf3   :  { %v185_v34 = vadd.f32 %v184_v31, %v97_v29  ;;  %v186_v35 = vpop.f32.mrb[1].mxu0  ;;  %v2436_v29 = vpack.c.bf16 %v580_v18, %v572_v17  ;;  %v592_v31 = vld [vmem:[%s5549_s5 + $0xa40] sm:$0xff]  ;;  %v2196_v17 = vpack.c.bf16 %v640_v8, %v632_v7  ;;  %v713_v7 = vld [vmem:[%s5549_s5 + $0xe08] sm:$0xff] }
  0xf4   :  { %v187_v39 = vadd.f32 %v186_v35, %v101_v30  ;;  %v3612_v5 = vpop.f32.mrb[0].mxu1  ;;  %v584_v30 = vld [vmem:[%s5549_s5 + $0xa00] sm:$0xff]  ;;  %v721_v8 = vld [vmem:[%s5549_s5 + $0xe48] sm:$0xff] }
  0xf5   :  { %v3570_v49 = vmax.f32 %v185_v34, 0.0  ;;  %v257_v9 = vpop.f32.mrb[1].mxu1  ;;  %v588_v34 = vld [vmem:[%s5549_s5 + $0xa20] sm:$0xff]  ;;  %v2184_v40 = vpack.c.bf16 %v592_v31, %v584_v30  ;;  %v665_v30 = vld [vmem:[%s5549_s5 + $0xc88] sm:$0xff] }
  0xf6   :  { %v3562_v44 = vmax.f32 %v187_v39, 0.0  ;;  %v258_v10 = vadd.f32 %v257_v9, %v109_v58  ;;  %v596_v35 = vld [vmem:[%s5549_s5 + $0xa60] sm:$0xff]  ;;  %v613_v39 = vld [vmem:[%s5549_s5 + $0xae8] sm:$0xff] }
  0xf7   :  { %v2440_v41 = vpack.c.bf16 %v596_v35, %v588_v34  ;;  %v2442_v47 = vpack.c.bf16 %v613_v39, %v605_v38  ;;  %v624_v58 = vld [vmem:[%s5549_s5 + $0xb40] sm:$0xff]  ;;  %v673_v31 = vld [vmem:[%s5549_s5 + $0xcc8] sm:$0xff]  ;;  %v2200_v34 = vpack.c.bf16 %v656_v21, %v648_v19 }
  0xf8   :  { %882 = vmatprep.mubr.f32.mxu1 %v3562_v44  ;;  %1166 = vmatprep.mubr.f32.mxu0 %v3562_v44  ;;  %v3638_v20 = vmax.f32 %v258_v10, 0.0  ;;  %v2192_v4 = vpack.c.bf16 %v624_v58, %v616_v57  ;;  %v2450_v10 = vpack.c.bf16 %v645_v2, %v637_v1  ;;  %v2202_v38 = vpack.c.bf16 %v673_v31, %v665_v30  ;;  %v697_v57 = vld [vmem:[%s5549_s5 + $0xd88] sm:$0xff]  ;;  %v728_v30 = vld [vmem:[%s5549_s5 + $0xe80] sm:$0xff] }
  0xf9   :  { %883 = vmatmul.mubr.f32.vlgmr.msra.gmra.mrb[2].mxu1 %v3570_v49  ;;  %1167 = vmatmul.mubr.f32.vlgmr.msra.gmra.mrb[2].mxu0 %v3570_v49  ;;  %v705_v58 = vld [vmem:[%s5549_s5 + $0xdc8] sm:$0xff]  ;;  %v736_v31 = vld [vmem:[%s5549_s5 + $0xec0] sm:$0xff] }
  0xfa   :  { %2169 = vmatpush1.bf16.msra.mxu1 %v2168_v45  ;;  %2425 = vmatpush1.bf16.msra.mxu0 %v2424_v46  ;;  %v608_v45 = vld [vmem:[%s5549_s5 + $0xac0] sm:$0xff]  ;;  %v2186_v46 = vpack.c.bf16 %v609_v37, %v601_v36  ;;  %v2210_v1 = vpack.c.bf16 %v705_v58, %v697_v57  ;;  %v729_v19 = vld [vmem:[%s5549_s5 + $0xe88] sm:$0xff] }
  0xfb   :  { %2171 = vmatprep.subr.bf16.mxu1 %v2170_v50  ;;  %2427 = vmatprep.subr.bf16.mxu0 %v2426_v51  ;;  %v612_v50 = vld [vmem:[%s5549_s5 + $0xae0] sm:$0xff]  ;;  %v617_v51 = vld [vmem:[%s5549_s5 + $0xb08] sm:$0xff]  ;;  %v2188_v55 = vpack.c.bf16 %v608_v45, %v600_v42 }
  0xfc   :  { %953 = vmatprep.mubr.f32.mxu1 %v3638_v20  ;;  %1237 = vmatprep.mubr.f32.mxu0 %v3638_v20  ;;  %v2444_v56 = vpack.c.bf16 %v612_v50, %v604_v48  ;;  %v664_v36 = vld [vmem:[%s5549_s5 + $0xc80] sm:$0xff]  ;;  %v681_v42 = vld [vmem:[%s5549_s5 + $0xd08] sm:$0xff] }
  0xfd   :  { %v672_v37 = vld [vmem:[%s5549_s5 + $0xcc0] sm:$0xff]  ;;  %v689_v45 = vld [vmem:[%s5549_s5 + $0xd48] sm:$0xff] }
  0xfe   :  { %2173 = vmatpush1.bf16.msra.mxu1 %v2172_v59  ;;  %2429 = vmatpush1.bf16.msra.mxu0 %v2428_v60  ;;  %v2190_v59 = vpack.c.bf16 %v625_v52, %v617_v51  ;;  %v2446_v60 = vpack.c.bf16 %v629_v54, %v621_v53  ;;  %v2204_v48 = vpack.c.bf16 %v672_v37, %v664_v36  ;;  %v680_v51 = vld [vmem:[%s5549_s5 + $0xd00] sm:$0xff]  ;;  %v737_v21 = vld [vmem:[%s5549_s5 + $0xec8] sm:$0xff] }
  0xff   :  { %2175 = vmatprep.subr.bf16.mxu1 %v2174_v63  ;;  %2431 = vmatprep.subr.bf16.mxu0 %v2430_v0  ;;  %v633_v63 = vld [vmem:[%s5549_s5 + $0xb88] sm:$0xff]  ;;  %v688_v52 = vld [vmem:[%s5549_s5 + $0xd40] sm:$0xff]  ;;  %v2206_v53 = vpack.c.bf16 %v689_v45, %v681_v42 }
 0x100   :  { %v641_v0 = vld [vmem:[%s5549_s5 + $0xbc8] sm:$0xff]  ;;  %v2208_v61 = vpack.c.bf16 %v688_v52, %v680_v51  ;;  %v744_v45 = vld [vmem:[%s5549_s5 + $0xf00] sm:$0xff] }
 0x101   :  { %v2194_v9 = vpack.c.bf16 %v641_v0, %v633_v63  ;;  %v696_v63 = vld [vmem:[%s5549_s5 + $0xd80] sm:$0xff]  ;;  %v745_v36 = vld [vmem:[%s5549_s5 + $0xf08] sm:$0xff] }
 0x102   :  { %2177 = vmatpush1.bf16.msra.mxu1 %v2176_v11  ;;  %2433 = vmatpush1.bf16.msra.mxu0 %v2432_v12  ;;  %v636_v11 = vld [vmem:[%s5549_s5 + $0xba0] sm:$0xff]  ;;  %v753_v37 = vld [vmem:[%s5549_s5 + $0xf48] sm:$0xff] }
 0x103   :  { %2179 = vmatprep.subr.bf16.mxu1 %v2178_v15  ;;  %2435 = vmatprep.subr.bf16.mxu0 %v2434_v16  ;;  %v644_v12 = vld [vmem:[%s5549_s5 + $0xbe0] sm:$0xff]  ;;  %v653_v15 = vld [vmem:[%s5549_s5 + $0xc28] sm:$0xff] }
 0x104   :  { %v661_v16 = vld [vmem:[%s5549_s5 + $0xc68] sm:$0xff]  ;;  %v2452_v18 = vpack.c.bf16 %v644_v12, %v636_v11  ;;  %v704_v0 = vld [vmem:[%s5549_s5 + $0xdc0] sm:$0xff] }
 0x105   :  { %v2454_v23 = vpack.c.bf16 %v661_v16, %v653_v15  ;;  %v2212_v11 = vpack.c.bf16 %v704_v0, %v696_v63  ;;  %v2214_v15 = vpack.c.bf16 %v721_v8, %v713_v7  ;;  %v756_v51 = vld [vmem:[%s5549_s5 + $0xf60] sm:$0xff]  ;;  %v761_v52 = vld [vmem:[%s5549_s5 + $0xf88] sm:$0xff]  ;;  %v267_v0 = vld [vmem:[%s5549_s5 + $0x18] sm:$0xff] }
 0x106   :  { %2181 = vmatpush1.bf16.msra.mxu1 %v2180_v24  ;;  %2437 = vmatpush1.bf16.msra.mxu0 %v2436_v29  ;;  %v652_v24 = vld [vmem:[%s5549_s5 + $0xc20] sm:$0xff]  ;;  %v266_v8 = vld [vmem:[%s5549_s5 + $0x10] sm:$0xff] }
 0x107   :  { %2183 = vmatprep.subr.bf16.mxu1 %v2182_v32  ;;  %2439 = vmatprep.subr.bf16.mxu0 %v2438_v33  ;;  %v660_v29 = vld [vmem:[%s5549_s5 + $0xc60] sm:$0xff]  ;;  %v669_v32 = vld [vmem:[%s5549_s5 + $0xca8] sm:$0xff] }
 0x108   :  { %v677_v33 = vld [vmem:[%s5549_s5 + $0xce8] sm:$0xff]  ;;  %v2456_v35 = vpack.c.bf16 %v660_v29, %v652_v24  ;;  %v2216_v24 = vpack.c.bf16 %v720_v14, %v712_v13  ;;  %v772_v63 = vld [vmem:[%s5549_s5 + $0xfe0] sm:$0xff]  ;;  %v282_v14 = vld [vmem:[%s5549_s5 + $0x90] sm:$0xff] }
 0x109   :  { %v2458_v39 = vpack.c.bf16 %v677_v33, %v669_v32  ;;  %v2218_v32 = vpack.c.bf16 %v737_v21, %v729_v19  ;;  %v298_v21 = vld [vmem:[%s5549_s5 + $0x110] sm:$0xff] }
 0x10a   :  { %2185 = vmatpush1.bf16.msra.mxu1 %v2184_v40  ;;  %2441 = vmatpush1.bf16.msra.mxu0 %v2440_v41  ;;  %v668_v40 = vld [vmem:[%s5549_s5 + $0xca0] sm:$0xff] }
 0x10b   :  { %2187 = vmatprep.subr.bf16.mxu1 %v2186_v46  ;;  %2443 = vmatprep.subr.bf16.mxu0 %v2442_v47  ;;  %v676_v41 = vld [vmem:[%s5549_s5 + $0xce0] sm:$0xff]  ;;  %v685_v46 = vld [vmem:[%s5549_s5 + $0xd28] sm:$0xff] }
 0x10c   :  { %v693_v47 = vld [vmem:[%s5549_s5 + $0xd68] sm:$0xff]  ;;  %v2460_v50 = vpack.c.bf16 %v676_v41, %v668_v40  ;;  %v104_v40 = vsub.s32 2, %v3520_v25  ;;  %v2220_v41 = vpack.c.bf16 %v736_v31, %v728_v30  ;;  %v314_v31 = vld [vmem:[%s5549_s5 + $0x190] sm:$0xff] }
 0x10d   :  { %v2462_v54 = vpack.c.bf16 %v693_v47, %v685_v46  ;;  %v752_v46 = vld [vmem:[%s5549_s5 + $0xf40] sm:$0xff]  ;;  %v2222_v47 = vpack.c.bf16 %v753_v37, %v745_v36  ;;  %v330_v37 = vld [vmem:[%s5549_s5 + $0x210] sm:$0xff] }
 0x10e   :  { %2189 = vmatpush1.bf16.msra.mxu1 %v2188_v55  ;;  %2445 = vmatpush1.bf16.msra.mxu0 %v2444_v56  ;;  %v684_v55 = vld [vmem:[%s5549_s5 + $0xd20] sm:$0xff]  ;;  %v2224_v57 = vpack.c.bf16 %v752_v46, %v744_v45  ;;  %v346_v46 = vld [vmem:[%s5549_s5 + $0x290] sm:$0xff] }
 0x10f   :  { %2191 = vmatprep.subr.bf16.mxu1 %v2190_v59  ;;  %2447 = vmatprep.subr.bf16.mxu0 %v2446_v60  ;;  %v692_v56 = vld [vmem:[%s5549_s5 + $0xd60] sm:$0xff]  ;;  %v701_v59 = vld [vmem:[%s5549_s5 + $0xda8] sm:$0xff] }
 0x110   :  { %v709_v60 = vld [vmem:[%s5549_s5 + $0xde8] sm:$0xff]  ;;  %v2464_v62 = vpack.c.bf16 %v692_v56, %v684_v55  ;;  %v105_v56 = vrot.slane %v3528_v27, %v104_v40  ;;  %v764_v27 = vld [vmem:[%s5549_s5 + $0xfa0] sm:$0xff] }
 0x111   :  { %v2466_v2 = vpack.c.bf16 %v709_v60, %v701_v59  ;;  %v773_v55 = vld [vmem:[%s5549_s5 + $0xfe8] sm:$0xff]  ;;  %v760_v59 = vld [vmem:[%s5549_s5 + $0xf80] sm:$0xff] }
 0x112   :  { %2193 = vmatpush1.bf16.msra.mxu1 %v2192_v4  ;;  %2449 = vmatpush1.bf16.msra.mxu0 %v2448_v6  ;;  %v700_v4 = vld [vmem:[%s5549_s5 + $0xda0] sm:$0xff] }
 0x113   :  { %2195 = vmatprep.subr.bf16.mxu1 %v2194_v9  ;;  %2451 = vmatprep.subr.bf16.mxu0 %v2450_v10  ;;  %v708_v6 = vld [vmem:[%s5549_s5 + $0xde0] sm:$0xff]  ;;  %v717_v9 = vld [vmem:[%s5549_s5 + $0xe28] sm:$0xff] }
 0x114   :  { %v725_v10 = vld [vmem:[%s5549_s5 + $0xe68] sm:$0xff]  ;;  %v2468_v12 = vpack.c.bf16 %v708_v6, %v700_v4  ;;  %v2484_v6 = vpack.c.bf16 %v772_v63, %v764_v27  ;;  %v394_v63 = vld [vmem:[%s5549_s5 + $0x410] sm:$0xff] }
 0x115   :  { %v2470_v16 = vpack.c.bf16 %v725_v10, %v717_v9  ;;  %v274_v9 = vld [vmem:[%s5549_s5 + $0x50] sm:$0xff]  ;;  %v283_v10 = vld [vmem:[%s5549_s5 + $0x98] sm:$0xff] }
 0x116   :  { %2197 = vmatpush1.bf16.msra.mxu1 %v2196_v17  ;;  %2453 = vmatpush1.bf16.msra.mxu0 %v2452_v18  ;;  %v716_v17 = vld [vmem:[%s5549_s5 + $0xe20] sm:$0xff] }
 0x117   :  { %2199 = vmatprep.subr.bf16.mxu1 %v2198_v22  ;;  %2455 = vmatprep.subr.bf16.mxu0 %v2454_v23  ;;  %v724_v18 = vld [vmem:[%s5549_s5 + $0xe60] sm:$0xff]  ;;  %v733_v22 = vld [vmem:[%s5549_s5 + $0xea8] sm:$0xff] }
 0x118   :  { %v741_v23 = vld [vmem:[%s5549_s5 + $0xee8] sm:$0xff]  ;;  %v2472_v29 = vpack.c.bf16 %v724_v18, %v716_v17  ;;  %v307_v17 = vld [vmem:[%s5549_s5 + $0x158] sm:$0xff] }
 0x119   :  { %v2474_v33 = vpack.c.bf16 %v741_v23, %v733_v22  ;;  %v306_v22 = vld [vmem:[%s5549_s5 + $0x150] sm:$0xff]  ;;  %v315_v23 = vld [vmem:[%s5549_s5 + $0x198] sm:$0xff] }
 0x11a   :  { %2201 = vmatpush1.bf16.msra.mxu1 %v2200_v34  ;;  %2457 = vmatpush1.bf16.msra.mxu0 %v2456_v35  ;;  %v732_v34 = vld [vmem:[%s5549_s5 + $0xea0] sm:$0xff] }
 0x11b   :  { %2203 = vmatprep.subr.bf16.mxu1 %v2202_v38  ;;  %2459 = vmatprep.subr.bf16.mxu0 %v2458_v39  ;;  %v740_v35 = vld [vmem:[%s5549_s5 + $0xee0] sm:$0xff]  ;;  %v749_v38 = vld [vmem:[%s5549_s5 + $0xf28] sm:$0xff] }
 0x11c   :  { %v757_v39 = vld [vmem:[%s5549_s5 + $0xf68] sm:$0xff]  ;;  %v2476_v42 = vpack.c.bf16 %v740_v35, %v732_v34  ;;  %v339_v34 = vld [vmem:[%s5549_s5 + $0x258] sm:$0xff] }
 0x11e   :  { %2205 = vmatpush1.bf16.msra.mxu1 %v2204_v48  ;;  %2461 = vmatpush1.bf16.msra.mxu0 %v2460_v50  ;;  %v2478_v48 = vpack.c.bf16 %v757_v39, %v749_v38  ;;  %v748_v50 = vld [vmem:[%s5549_s5 + $0xf20] sm:$0xff]  ;;  %v338_v38 = vld [vmem:[%s5549_s5 + $0x250] sm:$0xff]  ;;  %v347_v39 = vld [vmem:[%s5549_s5 + $0x298] sm:$0xff] }
 0x11f   :  { %2207 = vmatprep.subr.bf16.mxu1 %v2206_v53  ;;  %2463 = vmatprep.subr.bf16.mxu0 %v2462_v54  ;;  %v769_v53 = vld [vmem:[%s5549_s5 + $0xfc8] sm:$0xff]  ;;  %v2480_v58 = vpack.c.bf16 %v756_v51, %v748_v50  ;;  %v371_v50 = vld [vmem:[%s5549_s5 + $0x358] sm:$0xff] }
 0x120   :  { %v765_v54 = vld [vmem:[%s5549_s5 + $0xfa8] sm:$0xff]  ;;  %v2226_v60 = vpack.c.bf16 %v769_v53, %v761_v52  ;;  %v362_v53 = vld [vmem:[%s5549_s5 + $0x310] sm:$0xff] }
 0x122   :  { %2209 = vmatpush1.bf16.msra.mxu1 %v2208_v61  ;;  %2465 = vmatpush1.bf16.msra.mxu0 %v2464_v62  ;;  %v2482_v61 = vpack.c.bf16 %v773_v55, %v765_v54  ;;  %v768_v62 = vld [vmem:[%s5549_s5 + $0xfc0] sm:$0xff]  ;;  %v370_v54 = vld [vmem:[%s5549_s5 + $0x350] sm:$0xff]  ;;  %v379_v55 = vld [vmem:[%s5549_s5 + $0x398] sm:$0xff] }
 0x123   :  { %2211 = vmatprep.subr.bf16.mxu1 %v2210_v1  ;;  %2467 = vmatprep.subr.bf16.mxu0 %v2466_v2  ;;  %v275_v1 = vld [vmem:[%s5549_s5 + $0x58] sm:$0xff]  ;;  %v256_v2 = vadd.f32 %v3612_v5, %v105_v56  ;;  %v2228_v4 = vpack.c.bf16 %v768_v62, %v760_v59  ;;  %v378_v59 = vld [vmem:[%s5549_s5 + $0x390] sm:$0xff] }
 0x124   :  { %v2230_v7 = vpack.c.bf16 %v275_v1, %v267_v0  ;;  %v291_v5 = vld [vmem:[%s5549_s5 + $0xd8] sm:$0xff]  ;;  %v1421_v0 = vld [vmem:[%s5552_s7 + $0x8] sm:$0xff] }
 0x125   :  { %v2234_v13 = vpack.c.bf16 %v291_v5, %v283_v10  ;;  %v387_v56 = vld [vmem:[%s5549_s5 + $0x3d8] sm:$0xff]  ;;  %v1422_v10 = vld [vmem:[%s5552_s7 + $0x10] sm:$0xff] }
 0x126   :  { %2213 = vmatpush1.bf16.msra.mxu1 %v2212_v11  ;;  %2469 = vmatpush1.bf16.msra.mxu0 %v2468_v12  ;;  %v3950_v11 = vmax.f32 %v256_v2, 0.0  ;;  %v2232_v12 = vpack.c.bf16 %v274_v9, %v266_v8  ;;  %v403_v62 = vld [vmem:[%s5549_s5 + $0x458] sm:$0xff]  ;;  %v402_v2 = vld [vmem:[%s5549_s5 + $0x450] sm:$0xff]  ;;  %v1420_v9 = vld [vmem:[%s5552_s7] sm:$0xff] }
 0x127   :  { %2215 = vmatprep.subr.bf16.mxu1 %v2214_v15  ;;  %2471 = vmatprep.subr.bf16.mxu0 %v2470_v16  ;;  %v290_v15 = vld [vmem:[%s5549_s5 + $0xd0] sm:$0xff]  ;;  %v299_v16 = vld [vmem:[%s5549_s5 + $0x118] sm:$0xff]  ;;  %v2616_v5 = vpack.c.bf16 %v1422_v10, %v1420_v9 }
 0x128   :  { %v2236_v18 = vpack.c.bf16 %v290_v15, %v282_v14  ;;  %v2238_v19 = vpack.c.bf16 %v307_v17, %v299_v16  ;;  %v1425_v14 = vld [vmem:[%s5552_s7 + $0x28] sm:$0xff]  ;;  %v418_v16 = vld [vmem:[%s5549_s5 + $0x4d0] sm:$0xff]  ;;  %v427_v17 = vld [vmem:[%s5549_s5 + $0x518] sm:$0xff] }
 0x129   :  { %v482_v10 = vld [vmem:[%s5549_s5 + $0x6d0] sm:$0xff] }
 0x12a   :  { %2217 = vmatpush1.bf16.msra.mxu1 %v2216_v24  ;;  %2473 = vmatpush1.bf16.msra.mxu0 %v2472_v29  ;;  %v323_v24 = vld [vmem:[%s5549_s5 + $0x1d8] sm:$0xff]  ;;  %v2240_v29 = vpack.c.bf16 %v306_v22, %v298_v21  ;;  %v1424_v22 = vld [vmem:[%s5552_s7 + $0x20] sm:$0xff] }
 0x12b   :  { %2219 = vmatprep.subr.bf16.mxu1 %v2218_v32  ;;  %2475 = vmatprep.subr.bf16.mxu0 %v2474_v33  ;;  %v2242_v30 = vpack.c.bf16 %v323_v24, %v315_v23  ;;  %v322_v32 = vld [vmem:[%s5549_s5 + $0x1d0] sm:$0xff]  ;;  %v331_v33 = vld [vmem:[%s5549_s5 + $0x218] sm:$0xff] }
 0x12c   :  { %v2244_v35 = vpack.c.bf16 %v322_v32, %v314_v31  ;;  %v2246_v36 = vpack.c.bf16 %v339_v34, %v331_v33  ;;  %v1426_v23 = vld [vmem:[%s5552_s7 + $0x30] sm:$0xff]  ;;  %v1429_v31 = vld [vmem:[%s5552_s7 + $0x48] sm:$0xff]  ;;  %v443_v34 = vld [vmem:[%s5549_s5 + $0x598] sm:$0xff] }
 0x12d   :  { %v2620_v24 = vpack.c.bf16 %v1426_v23, %v1424_v22  ;;  %v434_v33 = vld [vmem:[%s5549_s5 + $0x550] sm:$0xff] }
 0x12e   :  { %2221 = vmatpush1.bf16.msra.mxu1 %v2220_v41  ;;  %2477 = vmatpush1.bf16.msra.mxu0 %v2476_v42  ;;  %v355_v41 = vld [vmem:[%s5549_s5 + $0x2d8] sm:$0xff]  ;;  %v2248_v42 = vpack.c.bf16 %v338_v38, %v330_v37  ;;  %v1428_v38 = vld [vmem:[%s5552_s7 + $0x40] sm:$0xff]  ;;  %v498_v23 = vld [vmem:[%s5549_s5 + $0x750] sm:$0xff] }
 0x12f   :  { %2223 = vmatprep.subr.bf16.mxu1 %v2222_v47  ;;  %2479 = vmatprep.subr.bf16.mxu0 %v2478_v48  ;;  %v2250_v45 = vpack.c.bf16 %v355_v41, %v347_v39  ;;  %v354_v47 = vld [vmem:[%s5549_s5 + $0x2d0] sm:$0xff]  ;;  %v363_v48 = vld [vmem:[%s5549_s5 + $0x318] sm:$0xff] }
 0x130   :  { %v2252_v51 = vpack.c.bf16 %v354_v47, %v346_v46  ;;  %v2254_v52 = vpack.c.bf16 %v371_v50, %v363_v48  ;;  %v1430_v39 = vld [vmem:[%s5552_s7 + $0x50] sm:$0xff]  ;;  %v1433_v46 = vld [vmem:[%s5552_s7 + $0x68] sm:$0xff]  ;;  %v459_v50 = vld [vmem:[%s5549_s5 + $0x618] sm:$0xff] }
 0x131   :  { %v2624_v41 = vpack.c.bf16 %v1430_v39, %v1428_v38  ;;  %v450_v48 = vld [vmem:[%s5549_s5 + $0x5d0] sm:$0xff] }
 0x132   :  { %2225 = vmatpush1.bf16.msra.mxu1 %v2224_v57  ;;  %2481 = vmatpush1.bf16.msra.mxu0 %v2480_v58  ;;  %v2256_v57 = vpack.c.bf16 %v370_v54, %v362_v53  ;;  %v2258_v58 = vpack.c.bf16 %v387_v56, %v379_v55  ;;  %v1432_v54 = vld [vmem:[%s5552_s7 + $0x60] sm:$0xff]  ;;  %v1434_v55 = vld [vmem:[%s5552_s7 + $0x70] sm:$0xff] }
 0x133   :  { %2227 = vmatprep.subr.bf16.mxu1 %v2226_v60  ;;  %2483 = vmatprep.subr.bf16.mxu0 %v2482_v61  ;;  %v386_v60 = vld [vmem:[%s5549_s5 + $0x3d0] sm:$0xff]  ;;  %v395_v61 = vld [vmem:[%s5549_s5 + $0x418] sm:$0xff]  ;;  %v2628_v56 = vpack.c.bf16 %v1434_v55, %v1432_v54 }
 0x134   :  { %v2260_v27 = vpack.c.bf16 %v386_v60, %v378_v59  ;;  %v2262_v1 = vpack.c.bf16 %v403_v62, %v395_v61  ;;  %v1437_v59 = vld [vmem:[%s5552_s7 + $0x88] sm:$0xff]  ;;  %v466_v61 = vld [vmem:[%s5549_s5 + $0x650] sm:$0xff]  ;;  %v475_v62 = vld [vmem:[%s5549_s5 + $0x698] sm:$0xff] }
 0x135   :  { %v514_v39 = vld [vmem:[%s5549_s5 + $0x7d0] sm:$0xff] }
 0x136   :  { %2229 = vmatpush1.bf16.msra.mxu1 %v2228_v4  ;;  %2485 = vmatpush1.bf16.msra.mxu0 %v2484_v6  ;;  %v411_v4 = vld [vmem:[%s5549_s5 + $0x498] sm:$0xff]  ;;  %v530_v55 = vld [vmem:[%s5549_s5 + $0x850] sm:$0xff] }
 0x137   :  { %2231 = vmatprep.subr.bf16.mxu1 %v2230_v7  ;;  %v1423_v6 = vld [vmem:[%s5552_s7 + $0x18] sm:$0xff] }
 0x138   :  { %v419_v7 = vld [vmem:[%s5549_s5 + $0x4d8] sm:$0xff]  ;;  %v2614_v8 = vpack.c.bf16 %v1423_v6, %v1421_v0 }
 0x139   :  { %954 = vmatmul.mubr.f32.vlgmr.msra.gmra.mrb[2].mxu1 %v3950_v11  ;;  %1238 = vmatmul.mubr.f32.vlgmr.msra.gmra.mrb[2].mxu0 %v3950_v11  ;;  %v2266_v15 = vpack.c.bf16 %v419_v7, %v411_v4  ;;  %v474_v7 = vld [vmem:[%s5549_s5 + $0x690] sm:$0xff] }
 0x13a   :  { %2233 = vmatpush1.bf16.msra.mxu1 %v2232_v12  ;;  %1024 = vmatprep.mubr.f32.mxu1 %v3562_v44  ;;  %v2264_v12 = vpack.c.bf16 %v402_v2, %v394_v63  ;;  %v483_v63 = vld [vmem:[%s5549_s5 + $0x6d8] sm:$0xff]  ;;  %v1438_v2 = vld [vmem:[%s5552_s7 + $0x90] sm:$0xff] }
 0x13b   :  { %2235 = vmatprep.subr.bf16.mxu1 %v2234_v13  ;;  %v410_v13 = vld [vmem:[%s5549_s5 + $0x490] sm:$0xff]  ;;  %2615 = vmatprep.subr.bf16.mxu0 %v2614_v8  ;;  %v1441_v8 = vld [vmem:[%s5552_s7 + $0xa8] sm:$0xff]  ;;  %v2282_v9 = vpack.c.bf16 %v483_v63, %v475_v62 }
 0x13c   :  { %2617 = vmatpush1.bf16.msra.mxu0 %v2616_v5  ;;  %v491_v5 = vld [vmem:[%s5549_s5 + $0x718] sm:$0xff]  ;;  %v538_v63 = vld [vmem:[%s5549_s5 + $0x890] sm:$0xff] }
 0x13e   :  { %2237 = vmatpush1.bf16.msra.mxu1 %v2236_v18  ;;  %v1427_v18 = vld [vmem:[%s5552_s7 + $0x38] sm:$0xff] }
 0x13f   :  { %2239 = vmatprep.subr.bf16.mxu1 %v2238_v19  ;;  %v435_v19 = vld [vmem:[%s5549_s5 + $0x558] sm:$0xff]  ;;  %v2618_v21 = vpack.c.bf16 %v1427_v18, %v1425_v14  ;;  %v2284_v18 = vpack.c.bf16 %v482_v10, %v474_v7  ;;  %v1458_v10 = vld [vmem:[%s5552_s7 + $0x130] sm:$0xff] }
 0x140   :  { %v2270_v32 = vpack.c.bf16 %v435_v19, %v427_v17  ;;  %v490_v19 = vld [vmem:[%s5549_s5 + $0x710] sm:$0xff]  ;;  %v563_v7 = vld [vmem:[%s5549_s5 + $0x958] sm:$0xff] }
 0x141   :  { %2619 = vmatprep.subr.bf16.mxu0 %v2618_v21  ;;  %v1445_v21 = vld [vmem:[%s5552_s7 + $0xc8] sm:$0xff] }
 0x142   :  { %2241 = vmatpush1.bf16.msra.mxu1 %v2240_v29  ;;  %v2268_v29 = vpack.c.bf16 %v418_v16, %v410_v13  ;;  %2621 = vmatpush1.bf16.msra.mxu0 %v2620_v24  ;;  %v499_v13 = vld [vmem:[%s5549_s5 + $0x758] sm:$0xff]  ;;  %v1442_v16 = vld [vmem:[%s5552_s7 + $0xb0] sm:$0xff] }
 0x143   :  { %2243 = vmatprep.subr.bf16.mxu1 %v2242_v30  ;;  %v426_v30 = vld [vmem:[%s5549_s5 + $0x510] sm:$0xff]  ;;  %v2286_v22 = vpack.c.bf16 %v499_v13, %v491_v5  ;;  %v507_v24 = vld [vmem:[%s5549_s5 + $0x798] sm:$0xff] }
 0x144   :  { %v554_v13 = vld [vmem:[%s5549_s5 + $0x910] sm:$0xff] }
 0x146   :  { %2245 = vmatpush1.bf16.msra.mxu1 %v2244_v35  ;;  %v1431_v35 = vld [vmem:[%s5552_s7 + $0x58] sm:$0xff] }
 0x147   :  { %2247 = vmatprep.subr.bf16.mxu1 %v2246_v36  ;;  %v451_v36 = vld [vmem:[%s5549_s5 + $0x5d8] sm:$0xff]  ;;  %v2622_v37 = vpack.c.bf16 %v1431_v35, %v1429_v31  ;;  %v2288_v35 = vpack.c.bf16 %v498_v23, %v490_v19  ;;  %v1462_v23 = vld [vmem:[%s5552_s7 + $0x150] sm:$0xff] }
 0x148   :  { %v2274_v47 = vpack.c.bf16 %v451_v36, %v443_v34  ;;  %v506_v36 = vld [vmem:[%s5549_s5 + $0x790] sm:$0xff]  ;;  %v579_v19 = vld [vmem:[%s5549_s5 + $0x9d8] sm:$0xff] }
 0x149   :  { %2623 = vmatprep.subr.bf16.mxu0 %v2622_v37  ;;  %v1449_v37 = vld [vmem:[%s5552_s7 + $0xe8] sm:$0xff] }
 0x14a   :  { %2249 = vmatpush1.bf16.msra.mxu1 %v2248_v42  ;;  %v2272_v42 = vpack.c.bf16 %v434_v33, %v426_v30  ;;  %2625 = vmatpush1.bf16.msra.mxu0 %v2624_v41  ;;  %v515_v30 = vld [vmem:[%s5549_s5 + $0x7d8] sm:$0xff]  ;;  %v1446_v33 = vld [vmem:[%s5552_s7 + $0xd0] sm:$0xff] }
 0x14b   :  { %2251 = vmatprep.subr.bf16.mxu1 %v2250_v45  ;;  %v442_v45 = vld [vmem:[%s5549_s5 + $0x590] sm:$0xff]  ;;  %v2290_v38 = vpack.c.bf16 %v515_v30, %v507_v24  ;;  %v523_v41 = vld [vmem:[%s5549_s5 + $0x818] sm:$0xff] }
 0x14c   :  { %v570_v30 = vld [vmem:[%s5549_s5 + $0x990] sm:$0xff] }
 0x14e   :  { %2253 = vmatpush1.bf16.msra.mxu1 %v2252_v51  ;;  %v1435_v51 = vld [vmem:[%s5552_s7 + $0x78] sm:$0xff] }
 0x14f   :  { %2255 = vmatprep.subr.bf16.mxu1 %v2254_v52  ;;  %v467_v52 = vld [vmem:[%s5549_s5 + $0x658] sm:$0xff]  ;;  %v2626_v53 = vpack.c.bf16 %v1435_v51, %v1433_v46  ;;  %v2292_v51 = vpack.c.bf16 %v514_v39, %v506_v36  ;;  %v1466_v39 = vld [vmem:[%s5552_s7 + $0x170] sm:$0xff] }
 0x150   :  { %v2278_v60 = vpack.c.bf16 %v467_v52, %v459_v50  ;;  %v522_v52 = vld [vmem:[%s5549_s5 + $0x810] sm:$0xff]  ;;  %v595_v36 = vld [vmem:[%s5549_s5 + $0xa58] sm:$0xff] }
 0x151   :  { %2627 = vmatprep.subr.bf16.mxu0 %v2626_v53  ;;  %v1453_v53 = vld [vmem:[%s5552_s7 + $0x108] sm:$0xff] }
 0x152   :  { %2257 = vmatpush1.bf16.msra.mxu1 %v2256_v57  ;;  %v2276_v57 = vpack.c.bf16 %v450_v48, %v442_v45  ;;  %2629 = vmatpush1.bf16.msra.mxu0 %v2628_v56  ;;  %v531_v45 = vld [vmem:[%s5549_s5 + $0x858] sm:$0xff]  ;;  %v1450_v48 = vld [vmem:[%s5552_s7 + $0xf0] sm:$0xff] }
 0x153   :  { %2259 = vmatprep.subr.bf16.mxu1 %v2258_v58  ;;  %v458_v58 = vld [vmem:[%s5549_s5 + $0x610] sm:$0xff]  ;;  %v2294_v54 = vpack.c.bf16 %v531_v45, %v523_v41  ;;  %v539_v56 = vld [vmem:[%s5549_s5 + $0x898] sm:$0xff] }
 0x154   :  { %v2280_v6 = vpack.c.bf16 %v466_v61, %v458_v58  ;;  %v547_v58 = vld [vmem:[%s5549_s5 + $0x8d8] sm:$0xff]  ;;  %v1454_v61 = vld [vmem:[%s5552_s7 + $0x110] sm:$0xff] }
 0x155   :  { %v586_v45 = vld [vmem:[%s5549_s5 + $0xa10] sm:$0xff] }
 0x156   :  { %2261 = vmatpush1.bf16.msra.mxu1 %v2260_v27  ;;  %v1439_v27 = vld [vmem:[%s5552_s7 + $0x98] sm:$0xff] }
 0x157   :  { %2263 = vmatprep.subr.bf16.mxu1 %v2262_v1  ;;  %v2630_v0 = vpack.c.bf16 %v1439_v27, %v1437_v59  ;;  %v1436_v1 = vld [vmem:[%s5552_s7 + $0x80] sm:$0xff]  ;;  %v2296_v27 = vpack.c.bf16 %v530_v55, %v522_v52  ;;  %v611_v52 = vld [vmem:[%s5549_s5 + $0xad8] sm:$0xff]  ;;  %v1470_v55 = vld [vmem:[%s5552_s7 + $0x190] sm:$0xff] }
 0x158   :  { %v2632_v4 = vpack.c.bf16 %v1438_v2, %v1436_v1  ;;  %v2298_v1 = vpack.c.bf16 %v547_v58, %v539_v56  ;;  %v546_v2 = vld [vmem:[%s5549_s5 + $0x8d0] sm:$0xff] }
 0x159   :  { %2631 = vmatprep.subr.bf16.mxu0 %v2630_v0  ;;  %v1457_v0 = vld [vmem:[%s5552_s7 + $0x128] sm:$0xff]  ;;  %v602_v58 = vld [vmem:[%s5549_s5 + $0xa90] sm:$0xff] }
 0x15a   :  { %2265 = vmatpush1.bf16.msra.mxu1 %v2264_v12  ;;  %2633 = vmatpush1.bf16.msra.mxu0 %v2632_v4  ;;  %v1443_v12 = vld [vmem:[%s5552_s7 + $0xb8] sm:$0xff] }
 0x15b   :  { %2267 = vmatprep.subr.bf16.mxu1 %v2266_v15  ;;  %v2634_v14 = vpack.c.bf16 %v1443_v12, %v1441_v8  ;;  %v1440_v15 = vld [vmem:[%s5552_s7 + $0xa0] sm:$0xff]  ;;  %v555_v4 = vld [vmem:[%s5549_s5 + $0x918] sm:$0xff]  ;;  %v2300_v12 = vpack.c.bf16 %v546_v2, %v538_v63  ;;  %v1474_v2 = vld [vmem:[%s5552_s7 + $0x1b0] sm:$0xff] }
 0x15c   :  { %v2636_v17 = vpack.c.bf16 %v1442_v16, %v1440_v15  ;;  %v2302_v15 = vpack.c.bf16 %v563_v7, %v555_v4  ;;  %v562_v16 = vld [vmem:[%s5549_s5 + $0x950] sm:$0xff]  ;;  %v627_v63 = vld [vmem:[%s5549_s5 + $0xb58] sm:$0xff] }
 0x15d   :  { %2635 = vmatprep.subr.bf16.mxu0 %v2634_v14  ;;  %v1461_v14 = vld [vmem:[%s5552_s7 + $0x148] sm:$0xff]  ;;  %v618_v7 = vld [vmem:[%s5549_s5 + $0xb10] sm:$0xff] }
 0x15e   :  { %2269 = vmatpush1.bf16.msra.mxu1 %v2268_v29  ;;  %2637 = vmatpush1.bf16.msra.mxu0 %v2636_v17  ;;  %v1447_v29 = vld [vmem:[%s5552_s7 + $0xd8] sm:$0xff] }
 0x15f   :  { %2271 = vmatprep.subr.bf16.mxu1 %v2270_v32  ;;  %v2638_v31 = vpack.c.bf16 %v1447_v29, %v1445_v21  ;;  %v1444_v32 = vld [vmem:[%s5552_s7 + $0xc0] sm:$0xff]  ;;  %v571_v17 = vld [vmem:[%s5549_s5 + $0x998] sm:$0xff]  ;;  %v2304_v29 = vpack.c.bf16 %v562_v16, %v554_v13  ;;  %v1478_v16 = vld [vmem:[%s5552_s7 + $0x1d0] sm:$0xff] }
 0x160   :  { %v2640_v34 = vpack.c.bf16 %v1446_v33, %v1444_v32  ;;  %v2306_v32 = vpack.c.bf16 %v579_v19, %v571_v17  ;;  %v578_v33 = vld [vmem:[%s5549_s5 + $0x9d0] sm:$0xff]  ;;  %v643_v13 = vld [vmem:[%s5549_s5 + $0xbd8] sm:$0xff] }
 0x161   :  { %2639 = vmatprep.subr.bf16.mxu0 %v2638_v31  ;;  %v1465_v31 = vld [vmem:[%s5552_s7 + $0x168] sm:$0xff]  ;;  %v634_v19 = vld [vmem:[%s5549_s5 + $0xb90] sm:$0xff] }
 0x162   :  { %2273 = vmatpush1.bf16.msra.mxu1 %v2272_v42  ;;  %2641 = vmatpush1.bf16.msra.mxu0 %v2640_v34  ;;  %v1451_v42 = vld [vmem:[%s5552_s7 + $0xf8] sm:$0xff] }
 0x163   :  { %2275 = vmatprep.subr.bf16.mxu1 %v2274_v47  ;;  %v2642_v46 = vpack.c.bf16 %v1451_v42, %v1449_v37  ;;  %v1448_v47 = vld [vmem:[%s5552_s7 + $0xe0] sm:$0xff]  ;;  %v587_v34 = vld [vmem:[%s5549_s5 + $0xa18] sm:$0xff]  ;;  %v2308_v42 = vpack.c.bf16 %v578_v33, %v570_v30  ;;  %v1482_v33 = vld [vmem:[%s5552_s7 + $0x1f0] sm:$0xff] }
 0x164   :  { %v2644_v50 = vpack.c.bf16 %v1450_v48, %v1448_v47  ;;  %v2310_v47 = vpack.c.bf16 %v595_v36, %v587_v34  ;;  %v594_v48 = vld [vmem:[%s5549_s5 + $0xa50] sm:$0xff]  ;;  %v659_v30 = vld [vmem:[%s5549_s5 + $0xc58] sm:$0xff] }
 0x165   :  { %2643 = vmatprep.subr.bf16.mxu0 %v2642_v46  ;;  %v1469_v46 = vld [vmem:[%s5552_s7 + $0x188] sm:$0xff] }
 0x166   :  { %2277 = vmatpush1.bf16.msra.mxu1 %v2276_v57  ;;  %2645 = vmatpush1.bf16.msra.mxu0 %v2644_v50  ;;  %v1455_v57 = vld [vmem:[%s5552_s7 + $0x118] sm:$0xff] }
 0x167   :  { %2279 = vmatprep.subr.bf16.mxu1 %v2278_v60  ;;  %v2646_v59 = vpack.c.bf16 %v1455_v57, %v1453_v53  ;;  %v1452_v60 = vld [vmem:[%s5552_s7 + $0x100] sm:$0xff]  ;;  %v603_v50 = vld [vmem:[%s5549_s5 + $0xa98] sm:$0xff]  ;;  %v2312_v57 = vpack.c.bf16 %v594_v48, %v586_v45 }
 0x168   :  { %v2648_v62 = vpack.c.bf16 %v1454_v61, %v1452_v60  ;;  %v2314_v60 = vpack.c.bf16 %v611_v52, %v603_v50  ;;  %v610_v61 = vld [vmem:[%s5549_s5 + $0xad0] sm:$0xff]  ;;  %v683_v48 = vld [vmem:[%s5549_s5 + $0xd18] sm:$0xff] }
 0x169   :  { %2647 = vmatprep.subr.bf16.mxu0 %v2646_v59  ;;  %v1473_v59 = vld [vmem:[%s5552_s7 + $0x1a8] sm:$0xff]  ;;  %v691_v50 = vld [vmem:[%s5549_s5 + $0xd58] sm:$0xff] }
 0x16a   :  { %2281 = vmatpush1.bf16.msra.mxu1 %v2280_v6  ;;  %2649 = vmatpush1.bf16.msra.mxu0 %v2648_v62  ;;  %v1459_v6 = vld [vmem:[%s5552_s7 + $0x138] sm:$0xff]  ;;  %v2334_v52 = vpack.c.bf16 %v691_v50, %v683_v48  ;;  %v302_v50 = vld [vmem:[%s5549_s5 + $0x130] sm:$0xff] }
 0x16b   :  { %2283 = vmatprep.subr.bf16.mxu1 %v2282_v9  ;;  %v2650_v8 = vpack.c.bf16 %v1459_v6, %v1457_v0  ;;  %v1456_v9 = vld [vmem:[%s5552_s7 + $0x120] sm:$0xff]  ;;  %v619_v62 = vld [vmem:[%s5549_s5 + $0xb18] sm:$0xff]  ;;  %v2316_v6 = vpack.c.bf16 %v610_v61, %v602_v58 }
 0x16c   :  { %v2652_v5 = vpack.c.bf16 %v1458_v10, %v1456_v9  ;;  %v2318_v9 = vpack.c.bf16 %v627_v63, %v619_v62  ;;  %v635_v10 = vld [vmem:[%s5549_s5 + $0xb98] sm:$0xff] }
 0x16d   :  { %2651 = vmatprep.subr.bf16.mxu0 %v2650_v8  ;;  %v626_v8 = vld [vmem:[%s5549_s5 + $0xb50] sm:$0xff]  ;;  %v715_v61 = vld [vmem:[%s5549_s5 + $0xe18] sm:$0xff] }
 0x16e   :  { %2285 = vmatpush1.bf16.msra.mxu1 %v2284_v18  ;;  %v1463_v18 = vld [vmem:[%s5552_s7 + $0x158] sm:$0xff]  ;;  %2653 = vmatpush1.bf16.msra.mxu0 %v2652_v5  ;;  %v1477_v5 = vld [vmem:[%s5552_s7 + $0x1c8] sm:$0xff] }
 0x16f   :  { %2287 = vmatprep.subr.bf16.mxu1 %v2286_v22  ;;  %v2654_v21 = vpack.c.bf16 %v1463_v18, %v1461_v14  ;;  %v1460_v22 = vld [vmem:[%s5552_s7 + $0x140] sm:$0xff]  ;;  %v2320_v18 = vpack.c.bf16 %v626_v8, %v618_v7  ;;  %v723_v62 = vld [vmem:[%s5549_s5 + $0xe58] sm:$0xff]  ;;  %v730_v8 = vld [vmem:[%s5549_s5 + $0xe90] sm:$0xff] }
 0x170   :  { %v2656_v24 = vpack.c.bf16 %v1462_v23, %v1460_v22  ;;  %v2322_v22 = vpack.c.bf16 %v643_v13, %v635_v10  ;;  %v642_v23 = vld [vmem:[%s5549_s5 + $0xbd0] sm:$0xff]  ;;  %v2342_v63 = vpack.c.bf16 %v723_v62, %v715_v61  ;;  %v747_v10 = vld [vmem:[%s5549_s5 + $0xf18] sm:$0xff] }
 0x171   :  { %2655 = vmatprep.subr.bf16.mxu0 %v2654_v21  ;;  %v1481_v21 = vld [vmem:[%s5552_s7 + $0x1e8] sm:$0xff]  ;;  %v334_v61 = vld [vmem:[%s5549_s5 + $0x230] sm:$0xff] }
 0x172   :  { %2289 = vmatpush1.bf16.msra.mxu1 %v2288_v35  ;;  %v1467_v35 = vld [vmem:[%s5552_s7 + $0x178] sm:$0xff]  ;;  %2657 = vmatpush1.bf16.msra.mxu0 %v2656_v24  ;;  %v342_v62 = vld [vmem:[%s5549_s5 + $0x270] sm:$0xff] }
 0x173   :  { %2291 = vmatprep.subr.bf16.mxu1 %v2290_v38  ;;  %v2658_v37 = vpack.c.bf16 %v1467_v35, %v1465_v31  ;;  %v1464_v38 = vld [vmem:[%s5552_s7 + $0x160] sm:$0xff]  ;;  %v651_v24 = vld [vmem:[%s5549_s5 + $0xc18] sm:$0xff]  ;;  %v2324_v35 = vpack.c.bf16 %v642_v23, %v634_v19 }
 0x174   :  { %v2660_v41 = vpack.c.bf16 %v1466_v39, %v1464_v38  ;;  %v2326_v36 = vpack.c.bf16 %v659_v30, %v651_v24  ;;  %v658_v38 = vld [vmem:[%s5549_s5 + $0xc50] sm:$0xff]  ;;  %v667_v39 = vld [vmem:[%s5549_s5 + $0xc98] sm:$0xff] }
 0x175   :  { %2659 = vmatprep.subr.bf16.mxu0 %v2658_v37  ;;  %v650_v37 = vld [vmem:[%s5549_s5 + $0xc10] sm:$0xff]  ;;  %v271_v23 = vld [vmem:[%s5549_s5 + $0x38] sm:$0xff] }
 0x176   :  { %2293 = vmatpush1.bf16.msra.mxu1 %v2292_v51  ;;  %v1471_v51 = vld [vmem:[%s5552_s7 + $0x198] sm:$0xff]  ;;  %2661 = vmatpush1.bf16.msra.mxu0 %v2660_v41 }
 0x177   :  { %2295 = vmatprep.subr.bf16.mxu1 %v2294_v54  ;;  %v2662_v53 = vpack.c.bf16 %v1471_v51, %v1469_v46  ;;  %v1468_v54 = vld [vmem:[%s5552_s7 + $0x180] sm:$0xff]  ;;  %v675_v41 = vld [vmem:[%s5549_s5 + $0xcd8] sm:$0xff]  ;;  %v666_v46 = vld [vmem:[%s5549_s5 + $0xc90] sm:$0xff] }
 0x178   :  { %v2664_v56 = vpack.c.bf16 %v1470_v55, %v1468_v54  ;;  %v2330_v45 = vpack.c.bf16 %v675_v41, %v667_v39  ;;  %v690_v54 = vld [vmem:[%s5549_s5 + $0xd50] sm:$0xff]  ;;  %v699_v55 = vld [vmem:[%s5549_s5 + $0xd98] sm:$0xff] }
 0x179   :  { %1025 = vmatmul.mubr.f32.vlgmr.msra.gmra.mrb[4].mxu1 %v3570_v49  ;;  %2663 = vmatprep.subr.bf16.mxu0 %v2662_v53  ;;  %v682_v53 = vld [vmem:[%s5549_s5 + $0xd10] sm:$0xff]  ;;  %v279_v24 = vld [vmem:[%s5549_s5 + $0x78] sm:$0xff] }
 0x17a   :  { %2297 = vmatpush1.bf16.msra.mxu1 %v2296_v27  ;;  %1095 = vmatprep.mubr.f32.mxu1 %v3638_v20  ;;  %v1475_v27 = vld [vmem:[%s5552_s7 + $0x1b8] sm:$0xff]  ;;  %v2486_v30 = vpack.c.bf16 %v279_v24, %v271_v23  ;;  %v398_v23 = vld [vmem:[%s5549_s5 + $0x430] sm:$0xff] }
 0x17b   :  { %2299 = vmatprep.subr.bf16.mxu1 %v2298_v1  ;;  %2665 = vmatpush1.bf16.msra.mxu0 %v2664_v56  ;;  %v2666_v0 = vpack.c.bf16 %v1475_v27, %v1473_v59  ;;  %v1472_v1 = vld [vmem:[%s5552_s7 + $0x1a0] sm:$0xff]  ;;  %v707_v56 = vld [vmem:[%s5549_s5 + $0xdd8] sm:$0xff]  ;;  %v698_v59 = vld [vmem:[%s5549_s5 + $0xd90] sm:$0xff] }
 0x17c   :  { %v2668_v4 = vpack.c.bf16 %v1474_v2, %v1472_v1  ;;  %v2338_v58 = vpack.c.bf16 %v707_v56, %v699_v55  ;;  %v722_v1 = vld [vmem:[%s5549_s5 + $0xe50] sm:$0xff]  ;;  %v731_v2 = vld [vmem:[%s5549_s5 + $0xe98] sm:$0xff] }
 0x17d   :  { %2667 = vmatprep.subr.bf16.mxu0 %v2666_v0  ;;  %v714_v0 = vld [vmem:[%s5549_s5 + $0xe10] sm:$0xff]  ;;  %v303_v39 = vld [vmem:[%s5549_s5 + $0x138] sm:$0xff] }
 0x17e   :  { %2301 = vmatpush1.bf16.msra.mxu1 %v2300_v12  ;;  %v1479_v12 = vld [vmem:[%s5552_s7 + $0x1d8] sm:$0xff]  ;;  %v318_v55 = vld [vmem:[%s5549_s5 + $0x1b0] sm:$0xff] }
 0x17f   :  { %2303 = vmatprep.subr.bf16.mxu1 %v2302_v15  ;;  %2669 = vmatpush1.bf16.msra.mxu0 %v2668_v4  ;;  %v2670_v14 = vpack.c.bf16 %v1479_v12, %v1477_v5  ;;  %v1476_v15 = vld [vmem:[%s5552_s7 + $0x1c0] sm:$0xff]  ;;  %v739_v4 = vld [vmem:[%s5549_s5 + $0xed8] sm:$0xff]  ;;  %v326_v56 = vld [vmem:[%s5549_s5 + $0x1f0] sm:$0xff] }
 0x180   :  { %v2672_v17 = vpack.c.bf16 %v1478_v16, %v1476_v15  ;;  %v2346_v7 = vpack.c.bf16 %v739_v4, %v731_v2  ;;  %v755_v5 = vld [vmem:[%s5549_s5 + $0xf58] sm:$0xff]  ;;  %v754_v15 = vld [vmem:[%s5549_s5 + $0xf50] sm:$0xff] }
 0x181   :  { %2671 = vmatprep.subr.bf16.mxu0 %v2670_v14  ;;  %v2350_v13 = vpack.c.bf16 %v755_v5, %v747_v10  ;;  %v746_v14 = vld [vmem:[%s5549_s5 + $0xf10] sm:$0xff]  ;;  %v763_v16 = vld [vmem:[%s5549_s5 + $0xf98] sm:$0xff] }
 0x182   :  { %2305 = vmatpush1.bf16.msra.mxu1 %v2304_v29  ;;  %v1483_v29 = vld [vmem:[%s5552_s7 + $0x1f8] sm:$0xff]  ;;  %v350_v2 = vld [vmem:[%s5549_s5 + $0x2b0] sm:$0xff] }
 0x183   :  { %2307 = vmatprep.subr.bf16.mxu1 %v2306_v32  ;;  %2673 = vmatpush1.bf16.msra.mxu0 %v2672_v17  ;;  %v2674_v31 = vpack.c.bf16 %v1483_v29, %v1481_v21  ;;  %v1480_v32 = vld [vmem:[%s5552_s7 + $0x1e0] sm:$0xff]  ;;  %v771_v17 = vld [vmem:[%s5549_s5 + $0xfd8] sm:$0xff]  ;;  %v762_v21 = vld [vmem:[%s5549_s5 + $0xf90] sm:$0xff] }
 0x184   :  { %v2676_v34 = vpack.c.bf16 %v1482_v33, %v1480_v32  ;;  %v2354_v19 = vpack.c.bf16 %v771_v17, %v763_v16  ;;  %v278_v32 = vld [vmem:[%s5549_s5 + $0x70] sm:$0xff]  ;;  %v287_v33 = vld [vmem:[%s5549_s5 + $0xb8] sm:$0xff] }
 0x185   :  { %2675 = vmatprep.subr.bf16.mxu0 %v2674_v31  ;;  %v270_v31 = vld [vmem:[%s5549_s5 + $0x30] sm:$0xff]  ;;  %v311_v41 = vld [vmem:[%s5549_s5 + $0x178] sm:$0xff] }
 0x186   :  { %2309 = vmatpush1.bf16.msra.mxu1 %v2308_v42  ;;  %v2328_v42 = vpack.c.bf16 %v658_v38, %v650_v37  ;;  %v286_v37 = vld [vmem:[%s5549_s5 + $0xb0] sm:$0xff]  ;;  %v2494_v48 = vpack.c.bf16 %v311_v41, %v303_v39 }
 0x187   :  { %2311 = vmatprep.subr.bf16.mxu1 %v2310_v47  ;;  %2677 = vmatpush1.bf16.msra.mxu0 %v2676_v34  ;;  %v674_v47 = vld [vmem:[%s5549_s5 + $0xcd0] sm:$0xff]  ;;  %v295_v34 = vld [vmem:[%s5549_s5 + $0xf8] sm:$0xff] }
 0x188   :  { %v2332_v51 = vpack.c.bf16 %v674_v47, %v666_v46  ;;  %v294_v38 = vld [vmem:[%s5549_s5 + $0xf0] sm:$0xff] }
 0x189   :  { %v2492_v46 = vpack.c.bf16 %v294_v38, %v286_v37  ;;  %v358_v4 = vld [vmem:[%s5549_s5 + $0x2f0] sm:$0xff] }
 0x18a   :  { %2313 = vmatpush1.bf16.msra.mxu1 %v2312_v57  ;;  %v2336_v57 = vpack.c.bf16 %v690_v54, %v682_v53  ;;  %v366_v10 = vld [vmem:[%s5549_s5 + $0x330] sm:$0xff] }
 0x18b   :  { %2315 = vmatprep.subr.bf16.mxu1 %v2314_v60  ;;  %v706_v60 = vld [vmem:[%s5549_s5 + $0xdd0] sm:$0xff] }
 0x18c   :  { %v2340_v27 = vpack.c.bf16 %v706_v60, %v698_v59  ;;  %v2500_v59 = vpack.c.bf16 %v326_v56, %v318_v55  ;;  %v374_v5 = vld [vmem:[%s5549_s5 + $0x370] sm:$0xff]  ;;  %v479_v56 = vld [vmem:[%s5549_s5 + $0x6b8] sm:$0xff] }
 0x18d   :  { %v382_v16 = vld [vmem:[%s5549_s5 + $0x3b0] sm:$0xff] }
 0x18e   :  { %2317 = vmatpush1.bf16.msra.mxu1 %v2316_v6  ;;  %v2344_v6 = vpack.c.bf16 %v722_v1, %v714_v0  ;;  %v2504_v0 = vpack.c.bf16 %v342_v62, %v334_v61  ;;  %v390_v17 = vld [vmem:[%s5549_s5 + $0x3f0] sm:$0xff]  ;;  %v495_v62 = vld [vmem:[%s5549_s5 + $0x738] sm:$0xff] }
 0x18f   :  { %2319 = vmatprep.subr.bf16.mxu1 %v2318_v9  ;;  %v738_v9 = vld [vmem:[%s5549_s5 + $0xed0] sm:$0xff] }
 0x190   :  { %v2348_v12 = vpack.c.bf16 %v738_v9, %v730_v8  ;;  %v2508_v8 = vpack.c.bf16 %v358_v4, %v350_v2  ;;  %v406_v24 = vld [vmem:[%s5549_s5 + $0x470] sm:$0xff]  ;;  %v511_v4 = vld [vmem:[%s5549_s5 + $0x7b8] sm:$0xff] }
 0x191   :  { %v430_v39 = vld [vmem:[%s5549_s5 + $0x530] sm:$0xff] }
 0x192   :  { %2321 = vmatpush1.bf16.msra.mxu1 %v2320_v18  ;;  %v2352_v18 = vpack.c.bf16 %v754_v15, %v746_v14  ;;  %v2512_v14 = vpack.c.bf16 %v374_v5, %v366_v10  ;;  %v438_v41 = vld [vmem:[%s5549_s5 + $0x570] sm:$0xff]  ;;  %v527_v5 = vld [vmem:[%s5549_s5 + $0x838] sm:$0xff] }
 0x193   :  { %2323 = vmatprep.subr.bf16.mxu1 %v2322_v22  ;;  %v770_v22 = vld [vmem:[%s5549_s5 + $0xfd0] sm:$0xff] }
 0x194   :  { %v2356_v29 = vpack.c.bf16 %v770_v22, %v762_v21  ;;  %v2516_v21 = vpack.c.bf16 %v390_v17, %v382_v16  ;;  %v470_v55 = vld [vmem:[%s5549_s5 + $0x670] sm:$0xff]  ;;  %v543_v17 = vld [vmem:[%s5549_s5 + $0x8b8] sm:$0xff] }
 0x195   :  { %v486_v61 = vld [vmem:[%s5549_s5 + $0x6f0] sm:$0xff] }
 0x196   :  { %2325 = vmatpush1.bf16.msra.mxu1 %v2324_v35  ;;  %v2488_v35 = vpack.c.bf16 %v278_v32, %v270_v31  ;;  %v2520_v31 = vpack.c.bf16 %v406_v24, %v398_v23  ;;  %v502_v2 = vld [vmem:[%s5549_s5 + $0x770] sm:$0xff]  ;;  %v559_v24 = vld [vmem:[%s5549_s5 + $0x938] sm:$0xff] }
 0x197   :  { %2327 = vmatprep.subr.bf16.mxu1 %v2326_v36  ;;  %v2490_v36 = vpack.c.bf16 %v295_v34, %v287_v33  ;;  %v414_v33 = vld [vmem:[%s5549_s5 + $0x4b0] sm:$0xff] }
 0x198   :  { %v422_v34 = vld [vmem:[%s5549_s5 + $0x4f0] sm:$0xff] }
 0x199   :  { %v2524_v37 = vpack.c.bf16 %v422_v34, %v414_v33  ;;  %v518_v10 = vld [vmem:[%s5549_s5 + $0x7f0] sm:$0xff]  ;;  %v575_v34 = vld [vmem:[%s5549_s5 + $0x9b8] sm:$0xff] }
 0x19a   :  { %2329 = vmatpush1.bf16.msra.mxu1 %v2328_v42  ;;  %v1485_v42 = vld [vmem:[%s5552_s7 + $0x208] sm:$0xff]  ;;  %v534_v16 = vld [vmem:[%s5549_s5 + $0x870] sm:$0xff] }
 0x19b   :  { %2331 = vmatprep.subr.bf16.mxu1 %v2330_v45  ;;  %v1487_v45 = vld [vmem:[%s5552_s7 + $0x218] sm:$0xff]  ;;  %v550_v23 = vld [vmem:[%s5549_s5 + $0x8f0] sm:$0xff] }
 0x19c   :  { %v2678_v47 = vpack.c.bf16 %v1487_v45, %v1485_v42  ;;  %v447_v42 = vld [vmem:[%s5549_s5 + $0x5b8] sm:$0xff]  ;;  %v566_v33 = vld [vmem:[%s5549_s5 + $0x970] sm:$0xff] }
 0x19d   :  { %v455_v45 = vld [vmem:[%s5549_s5 + $0x5f8] sm:$0xff] }
 0x19e   :  { %2333 = vmatpush1.bf16.msra.mxu1 %v2332_v51  ;;  %v310_v51 = vld [vmem:[%s5549_s5 + $0x170] sm:$0xff]  ;;  %2679 = vmatprep.subr.bf16.mxu0 %v2678_v47  ;;  %v2530_v47 = vpack.c.bf16 %v455_v45, %v447_v42 }
 0x19f   :  { %2335 = vmatprep.subr.bf16.mxu1 %v2334_v52  ;;  %v319_v52 = vld [vmem:[%s5549_s5 + $0x1b8] sm:$0xff]  ;;  %v2496_v53 = vpack.c.bf16 %v310_v51, %v302_v50  ;;  %v454_v50 = vld [vmem:[%s5549_s5 + $0x5f0] sm:$0xff] }
 0x1a0   :  { %v463_v51 = vld [vmem:[%s5549_s5 + $0x638] sm:$0xff]  ;;  %v590_v45 = vld [vmem:[%s5549_s5 + $0xa30] sm:$0xff] }
 0x1a2   :  { %2337 = vmatpush1.bf16.msra.mxu1 %v2336_v57  ;;  %v335_v57 = vld [vmem:[%s5549_s5 + $0x238] sm:$0xff] }
 0x1a3   :  { %2339 = vmatprep.subr.bf16.mxu1 %v2338_v58  ;;  %v343_v58 = vld [vmem:[%s5549_s5 + $0x278] sm:$0xff] }
 0x1a4   :  { %v2502_v60 = vpack.c.bf16 %v343_v58, %v335_v57  ;;  %v487_v57 = vld [vmem:[%s5549_s5 + $0x6f8] sm:$0xff] }
 0x1a6   :  { %2341 = vmatpush1.bf16.msra.mxu1 %v2340_v27  ;;  %v351_v27 = vld [vmem:[%s5549_s5 + $0x2b8] sm:$0xff] }
 0x1a7   :  { %2343 = vmatprep.subr.bf16.mxu1 %v2342_v63  ;;  %v359_v63 = vld [vmem:[%s5549_s5 + $0x2f8] sm:$0xff] }
 0x1a8   :  { %v2506_v1 = vpack.c.bf16 %v359_v63, %v351_v27  ;;  %v503_v27 = vld [vmem:[%s5549_s5 + $0x778] sm:$0xff] }
 0x1aa   :  { %2345 = vmatpush1.bf16.msra.mxu1 %v2344_v6  ;;  %v367_v6 = vld [vmem:[%s5549_s5 + $0x338] sm:$0xff] }
 0x1ab   :  { %2347 = vmatprep.subr.bf16.mxu1 %v2346_v7  ;;  %v375_v7 = vld [vmem:[%s5549_s5 + $0x378] sm:$0xff] }
 0x1ac   :  { %v2510_v9 = vpack.c.bf16 %v375_v7, %v367_v6  ;;  %v519_v6 = vld [vmem:[%s5549_s5 + $0x7f8] sm:$0xff] }
 0x1ae   :  { %2349 = vmatpush1.bf16.msra.mxu1 %v2348_v12  ;;  %v383_v12 = vld [vmem:[%s5549_s5 + $0x3b8] sm:$0xff] }
 0x1af   :  { %2351 = vmatprep.subr.bf16.mxu1 %v2350_v13  ;;  %v391_v13 = vld [vmem:[%s5549_s5 + $0x3f8] sm:$0xff] }
 0x1b0   :  { %v2514_v15 = vpack.c.bf16 %v391_v13, %v383_v12  ;;  %v535_v12 = vld [vmem:[%s5549_s5 + $0x878] sm:$0xff] }
 0x1b2   :  { %2353 = vmatpush1.bf16.msra.mxu1 %v2352_v18  ;;  %v399_v18 = vld [vmem:[%s5549_s5 + $0x438] sm:$0xff] }
 0x1b3   :  { %2355 = vmatprep.subr.bf16.mxu1 %v2354_v19  ;;  %v407_v19 = vld [vmem:[%s5549_s5 + $0x478] sm:$0xff] }
 0x1b4   :  { %v2518_v22 = vpack.c.bf16 %v407_v19, %v399_v18  ;;  %v551_v18 = vld [vmem:[%s5549_s5 + $0x8f8] sm:$0xff] }
 0x1b6   :  { %2357 = vmatpush1.bf16.msra.mxu1 %v2356_v29  ;;  %v415_v29 = vld [vmem:[%s5549_s5 + $0x4b8] sm:$0xff] }
 0x1b7   :  { %2487 = vmatprep.subr.bf16.mxu1 %v2486_v30  ;;  %v423_v30 = vld [vmem:[%s5549_s5 + $0x4f8] sm:$0xff] }
 0x1b8   :  { %v2522_v32 = vpack.c.bf16 %v423_v30, %v415_v29  ;;  %v567_v29 = vld [vmem:[%s5549_s5 + $0x978] sm:$0xff] }
 0x1b9   :  { %1096 = vmatmul.mubr.f32.vlgmr.msra.gmra.mrb[4].mxu1 %v3950_v11 }
 0x1ba   :  { %2489 = vmatpush1.bf16.msra.mxu1 %v2488_v35  ;;  %1308 = vmatprep.mubr.f32.mxu1 %v3562_v44  ;;  %v327_v44 = vld [vmem:[%s5549_s5 + $0x1f8] sm:$0xff] }
 0x1bb   :  { %2491 = vmatprep.subr.bf16.mxu1 %v2490_v36  ;;  %v2498_v54 = vpack.c.bf16 %v327_v44, %v319_v52  ;;  %v431_v35 = vld [vmem:[%s5549_s5 + $0x538] sm:$0xff] }
 0x1bc   :  { %v439_v36 = vld [vmem:[%s5549_s5 + $0x578] sm:$0xff] }
 0x1bd   :  { %v2526_v38 = vpack.c.bf16 %v439_v36, %v431_v35  ;;  %v471_v52 = vld [vmem:[%s5549_s5 + $0x678] sm:$0xff]  ;;  %v574_v36 = vld [vmem:[%s5549_s5 + $0x9b0] sm:$0xff] }
 0x1be   :  { %2493 = vmatpush1.bf16.msra.mxu1 %v2492_v46  ;;  %v2528_v46 = vpack.c.bf16 %v438_v41, %v430_v39  ;;  %v599_v39 = vld [vmem:[%s5549_s5 + $0xa78] sm:$0xff] }
 0x1bf   :  { %2495 = vmatprep.subr.bf16.mxu1 %v2494_v48  ;;  %v446_v48 = vld [vmem:[%s5549_s5 + $0x5b0] sm:$0xff] }
 0x1c0   :  { %v2532_v44 = vpack.c.bf16 %v454_v50, %v446_v48  ;;  %v615_v48 = vld [vmem:[%s5549_s5 + $0xaf8] sm:$0xff]  ;;  %v796_v50 = vsub.s32 4, %v3520_v25 }
 0x1c2   :  { %2497 = vmatpush1.bf16.msra.mxu1 %v2496_v53  ;;  %v2534_v53 = vpack.c.bf16 %v471_v52, %v463_v51  ;;  %v4787_v52 = vld [vmem:[%s5553_s6] sm:$0xff] }
 0x1c3   :  { %2499 = vmatprep.subr.bf16.mxu1 %v2498_v54  ;;  %v462_v54 = vld [vmem:[%s5549_s5 + $0x630] sm:$0xff] }
 0x1c4   :  { %v2536_v58 = vpack.c.bf16 %v470_v55, %v462_v54  ;;  %v606_v54 = vld [vmem:[%s5549_s5 + $0xab0] sm:$0xff] }
 0x1c5   :  { %v614_v55 = vld [vmem:[%s5549_s5 + $0xaf0] sm:$0xff] }
 0x1c6   :  { %2501 = vmatpush1.bf16.msra.mxu1 %v2500_v59  ;;  %v2538_v59 = vpack.c.bf16 %v487_v57, %v479_v56  ;;  %v623_v56 = vld [vmem:[%s5549_s5 + $0xb38] sm:$0xff] }
 0x1c7   :  { %2503 = vmatprep.subr.bf16.mxu1 %v2502_v60  ;;  %v478_v60 = vld [vmem:[%s5549_s5 + $0x6b0] sm:$0xff]  ;;  %v631_v57 = vld [vmem:[%s5549_s5 + $0xb78] sm:$0xff] }
 0x1c8   :  { %v2540_v63 = vpack.c.bf16 %v486_v61, %v478_v60  ;;  %v785_v60 = vrot.slane %v4787_v52, %v3531_v28 }
 0x1ca   :  { %2505 = vmatpush1.bf16.msra.mxu1 %v2504_v0  ;;  %v2542_v0 = vpack.c.bf16 %v503_v27, %v495_v62  ;;  %v2572_v62 = vpack.c.bf16 %v614_v55, %v606_v54  ;;  %v2574_v27 = vpack.c.bf16 %v631_v57, %v623_v56  ;;  %v687_v54 = vld [vmem:[%s5549_s5 + $0xd38] sm:$0xff]  ;;  %v1492_v56 = vld [vmem:[%s5552_s7 + $0x240] sm:$0xff]  ;;  %v1494_v57 = vld [vmem:[%s5552_s7 + $0x250] sm:$0xff] }
 0x1cb   :  { %2507 = vmatprep.subr.bf16.mxu1 %v2506_v1  ;;  %v494_v1 = vld [vmem:[%s5549_s5 + $0x730] sm:$0xff] }
 0x1cc   :  { %v2544_v7 = vpack.c.bf16 %v502_v2, %v494_v1 }
 0x1ce   :  { %2509 = vmatpush1.bf16.msra.mxu1 %v2508_v8  ;;  %v2546_v8 = vpack.c.bf16 %v519_v6, %v511_v4  ;;  %v639_v4 = vld [vmem:[%s5549_s5 + $0xbb8] sm:$0xff] }
 0x1cf   :  { %2511 = vmatprep.subr.bf16.mxu1 %v2510_v9  ;;  %v510_v9 = vld [vmem:[%s5549_s5 + $0x7b0] sm:$0xff]  ;;  %v647_v6 = vld [vmem:[%s5549_s5 + $0xbf8] sm:$0xff] }
 0x1d0   :  { %v2548_v13 = vpack.c.bf16 %v518_v10, %v510_v9 }
 0x1d2   :  { %2513 = vmatpush1.bf16.msra.mxu1 %v2512_v14  ;;  %v2550_v14 = vpack.c.bf16 %v535_v12, %v527_v5 }
 0x1d3   :  { %2515 = vmatprep.subr.bf16.mxu1 %v2514_v15  ;;  %v526_v15 = vld [vmem:[%s5549_s5 + $0x830] sm:$0xff] }
 0x1d4   :  { %v2552_v19 = vpack.c.bf16 %v534_v16, %v526_v15  ;;  %v646_v15 = vld [vmem:[%s5549_s5 + $0xbf0] sm:$0xff] }
 0x1d6   :  { %2517 = vmatpush1.bf16.msra.mxu1 %v2516_v21  ;;  %v2554_v21 = vpack.c.bf16 %v551_v18, %v543_v17  ;;  %v2578_v18 = vpack.c.bf16 %v647_v6, %v639_v4  ;;  %v1496_v4 = vld [vmem:[%s5552_s7 + $0x260] sm:$0xff]  ;;  %v1498_v6 = vld [vmem:[%s5552_s7 + $0x270] sm:$0xff] }
 0x1d7   :  { %2519 = vmatprep.subr.bf16.mxu1 %v2518_v22  ;;  %v542_v22 = vld [vmem:[%s5549_s5 + $0x8b0] sm:$0xff] }
 0x1d8   :  { %v2556_v30 = vpack.c.bf16 %v550_v23, %v542_v22  ;;  %v1486_v22 = vld [vmem:[%s5552_s7 + $0x210] sm:$0xff] }
 0x1da   :  { %2521 = vmatpush1.bf16.msra.mxu1 %v2520_v31  ;;  %v2558_v31 = vpack.c.bf16 %v567_v29, %v559_v24  ;;  %v663_v29 = vld [vmem:[%s5549_s5 + $0xc78] sm:$0xff] }
 0x1db   :  { %2523 = vmatprep.subr.bf16.mxu1 %v2522_v32  ;;  %v558_v32 = vld [vmem:[%s5549_s5 + $0x930] sm:$0xff] }
 0x1de   :  { %2525 = vmatpush1.bf16.msra.mxu1 %v2524_v37  ;;  %v582_v37 = vld [vmem:[%s5549_s5 + $0x9f0] sm:$0xff] }
 0x1df   :  { %2527 = vmatprep.subr.bf16.mxu1 %v2526_v38  ;;  %v591_v38 = vld [vmem:[%s5549_s5 + $0xa38] sm:$0xff]  ;;  %v2564_v41 = vpack.c.bf16 %v582_v37, %v574_v36 }
 0x1e0   :  { %v2566_v42 = vpack.c.bf16 %v599_v39, %v591_v38  ;;  %v671_v38 = vld [vmem:[%s5549_s5 + $0xcb8] sm:$0xff] }
 0x1e2   :  { %2529 = vmatpush1.bf16.msra.mxu1 %v2528_v46  ;;  %v598_v46 = vld [vmem:[%s5549_s5 + $0xa70] sm:$0xff] }
 0x1e3   :  { %2531 = vmatprep.subr.bf16.mxu1 %v2530_v47  ;;  %v607_v47 = vld [vmem:[%s5549_s5 + $0xab8] sm:$0xff]  ;;  %v2568_v51 = vpack.c.bf16 %v598_v46, %v590_v45  ;;  %v1493_v46 = vld [vmem:[%s5552_s7 + $0x248] sm:$0xff] }
 0x1e4   :  { %v679_v45 = vld [vmem:[%s5549_s5 + $0xcf8] sm:$0xff] }
 0x1e6   :  { %2533 = vmatpush1.bf16.msra.mxu1 %v2532_v44  ;;  %v800_v44 = vsub.s32 5, %v3520_v25 }
 0x1e7   :  { %2535 = vmatprep.subr.bf16.mxu1 %v2534_v53  ;;  %v2570_v53 = vpack.c.bf16 %v615_v48, %v607_v47  ;;  %v1495_v47 = vld [vmem:[%s5552_s7 + $0x258] sm:$0xff] }
 0x1e8   :  { %v801_v61 = vrot.slane %v4787_v52, %v800_v44  ;;  %v2686_v55 = vpack.c.bf16 %v1495_v47, %v1493_v46  ;;  %v751_v47 = vld [vmem:[%s5549_s5 + $0xf38] sm:$0xff] }
 0x1ea   :  { %2537 = vmatpush1.bf16.msra.mxu1 %v2536_v58  ;;  %v781_v58 = vrot.slane %v4787_v52, %v3523_v26 }
 0x1eb   :  { %2539 = vmatprep.subr.bf16.mxu1 %v2538_v59  ;;  %v797_v59 = vrot.slane %v4787_v52, %v796_v50  ;;  %v670_v50 = vld [vmem:[%s5549_s5 + $0xcb0] sm:$0xff] }
 0x1ee   :  { %2541 = vmatpush1.bf16.msra.mxu1 %v2540_v63  ;;  %v622_v63 = vld [vmem:[%s5549_s5 + $0xb30] sm:$0xff] }
 0x1ef   :  { %2543 = vmatprep.subr.bf16.mxu1 %v2542_v0  ;;  %v630_v0 = vld [vmem:[%s5549_s5 + $0xb70] sm:$0xff] }
 0x1f2   :  { %2545 = vmatpush1.bf16.msra.mxu1 %v2544_v7 }
 0x1f3   :  { %2547 = vmatprep.subr.bf16.mxu1 %v2546_v8 }
 0x1f6   :  { %2549 = vmatpush1.bf16.msra.mxu1 %v2548_v13  ;;  %v2576_v13 = vpack.c.bf16 %v630_v0, %v622_v63  ;;  %v2688_v63 = vpack.c.bf16 %v1494_v57, %v1492_v56  ;;  %v750_v56 = vld [vmem:[%s5549_s5 + $0xf30] sm:$0xff] }
 0x1f7   :  { %2551 = vmatprep.subr.bf16.mxu1 %v2550_v14  ;;  %v638_v14 = vld [vmem:[%s5549_s5 + $0xbb0] sm:$0xff] }
 0x1f8   :  { %v758_v57 = vld [vmem:[%s5549_s5 + $0xf70] sm:$0xff] }
 0x1f9   :  { %1309 = vmatmul.mubr.f32.vlgmr.msra.gmra.mrb[6].mxu1 %v3570_v49  ;;  %v583_v49 = vld [vmem:[%s5549_s5 + $0x9f8] sm:$0xff] }
 0x1fa   :  { %2553 = vmatpush1.bf16.msra.mxu1 %v2552_v19  ;;  %1379 = vmatprep.mubr.f32.mxu1 %v3638_v20  ;;  %v2560_v20 = vpack.c.bf16 %v566_v33, %v558_v32  ;;  %v2562_v35 = vpack.c.bf16 %v583_v49, %v575_v34  ;;  %v655_v19 = vld [vmem:[%s5549_s5 + $0xc38] sm:$0xff]  ;;  %v2580_v32 = vpack.c.bf16 %v646_v15, %v638_v14 }
 0x1fb   :  { %2555 = vmatprep.subr.bf16.mxu1 %v2554_v21  ;;  %v1484_v21 = vld [vmem:[%s5552_s7 + $0x200] sm:$0xff]  ;;  %v2582_v37 = vpack.c.bf16 %v663_v29, %v655_v19  ;;  %v719_v15 = vld [vmem:[%s5549_s5 + $0xe38] sm:$0xff]  ;;  %v718_v29 = vld [vmem:[%s5549_s5 + $0xe30] sm:$0xff] }
 0x1fc   :  { %v2680_v36 = vpack.c.bf16 %v1486_v22, %v1484_v21  ;;  %v727_v19 = vld [vmem:[%s5549_s5 + $0xe78] sm:$0xff]  ;;  %v1505_v21 = vld [vmem:[%s5552_s7 + $0x2a8] sm:$0xff] }
 0x1fd   :  { %v1507_v22 = vld [vmem:[%s5552_s7 + $0x2b8] sm:$0xff] }
 0x1fe   :  { %2557 = vmatpush1.bf16.msra.mxu1 %v2556_v30  ;;  %v1489_v30 = vld [vmem:[%s5552_s7 + $0x228] sm:$0xff] }
 0x1ff   :  { %2559 = vmatprep.subr.bf16.mxu1 %v2558_v31  ;;  %v1491_v31 = vld [vmem:[%s5552_s7 + $0x238] sm:$0xff] }
 0x200   :  { %v2682_v39 = vpack.c.bf16 %v1491_v31, %v1489_v30  ;;  %v726_v30 = vld [vmem:[%s5549_s5 + $0xe70] sm:$0xff] }
 0x202   :  { %2561 = vmatpush1.bf16.msra.mxu1 %v2560_v20  ;;  %v654_v20 = vld [vmem:[%s5549_s5 + $0xc30] sm:$0xff] }
 0x203   :  { %2563 = vmatprep.subr.bf16.mxu1 %v2562_v35  ;;  %v662_v35 = vld [vmem:[%s5549_s5 + $0xc70] sm:$0xff] }
 0x204   :  { %v2584_v48 = vpack.c.bf16 %v662_v35, %v654_v20  ;;  %v1504_v20 = vld [vmem:[%s5552_s7 + $0x2a0] sm:$0xff]  ;;  %v1506_v35 = vld [vmem:[%s5552_s7 + $0x2b0] sm:$0xff] }
 0x206   :  { %2565 = vmatpush1.bf16.msra.mxu1 %v2564_v41  ;;  %v1488_v41 = vld [vmem:[%s5552_s7 + $0x220] sm:$0xff] }
 0x207   :  { %2567 = vmatprep.subr.bf16.mxu1 %v2566_v42  ;;  %v1490_v42 = vld [vmem:[%s5552_s7 + $0x230] sm:$0xff] }
 0x208   :  { %v2684_v44 = vpack.c.bf16 %v1490_v42, %v1488_v41  ;;  %v734_v41 = vld [vmem:[%s5549_s5 + $0xeb0] sm:$0xff] }
 0x209   :  { %v742_v42 = vld [vmem:[%s5549_s5 + $0xef0] sm:$0xff] }
 0x20a   :  { %2569 = vmatpush1.bf16.msra.mxu1 %v2568_v51  ;;  %v678_v51 = vld [vmem:[%s5549_s5 + $0xcf0] sm:$0xff] }
 0x20b   :  { %2571 = vmatprep.subr.bf16.mxu1 %v2570_v53  ;;  %v2586_v53 = vpack.c.bf16 %v679_v45, %v671_v38  ;;  %v1511_v38 = vld [vmem:[%s5552_s7 + $0x2d8] sm:$0xff]  ;;  %v2700_v45 = vpack.c.bf16 %v1506_v35, %v1504_v20  ;;  %v1528_v20 = vld [vmem:[%s5552_s7 + $0x360] sm:$0xff]  ;;  %v1530_v35 = vld [vmem:[%s5552_s7 + $0x370] sm:$0xff] }
 0x20c   :  { %v955_v1 = vpop.f32.mrb[2].mxu1  ;;  %v1239_v2 = vpop.f32.mrb[2].mxu0 }
 0x20d   :  { %v2870_v7 = vadd.f32 %v955_v1, %v781_v58  ;;  %v2874_v8 = vadd.f32 %v1239_v2, %v797_v59  ;;  %v957_v9 = vpop.f32.mrb[3].mxu1  ;;  %v1241_v10 = vpop.f32.mrb[3].mxu0  ;;  %v695_v58 = vld [vmem:[%s5549_s5 + $0xd78] sm:$0xff]  ;;  %v1497_v59 = vld [vmem:[%s5552_s7 + $0x268] sm:$0xff] }
 0x20e   :  { %v2871_v5 = vadd.f32 %v957_v9, %v785_v60  ;;  %v2875_v12 = vadd.f32 %v1241_v10, %v801_v61  ;;  %2573 = vmatpush1.bf16.msra.mxu1 %v2572_v62  ;;  %v1499_v60 = vld [vmem:[%s5552_s7 + $0x278] sm:$0xff]  ;;  %v2588_v61 = vpack.c.bf16 %v678_v51, %v670_v50  ;;  %v686_v62 = vld [vmem:[%s5549_s5 + $0xd30] sm:$0xff]  ;;  %v2590_v0 = vpack.c.bf16 %v695_v58, %v687_v54  ;;  %v1508_v50 = vld [vmem:[%s5552_s7 + $0x2c0] sm:$0xff] }
 0x20f   :  { %v1386_v16 = vmax.f32 %v2870_v7, 0.0  ;;  %v1390_v17 = vmax.f32 %v2874_v8, 0.0  ;;  %2575 = vmatprep.subr.bf16.mxu1 %v2574_v27  ;;  %v694_v27 = vld [vmem:[%s5549_s5 + $0xd70] sm:$0xff]  ;;  %v703_v1 = vld [vmem:[%s5549_s5 + $0xdb8] sm:$0xff]  ;;  %v2690_v2 = vpack.c.bf16 %v1499_v60, %v1497_v59  ;;  %v1501_v8 = vld [vmem:[%s5552_s7 + $0x288] sm:$0xff] }
 0x210   :  { %v1387_v23 = vmax.f32 %v2871_v5, 0.0  ;;  %v4835_v24 = vmax.f32 %v2875_v12, 0.0  ;;  %v711_v7 = vld [vmem:[%s5549_s5 + $0xdf8] sm:$0xff]  ;;  %v2592_v10 = vpack.c.bf16 %v694_v27, %v686_v62  ;;  %v702_v5 = vld [vmem:[%s5549_s5 + $0xdb0] sm:$0xff]  ;;  %v1512_v62 = vld [vmem:[%s5552_s7 + $0x2e0] sm:$0xff] }
 0x211   :  { %v1503_v9 = vld [vmem:[%s5552_s7 + $0x298] sm:$0xff]  ;;  %v710_v12 = vld [vmem:[%s5549_s5 + $0xdf0] sm:$0xff]  ;;  %v2594_v14 = vpack.c.bf16 %v711_v7, %v703_v1 }
 0x212   :  { %v1402_v33 = vcombine.low %v1386_v16, %v1387_v23  ;;  %v2050_v34 = vcombine.low %v1387_v23, %v1387_v23  ;;  %v4847_v49 = vcombine.low %v1390_v17, %v4835_v24  ;;  %2577 = vmatpush1.bf16.msra.mxu1 %v2576_v13  ;;  %v2692_v13 = vpack.c.bf16 %v1498_v6, %v1496_v4  ;;  %v1500_v17 = vld [vmem:[%s5552_s7 + $0x280] sm:$0xff]  ;;  %v1510_v51 = vld [vmem:[%s5552_s7 + $0x2d0] sm:$0xff]  ;;  %v1515_v54 = vld [vmem:[%s5552_s7 + $0x2f8] sm:$0xff] }
 0x213   :  { %2579 = vmatprep.subr.bf16.mxu1 %v2578_v18  ;;  %v2694_v16 = vpack.c.bf16 %v1503_v9, %v1501_v8  ;;  %v1502_v18 = vld [vmem:[%s5552_s7 + $0x290] sm:$0xff]  ;;  %v2596_v23 = vpack.c.bf16 %v710_v12, %v702_v5  ;;  %v2704_v58 = vpack.c.bf16 %v1510_v51, %v1508_v50  ;;  %v767_v60 = vld [vmem:[%s5549_s5 + $0xfb8] sm:$0xff]  ;;  %v1521_v12 = vld [vmem:[%s5552_s7 + $0x328] sm:$0xff] }
 0x214   :  { %1764 = vmatprep.mubr.f32.mxu0 %v2050_v34  ;;  %v2696_v31 = vpack.c.bf16 %v1502_v18, %v1500_v17  ;;  %v2698_v34 = vpack.c.bf16 %v1507_v22, %v1505_v21  ;;  %v1514_v27 = vld [vmem:[%s5552_s7 + $0x2f0] sm:$0xff]  ;;  %v1519_v1 = vld [vmem:[%s5552_s7 + $0x318] sm:$0xff]  ;;  %v1520_v17 = vld [vmem:[%s5552_s7 + $0x320] sm:$0xff] }
 0x215   :  { %1765 = vmatmul.mubr.f32.vlgmr.msra.gmra.mrb[4].mxu0 %v1402_v33  ;;  %v735_v33 = vld [vmem:[%s5549_s5 + $0xeb8] sm:$0xff]  ;;  %v766_v4 = vld [vmem:[%s5549_s5 + $0xfb0] sm:$0xff]  ;;  %v2708_v6 = vpack.c.bf16 %v1514_v27, %v1512_v62  ;;  %v1541_v51 = vld [vmem:[%s5552_s7 + $0x3c8] sm:$0xff] }
 0x216   :  { %2581 = vmatpush1.bf16.msra.mxu1 %v2580_v32  ;;  %2681 = vmatpush1.bf16.msra.mxu0 %v2680_v36  ;;  %v2598_v32 = vpack.c.bf16 %v727_v19, %v719_v15  ;;  %v743_v36 = vld [vmem:[%s5549_s5 + $0xef8] sm:$0xff]  ;;  %v774_v8 = vld [vmem:[%s5549_s5 + $0xff0] sm:$0xff]  ;;  %v1525_v19 = vld [vmem:[%s5552_s7 + $0x348] sm:$0xff] }
 0x217   :  { %2583 = vmatprep.subr.bf16.mxu1 %v2582_v37  ;;  %2683 = vmatprep.subr.bf16.mxu0 %v2682_v39  ;;  %v1509_v37 = vld [vmem:[%s5552_s7 + $0x2c8] sm:$0xff]  ;;  %v2600_v39 = vpack.c.bf16 %v726_v30, %v718_v29  ;;  %v2602_v46 = vpack.c.bf16 %v743_v36, %v735_v33  ;;  %v1518_v5 = vld [vmem:[%s5552_s7 + $0x310] sm:$0xff]  ;;  %v1527_v21 = vld [vmem:[%s5552_s7 + $0x358] sm:$0xff] }
 0x218   :  { %v1522_v18 = vld [vmem:[%s5552_s7 + $0x330] sm:$0xff]  ;;  %v1524_v29 = vld [vmem:[%s5552_s7 + $0x340] sm:$0xff]  ;;  %v1533_v36 = vld [vmem:[%s5552_s7 + $0x388] sm:$0xff] }
 0x219   :  { %v2716_v22 = vpack.c.bf16 %v1522_v18, %v1520_v17  ;;  %v1526_v30 = vld [vmem:[%s5552_s7 + $0x350] sm:$0xff]  ;;  %v1549_v27 = vld [vmem:[%s5552_s7 + $0x408] sm:$0xff]  ;;  %v1552_v18 = vld [vmem:[%s5552_s7 + $0x420] sm:$0xff] }
 0x21a   :  { %2585 = vmatpush1.bf16.msra.mxu1 %v2584_v48  ;;  %2685 = vmatpush1.bf16.msra.mxu0 %v2684_v44  ;;  %v2702_v48 = vpack.c.bf16 %v1511_v38, %v1509_v37  ;;  %v759_v44 = vld [vmem:[%s5549_s5 + $0xf78] sm:$0xff]  ;;  %v2720_v33 = vpack.c.bf16 %v1526_v30, %v1524_v29  ;;  %v2724_v37 = vpack.c.bf16 %v1530_v35, %v1528_v20  ;;  %v1538_v50 = vld [vmem:[%s5552_s7 + $0x3b0] sm:$0xff] }
 0x21b   :  { %2587 = vmatprep.subr.bf16.mxu1 %v2586_v53  ;;  %2687 = vmatprep.subr.bf16.mxu0 %v2686_v55  ;;  %v1513_v53 = vld [vmem:[%s5552_s7 + $0x2e8] sm:$0xff]  ;;  %v2604_v55 = vpack.c.bf16 %v742_v42, %v734_v41  ;;  %v2606_v59 = vpack.c.bf16 %v759_v44, %v751_v47  ;;  %v1534_v41 = vld [vmem:[%s5552_s7 + $0x390] sm:$0xff]  ;;  %v1543_v44 = vld [vmem:[%s5552_s7 + $0x3d8] sm:$0xff] }
 0x21c   :  { %v1537_v42 = vld [vmem:[%s5552_s7 + $0x3a8] sm:$0xff]  ;;  %v1546_v62 = vld [vmem:[%s5552_s7 + $0x3f0] sm:$0xff] }
 0x21e   :  { %2589 = vmatpush1.bf16.msra.mxu1 %v2588_v61  ;;  %2689 = vmatpush1.bf16.msra.mxu0 %v2688_v63  ;;  %v2706_v61 = vpack.c.bf16 %v1515_v54, %v1513_v53  ;;  %v775_v63 = vld [vmem:[%s5549_s5 + $0xff8] sm:$0xff]  ;;  %v2734_v54 = vpack.c.bf16 %v1543_v44, %v1541_v51  ;;  %v1568_v44 = vld [vmem:[%s5552_s7 + $0x4a0] sm:$0xff] }
 0x21f   :  { %2591 = vmatprep.subr.bf16.mxu1 %v2590_v0  ;;  %2691 = vmatprep.subr.bf16.mxu0 %v2690_v2  ;;  %v1517_v0 = vld [vmem:[%s5552_s7 + $0x308] sm:$0xff]  ;;  %v2608_v2 = vpack.c.bf16 %v758_v57, %v750_v56  ;;  %v2610_v7 = vpack.c.bf16 %v775_v63, %v767_v60  ;;  %v1542_v56 = vld [vmem:[%s5552_s7 + $0x3d0] sm:$0xff]  ;;  %v1551_v63 = vld [vmem:[%s5552_s7 + $0x418] sm:$0xff] }
 0x220   :  { %v2710_v9 = vpack.c.bf16 %v1519_v1, %v1517_v0  ;;  %v1545_v57 = vld [vmem:[%s5552_s7 + $0x3e8] sm:$0xff]  ;;  %v2742_v1 = vpack.c.bf16 %v1551_v63, %v1549_v27 }
 0x222   :  { %2593 = vmatpush1.bf16.msra.mxu1 %v2592_v10  ;;  %2693 = vmatpush1.bf16.msra.mxu0 %v2692_v13  ;;  %v1516_v10 = vld [vmem:[%s5552_s7 + $0x300] sm:$0xff]  ;;  %v1523_v13 = vld [vmem:[%s5552_s7 + $0x338] sm:$0xff] }
 0x223   :  { %2595 = vmatprep.subr.bf16.mxu1 %v2594_v14  ;;  %2695 = vmatprep.subr.bf16.mxu0 %v2694_v16  ;;  %v2612_v14 = vpack.c.bf16 %v774_v8, %v766_v4  ;;  %v2712_v15 = vpack.c.bf16 %v1518_v5, %v1516_v10  ;;  %v2714_v16 = vpack.c.bf16 %v1523_v13, %v1521_v12  ;;  %v1548_v5 = vld [vmem:[%s5552_s7 + $0x400] sm:$0xff]  ;;  %v1550_v12 = vld [vmem:[%s5552_s7 + $0x410] sm:$0xff] }
 0x224   :  { %v793_v4 = vrot.slane %v4787_v52, %v108_v43  ;;  %v1555_v43 = vld [vmem:[%s5552_s7 + $0x438] sm:$0xff] }
 0x226   :  { %2597 = vmatpush1.bf16.msra.mxu1 %v2596_v23  ;;  %2697 = vmatpush1.bf16.msra.mxu0 %v2696_v31  ;;  %v2718_v23 = vpack.c.bf16 %v1527_v21, %v1525_v19  ;;  %v1529_v31 = vld [vmem:[%s5552_s7 + $0x368] sm:$0xff]  ;;  %v1554_v19 = vld [vmem:[%s5552_s7 + $0x430] sm:$0xff]  ;;  %v2052_v21 = vcombine.low %v4835_v24, %v4835_v24  ;;  %v1556_v24 = vld [vmem:[%s5552_s7 + $0x440] sm:$0xff] }
 0x227   :  { %2599 = vmatprep.subr.bf16.mxu1 %v2598_v32  ;;  %2699 = vmatprep.subr.bf16.mxu0 %v2698_v34  ;;  %v1531_v32 = vld [vmem:[%s5552_s7 + $0x378] sm:$0xff]  ;;  %v2748_v29 = vpack.c.bf16 %v1554_v19, %v1552_v18  ;;  %v1588_v18 = vld [vmem:[%s5552_s7 + $0x540] sm:$0xff]  ;;  %v1590_v19 = vld [vmem:[%s5552_s7 + $0x550] sm:$0xff] }
 0x228   :  { %v2722_v34 = vpack.c.bf16 %v1531_v32, %v1529_v31  ;;  %v1558_v31 = vld [vmem:[%s5552_s7 + $0x450] sm:$0xff]  ;;  %v1561_v32 = vld [vmem:[%s5552_s7 + $0x468] sm:$0xff] }
 0x229   :  { %v2752_v35 = vpack.c.bf16 %v1558_v31, %v1556_v24  ;;  %v1594_v24 = vld [vmem:[%s5552_s7 + $0x570] sm:$0xff]  ;;  %v1597_v31 = vld [vmem:[%s5552_s7 + $0x588] sm:$0xff] }
 0x22a   :  { %2601 = vmatpush1.bf16.msra.mxu1 %v2600_v39  ;;  %2701 = vmatpush1.bf16.msra.mxu0 %v2700_v45  ;;  %v1532_v39 = vld [vmem:[%s5552_s7 + $0x380] sm:$0xff]  ;;  %v1539_v45 = vld [vmem:[%s5552_s7 + $0x3b8] sm:$0xff] }
 0x22b   :  { %2603 = vmatprep.subr.bf16.mxu1 %v2602_v46  ;;  %2703 = vmatprep.subr.bf16.mxu0 %v2702_v48  ;;  %v2728_v46 = vpack.c.bf16 %v1534_v41, %v1532_v39  ;;  %v2730_v47 = vpack.c.bf16 %v1539_v45, %v1537_v42  ;;  %v1536_v48 = vld [vmem:[%s5552_s7 + $0x3a0] sm:$0xff]  ;;  %v1567_v39 = vld [vmem:[%s5552_s7 + $0x498] sm:$0xff] }
 0x22c   :  { %v2732_v53 = vpack.c.bf16 %v1538_v50, %v1536_v48  ;;  %v1564_v45 = vld [vmem:[%s5552_s7 + $0x480] sm:$0xff]  ;;  %v1571_v48 = vld [vmem:[%s5552_s7 + $0x4b8] sm:$0xff] }
 0x22e   :  { %2605 = vmatpush1.bf16.msra.mxu1 %v2604_v55  ;;  %2705 = vmatpush1.bf16.msra.mxu0 %v2704_v58  ;;  %v1540_v55 = vld [vmem:[%s5552_s7 + $0x3c0] sm:$0xff]  ;;  %v1547_v58 = vld [vmem:[%s5552_s7 + $0x3f8] sm:$0xff] }
 0x22f   :  { %2607 = vmatprep.subr.bf16.mxu1 %v2606_v59  ;;  %2707 = vmatprep.subr.bf16.mxu0 %v2706_v61  ;;  %v2736_v59 = vpack.c.bf16 %v1542_v56, %v1540_v55  ;;  %v2738_v60 = vpack.c.bf16 %v1547_v58, %v1545_v57  ;;  %v1544_v61 = vld [vmem:[%s5552_s7 + $0x3e0] sm:$0xff]  ;;  %v1575_v55 = vld [vmem:[%s5552_s7 + $0x4d8] sm:$0xff] }
 0x230   :  { %v2740_v0 = vpack.c.bf16 %v1546_v62, %v1544_v61  ;;  %v1577_v61 = vld [vmem:[%s5552_s7 + $0x4e8] sm:$0xff]  ;;  %v1579_v62 = vld [vmem:[%s5552_s7 + $0x4f8] sm:$0xff] }
 0x231   :  { %v2770_v63 = vpack.c.bf16 %v1579_v62, %v1577_v61  ;;  %v1612_v61 = vld [vmem:[%s5552_s7 + $0x600] sm:$0xff]  ;;  %v1614_v62 = vld [vmem:[%s5552_s7 + $0x610] sm:$0xff] }
 0x232   :  { %2609 = vmatpush1.bf16.msra.mxu1 %v2608_v2  ;;  %2709 = vmatpush1.bf16.msra.mxu0 %v2708_v6  ;;  %v789_v2 = vrot.slane %v4787_v52, %v104_v40  ;;  %v1553_v40 = vld [vmem:[%s5552_s7 + $0x428] sm:$0xff] }
 0x233   :  { %2611 = vmatprep.subr.bf16.mxu1 %v2610_v7  ;;  %2711 = vmatprep.subr.bf16.mxu0 %v2710_v9  ;;  %v2746_v17 = vpack.c.bf16 %v1555_v43, %v1553_v40  ;;  %v1584_v40 = vld [vmem:[%s5552_s7 + $0x520] sm:$0xff]  ;;  %v1586_v43 = vld [vmem:[%s5552_s7 + $0x530] sm:$0xff] }
 0x236   :  { %2613 = vmatpush1.bf16.msra.mxu1 %v2612_v14  ;;  %2713 = vmatpush1.bf16.msra.mxu0 %v2712_v15 }
 0x237   :  { %2715 = vmatprep.subr.bf16.mxu0 %v2714_v16  ;;  %v2744_v16 = vpack.c.bf16 %v1550_v12, %v1548_v5  ;;  %v1587_v5 = vld [vmem:[%s5552_s7 + $0x538] sm:$0xff] }
 0x239   :  { %1380 = vmatmul.mubr.f32.vlgmr.msra.gmra.mrb[6].mxu1 %v3950_v11  ;;  %v1535_v11 = vld [vmem:[%s5552_s7 + $0x398] sm:$0xff] }
 0x23a   :  { %2717 = vmatpush1.bf16.msra.mxu0 %v2716_v22  ;;  %v2726_v38 = vpack.c.bf16 %v1535_v11, %v1533_v36  ;;  %v1557_v22 = vld [vmem:[%s5552_s7 + $0x448] sm:$0xff]  ;;  %v1560_v11 = vld [vmem:[%s5552_s7 + $0x460] sm:$0xff] }
 0x23b   :  { %2719 = vmatprep.subr.bf16.mxu0 %v2718_v23  ;;  %v1559_v23 = vld [vmem:[%s5552_s7 + $0x458] sm:$0xff] }
 0x23c   :  { %v2750_v30 = vpack.c.bf16 %v1559_v23, %v1557_v22  ;;  %v1595_v22 = vld [vmem:[%s5552_s7 + $0x578] sm:$0xff]  ;;  %v2784_v23 = vpack.c.bf16 %v1590_v19, %v1588_v18  ;;  %v1628_v19 = vld [vmem:[%s5552_s7 + $0x680] sm:$0xff] }
 0x23e   :  { %2721 = vmatpush1.bf16.msra.mxu0 %v2720_v33  ;;  %v1563_v33 = vld [vmem:[%s5552_s7 + $0x478] sm:$0xff] }
 0x23f   :  { %2723 = vmatprep.subr.bf16.mxu0 %v2722_v34  ;;  %v2007_v34 = vstv %s2006_s15  ;;  %v2754_v36 = vpack.c.bf16 %v1563_v33, %v1561_v32  ;;  %v1599_v32 = vld [vmem:[%s5552_s7 + $0x598] sm:$0xff] }
 0x240   :  { %v2008_v20 = vmul.f32 1.442695, %v2007_v34  ;;  %v2790_v34 = vpack.c.bf16 %v1599_v32, %v1597_v31  ;;  %v1634_v31 = vld [vmem:[%s5552_s7 + $0x6b0] sm:$0xff]  ;;  %v1637_v32 = vld [vmem:[%s5552_s7 + $0x6c8] sm:$0xff] }
 0x242   :  { %2725 = vmatpush1.bf16.msra.mxu0 %v2724_v37  ;;  %v1562_v37 = vld [vmem:[%s5552_s7 + $0x470] sm:$0xff]  ;;  %2898 = vpow2.f32 %v2008_v20  ;;  %v1596_v20 = vld [vmem:[%s5552_s7 + $0x580] sm:$0xff] }
 0x243   :  { %2727 = vmatprep.subr.bf16.mxu0 %v2726_v38  ;;  %v1565_v38 = vld [vmem:[%s5552_s7 + $0x488] sm:$0xff]  ;;  %v2756_v41 = vpack.c.bf16 %v1562_v37, %v1560_v11  ;;  %v1603_v11 = vld [vmem:[%s5552_s7 + $0x5b8] sm:$0xff] }
 0x244   :  { %v2758_v42 = vpack.c.bf16 %v1567_v39, %v1565_v38  ;;  %v1600_v39 = vld [vmem:[%s5552_s7 + $0x5a0] sm:$0xff] }
 0x246   :  { %2729 = vmatpush1.bf16.msra.mxu0 %v2728_v46  ;;  %v1566_v46 = vld [vmem:[%s5552_s7 + $0x490] sm:$0xff] }
 0x247   :  { %2731 = vmatprep.subr.bf16.mxu0 %v2730_v47  ;;  %v1569_v47 = vld [vmem:[%s5552_s7 + $0x4a8] sm:$0xff]  ;;  %v2760_v50 = vpack.c.bf16 %v1566_v46, %v1564_v45  ;;  %v1607_v45 = vld [vmem:[%s5552_s7 + $0x5d8] sm:$0xff] }
 0x248   :  { %v2762_v51 = vpack.c.bf16 %v1571_v48, %v1569_v47  ;;  %v1604_v48 = vld [vmem:[%s5552_s7 + $0x5c0] sm:$0xff] }
 0x24a   :  { %2733 = vmatpush1.bf16.msra.mxu0 %v2732_v53  ;;  %v1570_v53 = vld [vmem:[%s5552_s7 + $0x4b0] sm:$0xff] }
 0x24b   :  { %2735 = vmatprep.subr.bf16.mxu0 %v2734_v54  ;;  %v1573_v54 = vld [vmem:[%s5552_s7 + $0x4c8] sm:$0xff]  ;;  %v2764_v57 = vpack.c.bf16 %v1570_v53, %v1568_v44  ;;  %v1611_v44 = vld [vmem:[%s5552_s7 + $0x5f8] sm:$0xff] }
 0x24c   :  { %v2899_v56 = vpop.eup %2898  ;;  %v2766_v58 = vpack.c.bf16 %v1575_v55, %v1573_v54  ;;  %v1608_v55 = vld [vmem:[%s5552_s7 + $0x5e0] sm:$0xff] }
 0x24d   :  { %2894 = vpush %v2899_v56  ;;  %v1610_v56 = vld [vmem:[%s5552_s7 + $0x5f0] sm:$0xff] }
 0x24e   :  { %2737 = vmatpush1.bf16.msra.mxu0 %v2736_v59  ;;  %v1572_v59 = vld [vmem:[%s5552_s7 + $0x4c0] sm:$0xff] }
 0x24f   :  { %2739 = vmatprep.subr.bf16.mxu0 %v2738_v60  ;;  %v1574_v60 = vld [vmem:[%s5552_s7 + $0x4d0] sm:$0xff] }
 0x250   :  { %v2768_v27 = vpack.c.bf16 %v1574_v60, %v1572_v59  ;;  %v2804_v59 = vpack.c.bf16 %v1610_v56, %v1608_v55  ;;  %v1648_v56 = vld [vmem:[%s5552_s7 + $0x720] sm:$0xff] }
 0x252   :  { %2741 = vmatpush1.bf16.msra.mxu0 %v2740_v0  ;;  %v1576_v0 = vld [vmem:[%s5552_s7 + $0x4e0] sm:$0xff] }
 0x253   :  { %2743 = vmatprep.subr.bf16.mxu0 %v2742_v1  ;;  %v1578_v1 = vld [vmem:[%s5552_s7 + $0x4f0] sm:$0xff] }
 0x27e   :  { %s2895_s16 = spop %2894 }
 0x28c   :  { %v1097_v6 = vpop.f32.mrb[4].mxu1 }
 0x28d   :  { %v2872_v7 = vadd.f32 %v1097_v6, %v789_v2  ;;  %v1099_v8 = vpop.f32.mrb[5].mxu1  ;;  %v1581_v2 = vld [vmem:[%s5552_s7 + $0x508] sm:$0xff]  ;;  %v2772_v6 = vpack.c.bf16 %v1578_v1, %v1576_v0  ;;  %v2808_v0 = vpack.c.bf16 %v1614_v62, %v1612_v61  ;;  %v1652_v62 = vld [vmem:[%s5552_s7 + $0x740] sm:$0xff] }
 0x28e   :  { %v2873_v9 = vadd.f32 %v1099_v8, %v793_v4  ;;  %v1583_v4 = vld [vmem:[%s5552_s7 + $0x518] sm:$0xff]  ;;  %v1580_v8 = vld [vmem:[%s5552_s7 + $0x500] sm:$0xff] }
 0x28f   :  { %v1388_v10 = vmax.f32 %v2872_v7, 0.0  ;;  %v2774_v7 = vpack.c.bf16 %v1583_v4, %v1581_v2  ;;  %v1616_v2 = vld [vmem:[%s5552_s7 + $0x620] sm:$0xff]  ;;  %v1618_v4 = vld [vmem:[%s5552_s7 + $0x630] sm:$0xff] }
 0x290   :  { %v1389_v13 = vmax.f32 %v2873_v9, 0.0  ;;  %v1582_v9 = vld [vmem:[%s5552_s7 + $0x510] sm:$0xff] }
 0x291   :  { %v2776_v12 = vpack.c.bf16 %v1582_v9, %v1580_v8  ;;  %v2812_v8 = vpack.c.bf16 %v1618_v4, %v1616_v2  ;;  %v1656_v4 = vld [vmem:[%s5552_s7 + $0x760] sm:$0xff] }
 0x292   :  { %v1403_v14 = vcombine.low %v1388_v10, %v1389_v13  ;;  %v2051_v15 = vcombine.low %v1389_v13, %v1389_v13  ;;  %v1585_v10 = vld [vmem:[%s5552_s7 + $0x528] sm:$0xff] }
 0x293   :  { %v2778_v13 = vpack.c.bf16 %v1587_v5, %v1585_v10  ;;  %v1620_v10 = vld [vmem:[%s5552_s7 + $0x640] sm:$0xff]  ;;  %v1622_v5 = vld [vmem:[%s5552_s7 + $0x650] sm:$0xff] }
 0x294   :  { %1835 = vmatprep.mubr.f32.mxu0 %v2051_v15  ;;  %v1591_v15 = vld [vmem:[%s5552_s7 + $0x558] sm:$0xff] }
 0x295   :  { %1836 = vmatmul.mubr.f32.vlgmr.msra.gmra.mrb[4].mxu0 %v1403_v14  ;;  %v1589_v14 = vld [vmem:[%s5552_s7 + $0x548] sm:$0xff] }
 0x296   :  { %2745 = vmatpush1.bf16.msra.mxu0 %v2744_v16  ;;  %1906 = vmatprep.mubr.f32.mxu0 %v2052_v21  ;;  %v2780_v16 = vpack.c.bf16 %v1586_v43, %v1584_v40  ;;  %v1593_v21 = vld [vmem:[%s5552_s7 + $0x568] sm:$0xff]  ;;  %v1624_v43 = vld [vmem:[%s5552_s7 + $0x660] sm:$0xff] }
 0x297   :  { %2747 = vmatprep.subr.bf16.mxu0 %v2746_v17  ;;  %v2782_v17 = vpack.c.bf16 %v1591_v15, %v1589_v14  ;;  %v1626_v14 = vld [vmem:[%s5552_s7 + $0x670] sm:$0xff]  ;;  %v1629_v15 = vld [vmem:[%s5552_s7 + $0x688] sm:$0xff] }
 0x29a   :  { %2749 = vmatpush1.bf16.msra.mxu0 %v2748_v29  ;;  %v2786_v29 = vpack.c.bf16 %v1595_v22, %v1593_v21  ;;  %v1630_v21 = vld [vmem:[%s5552_s7 + $0x690] sm:$0xff]  ;;  %v1633_v22 = vld [vmem:[%s5552_s7 + $0x6a8] sm:$0xff] }
 0x29b   :  { %2751 = vmatprep.subr.bf16.mxu0 %v2750_v30  ;;  %v1592_v30 = vld [vmem:[%s5552_s7 + $0x560] sm:$0xff] }
 0x29c   :  { %v2788_v33 = vpack.c.bf16 %v1594_v24, %v1592_v30  ;;  %v1632_v24 = vld [vmem:[%s5552_s7 + $0x6a0] sm:$0xff] }
 0x29e   :  { %2753 = vmatpush1.bf16.msra.mxu0 %v2752_v35  ;;  %v1598_v35 = vld [vmem:[%s5552_s7 + $0x590] sm:$0xff] }
 0x29f   :  { %2755 = vmatprep.subr.bf16.mxu0 %v2754_v36  ;;  %v1601_v36 = vld [vmem:[%s5552_s7 + $0x5a8] sm:$0xff]  ;;  %v2792_v37 = vpack.c.bf16 %v1598_v35, %v1596_v20  ;;  %v1636_v35 = vld [vmem:[%s5552_s7 + $0x6c0] sm:$0xff] }
 0x2a0   :  { %v2794_v38 = vpack.c.bf16 %v1603_v11, %v1601_v36  ;;  %v1638_v36 = vld [vmem:[%s5552_s7 + $0x6d0] sm:$0xff]  ;;  %v1641_v11 = vld [vmem:[%s5552_s7 + $0x6e8] sm:$0xff] }
 0x2a2   :  { %2757 = vmatpush1.bf16.msra.mxu0 %v2756_v41  ;;  %v1602_v41 = vld [vmem:[%s5552_s7 + $0x5b0] sm:$0xff] }
 0x2a3   :  { %2759 = vmatprep.subr.bf16.mxu0 %v2758_v42  ;;  %v1605_v42 = vld [vmem:[%s5552_s7 + $0x5c8] sm:$0xff]  ;;  %v2796_v46 = vpack.c.bf16 %v1602_v41, %v1600_v39  ;;  %v1640_v41 = vld [vmem:[%s5552_s7 + $0x6e0] sm:$0xff] }
 0x2a4   :  { %v2798_v47 = vpack.c.bf16 %v1607_v45, %v1605_v42  ;;  %v1642_v42 = vld [vmem:[%s5552_s7 + $0x6f0] sm:$0xff]  ;;  %v1645_v45 = vld [vmem:[%s5552_s7 + $0x708] sm:$0xff] }
 0x2a6   :  { %2761 = vmatpush1.bf16.msra.mxu0 %v2760_v50  ;;  %v1606_v50 = vld [vmem:[%s5552_s7 + $0x5d0] sm:$0xff] }
 0x2a7   :  { %2763 = vmatprep.subr.bf16.mxu0 %v2762_v51  ;;  %v1609_v51 = vld [vmem:[%s5552_s7 + $0x5e8] sm:$0xff]  ;;  %v2800_v53 = vpack.c.bf16 %v1606_v50, %v1604_v48  ;;  %v1644_v50 = vld [vmem:[%s5552_s7 + $0x700] sm:$0xff] }
 0x2a8   :  { %v2802_v54 = vpack.c.bf16 %v1611_v44, %v1609_v51  ;;  %v1646_v51 = vld [vmem:[%s5552_s7 + $0x710] sm:$0xff]  ;;  %v1649_v44 = vld [vmem:[%s5552_s7 + $0x728] sm:$0xff] }
 0x2aa   :  { %2765 = vmatpush1.bf16.msra.mxu0 %v2764_v57  ;;  %v1613_v57 = vld [vmem:[%s5552_s7 + $0x608] sm:$0xff] }
 0x2ab   :  { %2767 = vmatprep.subr.bf16.mxu0 %v2766_v58  ;;  %v1615_v58 = vld [vmem:[%s5552_s7 + $0x618] sm:$0xff] }
 0x2ac   :  { %v2806_v60 = vpack.c.bf16 %v1615_v58, %v1613_v57  ;;  %v1650_v57 = vld [vmem:[%s5552_s7 + $0x730] sm:$0xff]  ;;  %v1653_v58 = vld [vmem:[%s5552_s7 + $0x748] sm:$0xff] }
 0x2ae   :  { %2769 = vmatpush1.bf16.msra.mxu0 %v2768_v27  ;;  %v1617_v27 = vld [vmem:[%s5552_s7 + $0x628] sm:$0xff] }
 0x2af   :  { %2771 = vmatprep.subr.bf16.mxu0 %v2770_v63  ;;  %v1619_v63 = vld [vmem:[%s5552_s7 + $0x638] sm:$0xff] }
 0x2b0   :  { %v2810_v1 = vpack.c.bf16 %v1619_v63, %v1617_v27  ;;  %v1654_v27 = vld [vmem:[%s5552_s7 + $0x750] sm:$0xff]  ;;  %v1657_v63 = vld [vmem:[%s5552_s7 + $0x768] sm:$0xff] }
 0x2b2   :  { %2773 = vmatpush1.bf16.msra.mxu0 %v2772_v6  ;;  %v1621_v6 = vld [vmem:[%s5552_s7 + $0x648] sm:$0xff] }
 0x2b3   :  { %2775 = vmatprep.subr.bf16.mxu0 %v2774_v7  ;;  %v1623_v7 = vld [vmem:[%s5552_s7 + $0x658] sm:$0xff] }
 0x2b4   :  { %v2814_v9 = vpack.c.bf16 %v1623_v7, %v1621_v6  ;;  %v1658_v6 = vld [vmem:[%s5552_s7 + $0x770] sm:$0xff]  ;;  %v1661_v7 = vld [vmem:[%s5552_s7 + $0x788] sm:$0xff] }
 0x2b6   :  { %2777 = vmatpush1.bf16.msra.mxu0 %v2776_v12  ;;  %v1625_v12 = vld [vmem:[%s5552_s7 + $0x668] sm:$0xff] }
 0x2b7   :  { %2779 = vmatprep.subr.bf16.mxu0 %v2778_v13  ;;  %v2816_v13 = vpack.c.bf16 %v1622_v5, %v1620_v10  ;;  %v1660_v5 = vld [vmem:[%s5552_s7 + $0x780] sm:$0xff] }
 0x2ba   :  { %2781 = vmatpush1.bf16.msra.mxu0 %v2780_v16  ;;  %v1631_v16 = vld [vmem:[%s5552_s7 + $0x698] sm:$0xff] }
 0x2bb   :  { %2783 = vmatprep.subr.bf16.mxu0 %v2782_v17  ;;  %v2820_v17 = vpack.c.bf16 %v1626_v14, %v1624_v43  ;;  %v2822_v18 = vpack.c.bf16 %v1631_v16, %v1629_v15  ;;  %v1664_v14 = vld [vmem:[%s5552_s7 + $0x7a0] sm:$0xff]  ;;  %v1666_v15 = vld [vmem:[%s5552_s7 + $0x7b0] sm:$0xff]  ;;  %v1669_v16 = vld [vmem:[%s5552_s7 + $0x7c8] sm:$0xff] }
 0x2be   :  { %2785 = vmatpush1.bf16.msra.mxu0 %v2784_v23  ;;  %v1635_v23 = vld [vmem:[%s5552_s7 + $0x6b8] sm:$0xff] }
 0x2bf   :  { %2787 = vmatprep.subr.bf16.mxu0 %v2786_v29  ;;  %v2824_v29 = vpack.c.bf16 %v1630_v21, %v1628_v19  ;;  %v2826_v30 = vpack.c.bf16 %v1635_v23, %v1633_v22  ;;  %v2860_v19 = vpack.c.bf16 %v1666_v15, %v1664_v14  ;;  %v808_v21 = vsub.s32 7, %v3520_v25  ;;  %v1668_v23 = vld [vmem:[%s5552_s7 + $0x7c0] sm:$0xff] }
 0x2c2   :  { %2789 = vmatpush1.bf16.msra.mxu0 %v2788_v33  ;;  %v1639_v33 = vld [vmem:[%s5552_s7 + $0x6d8] sm:$0xff] }
 0x2c3   :  { %2791 = vmatprep.subr.bf16.mxu0 %v2790_v34  ;;  %v2828_v34 = vpack.c.bf16 %v1634_v31, %v1632_v24  ;;  %v2830_v20 = vpack.c.bf16 %v1639_v33, %v1637_v32  ;;  %v1675_v24 = vld [vmem:[%s5552_s7 + $0x7f8] sm:$0xff]  ;;  %v809_v32 = vrot.slane %v4787_v52, %v808_v21 }
 0x2c6   :  { %2793 = vmatpush1.bf16.msra.mxu0 %v2792_v37  ;;  %v1643_v37 = vld [vmem:[%s5552_s7 + $0x6f8] sm:$0xff] }
 0x2c7   :  { %2795 = vmatprep.subr.bf16.mxu0 %v2794_v38  ;;  %v2832_v38 = vpack.c.bf16 %v1638_v36, %v1636_v35  ;;  %v2834_v39 = vpack.c.bf16 %v1643_v37, %v1641_v11  ;;  %v1674_v35 = vld [vmem:[%s5552_s7 + $0x7f0] sm:$0xff] }
 0x2ca   :  { %2797 = vmatpush1.bf16.msra.mxu0 %v2796_v46  ;;  %v1647_v46 = vld [vmem:[%s5552_s7 + $0x718] sm:$0xff] }
 0x2cb   :  { %2799 = vmatprep.subr.bf16.mxu0 %v2798_v47  ;;  %v2836_v47 = vpack.c.bf16 %v1642_v42, %v1640_v41  ;;  %v2838_v48 = vpack.c.bf16 %v1647_v46, %v1645_v45  ;;  %v1676_v46 = vld [vmem:[%s5556_s8] sm:$0x3] }
 0x2ce   :  { %2801 = vmatpush1.bf16.msra.mxu0 %v2800_v53  ;;  %v1651_v53 = vld [vmem:[%s5552_s7 + $0x738] sm:$0xff] }
 0x2cf   :  { %2803 = vmatprep.subr.bf16.mxu0 %v2802_v54  ;;  %v2840_v54 = vpack.c.bf16 %v1646_v51, %v1644_v50  ;;  %v2842_v55 = vpack.c.bf16 %v1651_v53, %v1649_v44 }
 0x2d2   :  { %2805 = vmatpush1.bf16.msra.mxu0 %v2804_v59  ;;  %v1655_v59 = vld [vmem:[%s5552_s7 + $0x758] sm:$0xff] }
 0x2d3   :  { %2807 = vmatprep.subr.bf16.mxu0 %v2806_v60  ;;  %v2844_v60 = vpack.c.bf16 %v1650_v57, %v1648_v56  ;;  %v2846_v61 = vpack.c.bf16 %v1655_v59, %v1653_v58 }
 0x2d5   :  { %1907 = vmatmul.mubr.f32.vlgmr.msra.gmra.mrb[4].mxu0 %v4847_v49  ;;  %v1627_v49 = vld [vmem:[%s5552_s7 + $0x678] sm:$0xff] }
 0x2d6   :  { %2809 = vmatpush1.bf16.msra.mxu0 %v2808_v0  ;;  %v2818_v40 = vpack.c.bf16 %v1627_v49, %v1625_v12  ;;  %v1659_v0 = vld [vmem:[%s5552_s7 + $0x778] sm:$0xff]  ;;  %v1662_v12 = vld [vmem:[%s5552_s7 + $0x790] sm:$0xff]  ;;  %v1665_v49 = vld [vmem:[%s5552_s7 + $0x7a8] sm:$0xff] }
 0x2d7   :  { %2811 = vmatprep.subr.bf16.mxu0 %v2810_v1  ;;  %v2848_v1 = vpack.c.bf16 %v1654_v27, %v1652_v62  ;;  %v2850_v2 = vpack.c.bf16 %v1659_v0, %v1657_v63  ;;  %v2016_v63 = vstv %s2049_s20 }
 0x2da   :  { %2813 = vmatpush1.bf16.msra.mxu0 %v2812_v8  ;;  %v1663_v8 = vld [vmem:[%s5552_s7 + $0x798] sm:$0xff] }
 0x2db   :  { %2815 = vmatprep.subr.bf16.mxu0 %v2814_v9  ;;  %v2852_v9 = vpack.c.bf16 %v1658_v6, %v1656_v4  ;;  %v2854_v10 = vpack.c.bf16 %v1663_v8, %v1661_v7 }
 0x2de   :  { %2817 = vmatpush1.bf16.msra.mxu0 %v2816_v13  ;;  %v1667_v13 = vld [vmem:[%s5552_s7 + $0x7b8] sm:$0xff] }
 0x2df   :  { %2819 = vmatprep.subr.bf16.mxu0 %v2818_v40  ;;  %v2856_v40 = vpack.c.bf16 %v1662_v12, %v1660_v5  ;;  %v2858_v43 = vpack.c.bf16 %v1667_v13, %v1665_v49 }
 0x2e2   :  { %2821 = vmatpush1.bf16.msra.mxu0 %v2820_v17  ;;  %v1671_v17 = vld [vmem:[%s5552_s7 + $0x7d8] sm:$0xff] }
 0x2e3   :  { %2823 = vmatprep.subr.bf16.mxu0 %v2822_v18  ;;  %v804_v18 = vsub.s32 6, %v3520_v25  ;;  %v2862_v22 = vpack.c.bf16 %v1671_v17, %v1669_v16 }
 0x2e5   :  { %v805_v31 = vrot.slane %v4787_v52, %v804_v18 }
 0x2e6   :  { %2825 = vmatpush1.bf16.msra.mxu0 %v2824_v29  ;;  %v1670_v29 = vld [vmem:[%s5552_s7 + $0x7d0] sm:$0xff] }
 0x2e7   :  { %2827 = vmatprep.subr.bf16.mxu0 %v2826_v30  ;;  %v1673_v30 = vld [vmem:[%s5552_s7 + $0x7e8] sm:$0xff]  ;;  %v2864_v33 = vpack.c.bf16 %v1670_v29, %v1668_v23 }
 0x2ea   :  { %2829 = vmatpush1.bf16.msra.mxu0 %v2828_v34  ;;  %v2866_v34 = vpack.c.bf16 %v1675_v24, %v1673_v30 }
 0x2eb   :  { %2831 = vmatprep.subr.bf16.mxu0 %v2830_v20  ;;  %v1672_v20 = vld [vmem:[%s5552_s7 + $0x7e0] sm:$0xff] }
 0x2ee   :  { %2833 = vmatpush1.bf16.msra.mxu0 %v2832_v38 }
 0x2ef   :  { %2835 = vmatprep.subr.bf16.mxu0 %v2834_v39  ;;  %v2868_v39 = vpack.c.bf16 %v1674_v35, %v1672_v20 }
 0x2f2   :  { %2837 = vmatpush1.bf16.msra.mxu0 %v2836_v47  ;;  %v1681_v47 = vrot.slane %v1676_v46, %v3523_v26  ;;  %v2003_v26 = vld [vmem:[%s5557_s1] sm:$0xf] }
 0x2f3   :  { %2839 = vmatprep.subr.bf16.mxu0 %v2838_v48  ;;  %v1685_v48 = vrot.slane %v1676_v46, %v3531_v28 }
 0x2f6   :  { %2841 = vmatpush1.bf16.msra.mxu0 %v2840_v54  ;;  %v2905_v54 = vmov 1983009808  }
 0x2f7   :  { %2843 = vmatprep.subr.bf16.mxu0 %v2842_v55  ;;  %v1990_v55 = vunpack.c.l.s4 %v2905_v54 }
 0x2f9   :  { %v1991_v56 = vunpack.c.0.s8 %v1990_v55 }
 0x2fa   :  { %2845 = vmatpush1.bf16.msra.mxu0 %v2844_v60  ;;  %v2011_v60 = vstv %s2895_s16 }
 0x2fb   :  { %2847 = vmatprep.subr.bf16.mxu0 %v2846_v61  ;;  %v1994_v3 = vsub.s32 %v1991_v56, %v3520_v25 }
 0x2fe   :  { %2849 = vmatpush1.bf16.msra.mxu0 %v2848_v1 }
 0x2ff   :  { %2851 = vmatprep.subr.bf16.mxu0 %v2850_v2 }
 0x302   :  { %2853 = vmatpush1.bf16.msra.mxu0 %v2852_v9  ;;  %v2018_v9 = vld [vmem:[%s5555_s10] sm:$0x3] }
 0x303   :  { %2855 = vmatprep.subr.bf16.mxu0 %v2854_v10 }
 0x306   :  { %2857 = vmatpush1.bf16.msra.mxu0 %v2856_v40 }
 0x307   :  { %2859 = vmatprep.subr.bf16.mxu0 %v2858_v43 }
 0x30a   :  { %2861 = vmatpush1.bf16.msra.mxu0 %v2860_v19 }
 0x30b   :  { %2863 = vmatprep.subr.bf16.mxu0 %v2862_v22 }
 0x30c   :  { %v1381_v36 = vpop.f32.mrb[6].mxu1 }
 0x30d   :  { %v2876_v11 = vadd.f32 %v1381_v36, %v805_v31  ;;  %v1383_v37 = vpop.f32.mrb[7].mxu1 }
 0x30e   :  { %v2877_v38 = vadd.f32 %v1383_v37, %v809_v32  ;;  %2865 = vmatpush1.bf16.msra.mxu0 %v2864_v33 }
 0x30f   :  { %v1392_v41 = vmax.f32 %v2876_v11, 0.0  ;;  %2867 = vmatprep.subr.bf16.mxu0 %v2866_v34 }
 0x310   :  { %v1393_v52 = vmax.f32 %v2877_v38, 0.0 }
 0x312   :  { %v1405_v42 = vcombine.low %v1392_v41, %v1393_v52  ;;  %v2053_v45 = vcombine.low %v1393_v52, %v1393_v52  ;;  %2869 = vmatpush1.bf16.msra.mxu0 %v2868_v39 }
 0x314   :  { %1977 = vmatprep.mubr.f32.mxu0 %v2053_v45 }
 0x315   :  { %1978 = vmatmul.mubr.f32.vlgmr.msra.gmra.mrb[4].mxu0 %v1405_v42 }
 0x3e8   :  { %v1979_v50 = vpop.f32.mrb[4].mxu0 }
 0x3e9   :  { %v2878_v51 = vadd.f32 %v1979_v50, %v1681_v47  ;;  %v1981_v44 = vpop.f32.mrb[5].mxu0 }
 0x3ea   :  { %v2879_v53 = vadd.f32 %v1981_v44, %v1685_v48 }
 0x3eb   :  { %2900 = vtanh.f32 %v2878_v51 }
 0x3ec   :  { %2902 = vtanh.f32 %v2879_v53 }
 0x3f5   :  { %v2901_v57 = vpop.eup %2900 }
 0x3f6   :  { %v2903_v58 = vpop.eup %2902 }
 0x3f7   :  { %v1988_v59 = vcombine.low %v2901_v57, %v2903_v58 }
 0x3f9   :  { %v1995_v28 = vrot.slane %v1988_v59, %v1994_v3 }
 0x3fb   :  { %v1996_v61 = vcombine.high %v1995_v28, %v1995_v28  ;;  %v2005_v62 = vsub.f32 %v2003_v26, %v1995_v28 }
 0x3fd   :  { %v2012_v25 = vmul.f32 %v2011_v60, %v2005_v62  ;;  %2001 = vst.msk [vmem:[%s5558_s9] sm:$0xf] %vm2000_vm4, %v1996_v61 }
 0x3ff   :  { %v2014_v27 = vmul.f32 0.5, %v2012_v25 }
 0x401   :  { %v2015_v0 = vmul.f32 %v2014_v27, %v2012_v25 }
 0x403   :  { %v2017_v1 = vsub.f32 %v2016_v63, %v2015_v0 }
 0x405   :  { %v2026_v2 = vrot.slane %v2017_v1, %v1994_v3 }
 0x407   :  { %v2027_v4 = vcombine.high %v2026_v2, %v2026_v2  ;;  %v2030_v6 = vsel %vm1998_vm2, %v2026_v2, 0.0 }
 0x409   :  { %v2032_v7 = vsel %vm2031_vm5, %v2027_v4, 0.0 }
 0x40a   :  { %v2033_v8 = vadd.f32 %v2032_v7, %v2030_v6 }
 0x40c   :  { %2034 = vadd.xlane.f32.xlu0 %v2033_v8 }
 0x499   :  { %v2035_v10 = vpop.xlane.xlu0 %2034 }
 0x49a   :  { %v2036_v5 = vadd.f32 %v2035_v10, %v2018_v9 }
 0x49c   :  { %2038 = vst.msk [vmem:[%s5555_s10] sm:$0x3] %vm1414_vm1, %v2036_v5 }

</bundles_post_ra>
